<compile_context>
chip_gen: v5e
topology: v5e:2x2
jax: 0.10.0
libtpu: 0.0.40
codegen_flags: <defaults>
</compile_context>

<pallas_src>
import jax
import jax.numpy as jnp
from jax import lax
from jax.experimental import pallas as pl
from jax.experimental.pallas import tpu as pltpu

GROUPS = 32
EPS = 1e-5


# ---------------------------------------------------------------------------
# In-kernel helpers
# ---------------------------------------------------------------------------
def _groupnorm(x2d, sum_ref, bcast_ref, gamma_ref, beta_ref):
    # x2d: (H*W, C) f32.
    # sum_ref: (C, GROUPS) f32, entry 1/(cpg*H*W) where channel c belongs to group g.
    # bcast_ref: (GROUPS, C) f32 0/1 group->channel broadcast matrix.
    cs = jnp.sum(x2d, axis=0, keepdims=True)              # (1, C)
    css = jnp.sum(x2d * x2d, axis=0, keepdims=True)       # (1, C)
    stats = jnp.concatenate([cs, css], axis=0)            # (2, C)
    grp = jnp.dot(stats, sum_ref[...], preferred_element_type=jnp.float32)  # (2, G)
    g = jnp.dot(grp, bcast_ref[...], preferred_element_type=jnp.float32)    # (2, C)
    mean = g[0:1, :]
    var = g[1:2, :] - mean * mean                          # biased var (matches torch GN)
    scale = lax.rsqrt(var + EPS) * gamma_ref[...]
    shift = beta_ref[...] - mean * scale
    return x2d * scale + shift                             # 2 VPU ops / element


def _conv3x3(h2d, pad_ref, w_ref, b_ref, H, W, not_first_col, not_last_col):
    # h2d: (H*W, Cin) f32.  pad_ref: ((H+2)*W, >=3*Cin) bf16 shared im2col scratch.
    # w_ref: (3, 3*Cin, Cout) bf16 (per kernel row, dw-major K).  b_ref: (1, Cout) f32.
    HW, Cin = h2d.shape
    K = 3 * Cin
    cdt = pad_ref.dtype

    # +/-1 column shifts of the row-major (H*W, C) slab (flat shift of 1 row == width
    # shift) via XLU sublane rotate.  The rows that wrap around image rows are exactly
    # the rows zeroed by the column-edge masks (w == 0 / w == W-1 -> width padding).
    left = jnp.where(not_first_col, pltpu.roll(h2d, 1, axis=0), 0.0)
    right = jnp.where(not_last_col, pltpu.roll(h2d, HW - 1, axis=0), 0.0)

    # Height-padding halos: only the 2*W halo rows are zeroed, every step (cheap; keeps
    # the kernel correct when the batch grid axis is sharded across TensorCores).
    halo = jnp.zeros((W, pad_ref.shape[1]), cdt)
    pad_ref[0:W, :] = halo
    pad_ref[(H + 1) * W:(H + 2) * W, :] = halo

    if Cin % 128 == 0:
        # Lane-aligned direct K-third stores: no (HW, 3*Cin) concatenate temporary.
        pad_ref[W:W + HW, 0:Cin] = left.astype(cdt)
        pad_ref[W:W + HW, Cin:2 * Cin] = h2d.astype(cdt)
        pad_ref[W:W + HW, 2 * Cin:3 * Cin] = right.astype(cdt)
    else:
        # Small-channel fallback: offsets Cin / 2*Cin would be lane-unaligned, so build
        # the slab once and store it with a single offset-0 (aligned) store.
        slab = jnp.concatenate(
            [left.astype(cdt), h2d.astype(cdt), right.astype(cdt)], axis=-1)
        pad_ref[W:W + HW, 0:K] = slab

    # 3 MXU matmuls, K = 3*Cin; every slab read starts at a sublane-aligned offset dh*W.
    acc = jnp.dot(pad_ref[0:HW, 0:K], w_ref[0], preferred_element_type=jnp.float32)
    acc = acc + jnp.dot(pad_ref[W:W + HW, 0:K], w_ref[1],
                        preferred_element_type=jnp.float32)
    acc = acc + jnp.dot(pad_ref[2 * W:2 * W + HW, 0:K], w_ref[2],
                        preferred_element_type=jnp.float32)
    return acc + b_ref[...]                                # bias added once, at the end


def _make_resblock_kernel(has_res):
    def kernel(x_ref, g1_ref, bt1_ref, s1_ref, bc1_ref, w1_ref, cb1_ref,
               g2_ref, bt2_ref, s2_ref, bc2_ref, w2_ref, cb2_ref, *rest):
        if has_res:
            wres_ref, bres_ref, o_ref, pad_ref = rest
        else:
            o_ref, pad_ref = rest

        _, H, W, Cin = x_ref.shape
        Cout = o_ref.shape[-1]
        HW = H * W

        x2d = x_ref[0].astype(jnp.float32).reshape(HW, Cin)

        # Column-edge masks shared by both convs (rows with w == 0 / w == W-1).
        w_idx = lax.broadcasted_iota(jnp.int32, (HW, 1), 0) % W
        not_first_col = w_idx > 0
        not_last_col = w_idx < (W - 1)

        # GroupNorm 1 + SiLU (f32 elementwise; sigmoid goes to the EUP).
        h = _groupnorm(x2d, s1_ref, bc1_ref, g1_ref, bt1_ref)
        h = h * jax.nn.sigmoid(h)

        # Conv 3x3 (pad 1) -> GroupNorm 2 (NO activation, matches the reference module)
        # -> Conv 3x3.  Both convs share the single im2col scratch.
        h = _conv3x3(h, pad_ref, w1_ref, cb1_ref, H, W, not_first_col, not_last_col)
        h = _groupnorm(h, s2_ref, bc2_ref, g2_ref, bt2_ref)
        h = _conv3x3(h, pad_ref, w2_ref, cb2_ref, H, W, not_first_col, not_last_col)

        # Residual path, specialized at trace time: identity adds x directly (no matmul);
        # the 1x1 conv case is a single (H*W, Cin) @ (Cin, Cout) bf16 matmul.
        if has_res:
            res = jnp.dot(x2d.astype(wres_ref.dtype), wres_ref[...],
                          preferred_element_type=jnp.float32) + bres_ref[...]
        else:
            res = x2d

        o_ref[0] = (h + res).reshape(H, W, Cout).astype(o_ref.dtype)

    return kernel


# ---------------------------------------------------------------------------
# Wrapper: parameter packing, BlockSpecs, pallas_call
# ---------------------------------------------------------------------------
def _group_matrices(C, hw):
    cpg = C // GROUPS
    gid = jnp.arange(C) // cpg
    onehot = (gid[:, None] == jnp.arange(GROUPS)[None, :]).astype(jnp.float32)  # (C, G)
    return onehot / float(cpg * hw), onehot.T        # (C, G) mean-sum, (G, C) broadcast


def vae_residual_block(x, params, *, matmul_dtype=jnp.bfloat16):
    N, H, W, Cin = x.shape
    Cout = params["w1"].shape[-1]
    has_res = params.get("wres") is not None
    Cmax = max(Cin, Cout)

    if Cin % GROUPS or Cout % GROUPS:
        raise ValueError("channels must be divisible by 32 (GroupNorm groups)")
    if W % 8:
        # dh*W slab row offsets must stay sublane-aligned (ideally W % 16 for the bf16
        # slab) — otherwise the slab reads silently become retiled whole-buffer copies.
        raise ValueError("W must be a multiple of 8")

    s1, bc1 = _group_matrices(Cin, H * W)
    s2, bc2 = _group_matrices(Cout, H * W)
    # (3, 3, Cin, Cout) HWIO -> (3, 3*Cin, Cout): per kernel row, dw-major concat along K.
    w1 = params["w1"].reshape(3, 3 * Cin, Cout).astype(matmul_dtype)
    w2 = params["w2"].reshape(3, 3 * Cout, Cout).astype(matmul_dtype)

    args = [
        x,
        params["g1"].reshape(1, Cin).astype(jnp.float32),
        params["b1"].reshape(1, Cin).astype(jnp.float32),
        s1, bc1, w1, params["cb1"].reshape(1, Cout).astype(jnp.float32),
        params["g2"].reshape(1, Cout).astype(jnp.float32),
        params["b2"].reshape(1, Cout).astype(jnp.float32),
        s2, bc2, w2, params["cb2"].reshape(1, Cout).astype(jnp.float32),
    ]
    if has_res:
        args += [params["wres"].astype(matmul_dtype),
                 params["rb"].reshape(1, Cout).astype(jnp.float32)]

    def const_spec(a):
        nd = a.ndim
        # Single-buffer constants: their block index never changes, so the default
        # double-buffering would just duplicate the weights / GN matrices in VMEM.
        return pl.BlockSpec(a.shape, lambda n, _nd=nd: (0,) * _nd,
                            pipeline_mode=pl.Buffered(1))

    in_specs = [pl.BlockSpec((1, H, W, Cin), lambda n: (n, 0, 0, 0))]
    in_specs += [const_spec(a) for a in args[1:]]

    # VMEM budget from actual buffer sizes: double-buffered x/out blocks, single-buffered
    # constants, the shared im2col slab, plus headroom for f32 temporaries (h2d, rolled
    # copies, conv accumulators) and Mosaic internal scratch.
    slab_bytes = (H + 2) * W * 3 * Cmax * jnp.dtype(matmul_dtype).itemsize
    io_bytes = 2 * (H * W * Cin + H * W * Cout) * x.dtype.itemsize
    const_bytes = sum(int(a.size) * a.dtype.itemsize for a in args[1:])
    temp_bytes = 8 * H * W * Cmax * 4
    need = io_bytes + slab_bytes + const_bytes + temp_bytes
    vmem_limit = int(min(max(need, 16 * 1024 * 1024), 100 * 1024 * 1024))

    return pl.pallas_call(
        _make_resblock_kernel(has_res),
        out_shape=jax.ShapeDtypeStruct((N, H, W, Cout), x.dtype),
        grid=(N,),
        in_specs=in_specs,
        out_specs=pl.BlockSpec((1, H, W, Cout), lambda n: (n, 0, 0, 0)),
        scratch_shapes=[
            # Single shared flat ((H+2)*W, 3*Cmax) bf16 im2col staging buffer:
            # the two convs are never live at the same time.
            pltpu.VMEM(((H + 2) * W, 3 * Cmax), matmul_dtype),
        ],
        compiler_params=pltpu.CompilerParams(
            dimension_semantics=("parallel",),   # batch axis shards across TCs (v7x)
            vmem_limit_bytes=vmem_limit,
        ),
    )(*args)


# ---------------------------------------------------------------------------
# Deterministic synthetic parameters + pure-JAX reference for verification
# ---------------------------------------------------------------------------
def init_params(key, cin, cout):
    ks = jax.random.split(key, 10)
    p = {
        "g1": 1.0 + 0.1 * jax.random.normal(ks[0], (cin,), jnp.float32),
        "b1": 0.1 * jax.random.normal(ks[1], (cin,), jnp.float32),
        "w1": 0.05 * jax.random.normal(ks[2], (3, 3, cin, cout), jnp.float32),
        "cb1": 0.05 * jax.random.normal(ks[3], (cout,), jnp.float32),
        "g2": 1.0 + 0.1 * jax.random.normal(ks[4], (cout,), jnp.float32),
        "b2": 0.1 * jax.random.normal(ks[5], (cout,), jnp.float32),
        "w2": 0.05 * jax.random.normal(ks[6], (3, 3, cout, cout), jnp.float32),
        "cb2": 0.05 * jax.random.normal(ks[7], (cout,), jnp.float32),
    }
    if cin == cout:
        p["wres"] = None
        p["rb"] = None
    else:
        p["wres"] = 0.05 * jax.random.normal(ks[8], (cin, cout), jnp.float32)
        p["rb"] = 0.05 * jax.random.normal(ks[9], (cout,), jnp.float32)
    return p


def ref_forward(x, p, conv_dtype=jnp.float32):
    # conv_dtype=bfloat16 matches the kernel's matmul precision (f32 accumulation).
    def gn(h, gamma, beta):
        N, H, W, C = h.shape
        hg = h.reshape(N, H, W, GROUPS, C // GROUPS)
        m = hg.mean(axis=(1, 2, 4), keepdims=True)
        v = hg.var(axis=(1, 2, 4), keepdims=True)
        hn = ((hg - m) / jnp.sqrt(v + EPS)).reshape(N, H, W, C)
        return hn * gamma + beta

    def conv(h, w, b):
        y = lax.conv_general_dilated(
            h.astype(conv_dtype), w.astype(conv_dtype), (1, 1), "SAME",
            dimension_numbers=("NHWC", "HWIO", "NHWC"),
            preferred_element_type=jnp.float32)
        return y + b

    h = gn(x, p["g1"], p["b1"])
    h = h * jax.nn.sigmoid(h)
    h = conv(h, p["w1"], p["cb1"])
    h = gn(h, p["g2"], p["b2"])
    h = conv(h, p["w2"], p["cb2"])
    if p.get("wres") is None:
        res = x
    else:
        res = jnp.einsum("nhwc,co->nhwo", x.astype(conv_dtype),
                         p["wres"].astype(conv_dtype),
                         preferred_element_type=jnp.float32) + p["rb"]
    return h + res


if __name__ == "__main__":
    key = jax.random.PRNGKey(0)
    N = 2

    # Case 1: in_channels != out_channels (exercises the 1x1-conv residual matmul path
    # and, since Cout=128, the lane-aligned direct slab-third-store path for conv2).
    Cin, Cout, H, W = 64, 128, 16, 16
    kx, kp, key = jax.random.split(key, 3)
    x = jax.random.normal(kx, (N, H, W, Cin), jnp.float32)
    params = init_params(kp, Cin, Cout)
    out = jax.block_until_ready(vae_residual_block(x, params))
    ref = ref_forward(x, params, conv_dtype=jnp.bfloat16)
    assert out.shape == (N, H, W, Cout)
    err = float(jnp.max(jnp.abs(out - ref)))
    assert jnp.allclose(out, ref, rtol=2e-2, atol=2e-2), (
        "mismatch (cin != cout): max abs err %e" % err)

    # Case 2: in_channels == out_channels (identity residual: no residual matmul emitted).
    Cin2 = Cout2 = 64
    kx2, kp2 = jax.random.split(key)
    x2 = jax.random.normal(kx2, (N, 8, 8, Cin2), jnp.float32)
    params2 = init_params(kp2, Cin2, Cout2)
    out2 = jax.block_until_ready(vae_residual_block(x2, params2))
    ref2 = ref_forward(x2, params2, conv_dtype=jnp.bfloat16)
    err2 = float(jnp.max(jnp.abs(out2 - ref2)))
    assert jnp.allclose(out2, ref2, rtol=2e-2, atol=2e-2), (
        "mismatch (cin == cout): max abs err %e" % err2)

    print("KERNEL_OK")
</pallas_src>

<mosaic_0001>
module attributes {stable_mosaic.version = 11 : i64} {
  func.func @kernel(%arg0: i32, %arg1: memref<1x16x16x64xf32, #tpu.memory_space<vmem>>, %arg2: memref<1x64xf32, #tpu.memory_space<vmem>>, %arg3: memref<1x64xf32, #tpu.memory_space<vmem>>, %arg4: memref<64x32xf32, #tpu.memory_space<vmem>>, %arg5: memref<32x64xf32, #tpu.memory_space<vmem>>, %arg6: memref<3x192x128xbf16, #tpu.memory_space<vmem>>, %arg7: memref<1x128xf32, #tpu.memory_space<vmem>>, %arg8: memref<1x128xf32, #tpu.memory_space<vmem>>, %arg9: memref<1x128xf32, #tpu.memory_space<vmem>>, %arg10: memref<128x32xf32, #tpu.memory_space<vmem>>, %arg11: memref<32x128xf32, #tpu.memory_space<vmem>>, %arg12: memref<3x384x128xbf16, #tpu.memory_space<vmem>>, %arg13: memref<1x128xf32, #tpu.memory_space<vmem>>, %arg14: memref<64x128xbf16, #tpu.memory_space<vmem>>, %arg15: memref<1x128xf32, #tpu.memory_space<vmem>>, %arg16: memref<1x16x16x128xf32, #tpu.memory_space<vmem>>, %arg17: memref<288x384xbf16, #tpu.memory_space<vmem>>) attributes {dimension_semantics = [#tpu.dimension_semantics<parallel>], iteration_bounds = array<i64: 2>, scalar_prefetch = 0 : i64, scratch_operands = 1 : i64, tpu.core_type = #tpu.core_type<tc>, window_params = [{transform_indices = @transform_0, window_bounds = array<i64: 1, 16, 16, 64>}, {pipeline_mode = #tpu.pipeline_mode<synchronous>, transform_indices = @transform_1, window_bounds = array<i64: 1, 64>}, {pipeline_mode = #tpu.pipeline_mode<synchronous>, transform_indices = @transform_2, window_bounds = array<i64: 1, 64>}, {pipeline_mode = #tpu.pipeline_mode<synchronous>, transform_indices = @transform_3, window_bounds = array<i64: 64, 32>}, {pipeline_mode = #tpu.pipeline_mode<synchronous>, transform_indices = @transform_4, window_bounds = array<i64: 32, 64>}, {pipeline_mode = #tpu.pipeline_mode<synchronous>, transform_indices = @transform_5, window_bounds = array<i64: 3, 192, 128>}, {pipeline_mode = #tpu.pipeline_mode<synchronous>, transform_indices = @transform_6, window_bounds = array<i64: 1, 128>}, {pipeline_mode = #tpu.pipeline_mode<synchronous>, transform_indices = @transform_7, window_bounds = array<i64: 1, 128>}, {pipeline_mode = #tpu.pipeline_mode<synchronous>, transform_indices = @transform_8, window_bounds = array<i64: 1, 128>}, {pipeline_mode = #tpu.pipeline_mode<synchronous>, transform_indices = @transform_9, window_bounds = array<i64: 128, 32>}, {pipeline_mode = #tpu.pipeline_mode<synchronous>, transform_indices = @transform_10, window_bounds = array<i64: 32, 128>}, {pipeline_mode = #tpu.pipeline_mode<synchronous>, transform_indices = @transform_11, window_bounds = array<i64: 3, 384, 128>}, {pipeline_mode = #tpu.pipeline_mode<synchronous>, transform_indices = @transform_12, window_bounds = array<i64: 1, 128>}, {pipeline_mode = #tpu.pipeline_mode<synchronous>, transform_indices = @transform_13, window_bounds = array<i64: 64, 128>}, {pipeline_mode = #tpu.pipeline_mode<synchronous>, transform_indices = @transform_14, window_bounds = array<i64: 1, 128>}, {transform_indices = @transform_15, window_bounds = array<i64: 1, 16, 16, 128>}]} {
    %c0 = arith.constant 0 : index
    %c0_0 = arith.constant 0 : index
    %c0_1 = arith.constant 0 : index
    %c0_2 = arith.constant 0 : index
    %0 = vector.load %arg1[%c0, %c0_0, %c0_1, %c0_2] : memref<1x16x16x64xf32, #tpu.memory_space<vmem>>, vector<1x16x16x64xf32>
    %1 = vector.shape_cast %0 : vector<1x16x16x64xf32> to vector<16x16x64xf32>
    %2 = vector.shape_cast %1 : vector<16x16x64xf32> to vector<256x64xf32>
    %3 = tpu.iota {dimensions = array<i32: 0>} : vector<256x1xi32>
    %c16_i32 = arith.constant 16 : i32
    %c0_i32 = arith.constant 0 : i32
    %4 = arith.cmpi eq, %c16_i32, %c0_i32 : i32
    %c1_i32 = arith.constant 1 : i32
    %5 = arith.select %4, %c1_i32, %c16_i32 : i32
    %6 = vector.broadcast %5 : i32 to vector<256x1xi32>
    %7 = arith.remsi %3, %6 : vector<256x1xi32>
    %c0_i32_3 = arith.constant 0 : i32
    %8 = vector.broadcast %c0_i32_3 : i32 to vector<256x1xi32>
    %9 = arith.cmpi ne, %7, %8 : vector<256x1xi32>
    %c0_i32_4 = arith.constant 0 : i32
    %10 = vector.broadcast %c0_i32_4 : i32 to vector<256x1xi32>
    %11 = arith.cmpi slt, %7, %10 : vector<256x1xi32>
    %c0_i32_5 = arith.constant 0 : i32
    %12 = arith.cmpi slt, %5, %c0_i32_5 : i32
    %13 = vector.broadcast %12 : i1 to vector<256x1xi1>
    %14 = vector.broadcast %13 : vector<256x1xi1> to vector<256x1xi1>
    %15 = arith.xori %11, %14 : vector<256x1xi1>
    %16 = arith.andi %15, %9 : vector<256x1xi1>
    %17 = vector.broadcast %5 : i32 to vector<256x1xi32>
    %18 = arith.addi %7, %17 : vector<256x1xi32>
    %19 = arith.select %16, %18, %7 : vector<256x1xi1>, vector<256x1xi32>
    %c0_i32_6 = arith.constant 0 : i32
    %20 = vector.broadcast %c0_i32_6 : i32 to vector<256x1xi32>
    %21 = arith.cmpi sgt, %19, %20 : vector<256x1xi32>
    %c15_i32 = arith.constant 15 : i32
    %22 = vector.broadcast %c15_i32 : i32 to vector<256x1xi32>
    %23 = arith.cmpi slt, %19, %22 : vector<256x1xi32>
    %cst = arith.constant dense<0.000000e+00> : vector<64xf32>
    %24 = vector.multi_reduction <add>, %2, %cst [0] : vector<256x64xf32> to vector<64xf32>
    %25 = vector.shape_cast %24 : vector<64xf32> to vector<1x64xf32>
    %26 = arith.mulf %2, %2 : vector<256x64xf32>
    %cst_7 = arith.constant dense<0.000000e+00> : vector<64xf32>
    %27 = vector.multi_reduction <add>, %26, %cst_7 [0] : vector<256x64xf32> to vector<64xf32>
    %28 = vector.shape_cast %27 : vector<64xf32> to vector<1x64xf32>
    %29 = tpu.concatenate %25, %28 in 0 : vector<1x64xf32>, vector<1x64xf32> -> vector<2x64xf32>
    %c0_8 = arith.constant 0 : index
    %c0_9 = arith.constant 0 : index
    %30 = vector.load %arg4[%c0_8, %c0_9] : memref<64x32xf32, #tpu.memory_space<vmem>>, vector<64x32xf32>
    %cst_10 = arith.constant dense<0.000000e+00> : vector<2x32xf32>
    %31 = tpu.matmul %29, %30, %cst_10 {dimension_numbers = #tpu.dot_dimension_numbers<[1], [0], [0], [1], [0, 0, 1, 1], [], []>} : vector<2x64xf32>, vector<64x32xf32>, vector<2x32xf32> -> vector<2x32xf32>
    %c0_11 = arith.constant 0 : index
    %c0_12 = arith.constant 0 : index
    %32 = vector.load %arg5[%c0_11, %c0_12] : memref<32x64xf32, #tpu.memory_space<vmem>>, vector<32x64xf32>
    %cst_13 = arith.constant dense<0.000000e+00> : vector<2x64xf32>
    %33 = tpu.matmul %31, %32, %cst_13 {dimension_numbers = #tpu.dot_dimension_numbers<[1], [0], [0], [1], [0, 0, 1, 1], [], []>} : vector<2x32xf32>, vector<32x64xf32>, vector<2x64xf32> -> vector<2x64xf32>
    %34 = vector.extract_strided_slice %33 {offsets = [0, 0], sizes = [1, 64], strides = [1, 1]} : vector<2x64xf32> to vector<1x64xf32>
    %35 = vector.extract_strided_slice %33 {offsets = [1, 0], sizes = [1, 64], strides = [1, 1]} : vector<2x64xf32> to vector<1x64xf32>
    %36 = arith.mulf %34, %34 : vector<1x64xf32>
    %37 = arith.subf %35, %36 : vector<1x64xf32>
    %cst_14 = arith.constant 9.99999974E-6 : f32
    %38 = vector.broadcast %cst_14 : f32 to vector<1x64xf32>
    %39 = arith.addf %37, %38 : vector<1x64xf32>
    %40 = math.rsqrt %39 : vector<1x64xf32>
    %c0_15 = arith.constant 0 : index
    %c0_16 = arith.constant 0 : index
    %41 = vector.load %arg2[%c0_15, %c0_16] : memref<1x64xf32, #tpu.memory_space<vmem>>, vector<1x64xf32>
    %42 = arith.mulf %40, %41 : vector<1x64xf32>
    %c0_17 = arith.constant 0 : index
    %c0_18 = arith.constant 0 : index
    %43 = vector.load %arg3[%c0_17, %c0_18] : memref<1x64xf32, #tpu.memory_space<vmem>>, vector<1x64xf32>
    %44 = arith.mulf %34, %42 : vector<1x64xf32>
    %45 = arith.subf %43, %44 : vector<1x64xf32>
    %46 = vector.broadcast %42 : vector<1x64xf32> to vector<256x64xf32>
    %47 = arith.mulf %2, %46 : vector<256x64xf32>
    %48 = vector.broadcast %45 : vector<1x64xf32> to vector<256x64xf32>
    %49 = arith.addf %47, %48 : vector<256x64xf32>
    %50 = arith.negf %49 : vector<256x64xf32>
    %51 = math.exp %50 : vector<256x64xf32>
    %cst_19 = arith.constant 1.000000e+00 : f32
    %52 = vector.broadcast %cst_19 : f32 to vector<256x64xf32>
    %53 = arith.addf %52, %51 : vector<256x64xf32>
    %54 = arith.divf %52, %53 : vector<256x64xf32>
    %55 = arith.mulf %49, %54 : vector<256x64xf32>
    %c1_i32_20 = arith.constant 1 : i32
    %56 = tpu.dynamic_rotate %55 by %c1_i32_20 dim 0 : vector<256x64xf32>, i32 -> vector<256x64xf32>
    %cst_21 = arith.constant 0.000000e+00 : f32
    %57 = vector.shape_cast %21 : vector<256x1xi1> to vector<256x1xi1>
    %58 = vector.broadcast %57 : vector<256x1xi1> to vector<256x64xi1>
    %59 = vector.broadcast %cst_21 : f32 to vector<256x64xf32>
    %60 = arith.select %58, %56, %59 : vector<256x64xi1>, vector<256x64xf32>
    %c255_i32 = arith.constant 255 : i32
    %61 = tpu.dynamic_rotate %55 by %c255_i32 dim 0 : vector<256x64xf32>, i32 -> vector<256x64xf32>
    %cst_22 = arith.constant 0.000000e+00 : f32
    %62 = vector.shape_cast %23 : vector<256x1xi1> to vector<256x1xi1>
    %63 = vector.broadcast %62 : vector<256x1xi1> to vector<256x64xi1>
    %64 = vector.broadcast %cst_22 : f32 to vector<256x64xf32>
    %65 = arith.select %63, %61, %64 : vector<256x64xi1>, vector<256x64xf32>
    %cst_23 = arith.constant 0.000000e+00 : bf16
    %66 = vector.broadcast %cst_23 : bf16 to vector<16x384xbf16>
    %c0_24 = arith.constant 0 : index
    %c0_25 = arith.constant 0 : index
    %67 = vector.load %arg17[%c0_24, %c0_25] : memref<288x384xbf16, #tpu.memory_space<vmem>>, vector<16x384xbf16>
    tpu.vector_store %arg17[%c0_24, %c0_25], %66 {strides = array<i32>} : memref<288x384xbf16, #tpu.memory_space<vmem>>, vector<16x384xbf16>,
    %c272 = arith.constant 272 : index
    %c0_26 = arith.constant 0 : index
    %68 = vector.load %arg17[%c272, %c0_26] : memref<288x384xbf16, #tpu.memory_space<vmem>>, vector<16x384xbf16>
    tpu.vector_store %arg17[%c272, %c0_26], %66 {strides = array<i32>} : memref<288x384xbf16, #tpu.memory_space<vmem>>, vector<16x384xbf16>,
    %69 = arith.truncf %60 : vector<256x64xf32> to vector<256x64xbf16>
    %70 = arith.truncf %55 : vector<256x64xf32> to vector<256x64xbf16>
    %71 = arith.truncf %65 : vector<256x64xf32> to vector<256x64xbf16>
    %72 = tpu.concatenate %69, %70, %71 in 1 : vector<256x64xbf16>, vector<256x64xbf16>, vector<256x64xbf16> -> vector<256x192xbf16>
    %c16 = arith.constant 16 : index
    %c0_27 = arith.constant 0 : index
    %73 = vector.load %arg17[%c16, %c0_27] : memref<288x384xbf16, #tpu.memory_space<vmem>>, vector<256x192xbf16>
    tpu.vector_store %arg17[%c16, %c0_27], %72 {strides = array<i32>} : memref<288x384xbf16, #tpu.memory_space<vmem>>, vector<256x192xbf16>,
    %c0_28 = arith.constant 0 : index
    %c0_29 = arith.constant 0 : index
    %74 = vector.load %arg17[%c0_28, %c0_29] : memref<288x384xbf16, #tpu.memory_space<vmem>>, vector<256x192xbf16>
    %c0_30 = arith.constant 0 : index
    %c0_31 = arith.constant 0 : index
    %c0_32 = arith.constant 0 : index
    %75 = vector.load %arg6[%c0_30, %c0_31, %c0_32] : memref<3x192x128xbf16, #tpu.memory_space<vmem>>, vector<1x192x128xbf16>
    %76 = vector.shape_cast %75 : vector<1x192x128xbf16> to vector<192x128xbf16>
    %cst_33 = arith.constant dense<0.000000e+00> : vector<256x128xf32>
    %77 = tpu.matmul %74, %76, %cst_33 {dimension_numbers = #tpu.dot_dimension_numbers<[1], [0], [0], [1], [0, 0, 1, 1], [], []>} : vector<256x192xbf16>, vector<192x128xbf16>, vector<256x128xf32> -> vector<256x128xf32>
    %c16_34 = arith.constant 16 : index
    %c0_35 = arith.constant 0 : index
    %78 = vector.load %arg17[%c16_34, %c0_35] : memref<288x384xbf16, #tpu.memory_space<vmem>>, vector<256x192xbf16>
    %c1 = arith.constant 1 : index
    %c0_36 = arith.constant 0 : index
    %c0_37 = arith.constant 0 : index
    %79 = vector.load %arg6[%c1, %c0_36, %c0_37] : memref<3x192x128xbf16, #tpu.memory_space<vmem>>, vector<1x192x128xbf16>
    %80 = vector.shape_cast %79 : vector<1x192x128xbf16> to vector<192x128xbf16>
    %cst_38 = arith.constant dense<0.000000e+00> : vector<256x128xf32>
    %81 = tpu.matmul %78, %80, %cst_38 {dimension_numbers = #tpu.dot_dimension_numbers<[1], [0], [0], [1], [0, 0, 1, 1], [], []>} : vector<256x192xbf16>, vector<192x128xbf16>, vector<256x128xf32> -> vector<256x128xf32>
    %82 = arith.addf %77, %81 : vector<256x128xf32>
    %c32 = arith.constant 32 : index
    %c0_39 = arith.constant 0 : index
    %83 = vector.load %arg17[%c32, %c0_39] : memref<288x384xbf16, #tpu.memory_space<vmem>>, vector<256x192xbf16>
    %c2 = arith.constant 2 : index
    %c0_40 = arith.constant 0 : index
    %c0_41 = arith.constant 0 : index
    %84 = vector.load %arg6[%c2, %c0_40, %c0_41] : memref<3x192x128xbf16, #tpu.memory_space<vmem>>, vector<1x192x128xbf16>
    %85 = vector.shape_cast %84 : vector<1x192x128xbf16> to vector<192x128xbf16>
    %cst_42 = arith.constant dense<0.000000e+00> : vector<256x128xf32>
    %86 = tpu.matmul %83, %85, %cst_42 {dimension_numbers = #tpu.dot_dimension_numbers<[1], [0], [0], [1], [0, 0, 1, 1], [], []>} : vector<256x192xbf16>, vector<192x128xbf16>, vector<256x128xf32> -> vector<256x128xf32>
    %87 = arith.addf %82, %86 : vector<256x128xf32>
    %c0_43 = arith.constant 0 : index
    %c0_44 = arith.constant 0 : index
    %88 = vector.load %arg7[%c0_43, %c0_44] : memref<1x128xf32, #tpu.memory_space<vmem>>, vector<1x128xf32>
    %89 = vector.broadcast %88 : vector<1x128xf32> to vector<256x128xf32>
    %90 = arith.addf %87, %89 : vector<256x128xf32>
    %cst_45 = arith.constant dense<0.000000e+00> : vector<128xf32>
    %91 = vector.multi_reduction <add>, %90, %cst_45 [0] : vector<256x128xf32> to vector<128xf32>
    %92 = vector.shape_cast %91 : vector<128xf32> to vector<1x128xf32>
    %93 = arith.mulf %90, %90 : vector<256x128xf32>
    %cst_46 = arith.constant dense<0.000000e+00> : vector<128xf32>
    %94 = vector.multi_reduction <add>, %93, %cst_46 [0] : vector<256x128xf32> to vector<128xf32>
    %95 = vector.shape_cast %94 : vector<128xf32> to vector<1x128xf32>
    %96 = tpu.concatenate %92, %95 in 0 : vector<1x128xf32>, vector<1x128xf32> -> vector<2x128xf32>
    %c0_47 = arith.constant 0 : index
    %c0_48 = arith.constant 0 : index
    %97 = vector.load %arg10[%c0_47, %c0_48] : memref<128x32xf32, #tpu.memory_space<vmem>>, vector<128x32xf32>
    %cst_49 = arith.constant dense<0.000000e+00> : vector<2x32xf32>
    %98 = tpu.matmul %96, %97, %cst_49 {dimension_numbers = #tpu.dot_dimension_numbers<[1], [0], [0], [1], [0, 0, 1, 1], [], []>} : vector<2x128xf32>, vector<128x32xf32>, vector<2x32xf32> -> vector<2x32xf32>
    %c0_50 = arith.constant 0 : index
    %c0_51 = arith.constant 0 : index
    %99 = vector.load %arg11[%c0_50, %c0_51] : memref<32x128xf32, #tpu.memory_space<vmem>>, vector<32x128xf32>
    %cst_52 = arith.constant dense<0.000000e+00> : vector<2x128xf32>
    %100 = tpu.matmul %98, %99, %cst_52 {dimension_numbers = #tpu.dot_dimension_numbers<[1], [0], [0], [1], [0, 0, 1, 1], [], []>} : vector<2x32xf32>, vector<32x128xf32>, vector<2x128xf32> -> vector<2x128xf32>
    %101 = vector.extract_strided_slice %100 {offsets = [0, 0], sizes = [1, 128], strides = [1, 1]} : vector<2x128xf32> to vector<1x128xf32>
    %102 = vector.extract_strided_slice %100 {offsets = [1, 0], sizes = [1, 128], strides = [1, 1]} : vector<2x128xf32> to vector<1x128xf32>
    %103 = arith.mulf %101, %101 : vector<1x128xf32>
    %104 = arith.subf %102, %103 : vector<1x128xf32>
    %cst_53 = arith.constant 9.99999974E-6 : f32
    %105 = vector.broadcast %cst_53 : f32 to vector<1x128xf32>
    %106 = arith.addf %104, %105 : vector<1x128xf32>
    %107 = math.rsqrt %106 : vector<1x128xf32>
    %c0_54 = arith.constant 0 : index
    %c0_55 = arith.constant 0 : index
    %108 = vector.load %arg8[%c0_54, %c0_55] : memref<1x128xf32, #tpu.memory_space<vmem>>, vector<1x128xf32>
    %109 = arith.mulf %107, %108 : vector<1x128xf32>
    %c0_56 = arith.constant 0 : index
    %c0_57 = arith.constant 0 : index
    %110 = vector.load %arg9[%c0_56, %c0_57] : memref<1x128xf32, #tpu.memory_space<vmem>>, vector<1x128xf32>
    %111 = arith.mulf %101, %109 : vector<1x128xf32>
    %112 = arith.subf %110, %111 : vector<1x128xf32>
    %113 = vector.broadcast %109 : vector<1x128xf32> to vector<256x128xf32>
    %114 = arith.mulf %90, %113 : vector<256x128xf32>
    %115 = vector.broadcast %112 : vector<1x128xf32> to vector<256x128xf32>
    %116 = arith.addf %114, %115 : vector<256x128xf32>
    %c1_i32_58 = arith.constant 1 : i32
    %117 = tpu.dynamic_rotate %116 by %c1_i32_58 dim 0 : vector<256x128xf32>, i32 -> vector<256x128xf32>
    %cst_59 = arith.constant 0.000000e+00 : f32
    %118 = vector.shape_cast %21 : vector<256x1xi1> to vector<256x1xi1>
    %119 = vector.broadcast %118 : vector<256x1xi1> to vector<256x128xi1>
    %120 = vector.broadcast %cst_59 : f32 to vector<256x128xf32>
    %121 = arith.select %119, %117, %120 : vector<256x128xi1>, vector<256x128xf32>
    %c255_i32_60 = arith.constant 255 : i32
    %122 = tpu.dynamic_rotate %116 by %c255_i32_60 dim 0 : vector<256x128xf32>, i32 -> vector<256x128xf32>
    %cst_61 = arith.constant 0.000000e+00 : f32
    %123 = vector.shape_cast %23 : vector<256x1xi1> to vector<256x1xi1>
    %124 = vector.broadcast %123 : vector<256x1xi1> to vector<256x128xi1>
    %125 = vector.broadcast %cst_61 : f32 to vector<256x128xf32>
    %126 = arith.select %124, %122, %125 : vector<256x128xi1>, vector<256x128xf32>
    %cst_62 = arith.constant 0.000000e+00 : bf16
    %127 = vector.broadcast %cst_62 : bf16 to vector<16x384xbf16>
    %c0_63 = arith.constant 0 : index
    %c0_64 = arith.constant 0 : index
    %128 = vector.load %arg17[%c0_63, %c0_64] : memref<288x384xbf16, #tpu.memory_space<vmem>>, vector<16x384xbf16>
    tpu.vector_store %arg17[%c0_63, %c0_64], %127 {strides = array<i32>} : memref<288x384xbf16, #tpu.memory_space<vmem>>, vector<16x384xbf16>,
    %c272_65 = arith.constant 272 : index
    %c0_66 = arith.constant 0 : index
    %129 = vector.load %arg17[%c272_65, %c0_66] : memref<288x384xbf16, #tpu.memory_space<vmem>>, vector<16x384xbf16>
    tpu.vector_store %arg17[%c272_65, %c0_66], %127 {strides = array<i32>} : memref<288x384xbf16, #tpu.memory_space<vmem>>, vector<16x384xbf16>,
    %130 = arith.truncf %121 : vector<256x128xf32> to vector<256x128xbf16>
    %c16_67 = arith.constant 16 : index
    %c0_68 = arith.constant 0 : index
    %131 = vector.load %arg17[%c16_67, %c0_68] : memref<288x384xbf16, #tpu.memory_space<vmem>>, vector<256x128xbf16>
    tpu.vector_store %arg17[%c16_67, %c0_68], %130 {strides = array<i32>} : memref<288x384xbf16, #tpu.memory_space<vmem>>, vector<256x128xbf16>,
    %132 = arith.truncf %116 : vector<256x128xf32> to vector<256x128xbf16>
    %c16_69 = arith.constant 16 : index
    %c128 = arith.constant 128 : index
    %133 = vector.load %arg17[%c16_69, %c128] : memref<288x384xbf16, #tpu.memory_space<vmem>>, vector<256x128xbf16>
    tpu.vector_store %arg17[%c16_69, %c128], %132 {strides = array<i32>} : memref<288x384xbf16, #tpu.memory_space<vmem>>, vector<256x128xbf16>,
    %134 = arith.truncf %126 : vector<256x128xf32> to vector<256x128xbf16>
    %c16_70 = arith.constant 16 : index
    %c256 = arith.constant 256 : index
    %135 = vector.load %arg17[%c16_70, %c256] : memref<288x384xbf16, #tpu.memory_space<vmem>>, vector<256x128xbf16>
    tpu.vector_store %arg17[%c16_70, %c256], %134 {strides = array<i32>} : memref<288x384xbf16, #tpu.memory_space<vmem>>, vector<256x128xbf16>,
    %c0_71 = arith.constant 0 : index
    %c0_72 = arith.constant 0 : index
    %136 = vector.load %arg17[%c0_71, %c0_72] : memref<288x384xbf16, #tpu.memory_space<vmem>>, vector<256x384xbf16>
    %c0_73 = arith.constant 0 : index
    %c0_74 = arith.constant 0 : index
    %c0_75 = arith.constant 0 : index
    %137 = vector.load %arg12[%c0_73, %c0_74, %c0_75] : memref<3x384x128xbf16, #tpu.memory_space<vmem>>, vector<1x384x128xbf16>
    %138 = vector.shape_cast %137 : vector<1x384x128xbf16> to vector<384x128xbf16>
    %cst_76 = arith.constant dense<0.000000e+00> : vector<256x128xf32>
    %139 = tpu.matmul %136, %138, %cst_76 {dimension_numbers = #tpu.dot_dimension_numbers<[1], [0], [0], [1], [0, 0, 1, 1], [], []>} : vector<256x384xbf16>, vector<384x128xbf16>, vector<256x128xf32> -> vector<256x128xf32>
    %c16_77 = arith.constant 16 : index
    %c0_78 = arith.constant 0 : index
    %140 = vector.load %arg17[%c16_77, %c0_78] : memref<288x384xbf16, #tpu.memory_space<vmem>>, vector<256x384xbf16>
    %c1_79 = arith.constant 1 : index
    %c0_80 = arith.constant 0 : index
    %c0_81 = arith.constant 0 : index
    %141 = vector.load %arg12[%c1_79, %c0_80, %c0_81] : memref<3x384x128xbf16, #tpu.memory_space<vmem>>, vector<1x384x128xbf16>
    %142 = vector.shape_cast %141 : vector<1x384x128xbf16> to vector<384x128xbf16>
    %cst_82 = arith.constant dense<0.000000e+00> : vector<256x128xf32>
    %143 = tpu.matmul %140, %142, %cst_82 {dimension_numbers = #tpu.dot_dimension_numbers<[1], [0], [0], [1], [0, 0, 1, 1], [], []>} : vector<256x384xbf16>, vector<384x128xbf16>, vector<256x128xf32> -> vector<256x128xf32>
    %144 = arith.addf %139, %143 : vector<256x128xf32>
    %c32_83 = arith.constant 32 : index
    %c0_84 = arith.constant 0 : index
    %145 = vector.load %arg17[%c32_83, %c0_84] : memref<288x384xbf16, #tpu.memory_space<vmem>>, vector<256x384xbf16>
    %c2_85 = arith.constant 2 : index
    %c0_86 = arith.constant 0 : index
    %c0_87 = arith.constant 0 : index
    %146 = vector.load %arg12[%c2_85, %c0_86, %c0_87] : memref<3x384x128xbf16, #tpu.memory_space<vmem>>, vector<1x384x128xbf16>
    %147 = vector.shape_cast %146 : vector<1x384x128xbf16> to vector<384x128xbf16>
    %cst_88 = arith.constant dense<0.000000e+00> : vector<256x128xf32>
    %148 = tpu.matmul %145, %147, %cst_88 {dimension_numbers = #tpu.dot_dimension_numbers<[1], [0], [0], [1], [0, 0, 1, 1], [], []>} : vector<256x384xbf16>, vector<384x128xbf16>, vector<256x128xf32> -> vector<256x128xf32>
    %149 = arith.addf %144, %148 : vector<256x128xf32>
    %c0_89 = arith.constant 0 : index
    %c0_90 = arith.constant 0 : index
    %150 = vector.load %arg13[%c0_89, %c0_90] : memref<1x128xf32, #tpu.memory_space<vmem>>, vector<1x128xf32>
    %151 = vector.broadcast %150 : vector<1x128xf32> to vector<256x128xf32>
    %152 = arith.addf %149, %151 : vector<256x128xf32>
    %153 = arith.truncf %2 : vector<256x64xf32> to vector<256x64xbf16>
    %c0_91 = arith.constant 0 : index
    %c0_92 = arith.constant 0 : index
    %154 = vector.load %arg14[%c0_91, %c0_92] : memref<64x128xbf16, #tpu.memory_space<vmem>>, vector<64x128xbf16>
    %cst_93 = arith.constant dense<0.000000e+00> : vector<256x128xf32>
    %155 = tpu.matmul %153, %154, %cst_93 {dimension_numbers = #tpu.dot_dimension_numbers<[1], [0], [0], [1], [0, 0, 1, 1], [], []>} : vector<256x64xbf16>, vector<64x128xbf16>, vector<256x128xf32> -> vector<256x128xf32>
    %c0_94 = arith.constant 0 : index
    %c0_95 = arith.constant 0 : index
    %156 = vector.load %arg15[%c0_94, %c0_95] : memref<1x128xf32, #tpu.memory_space<vmem>>, vector<1x128xf32>
    %157 = vector.broadcast %156 : vector<1x128xf32> to vector<256x128xf32>
    %158 = arith.addf %155, %157 : vector<256x128xf32>
    %159 = arith.addf %152, %158 : vector<256x128xf32>
    %160 = vector.shape_cast %159 : vector<256x128xf32> to vector<16x16x128xf32>
    %c0_96 = arith.constant 0 : index
    %c0_97 = arith.constant 0 : index
    %c0_98 = arith.constant 0 : index
    %c0_99 = arith.constant 0 : index
    %161 = vector.load %arg16[%c0_96, %c0_97, %c0_98, %c0_99] : memref<1x16x16x128xf32, #tpu.memory_space<vmem>>, vector<1x16x16x128xf32>
    %162 = vector.shape_cast %161 : vector<1x16x16x128xf32> to vector<16x16x128xf32>
    %163 = vector.shape_cast %160 : vector<16x16x128xf32> to vector<1x16x16x128xf32>
    tpu.vector_store %arg16[%c0_96, %c0_97, %c0_98, %c0_99], %163 {strides = array<i32>} : memref<1x16x16x128xf32, #tpu.memory_space<vmem>>, vector<1x16x16x128xf32>,
    return
  }
  func.func @transform_0(%arg0: i32) -> (i32, i32, i32, i32) {
    %c0_i32 = arith.constant 0 : i32
    %c0_i32_0 = arith.constant 0 : i32
    %c0_i32_1 = arith.constant 0 : i32
    %c0_i32_2 = arith.constant 0 : i32
    return %arg0, %c0_i32, %c0_i32_0, %c0_i32_1 : i32, i32, i32, i32
  }
  func.func @transform_1(%arg0: i32) -> (i32, i32) {
    %c0_i32 = arith.constant 0 : i32
    %c0_i32_0 = arith.constant 0 : i32
    %c0_i32_1 = arith.constant 0 : i32
    return %c0_i32, %c0_i32_0 : i32, i32
  }
  func.func @transform_2(%arg0: i32) -> (i32, i32) {
    %c0_i32 = arith.constant 0 : i32
    %c0_i32_0 = arith.constant 0 : i32
    %c0_i32_1 = arith.constant 0 : i32
    return %c0_i32, %c0_i32_0 : i32, i32
  }
  func.func @transform_3(%arg0: i32) -> (i32, i32) {
    %c0_i32 = arith.constant 0 : i32
    %c0_i32_0 = arith.constant 0 : i32
    %c0_i32_1 = arith.constant 0 : i32
    return %c0_i32, %c0_i32_0 : i32, i32
  }
  func.func @transform_4(%arg0: i32) -> (i32, i32) {
    %c0_i32 = arith.constant 0 : i32
    %c0_i32_0 = arith.constant 0 : i32
    %c0_i32_1 = arith.constant 0 : i32
    return %c0_i32, %c0_i32_0 : i32, i32
  }
  func.func @transform_5(%arg0: i32) -> (i32, i32, i32) {
    %c0_i32 = arith.constant 0 : i32
    %c0_i32_0 = arith.constant 0 : i32
    %c0_i32_1 = arith.constant 0 : i32
    %c0_i32_2 = arith.constant 0 : i32
    return %c0_i32, %c0_i32_0, %c0_i32_1 : i32, i32, i32
  }
  func.func @transform_6(%arg0: i32) -> (i32, i32) {
    %c0_i32 = arith.constant 0 : i32
    %c0_i32_0 = arith.constant 0 : i32
    %c0_i32_1 = arith.constant 0 : i32
    return %c0_i32, %c0_i32_0 : i32, i32
  }
  func.func @transform_7(%arg0: i32) -> (i32, i32) {
    %c0_i32 = arith.constant 0 : i32
    %c0_i32_0 = arith.constant 0 : i32
    %c0_i32_1 = arith.constant 0 : i32
    return %c0_i32, %c0_i32_0 : i32, i32
  }
  func.func @transform_8(%arg0: i32) -> (i32, i32) {
    %c0_i32 = arith.constant 0 : i32
    %c0_i32_0 = arith.constant 0 : i32
    %c0_i32_1 = arith.constant 0 : i32
    return %c0_i32, %c0_i32_0 : i32, i32
  }
  func.func @transform_9(%arg0: i32) -> (i32, i32) {
    %c0_i32 = arith.constant 0 : i32
    %c0_i32_0 = arith.constant 0 : i32
    %c0_i32_1 = arith.constant 0 : i32
    return %c0_i32, %c0_i32_0 : i32, i32
  }
  func.func @transform_10(%arg0: i32) -> (i32, i32) {
    %c0_i32 = arith.constant 0 : i32
    %c0_i32_0 = arith.constant 0 : i32
    %c0_i32_1 = arith.constant 0 : i32
    return %c0_i32, %c0_i32_0 : i32, i32
  }
  func.func @transform_11(%arg0: i32) -> (i32, i32, i32) {
    %c0_i32 = arith.constant 0 : i32
    %c0_i32_0 = arith.constant 0 : i32
    %c0_i32_1 = arith.constant 0 : i32
    %c0_i32_2 = arith.constant 0 : i32
    return %c0_i32, %c0_i32_0, %c0_i32_1 : i32, i32, i32
  }
  func.func @transform_12(%arg0: i32) -> (i32, i32) {
    %c0_i32 = arith.constant 0 : i32
    %c0_i32_0 = arith.constant 0 : i32
    %c0_i32_1 = arith.constant 0 : i32
    return %c0_i32, %c0_i32_0 : i32, i32
  }
  func.func @transform_13(%arg0: i32) -> (i32, i32) {
    %c0_i32 = arith.constant 0 : i32
    %c0_i32_0 = arith.constant 0 : i32
    %c0_i32_1 = arith.constant 0 : i32
    return %c0_i32, %c0_i32_0 : i32, i32
  }
  func.func @transform_14(%arg0: i32) -> (i32, i32) {
    %c0_i32 = arith.constant 0 : i32
    %c0_i32_0 = arith.constant 0 : i32
    %c0_i32_1 = arith.constant 0 : i32
    return %c0_i32, %c0_i32_0 : i32, i32
  }
  func.func @transform_15(%arg0: i32) -> (i32, i32, i32, i32) {
    %c0_i32 = arith.constant 0 : i32
    %c0_i32_0 = arith.constant 0 : i32
    %c0_i32_1 = arith.constant 0 : i32
    %c0_i32_2 = arith.constant 0 : i32
    return %arg0, %c0_i32, %c0_i32_0, %c0_i32_1 : i32, i32, i32, i32
  }
}

</mosaic_0001>

<bundles_post_ra>
// kernel: tpu_custom_call.1
= control target key start
LH: loop header
LB: loop body
LE: loop exit
PB: predicated region body
PF: predicated region fallthrough
CT: control target
= control target key end

     0   :  { %s13454_s0 = inlined_call_operand.hbm [shape: f32[2,16,16,64], index: 0, kind: input, shape index: {}]   ;;  %s13455_s1 = inlined_call_operand.vmem [shape: f32[1,64], index: 1, kind: input, shape index: {}]   ;;  %s13456_s2 = inlined_call_operand.vmem [shape: f32[1,64], index: 2, kind: input, shape index: {}]   ;;  %s13457_s3 = inlined_call_operand.vmem [shape: f32[64,32], index: 3, kind: input, shape index: {}]   ;;  %s13458_s4 = inlined_call_operand.vmem [shape: f32[32,64], index: 4, kind: input, shape index: {}]   ;;  %s13459_s5 = inlined_call_operand.hbm [shape: bf16[3,192,128], index: 5, kind: input, shape index: {}]   ;;  %s13460_s6 = inlined_call_operand.vmem [shape: f32[1,128], index: 6, kind: input, shape index: {}]   ;;  %s13461_s7 = inlined_call_operand.vmem [shape: f32[1,128], index: 7, kind: input, shape index: {}]   ;;  %s13462_s8 = inlined_call_operand.vmem [shape: f32[1,128], index: 8, kind: input, shape index: {}]   ;;  %s13463_s9 = inlined_call_operand.vmem [shape: f32[128,32], index: 9, kind: input, shape index: {}]   ;;  %s13464_s10 = inlined_call_operand.vmem [shape: f32[32,128], index: 10, kind: input, shape index: {}]   ;;  %s13465_s11 = inlined_call_operand.hbm [shape: bf16[3,384,128], index: 11, kind: input, shape index: {}]   ;;  %s13466_s12 = inlined_call_operand.vmem [shape: f32[1,128], index: 12, kind: input, shape index: {}]   ;;  %s13467_s13 = inlined_call_operand.vmem [shape: bf16[64,128], index: 13, kind: input, shape index: {}]   ;;  %s13468_s14 = inlined_call_operand.vmem [shape: f32[1,128], index: 14, kind: input, shape index: {}]   ;;  %s13469_s15 = inlined_call_operand.hbm [shape: f32[2,16,16,128], index: 15, kind: output, shape index: {}]  }
   0x1   :  { %13621 = sst [smem:[#allocation74_spill]] %s13459_s5 }
   0x2   :  { %13622 = sst [smem:[#allocation75_spill]] %s13465_s11 }
   0x3   :  { %13623 = sst [smem:[#allocation76_spill]] %s13466_s12 }
   0x4   :  { %13624 = sst [smem:[#allocation77_spill]] %s13469_s15 }
   0x5   :  { %20 = vsyncpa [#allocation4], 0 }
   0x6   :  { %22 = vsyncpa [#allocation4 + $0x1], 0 }
   0x7   :  { %23 = vsyncpa [#allocation7], 0 }
   0x8   :  { %24 = vsyncpa [#allocation5], 0 }
   0x9   :  { %26 = vsyncpa [#allocation5 + $0x1], 0  ;;  %s9409_s18 = smov 0   ;;  %s9411_s19 = smov 0  }
   0xa   :  { %s9413_s20 = smov 0   ;;  %s9415_s21 = smov 0  }
   0xb LB: > { %13625 = sst [smem:[#allocation13_spill]] %s9305_s18  ;;  %s9430_s22 = sadd.s32 4294967295, %s9317_s21   ;;  %s9317_s21 = sphi %s9415_s21, %s14217_s21   ;;  %s9313_s20 = sphi %s9413_s20, %s14219_s20   ;;  %s9309_s19 = sphi %s9411_s19, %s14221_s19   ;;  %s9305_s18 = sphi %s9409_s18, %s14220_s18  }
   0xc   : > { %13626 = sst [smem:[#allocation14_spill]] %s9313_s20  ;;  %s7385_s23 = sadd.s32 4294967294, %s9317_s21  }
   0xd   : > { %p52_p0 = scmp.ne.s32.totalorder %s9309_s19, %s9305_s18  ;;  %p53_p1 = scmp.eq.s32.totalorder %s9430_s22, 0 }
   0xe   : > { %p370_p2 = scmp.eq.s32.totalorder %s9430_s22, 1  ;;  %p376_p3 = scmp.eq.s32.totalorder %s7385_s23, 1 }
   0xf   : > { %p9439_p4 = por %p53_p1, %p52_p0  ;;  %p7386_p5 = scmp.ge.s32.totalorder %s9317_s21, 1 }
  0x10   : > { %p9444_p6 = por %p376_p3, %p52_p0  ;;  %p383_p7 = scmp.lt.s32.totalorder %s9317_s21, 3 }
  0x11   : > { %s13630_s5 = sld [smem:[#allocation74_spill]]  ;;  %s9319_s30 = smov [#allocation6]  }
  0x12   : > { %s13628_s25 = scalar_select %p9444_p6, 1, 0 }
  0x13   : > { %p9452_p8 = pnand %p7386_p5, %p383_p7  ;;  %s408_s16 = sshll.u32 %s9319_s30, 4  ;;  %s409_s16 = int_to_ptr.vmem [resolvable:$true] %s408_s16 }
  0x14   : > { %13629 = sst [smem:[#allocation15_spill]] %s13628_s25  ;;  %s9320_s27 = smov 64  }
  0x15   : > { %p8909_p9 = pneg %p9452_p8  ;;  %s13632_s11 = sld [smem:[#allocation75_spill]] }
  0x16   : > { %s9322_s30 = smov [#allocation8]   ;;  %s9465_s18 = sadd.s32 1, %s9317_s21  }
  0x17   : > { %s406_s28 = sshll.u32 %s13630_s5, 4  ;;  %p8910_p10 = pnand %p8909_p9, %p53_p1  ;;  %s407_s28 = int_to_ptr.hbm [resolvable:$true] %s406_s28 }
  0x18   : > { %s9321_s5 = smov 4   ;;  %s437_s25 = sshll.u32 %s9322_s30, 4  ;;  %s438_s25 = int_to_ptr.vmem [resolvable:$true] %s437_s25 }
  0x19   : > { %8912 = dma.hbm_to_vmem [thread:$0]  (!%p8910_p10), %s407_s28, 4608, %s409_s16, [#allocation7], %s9320_s27, %s9320_s27, %s9321_s5  }
  0x1a   : > { %13633 = sst [smem:[#allocation16_spill]] %s9465_s18  ;;  %s39_s15 = sadd.s32 1, %s9313_s20 }
  0x1b   : > { %s435_s26 = sshll.u32 %s13632_s11, 4  ;;  %s36_s12 = ssub.s32 %s9317_s21, %s9465_s18  ;;  %s436_s26 = int_to_ptr.hbm [resolvable:$true] %s435_s26 }
  0x1c   : > { %8915 = dma.hbm_to_vmem [thread:$0]  (!%p8910_p10), %s436_s26, 9216, %s438_s25, [#allocation7], %s9320_s27, %s9320_s27, %s9321_s5  }
  0x1d   : > { %p46_p12 = scmp.ne.s32.totalorder %s9313_s20, %s9309_s19  ;;  %p37_p13 = scmp.eq.s32.totalorder %s36_s12, 0 }
  0x1e   : > { %p47_p0 = scmp.eq.s32.totalorder %s9317_s21, 0  ;;  %p8926_p5 = scmp.lt.s32.totalorder %s9317_s21, 2 }
  0x1f   : > { %p9475_p3 = por %p370_p2, %p46_p12  ;;  %s460_s16 = sand.u32 1, %s9313_s20  }
  0x20   : > { %s9481_s28 = scalar_select %p37_p13, %s9313_s20, %s39_s15  }
  0x21   : > { %p48_p7 = por %p47_p0, %p46_p12  ;;  %s7390_s23 = sshll.u32 %s460_s16, 8 }
  0x22   : > { %13635 = sst [smem:[#allocation17_spill]] %s9481_s28  ;;  %s8610_s5 = sshll.u32 %s9317_s21, 8 }
  0x23   : > { %s469_s27 = scalar_lea.hbm %s13454_s0, %s8610_s5  ;;  %s464_s30 = scalar_lea.vmem [#allocation3], %s7390_s23 }
  0x24   : > { %s472_s11 = sshll.u32 %s464_s30, 4  ;;  %s470_s12 = sshll.u32 %s469_s27, 4  ;;  %s473_s11 = int_to_ptr.vmem [resolvable:$true] %s472_s11  ;;  %s471_s12 = int_to_ptr.hbm [resolvable:$true] %s470_s12 }
  0x25   : > { %p9488_p2 = pnand %p8926_p5, %p48_p7  ;;  %s461_s15 = scalar_lea.sflag [#allocation4], %s460_s16 }
  0x26   : > { %s9217_s28 = sshra.s32 %s471_s12, 4  ;;  %s9224_s25 = scalar_lea.hbm %s13454_s0, 512  ;;  %s9218_s28 = int_to_ptr.hbm [resolvable:$true] %s9217_s28 }
  0x27   : > { %s9219_s20 = scalar_lea.hbm %s9218_s28, 256  ;;  %p9221_p10 = pneg %p9488_p2 }
  0x28   : > { %p9220_p9 = scmp.ne.s32.totalorder %s9218_s28, %s9219_s20  ;;  %p9225_p0 = scmp.lt.s32.totalorder %s9218_s28, %s13454_s0 }
  0x29   : > { %p9226_p5 = scmp.lt.s32.totalorder %s9224_s25, %s9219_s20 }
  0x2a   : > { %p9222_p12 = pnand %p9221_p10, %p9220_p9 }
  0x2b   : > { %p9227_p7 = por %p9226_p5, %p9225_p0 }
  0x2c   : > { %p9223_p13 = pneg %p9222_p12 }
  0x2e   : > { %p9228_p11 = pnand %p9227_p7, %p9223_p13 }
  0x30   : > { %9231 = shalt.err (!%p9228_p11)
}
  0x31   : > { %s9323_s16 = smov 128   ;;  %s9324_s30 = smov 8  }
  0x32   : > { %8919 = dma.hbm_to_vmem [thread:$0]  (!%p9488_p2), %s471_s12, 4096, %s473_s11, %s461_s15, %s9323_s16, %s9323_s16, %s9324_s30  }
  0x33   : > { %484 = sbr.rel (%p9452_p8) target bundleno = 2678 (0xa76), region = 80 }
  0x38   : > { %s9505_s5 = sand.u32 1, %s9309_s19  }
  0x39   : > { %s7394_s28 = sshll.u32 %s9505_s5, 8  ;;  %s487_s20 = scalar_lea.sflag [#allocation4], %s9505_s5 }
  0x3a   : > { %s9511_s23 = scalar_lea.vmem [#allocation3], %s7394_s28 }
  0x3b   : > { %9292 = dma.done.wait (%p9439_p4), %s487_s20, 4096  }
  0x3c   : > { %9294 = vsyncadd (%p9439_p4), %s487_s20, 4294963200 }
  0x3d   : > { %9296 = dma.done.wait (%p53_p1), [#allocation7], 13824  }
  0x3e   : > { %9298 = vsyncadd (%p53_p1), [#allocation7], 4294953472  ;;  %v1242_v0 = vld [vmem:[%s13457_s3 + $0x38] sm:$0xff]  ;;  %v1241_v1 = vld [vmem:[%s13457_s3 + $0x30] sm:$0xff]  ;;  %vm13478_vm0 = vcmask 523264   ;;  %vm13477_vm1 = vcmask 1040384  }
  0x3f   : > { %1254 = vmatpush.msra.mxu0 %v1242_v0  ;;  %v1240_v2 = vld [vmem:[%s13457_s3 + $0x28] sm:$0xff]  ;;  %v9531_v3 = vld [vmem:[%s9511_s23] sm:$0xff]  ;;  %v9534_v4 = vld [vmem:[%s9511_s23 + $0x8] sm:$0xff]  ;;  %vm13476_vm2 = vcmask 261120   ;;  %s9325_s24 = smov 64   ;;  %s14185_s12 = sld [smem:[#allocation76_spill]] }
  0x40   : > { %v9537_v5 = vld [vmem:[%s9511_s23 + $0x10] sm:$0xff]  ;;  %v1063_v6 = vsel %vm13478_vm0, %v9531_v3, 0.0  ;;  %v1064_v8 = vsel %vm13478_vm0, %v9534_v4, 0.0  ;;  %v9549_v10 = vld [vmem:[%s9511_s23 + $0x18] sm:$0xff]  ;;  %v1238_v12 = vld [vmem:[%s13457_s3 + $0x18] sm:$0xff]  ;;  %v1132_v29 = vmul.f32 %v9531_v3, %v9531_v3  ;;  %v1133_v30 = vmul.f32 %v9534_v4, %v9534_v4  ;;  %s14213_s25 = sld [smem:[#allocation77_spill]] }
  0x41   : > { %1255 = vmatpush.msra.mxu0 %v1241_v1  ;;  %v1239_v7 = vld [vmem:[%s13457_s3 + $0x20] sm:$0xff]  ;;  %v1066_v9 = vsel %vm13478_vm0, %v9537_v5, 0.0  ;;  %v1065_v11 = vadd.f32 %v1064_v8, %v1063_v6  ;;  %v1068_v13 = vsel %vm13478_vm0, %v9549_v10, 0.0  ;;  %v9557_v14 = vld [vmem:[%s9511_s23 + $0x20] sm:$0xff]  ;;  %v9565_v18 = vld [vmem:[%s9511_s23 + $0x28] sm:$0xff]  ;;  %v1134_v31 = vmul.f32 %v9537_v5, %v9537_v5  ;;  %s7278_s16 = scalar_lea.sflag [#allocation5], %s9505_s5 }
  0x42   : > { %v1237_v16 = vld [vmem:[%s13457_s3 + $0x10] sm:$0xff]  ;;  %v1070_v17 = vsel %vm13478_vm0, %v9557_v14, 0.0  ;;  %v1236_v20 = vld [vmem:[%s13457_s3 + $0x8] sm:$0xff]  ;;  %v1072_v21 = vsel %vm13478_vm0, %v9565_v18, 0.0  ;;  %v9573_v22 = vld [vmem:[%s9511_s23 + $0x30] sm:$0xff]  ;;  %v1135_v34 = vmul.f32 %v9549_v10, %v9549_v10  ;;  %v1136_v38 = vmul.f32 %v9557_v14, %v9557_v14 }
  0x43   : > { %1256 = vmatpush.msra.mxu0 %v1240_v2  ;;  %v1067_v15 = vadd.f32 %v1066_v9, %v1065_v11  ;;  %v1235_v24 = vld [vmem:[%s13457_s3] sm:$0xff]  ;;  %v9579_v25 = vld [vmem:[%s9511_s23 + $0x38] sm:$0xff]  ;;  %v1074_v26 = vsel %vm13478_vm0, %v9573_v22, 0.0  ;;  %v9592_v32 = vld [vmem:[%s9511_s23 + $0x40] sm:$0xff]  ;;  %v1164_v39 = vsel %vm13478_vm0, %v1132_v29, 0.0  ;;  %v1165_v40 = vsel %vm13478_vm0, %v1133_v30, 0.0 }
  0x44   : > { %v1076_v28 = vsel %vm13478_vm0, %v9579_v25, 0.0  ;;  %v1078_v35 = vsel %vm13478_vm0, %v9592_v32, 0.0  ;;  %v9599_v36 = vld [vmem:[%s9511_s23 + $0x48] sm:$0xff]  ;;  %v1166_v42 = vadd.f32 %v1165_v40, %v1164_v39  ;;  %v1167_v43 = vsel %vm13478_vm0, %v1134_v31, 0.0  ;;  %v9609_v44 = vld [vmem:[%s9511_s23 + $0x50] sm:$0xff]  ;;  %v9617_v50 = vld [vmem:[%s9511_s23 + $0x58] sm:$0xff] }
  0x45   : > { %1257 = vmatpush.msra.mxu0 %v1239_v7  ;;  %v1069_v19 = vadd.f32 %v1068_v13, %v1067_v15  ;;  %v1080_v41 = vsel %vm13478_vm0, %v9599_v36, 0.0  ;;  %v1137_v46 = vmul.f32 %v9565_v18, %v9565_v18  ;;  %v1169_v47 = vsel %vm13478_vm0, %v1135_v34, 0.0  ;;  %v561_v56 = vld [vmem:[%s9511_s23 + $0x60] sm:$0xff]  ;;  %v562_v62 = vld [vmem:[%s9511_s23 + $0x68] sm:$0xff]  ;;  %v9635_v7 = vld [vmem:[%s9511_s23 + $0x70] sm:$0xff] }
  0x46   : > { %v1082_v48 = vsel %vm13478_vm0, %v9609_v44, 0.0  ;;  %v1168_v49 = vadd.f32 %v1167_v43, %v1166_v42  ;;  %v1138_v52 = vmul.f32 %v9573_v22, %v9573_v22  ;;  %v1171_v53 = vsel %vm13478_vm0, %v1136_v38, 0.0  ;;  %v9643_v15 = vld [vmem:[%s9511_s23 + $0x78] sm:$0xff]  ;;  %v9659_v30 = vld [vmem:[%s9511_s23 + $0x88] sm:$0xff]  ;;  %v567_v38 = vld [vmem:[%s9511_s23 + $0x90] sm:$0xff]  ;;  %s9267_s29 = scalar_lea.hbm %s14213_s25, 512 }
  0x47   : > { %1258 = vmatpush.msra.mxu0 %v1238_v12  ;;  %v1071_v23 = vadd.f32 %v1070_v17, %v1069_v19  ;;  %v1084_v54 = vsel %vm13478_vm0, %v9617_v50, 0.0  ;;  %v1139_v58 = vmul.f32 %v9579_v25, %v9579_v25  ;;  %v1173_v59 = vsel %vm13478_vm0, %v1137_v46, 0.0 }
  0x48   : > { %v1170_v55 = vadd.f32 %v1169_v47, %v1168_v49  ;;  %v1086_v60 = vsel %vm13478_vm0, %v561_v56, 0.0  ;;  %v1140_v0 = vmul.f32 %v9592_v32, %v9592_v32  ;;  %v1175_v1 = vsel %vm13478_vm0, %v1138_v52, 0.0  ;;  %v569_v52 = vld [vmem:[%s9511_s23 + $0xa0] sm:$0xff] }
  0x49   : > { %1259 = vmatpush.msra.mxu0 %v1237_v16  ;;  %v1073_v27 = vadd.f32 %v1072_v21, %v1071_v23  ;;  %v1088_v2 = vsel %vm13478_vm0, %v562_v62, 0.0  ;;  %v1141_v9 = vmul.f32 %v9599_v36, %v9599_v36  ;;  %v1177_v11 = vsel %vm13478_vm0, %v1139_v58, 0.0  ;;  %v9651_v23 = vld [vmem:[%s9511_s23 + $0x80] sm:$0xff]  ;;  %v570_v58 = vld [vmem:[%s9511_s23 + $0xa8] sm:$0xff] }
  0x4a   : > { %v1172_v61 = vadd.f32 %v1171_v53, %v1170_v55  ;;  %v1090_v12 = vsel %vm13478_vm0, %v9635_v7, 0.0  ;;  %v1142_v17 = vmul.f32 %v9609_v44, %v9609_v44  ;;  %v1179_v19 = vsel %vm13478_vm0, %v1140_v0, 0.0  ;;  %v571_v0 = vld [vmem:[%s9511_s23 + $0xb0] sm:$0xff] }
  0x4b   : > { %1260 = vmatpush.msra.mxu0 %v1236_v20  ;;  %v1075_v33 = vadd.f32 %v1074_v26, %v1073_v27  ;;  %v1092_v20 = vsel %vm13478_vm0, %v9643_v15, 0.0  ;;  %v1143_v26 = vmul.f32 %v9617_v50, %v9617_v50  ;;  %v1181_v27 = vsel %vm13478_vm0, %v1141_v9, 0.0 }
  0x4c   : > { %v1174_v6 = vadd.f32 %v1173_v59, %v1172_v61  ;;  %v1183_v34 = vsel %vm13478_vm0, %v1142_v17, 0.0  ;;  %v1145_v40 = vmul.f32 %v562_v62, %v562_v62  ;;  %v1098_v42 = vsel %vm13478_vm0, %v567_v38, 0.0 }
  0x4d   : > { %1261 = vmatpush.msra.mxu0 %v1235_v24  ;;  %v1077_v37 = vadd.f32 %v1076_v28, %v1075_v33  ;;  %v1094_v28 = vsel %vm13478_vm0, %v9651_v23, 0.0  ;;  %v1144_v33 = vmul.f32 %v561_v56, %v561_v56  ;;  %v1146_v47 = vmul.f32 %v9635_v7, %v9635_v7 }
  0x4e   : > { %v1176_v13 = vadd.f32 %v1175_v1, %v1174_v6  ;;  %v1189_v55 = vsel %vm13478_vm0, %v1145_v40, 0.0  ;;  %v1102_v56 = vsel %vm13478_vm0, %v569_v52, 0.0  ;;  %v1104_v62 = vsel %vm13478_vm0, %v570_v58, 0.0 }
  0x4f   : > { %v1079_v45 = vadd.f32 %v1078_v35, %v1077_v37  ;;  %v1096_v35 = vsel %vm13478_vm0, %v9659_v30, 0.0  ;;  %v1191_v61 = vsel %vm13478_vm0, %v1146_v47, 0.0  ;;  %v1153_v40 = vmul.f32 %v570_v58, %v570_v58  ;;  %v578_v58 = vld [vmem:[%s9511_s23 + $0xe8] sm:$0xff] }
  0x50   : > { %v1178_v21 = vadd.f32 %v1177_v11, %v1176_v13  ;;  %v9688_v11 = vld [vmem:[%s9511_s23 + $0xb8] sm:$0xff]  ;;  %v1150_v13 = vmul.f32 %v567_v38, %v567_v38  ;;  %v575_v38 = vld [vmem:[%s9511_s23 + $0xd0] sm:$0xff]  ;;  %v1154_v47 = vmul.f32 %v571_v0, %v571_v0 }
  0x51   : > { %v1081_v51 = vadd.f32 %v1080_v41, %v1079_v45  ;;  %v1185_v41 = vsel %vm13478_vm0, %v1143_v26, 0.0  ;;  %v568_v45 = vld [vmem:[%s9511_s23 + $0x98] sm:$0xff]  ;;  %v1108_v17 = vsel %vm13478_vm0, %v9688_v11, 0.0 }
  0x52   : > { %v1180_v29 = vadd.f32 %v1179_v19, %v1178_v21  ;;  %v1100_v49 = vsel %vm13478_vm0, %v568_v45, 0.0 }
  0x53   : > { %v1083_v57 = vadd.f32 %v1082_v48, %v1081_v51  ;;  %v1187_v48 = vsel %vm13478_vm0, %v1144_v33, 0.0  ;;  %v1152_v33 = vmul.f32 %v569_v52, %v569_v52  ;;  %v577_v52 = vld [vmem:[%s9511_s23 + $0xe0] sm:$0xff] }
  0x54   : > { %v1182_v37 = vadd.f32 %v1181_v27, %v1180_v29  ;;  %v574_v29 = vld [vmem:[%s9511_s23 + $0xc8] sm:$0xff] }
  0x55   : > { %v1085_v63 = vadd.f32 %v1084_v54, %v1083_v57  ;;  %v1147_v54 = vmul.f32 %v9643_v15, %v9643_v15 }
  0x56   : > { %v1184_v43 = vadd.f32 %v1183_v34, %v1182_v37  ;;  %v1199_v34 = vsel %vm13478_vm0, %v1150_v13, 0.0 }
  0x57   : > { %v1087_v8 = vadd.f32 %v1086_v60, %v1085_v63  ;;  %v1148_v60 = vmul.f32 %v9651_v23, %v9651_v23  ;;  %v1193_v6 = vsel %vm13478_vm0, %v1147_v54, 0.0  ;;  %v1155_v54 = vmul.f32 %v9688_v11, %v9688_v11 }
  0x58   : > { %v1186_v51 = vadd.f32 %v1185_v41, %v1184_v43 }
  0x59   : > { %v1089_v16 = vadd.f32 %v1088_v2, %v1087_v8  ;;  %v1149_v2 = vmul.f32 %v9659_v30, %v9659_v30  ;;  %v1106_v8 = vsel %vm13478_vm0, %v571_v0, 0.0  ;;  %v579_v0 = vld [vmem:[%s9511_s23 + $0xf0] sm:$0xff] }
  0x5a   : > { %v1188_v57 = vadd.f32 %v1187_v48, %v1186_v51  ;;  %v1203_v48 = vsel %vm13478_vm0, %v1152_v33, 0.0 }
  0x5b   : > { %v1091_v24 = vadd.f32 %v1090_v12, %v1089_v16  ;;  %v1195_v16 = vsel %vm13478_vm0, %v1148_v60, 0.0  ;;  %v1197_v26 = vsel %vm13478_vm0, %v1149_v2, 0.0  ;;  %v1157_v2 = vmul.f32 %v574_v29, %v574_v29 }
  0x5c   : > { %v1190_v63 = vadd.f32 %v1189_v55, %v1188_v57  ;;  %v1205_v55 = vsel %vm13478_vm0, %v1153_v40, 0.0 }
  0x5d   : > { %v1093_v31 = vadd.f32 %v1092_v20, %v1091_v24  ;;  %v573_v20 = vld [vmem:[%s9511_s23 + $0xc0] sm:$0xff]  ;;  %v1151_v24 = vmul.f32 %v568_v45, %v568_v45  ;;  %v576_v45 = vld [vmem:[%s9511_s23 + $0xd8] sm:$0xff] }
  0x5e   : > { %v1192_v9 = vadd.f32 %v1191_v61, %v1190_v63  ;;  %v1110_v27 = vsel %vm13478_vm0, %v573_v20, 0.0  ;;  %v1156_v60 = vmul.f32 %v573_v20, %v573_v20  ;;  %v1207_v61 = vsel %vm13478_vm0, %v1154_v47, 0.0  ;;  %v1268_v20 = vld [vmem:[%s13458_s4 + $0x10] sm:$0xff] }
  0x5f   : > { %v1095_v39 = vadd.f32 %v1094_v28, %v1093_v31  ;;  %v1201_v41 = vsel %vm13478_vm0, %v1151_v24, 0.0 }
  0x60   : > { %v1194_v19 = vadd.f32 %v1193_v6, %v1192_v9  ;;  %v1209_v6 = vsel %vm13478_vm0, %v1155_v54, 0.0 }
  0x61   : > { %v1097_v46 = vadd.f32 %v1096_v35, %v1095_v39  ;;  %v1112_v35 = vsel %vm13478_vm0, %v574_v29, 0.0  ;;  %v1267_v29 = vld [vmem:[%s13458_s4 + $0x8] sm:$0xff] }
  0x62   : > { %v1196_v28 = vadd.f32 %v1195_v16, %v1194_v19  ;;  %v1158_v16 = vmul.f32 %v575_v38, %v575_v38  ;;  %v1269_v19 = vld [vmem:[%s13458_s4 + $0x18] sm:$0xff] }
  0x63   : > { %v1099_v53 = vadd.f32 %v1098_v42, %v1097_v46  ;;  %v1114_v42 = vsel %vm13478_vm0, %v575_v38, 0.0  ;;  %1286 = vmatpush.msra.mxu1 %v1269_v19  ;;  %v1161_v38 = vmul.f32 %v578_v58, %v578_v58 }
  0x64   : > { %v1198_v37 = vadd.f32 %v1197_v26, %v1196_v28  ;;  %v1213_v28 = vsel %vm13478_vm0, %v1157_v2, 0.0 }
  0x65   : > { %v1101_v59 = vadd.f32 %v1100_v49, %v1099_v53  ;;  %v1116_v49 = vsel %vm13478_vm0, %v576_v45, 0.0  ;;  %1287 = vmatpush.msra.mxu1 %v1268_v20  ;;  %v1221_v47 = vsel %vm13478_vm0, %v1161_v38, 0.0 }
  0x66   : > { %v1200_v43 = vadd.f32 %v1199_v34, %v1198_v37  ;;  %v1160_v34 = vmul.f32 %v577_v52, %v577_v52 }
  0x67   : > { %v1103_v1 = vadd.f32 %v1102_v56, %v1101_v59  ;;  %v1118_v56 = vsel %vm13478_vm0, %v577_v52, 0.0  ;;  %1288 = vmatpush.msra.mxu1 %v1267_v29 }
  0x68   : > { %v1202_v51 = vadd.f32 %v1201_v41, %v1200_v43  ;;  %v1219_v43 = vsel %vm13478_vm0, %v1160_v34, 0.0  ;;  %v1315_v34 = vld [vmem:[%s13456_s2] sm:$0x1] }
  0x69   : > { %v1105_v12 = vadd.f32 %v1104_v62, %v1103_v1  ;;  %v1120_v62 = vsel %vm13478_vm0, %v578_v58, 0.0 }
  0x6a   : > { %v1204_v57 = vadd.f32 %v1203_v48, %v1202_v51 }
  0x6b   : > { %v1107_v21 = vadd.f32 %v1106_v8, %v1105_v12  ;;  %v1122_v8 = vsel %vm13478_vm0, %v579_v0, 0.0  ;;  %v580_v12 = vld [vmem:[%s9511_s23 + $0xf8] sm:$0xff] }
  0x6c   : > { %v1206_v63 = vadd.f32 %v1205_v55, %v1204_v57 }
  0x6d   : > { %v1109_v31 = vadd.f32 %v1108_v17, %v1107_v21  ;;  %v1211_v17 = vsel %vm13478_vm0, %v1156_v60, 0.0  ;;  %v1124_v21 = vsel %vm13478_vm0, %v580_v12, 0.0 }
  0x6e   : > { %v1208_v9 = vadd.f32 %v1207_v61, %v1206_v63 }
  0x6f   : > { %v1111_v39 = vadd.f32 %v1110_v27, %v1109_v31  ;;  %v1159_v27 = vmul.f32 %v576_v45, %v576_v45 }
  0x70   : > { %v1210_v24 = vadd.f32 %v1209_v6, %v1208_v9  ;;  %v1266_v6 = vld [vmem:[%s13458_s4] sm:$0xff] }
  0x71   : > { %v1113_v46 = vadd.f32 %v1112_v35, %v1111_v39  ;;  %v1215_v35 = vsel %vm13478_vm0, %v1158_v16, 0.0  ;;  %v1217_v39 = vsel %vm13478_vm0, %v1159_v27, 0.0  ;;  %1289 = vmatpush.msra.mxu1 %v1266_v6  ;;  %v8972_v27 = vld [vmem:[%s13455_s1] ss:$0 sm:$0xff] }
  0x72   : > { %v1212_v31 = vadd.f32 %v1211_v17, %v1210_v24 }
  0x73   : > { %v1115_v53 = vadd.f32 %v1114_v42, %v1113_v46  ;;  %v1162_v42 = vmul.f32 %v579_v0, %v579_v0  ;;  %v1163_v46 = vmul.f32 %v580_v12, %v580_v12 }
  0x74   : > { %v1214_v37 = vadd.f32 %v1213_v28, %v1212_v31 }
  0x75   : > { %v1117_v59 = vadd.f32 %v1116_v49, %v1115_v53  ;;  %v1223_v51 = vsel %vm13478_vm0, %v1162_v42, 0.0  ;;  %v1225_v53 = vsel %vm13478_vm0, %v1163_v46, 0.0 }
  0x76   : > { %v1216_v41 = vadd.f32 %v1215_v35, %v1214_v37 }
  0x77   : > { %v1119_v1 = vadd.f32 %v1118_v56, %v1117_v59 }
  0x78   : > { %v1218_v45 = vadd.f32 %v1217_v39, %v1216_v41 }
  0x79   : > { %v1121_v13 = vadd.f32 %v1120_v62, %v1119_v1 }
  0x7a   : > { %v1220_v49 = vadd.f32 %v1219_v43, %v1218_v45 }
  0x7b   : > { %v1123_v26 = vadd.f32 %v1122_v8, %v1121_v13 }
  0x7c   : > { %v1222_v52 = vadd.f32 %v1221_v47, %v1220_v49 }
  0x7d   : > { %v1125_v33 = vadd.f32 %v1124_v21, %v1123_v26 }
  0x7e   : > { %v1224_v55 = vadd.f32 %v1223_v51, %v1222_v52 }
  0x7f   : > { %v1126_v40 = vrot.slane %v1125_v33, 4 }
  0x80   : > { %v1226_v56 = vadd.f32 %v1225_v53, %v1224_v55 }
  0x81   : > { %v1127_v48 = vadd.f32 %v1126_v40, %v1125_v33 }
  0x82   : > { %v1227_v58 = vrot.slane %v1226_v56, 4 }
  0x83   : > { %v1128_v54 = vrot.slane %v1127_v48, 2 }
  0x84   : > { %v1228_v59 = vadd.f32 %v1227_v58, %v1226_v56 }
  0x85   : > { %v1129_v57 = vadd.f32 %v1128_v54, %v1127_v48 }
  0x86   : > { %v1229_v61 = vrot.slane %v1228_v59, 2 }
  0x87   : > { %v1130_v60 = vrot.slane %v1129_v57, 1 }
  0x88   : > { %v1230_v62 = vadd.f32 %v1229_v61, %v1228_v59 }
  0x89   : > { %v1131_v63 = vadd.f32 %v1130_v60, %v1129_v57 }
  0x8a   : > { %v1231_v0 = vrot.slane %v1230_v62, 1 }
  0x8c   : > { %v1232_v1 = vadd.f32 %v1231_v0, %v1230_v62 }
  0x8e   : > { %v1234_v2 = vsel %vm13477_vm1, %v1131_v63, %v1232_v1 }
  0x8f   : > { %7398 = vmatmul.msk.f32.vlgmr.msra.gmra.mxu0 %vm13478_vm0, %v1234_v2 }
 0x10c   : > { %v1263_v8 = vpop.f32.mrf.mxu0 }
 0x10d   : > { %7399 = vmatmul.msk.f32.vlgmr.msra.gmra.mxu1 %vm13476_vm2, %v1263_v8 }
 0x18a   : > { %v1291_v9 = vpop.f32.mrf.mxu1 }
 0x18b   : > { %v1294_v12 = vmul.f32 %v1291_v9, %v1291_v9 }
 0x18d   : > { %v1296_v13 = vrot.slane %v1294_v12, 7 }
 0x18f   : > { %v1298_v16 = vsub.f32 %v1291_v9, %v1296_v13 }
 0x191   : > { %v1299_v17 = vadd.f32 1e-05, %v1298_v16 }
 0x193   : > { %8977 = vrsqrt.f32 %v1299_v17  ;;  %vm1306_vm4 = vweird.f32 %v1299_v17 }
 0x199   : > { %v8978_v19 = vpop.eup %8977 }
 0x19a   : > { %v1301_v20 = vmul.f32 %v8978_v19, %v1299_v17  ;;  %vm1307_vm3 = vweird.f32 %v8978_v19 }
 0x19b   : > { %vm1308_vm5 = vmor %vm1306_vm4, %vm1307_vm3 }
 0x19c   : > { %v1302_v21 = vmul.f32 %v8978_v19, %v1301_v20 }
 0x19e   : > { %v1303_v24 = vmul.f32 0.5, %v1302_v21 }
 0x1a0   : > { %v1304_v26 = vsub.f32 1.5, %v1303_v24 }
 0x1a2   : > { %v1305_v28 = vmul.f32 %v8978_v19, %v1304_v26 }
 0x1a4   : > { %v1309_v29 = vsel %vm1308_vm5, %v8978_v19, %v1305_v28 }
 0x1a5   : > { %v1314_v31 = vmul.f32 %v8972_v27, %v1309_v29 }
 0x1a7   : > { %v1317_v33 = vrot.slane %v1314_v31, 1  ;;  %v9747_v35 = vperm.slane %v1314_v31, 1 }
 0x1a9   : > { %v1319_v37 = vmul.f32 %v1317_v33, %v1291_v9  ;;  %v1330_v39 = vmul.f32 %v9747_v35, %v9592_v32  ;;  %v1331_v41 = vmul.f32 %v9747_v35, %v9599_v36  ;;  %v1326_v42 = vmul.f32 %v9747_v35, %v9557_v14 }
 0x1aa   : > { %v1327_v43 = vmul.f32 %v9747_v35, %v9565_v18  ;;  %v1322_v45 = vmul.f32 %v9747_v35, %v9531_v3  ;;  %v1323_v46 = vmul.f32 %v9747_v35, %v9534_v4  ;;  %v1332_v51 = vmul.f32 %v9747_v35, %v9609_v44 }
 0x1ab   : > { %v1320_v38 = vsub.f32 %v1315_v34, %v1319_v37  ;;  %v1333_v56 = vmul.f32 %v9747_v35, %v9617_v50  ;;  %v1328_v57 = vmul.f32 %v9747_v35, %v9573_v22  ;;  %v1329_v22 = vmul.f32 %v9747_v35, %v9579_v25 }
 0x1ac   : > { %v1324_v25 = vmul.f32 %v9747_v35, %v9537_v5 }
 0x1ad   : > { %v9751_v40 = vperm.slane %v1320_v38, 0 }
 0x1af   : > { %v9764_v47 = vadd.f32 %v9751_v40, %v1330_v39  ;;  %v9767_v32 = vadd.f32 %v9751_v40, %v1331_v41  ;;  %v9770_v36 = vadd.f32 %v9751_v40, %v1326_v42  ;;  %v9773_v14 = vadd.f32 %v9751_v40, %v1327_v43 }
 0x1b0   : > { %v9776_v18 = vadd.f32 %v9751_v40, %v1322_v45  ;;  %v9779_v3 = vadd.f32 %v9751_v40, %v1323_v46  ;;  %v9789_v54 = vadd.f32 %v9751_v40, %v1332_v51  ;;  %v9797_v44 = vadd.f32 %v9751_v40, %v1333_v56 }
 0x1b1   : > { %v7408_v4 = vmul.f32 -1.442695, %v9764_v47  ;;  %v7409_v48 = vmul.f32 -1.442695, %v9767_v32  ;;  %v7404_v49 = vmul.f32 -1.442695, %v9770_v36  ;;  %v9801_v59 = vadd.f32 %v9751_v40, %v1328_v57 }
 0x1b2   : > { %v7405_v52 = vmul.f32 -1.442695, %v9773_v14  ;;  %v7400_v53 = vmul.f32 -1.442695, %v9776_v18  ;;  %v7401_v55 = vmul.f32 -1.442695, %v9779_v3  ;;  %v9814_v8 = vadd.f32 %v9751_v40, %v1329_v22 }
 0x1b3   : > { %8979 = vpow2.f32 %v7408_v4  ;;  %v7410_v58 = vmul.f32 -1.442695, %v9789_v54  ;;  %v7411_v50 = vmul.f32 -1.442695, %v9797_v44  ;;  %v7406_v1 = vmul.f32 -1.442695, %v9801_v59 }
 0x1b4   : > { %8981 = vpow2.f32 %v7409_v48  ;;  %v9835_v5 = vmul.f32 -1.442695, %v9814_v8  ;;  %v9838_v27 = vadd.f32 %v9751_v40, %v1324_v25 }
 0x1b5   : > { %8983 = vpow2.f32 %v7404_v49 }
 0x1b6   : > { %8985 = vpow2.f32 %v7405_v52 }
 0x1b7   : > { %8987 = vpow2.f32 %v7400_v53 }
 0x1b8   : > { %8989 = vpow2.f32 %v7401_v55 }
 0x1b9   : > { %v8980_v60 = vpop.eup %8979  ;;  %8991 = vpow2.f32 %v7410_v58 }
 0x1ba   : > { %v8982_v61 = vpop.eup %8981  ;;  %v9803_v62 = vadd.f32 1.0, %v8980_v60 }
 0x1bb   : > { %v8984_v63 = vpop.eup %8983  ;;  %v9806_v0 = vadd.f32 1.0, %v8982_v61 }
 0x1bc   : > { %v8986_v2 = vpop.eup %8985  ;;  %8993 = vrcp.f32 %v9803_v62  ;;  %v9816_v12 = vadd.f32 1.0, %v8984_v63  ;;  %v1646_v16 = vand.u32 2147483647, %v9803_v62  ;;  %v1648_v17 = vand.u32 2147483648, %v9803_v62 }
 0x1bd   : > { %v8988_v6 = vpop.eup %8987  ;;  %8995 = vrcp.f32 %v9806_v0  ;;  %v9818_v13 = vadd.f32 1.0, %v8986_v2  ;;  %v1661_v20 = vand.u32 2147483647, %v9806_v0  ;;  %v1663_v21 = vand.u32 2147483648, %v9806_v0 }
 0x1be   : > { %v8990_v9 = vpop.eup %8989  ;;  %8997 = vpow2.f32 %v7411_v50  ;;  %v9824_v19 = vadd.f32 1.0, %v8988_v6  ;;  %vm1642_vm6 = vweird.f32 %v9803_v62  ;;  %vm1657_vm7 = vweird.f32 %v9806_v0 }
 0x1bf   : > { %8999 = vpow2.f32 %v7406_v1  ;;  %v9829_v24 = vpop.eup %8991  ;;  %v9832_v26 = vadd.f32 1.0, %v8990_v9  ;;  %v1588_v29 = vand.u32 2147483648, %v9816_v12  ;;  %vm9845_vm8 = vcmp.eq.f32.partialorder %v1646_v16, 8.507059e+37 }
 0x1c0   : > { %9001 = vrcp.f32 %v9816_v12  ;;  %v1649_v37 = vor.u32 1.1754944e-38, %v1648_v17  ;;  %v1586_v38 = vand.u32 2147483647, %v9816_v12  ;;  %v1603_v39 = vand.u32 2147483648, %v9818_v13 }
 0x1c1   : > { %9003 = vrcp.f32 %v9818_v13  ;;  %vm9854_vm9 = vcmp.eq.f32.partialorder %v1661_v20, 8.507059e+37  ;;  %v1664_v45 = vor.u32 1.1754944e-38, %v1663_v21  ;;  %v1601_v46 = vand.u32 2147483647, %v9818_v13 }
 0x1c2   : > { %v8994_v28 = vpop.eup %8993  ;;  %9005 = vrcp.f32 %v9824_v19  ;;  %v1528_v4 = vand.u32 2147483648, %v9824_v19  ;;  %vm1582_vm10 = vweird.f32 %v9816_v12  ;;  %v1526_v51 = vand.u32 2147483647, %v9824_v19 }
 0x1c3   : > { %v8996_v31 = vpop.eup %8995  ;;  %v1638_v33 = vmul.f32 %v8994_v28, %v9803_v62  ;;  %9007 = vrcp.f32 %v9832_v26  ;;  %vm1643_vm11 = vweird.f32 %v8994_v28  ;;  %v1589_v55 = vor.u32 1.1754944e-38, %v1588_v29 }
 0x1c4   : > { %v9851_v41 = vpop.eup %8997  ;;  %v1653_v42 = vmul.f32 %v8996_v31, %v9806_v0  ;;  %vm1597_vm12 = vweird.f32 %v9818_v13  ;;  %vm1658_vm13 = vweird.f32 %v8996_v31  ;;  %vm9867_vm14 = vcmp.eq.f32.partialorder %v1586_v38, 8.507059e+37  ;;  %vm1644_vm5 = vmor %vm1642_vm6, %vm1643_vm11 }
 0x1c5   : > { %v9860_v48 = vpop.eup %8999  ;;  %v1639_v49 = vsub.f32 1.0, %v1638_v33  ;;  %v1604_v61 = vor.u32 1.1754944e-38, %v1603_v39  ;;  %vm9873_vm3 = vcmp.eq.f32.partialorder %v1601_v46, 8.507059e+37  ;;  %v1529_v2 = vor.u32 1.1754944e-38, %v1528_v4  ;;  %vm1659_vm0 = vmor %vm1657_vm7, %vm1658_vm13 }
 0x1c6   : > { %v9002_v52 = vpop.eup %9001  ;;  %v1654_v53 = vsub.f32 1.0, %v1653_v42  ;;  %v1541_v6 = vand.u32 2147483647, %v9832_v26  ;;  %vm9879_vm4 = vcmp.eq.f32.partialorder %v1526_v51, 8.507059e+37  ;;  %v1543_v20 = vand.u32 2147483648, %v9832_v26 }
 0x1c7   : > { %v9004_v56 = vpop.eup %9003  ;;  %v1640_v57 = vmul.f32 %v8994_v28, %v1639_v49  ;;  %v1578_v58 = vmul.f32 %v9002_v52, %v9816_v12  ;;  %vm1583_vm2 = vweird.f32 %v9002_v52  ;;  %9009 = vpow2.f32 %v9835_v5 }
 0x1c8   : > { %v9006_v50 = vpop.eup %9005  ;;  %v1655_v63 = vmul.f32 %v8996_v31, %v1654_v53  ;;  %v1593_v22 = vmul.f32 %v9004_v56, %v9818_v13  ;;  %vm1598_vm1 = vweird.f32 %v9004_v56  ;;  %vm1584_vm6 = vmor %vm1582_vm10, %vm1583_vm2  ;;  %vm13647_vm2 = vweird.f32 %v9824_v19 }
 0x1c9   : > { %v1641_v9 = vadd.f32 %v8994_v28, %v1640_v57  ;;  %v1579_v25 = vsub.f32 1.0, %v1578_v58  ;;  %v1518_v16 = vmul.f32 %v9006_v50, %v9824_v19  ;;  %v9008_v33 = vpop.eup %9007  ;;  %vm1523_vm15 = vweird.f32 %v9006_v50 }
 0x1ca   : > { %v1656_v21 = vadd.f32 %v8996_v31, %v1655_v63  ;;  %v1594_v29 = vsub.f32 1.0, %v1593_v22  ;;  %v1533_v62 = vmul.f32 %v9008_v33, %v9832_v26  ;;  %vm1524_vm7 = vmor %vm13647_vm2, %vm1523_vm15  ;;  %vm1542_vm10 = vcmp.eq.f32.partialorder %v1541_v6, 8.507059e+37 }
 0x1cb   : > { %v1645_v38 = vsel %vm1644_vm5, %v8994_v28, %v1641_v9  ;;  %v1580_v39 = vmul.f32 %v9002_v52, %v1579_v25  ;;  %v1519_v42 = vsub.f32 1.0, %v1518_v16  ;;  %v1544_v9 = vor.u32 1.1754944e-38, %v1543_v20 }
 0x1cc   : > { %v1650_v46 = vsel %vm9845_vm8, %v1649_v37, %v1645_v38  ;;  %v1660_v4 = vsel %vm1659_vm0, %v8996_v31, %v1656_v21  ;;  %v1595_v49 = vmul.f32 %v9004_v56, %v1594_v29  ;;  %v1534_v31 = vsub.f32 1.0, %v1533_v62  ;;  %vm1599_vm0 = vmor %vm1597_vm12, %vm1598_vm1 }
 0x1cd   : > { %v1665_v51 = vsel %vm9854_vm9, %v1664_v45, %v1660_v4  ;;  %v9896_v53 = vmul.f32 %v1650_v46, %v9764_v47  ;;  %v1581_v28 = vadd.f32 %v9002_v52, %v1580_v39  ;;  %v1520_v57 = vmul.f32 %v9006_v50, %v1519_v42  ;;  %v9010_v1 = vpop.eup %9009 }
 0x1ce   : > { %v9899_v0 = vmul.f32 %v1665_v51, %v9767_v32  ;;  %v1596_v34 = vadd.f32 %v9004_v56, %v1595_v49  ;;  %v9905_v37 = vadd.f32 1.0, %v9829_v24  ;;  %vm1538_vm8 = vweird.f32 %v9008_v33 }
 0x1cf   : > { %v2399_v43 = vpack.c.bf16 %v9896_v53, %v9896_v53  ;;  %v1585_v45 = vsel %vm1584_vm6, %v9002_v52, %v1581_v28  ;;  %v1521_v47 = vadd.f32 %v9006_v50, %v1520_v57  ;;  %vm1537_vm1 = vweird.f32 %v9832_v26 }
 0x1d0   : > { %v2400_v32 = vpack.c.bf16 %v9899_v0, %v9899_v0  ;;  %v1590_v12 = vsel %vm9867_vm14, %v1589_v55, %v1585_v45  ;;  %v1600_v58 = vsel %vm1599_vm0, %v9004_v56, %v1596_v34  ;;  %v1535_v56 = vmul.f32 %v9008_v33, %v1534_v31  ;;  %vm1539_vm9 = vmor %vm1537_vm1, %vm1538_vm8 }
 0x1d1   : > { %v2575_v24 = vunpack.c.l.b16 %v2399_v43  ;;  %v1605_v13 = vsel %vm9873_vm3, %v1604_v61, %v1600_v58  ;;  %v9923_v52 = vmul.f32 %v1590_v12, %v9770_v36  ;;  %v1525_v5 = vsel %vm1524_vm7, %v9006_v50, %v1521_v47 }
 0x1d2   : > { %v2576_v63 = vunpack.c.l.b16 %v2400_v32  ;;  %v9926_v22 = vmul.f32 %v1605_v13, %v9773_v14  ;;  %v1530_v55 = vsel %vm9879_vm4, %v1529_v2, %v1525_v5  ;;  %v9936_v61 = vadd.f32 1.0, %v9851_v41 }
 0x1d3   : > { %v2395_v19 = vpack.c.bf16 %v9923_v52, %v9923_v52  ;;  %v9933_v60 = vmul.f32 %v1530_v55, %v9776_v18  ;;  %9011 = vrcp.f32 %v9905_v37  ;;  %v1536_v50 = vadd.f32 %v9008_v33, %v1535_v56 }
 0x1d4   : > { %v2603_v36 = vpack.c.b16 %v2576_v63, %v2575_v24  ;;  %v2396_v14 = vpack.c.bf16 %v9926_v22, %v9926_v22  ;;  %v1325_v18 = vmul.f32 %v9747_v35, %v9549_v10  ;;  %9013 = vrcp.f32 %v9936_v61 }
 0x1d5   : > { %v2571_v2 = vunpack.c.l.b16 %v2395_v19  ;;  %v1540_v25 = vsel %vm1539_vm9, %v9008_v33, %v1536_v50  ;;  %v2391_v16 = vpack.c.bf16 %v9933_v60, %v9933_v60  ;;  %v7402_v29 = vmul.f32 -1.442695, %v9838_v27 }
 0x1d6   : > { %2623 = vrot.lane.b32.xlu2 %v2603_v36, %s9325_s24  ;;  %v2572_v41 = vunpack.c.l.b16 %v2396_v14  ;;  %v1545_v17 = vsel %vm1542_vm10, %v1544_v9, %v1540_v25  ;;  %v9955_v10 = vadd.f32 %v9751_v40, %v1325_v18  ;;  %v1676_v33 = vand.u32 2147483647, %v9905_v37 }
 0x1d7   : > { %v9952_v20 = vmul.f32 %v1545_v17, %v9779_v3  ;;  %v1678_v26 = vand.u32 2147483648, %v9905_v37  ;;  %v9961_v6 = vadd.f32 1.0, %v9860_v48  ;;  %v9963_v39 = vadd.f32 1.0, %v9010_v1 }
 0x1d8   : > { %v2601_v21 = vpack.c.b16 %v2572_v41, %v2571_v2  ;;  %v2567_v42 = vunpack.c.l.b16 %v2391_v16  ;;  %v1338_v4 = vmul.f32 %v9747_v35, %v9651_v23  ;;  %v1691_v49 = vand.u32 2147483647, %v9936_v61 }
 0x1d9   : > { %v9012_v38 = vpop.eup %9011  ;;  %v2392_v3 = vpack.c.bf16 %v9952_v20, %v9952_v20  ;;  %v1693_v62 = vand.u32 2147483648, %v9936_v61  ;;  %9015 = vrcp.f32 %v9961_v6  ;;  %v1339_v48 = vmul.f32 %v9747_v35, %v9659_v30 }
 0x1da   : > { %2619 = vrot.lane.b32.xlu1 %v2601_v21, %s9325_s24  ;;  %v1668_v46 = vmul.f32 %v9012_v38, %v9905_v37  ;;  %vm1672_vm11 = vweird.f32 %v9905_v37  ;;  %vm1687_vm12 = vweird.f32 %v9936_v61  ;;  %v9014_v57 = vpop.eup %9013  ;;  %vm1673_vm13 = vweird.f32 %v9012_v38 }
 0x1db   : > { %v2568_v51 = vunpack.c.l.b16 %v2392_v3  ;;  %vm9978_vm14 = vcmp.eq.f32.partialorder %v1676_v33, 8.507059e+37  ;;  %v1679_v23 = vor.u32 1.1754944e-38, %v1678_v26  ;;  %9017 = vrcp.f32 %v9963_v39  ;;  %vm1674_vm4 = vmor %vm1672_vm11, %vm1673_vm13 }
 0x1dc   : > { %v1669_v28 = vsub.f32 1.0, %v1668_v46  ;;  %v1683_v45 = vmul.f32 %v9014_v57, %v9936_v61  ;;  %v1616_v30 = vand.u32 2147483647, %v9961_v6  ;;  %vm9985_vm15 = vcmp.eq.f32.partialorder %v1691_v49, 8.507059e+37 }
 0x1dd   : > { %v2599_v31 = vpack.c.b16 %v2568_v51, %v2567_v42  ;;  %v1694_v32 = vor.u32 1.1754944e-38, %v1693_v62  ;;  %v1618_v12 = vand.u32 2147483648, %v9961_v6  ;;  %v1631_v58 = vand.u32 2147483647, %v9963_v39 }
 0x1de   : > { %v1670_v43 = vmul.f32 %v9012_v38, %v1669_v28  ;;  %v1684_v13 = vsub.f32 1.0, %v1683_v45  ;;  %vm1612_vm3 = vweird.f32 %v9961_v6  ;;  %9019 = vpow2.f32 %v7402_v29 }
 0x1df   : > { %2615 = vrot.lane.b32.xlu0 %v2599_v31, %s9325_s24  ;;  %v7403_v5 = vmul.f32 -1.442695, %v9955_v10  ;;  %v9016_v63 = vpop.eup %9015  ;;  %vm1688_vm5 = vweird.f32 %v9014_v57  ;;  %v1633_v55 = vand.u32 2147483648, %v9963_v39  ;;  %v9999_v56 = vadd.f32 %v9751_v40, %v1338_v4 }
 0x1e0   : > { %v1671_v24 = vadd.f32 %v9012_v38, %v1670_v43  ;;  %v10002_v19 = vadd.f32 %v9751_v40, %v1339_v48  ;;  %v1685_v14 = vmul.f32 %v9014_v57, %v1684_v13  ;;  %v1608_v50 = vmul.f32 %v9016_v63, %v9961_v6  ;;  %vm1689_vm2 = vmor %vm1687_vm12, %vm1688_vm5 }
 0x1e1   : > { %vm10005_vm6 = vcmp.eq.f32.partialorder %v1616_v30, 8.507059e+37  ;;  %vm1627_vm0 = vweird.f32 %v9963_v39  ;;  %v1336_v37 = vmul.f32 %v9747_v35, %v9635_v7  ;;  %v9018_v2 = vpop.eup %9017  ;;  %9021 = vpow2.f32 %v7403_v5 }
 0x1e2   : > { %v1675_v36 = vsel %vm1674_vm4, %v9012_v38, %v1671_v24  ;;  %v7416_v18 = vmul.f32 -1.442695, %v9999_v56  ;;  %v7417_v41 = vmul.f32 -1.442695, %v10002_v19  ;;  %v1686_v25 = vadd.f32 %v9014_v57, %v1685_v14 }
 0x1e3   : > { %v1680_v9 = vsel %vm9978_vm14, %v1679_v23, %v1675_v36  ;;  %v1609_v17 = vsub.f32 1.0, %v1608_v50  ;;  %v1623_v21 = vmul.f32 %v9018_v2, %v9963_v39  ;;  %vm1613_vm7 = vweird.f32 %v9016_v63 }
 0x1e4   : > { %v10017_v16 = vmul.f32 %v1680_v9, %v9789_v54  ;;  %v1619_v7 = vor.u32 1.1754944e-38, %v1618_v12  ;;  %9023 = vpow2.f32 %v7416_v18  ;;  %v10024_v29 = vadd.f32 %v9751_v40, %v1336_v37  ;;  %v9020_v38 = vpop.eup %9019  ;;  %vm1614_vm1 = vmor %vm1612_vm3, %vm1613_vm7 }
 0x1e5   : > { %v1690_v33 = vsel %vm1689_vm2, %v9014_v57, %v1686_v25  ;;  %v1610_v54 = vmul.f32 %v9016_v63, %v1609_v17  ;;  %v1624_v3 = vsub.f32 1.0, %v1623_v21  ;;  %v10030_v46 = vadd.f32 1.0, %v9020_v38 }
 0x1e6   : > { %v2401_v26 = vpack.c.bf16 %v10017_v16, %v10017_v16  ;;  %v1695_v42 = vsel %vm9985_vm15, %v1694_v32, %v1690_v33  ;;  %9025 = vpow2.f32 %v7417_v41  ;;  %v7414_v61 = vmul.f32 -1.442695, %v10024_v29 }
 0x1e7   : > { %v10034_v4 = vmul.f32 %v1695_v42, %v9797_v44  ;;  %v1611_v49 = vadd.f32 %v9016_v63, %v1610_v54  ;;  %v1625_v62 = vmul.f32 %v9018_v2, %v1624_v3  ;;  %vm1628_vm8 = vweird.f32 %v9018_v2  ;;  %v9022_v48 = vpop.eup %9021 }
 0x1e8   : > { %v2577_v51 = vunpack.c.l.b16 %v2401_v26  ;;  %vm10039_vm9 = vcmp.eq.f32.partialorder %v1631_v58, 8.507059e+37  ;;  %v1634_v57 = vor.u32 1.1754944e-38, %v1633_v55  ;;  %9027 = vrcp.f32 %v10030_v46  ;;  %vm1629_vm10 = vmor %vm1627_vm0, %vm1628_vm8 }
 0x1e9   : > { %v2402_v44 = vpack.c.bf16 %v10034_v4, %v10034_v4  ;;  %v1615_v34 = vsel %vm1614_vm1, %v9016_v63, %v1611_v49  ;;  %v1626_v23 = vadd.f32 %v9018_v2, %v1625_v62  ;;  %v10046_v31 = vadd.f32 1.0, %v9022_v48 }
 0x1ea   : > { %v9024_v43 = vpop.eup %9023  ;;  %v1620_v45 = vsel %vm10005_vm6, %v1619_v7, %v1615_v34  ;;  %v1556_v6 = vand.u32 2147483647, %v10030_v46  ;;  %v1337_v30 = vmul.f32 %v9747_v35, %v9643_v15  ;;  %9029 = vpow2.f32 %v7414_v61 }
 0x1eb   : > { %v2578_v47 = vunpack.c.l.b16 %v2402_v44  ;;  %v1630_v32 = vsel %vm1629_vm10, %v9018_v2, %v1626_v23  ;;  %v10056_v12 = vmul.f32 %v1620_v45, %v9801_v59  ;;  %9031 = vrcp.f32 %v10046_v31 }
 0x1ec   : > { %v9026_v58 = vpop.eup %9025  ;;  %v1635_v24 = vsel %vm10039_vm9, %v1634_v57, %v1630_v32  ;;  %v1558_v39 = vand.u32 2147483648, %v10030_v46  ;;  %v10063_v13 = vadd.f32 %v9751_v40, %v1337_v30  ;;  %v10070_v59 = vadd.f32 1.0, %v9024_v43  ;;  %v9109_v30 = vld [vmem:[%s9511_s23 + $0x60] sm:$0xff] }
 0x1ed   : > { %v2604_v5 = vpack.c.b16 %v2578_v47, %v2577_v51  ;;  %v10066_v15 = vmul.f32 %v1635_v24, %v9814_v8  ;;  %v2397_v63 = vpack.c.bf16 %v10056_v12, %v10056_v12  ;;  %vm1552_vm11 = vweird.f32 %v10030_v46 }
 0x1ee   : > { %v9028_v55 = vpop.eup %9027  ;;  %v10073_v36 = vadd.f32 1.0, %v9026_v58  ;;  %vm10079_vm12 = vcmp.eq.f32.partialorder %v1556_v6, 8.507059e+37  ;;  %v1559_v2 = vor.u32 1.1754944e-38, %v1558_v39  ;;  %v1571_v9 = vand.u32 2147483647, %v10046_v31  ;;  %v9110_v39 = vld [vmem:[%s9511_s23 + $0x68] sm:$0xff] }
 0x1ef   : > { %2625 = vrot.lane.b32.xlu2 %v2604_v5, %s9325_s24  ;;  %v2398_v14 = vpack.c.bf16 %v10066_v15, %v10066_v15  ;;  %v2573_v50 = vunpack.c.l.b16 %v2397_v63  ;;  %v1548_v1 = vmul.f32 %v9028_v55, %v10030_v46  ;;  %9033 = vrcp.f32 %v10070_v59 }
 0x1f0   : > { %v9030_v37 = vpop.eup %9029  ;;  %v7415_v18 = vmul.f32 -1.442695, %v10063_v13  ;;  %v1573_v21 = vand.u32 2147483648, %v10046_v31  ;;  %9035 = vrcp.f32 %v10073_v36  ;;  %vm1553_vm13 = vweird.f32 %v9028_v55 }
 0x1f1   : > { %v9032_v41 = vpop.eup %9031  ;;  %v2574_v25 = vunpack.c.l.b16 %v2398_v14  ;;  %v1549_v17 = vsub.f32 1.0, %v1548_v1  ;;  %vm1567_vm14 = vweird.f32 %v10046_v31  ;;  %v1768_v38 = vand.u32 2147483648, %v10070_v59  ;;  %vm1554_vm4 = vmor %vm1552_vm11, %vm1553_vm13 }
 0x1f2   : > { %v1563_v7 = vmul.f32 %v9032_v41, %v10046_v31  ;;  %v1766_v54 = vand.u32 2147483647, %v10070_v59  ;;  %v1783_v3 = vand.u32 2147483648, %v10073_v36  ;;  %v1781_v61 = vand.u32 2147483647, %v10073_v36 }
 0x1f3   : > { %v2602_v33 = vpack.c.b16 %v2574_v25, %v2573_v50  ;;  %v1550_v26 = vmul.f32 %v9028_v55, %v1549_v17  ;;  %9037 = vpow2.f32 %v7415_v18  ;;  %v10094_v49 = vadd.f32 1.0, %v9030_v37 }
 0x1f4   : > { %v1564_v42 = vsub.f32 1.0, %v1563_v7  ;;  %vm10097_vm15 = vcmp.eq.f32.partialorder %v1571_v9, 8.507059e+37  ;;  %v1574_v51 = vor.u32 1.1754944e-38, %v1573_v21  ;;  %vm1762_vm3 = vweird.f32 %v10070_v59 }
 0x1f5   : > { %2621 = vrot.lane.b32.xlu1 %v2602_v33, %s9325_s24  ;;  %v1551_v62 = vadd.f32 %v9028_v55, %v1550_v26  ;;  %v9034_v28 = vpop.eup %9033  ;;  %vm1568_vm5 = vweird.f32 %v9032_v41  ;;  %v1769_v44 = vor.u32 1.1754944e-38, %v1768_v38  ;;  %vm1777_vm6 = vweird.f32 %v10073_v36 }
 0x1f6   : > { %v1565_v57 = vmul.f32 %v9032_v41, %v1564_v42  ;;  %9039 = vrcp.f32 %v10094_v49  ;;  %v9036_v34 = vpop.eup %9035  ;;  %v1758_v43 = vmul.f32 %v9034_v28, %v10070_v59  ;;  %vm10108_vm0 = vcmp.eq.f32.partialorder %v1766_v54, 8.507059e+37  ;;  %vm1569_vm7 = vmor %vm1567_vm14, %vm1568_vm5 }
 0x1f7   : > { %v1555_v23 = vsel %vm1554_vm4, %v9028_v55, %v1551_v62  ;;  %v1784_v6 = vor.u32 1.1754944e-38, %v1783_v3  ;;  %v1334_v46 = vmul.f32 %v9109_v30, %v9747_v35  ;;  %v1773_v58 = vmul.f32 %v9036_v34, %v10073_v36 }
 0x1f8   : > { %v1560_v47 = vsel %vm10079_vm12, %v1559_v2, %v1555_v23  ;;  %v1566_v32 = vadd.f32 %v9032_v41, %v1565_v57  ;;  %vm10117_vm2 = vcmp.eq.f32.partialorder %v1781_v61, 8.507059e+37  ;;  %v1335_v5 = vmul.f32 %v9110_v39, %v9747_v35 }
 0x1f9   : > { %v10127_v63 = vmul.f32 %v1560_v47, %v9838_v27  ;;  %v1759_v55 = vsub.f32 1.0, %v1758_v43  ;;  %vm1763_vm8 = vweird.f32 %v9034_v28  ;;  %v1736_v14 = vand.u32 2147483647, %v10094_v49  ;;  %v9038_v50 = vpop.eup %9037 }
 0x1fa   : > { %v1570_v1 = vsel %vm1569_vm7, %v9032_v41, %v1566_v32  ;;  %v1774_v8 = vsub.f32 1.0, %v1773_v58  ;;  %v10131_v37 = vadd.f32 %v9751_v40, %v1334_v46  ;;  %v10134_v2 = vadd.f32 %v9751_v40, %v1335_v5  ;;  %vm1764_vm9 = vmor %vm1762_vm3, %vm1763_vm8  ;;  %v9112_v58 = vld [vmem:[%s9511_s23 + $0xa0] sm:$0xff] }
 0x1fb   : > { %v1575_v31 = vsel %vm10097_vm15, %v1574_v51, %v1570_v1  ;;  %v2393_v27 = vpack.c.bf16 %v10127_v63, %v10127_v63  ;;  %v1760_v9 = vmul.f32 %v9034_v28, %v1759_v55  ;;  %v10140_v18 = vadd.f32 1.0, %v9038_v50 }
 0x1fc   : > { %v9040_v25 = vpop.eup %9039  ;;  %v10143_v17 = vmul.f32 %v1575_v31, %v9955_v10  ;;  %v1775_v41 = vmul.f32 %v9036_v34, %v1774_v8  ;;  %vm1778_vm1 = vweird.f32 %v9036_v34  ;;  %v7412_v21 = vmul.f32 -1.442695, %v10131_v37 }
 0x1fd   : > { %v1761_v7 = vadd.f32 %v9034_v28, %v1760_v9  ;;  %v1728_v38 = vmul.f32 %v9040_v25, %v10094_v49  ;;  %v1738_v33 = vand.u32 2147483648, %v10094_v49  ;;  %v7413_v26 = vmul.f32 -1.442695, %v10134_v2  ;;  %vm1779_vm10 = vmor %vm1777_vm6, %vm1778_vm1 }
 0x1fe   : > { %v2394_v54 = vpack.c.bf16 %v10143_v17, %v10143_v17  ;;  %v2569_v3 = vunpack.c.l.b16 %v2393_v27  ;;  %v1776_v10 = vadd.f32 %v9036_v34, %v1775_v41  ;;  %9041 = vrcp.f32 %v10140_v18 }
 0x1ff   : > { %v1765_v42 = vsel %vm1764_vm9, %v9034_v28, %v1761_v7  ;;  %v1729_v61 = vsub.f32 1.0, %v1728_v38  ;;  %vm1732_vm11 = vweird.f32 %v10094_v49  ;;  %vm10158_vm12 = vcmp.eq.f32.partialorder %v1736_v14, 8.507059e+37  ;;  %v9113_v14 = vld [vmem:[%s9511_s23 + $0xa8] sm:$0xff] }
 0x200   : > { %v2570_v48 = vunpack.c.l.b16 %v2394_v54  ;;  %v1770_v51 = vsel %vm10108_vm0, %v1769_v44, %v1765_v42  ;;  %v1780_v59 = vsel %vm1779_vm10, %v9036_v34, %v1776_v10  ;;  %9043 = vpow2.f32 %v7412_v21 }
 0x201   : > { %v1785_v57 = vsel %vm10117_vm2, %v1784_v6, %v1780_v59  ;;  %v10167_v36 = vmul.f32 %v1770_v51, %v9999_v56  ;;  %v1730_v28 = vmul.f32 %v9040_v25, %v1729_v61  ;;  %vm1733_vm13 = vweird.f32 %v9040_v25 }
 0x202   : > { %v2600_v23 = vpack.c.b16 %v2570_v48, %v2569_v3  ;;  %v10170_v43 = vmul.f32 %v1785_v57, %v10002_v19  ;;  %v1739_v30 = vor.u32 1.1754944e-38, %v1738_v33  ;;  %9045 = vpow2.f32 %v7413_v26  ;;  %vm1734_vm14 = vmor %vm1732_vm11, %vm1733_vm13  ;;  %v9111_v19 = vld [vmem:[%s9511_s23 + $0xb0] sm:$0xff] }
 0x203   : > { %v2407_v44 = vpack.c.bf16 %v10167_v36, %v10167_v36  ;;  %v1731_v34 = vadd.f32 %v9040_v25, %v1730_v28  ;;  %v1751_v45 = vand.u32 2147483647, %v10140_v18  ;;  %v1753_v6 = vand.u32 2147483648, %v10140_v18  ;;  %v9114_v48 = vld [vmem:[%s9511_s23 + $0x90] sm:$0xff] }
 0x204   : > { %v9042_v56 = vpop.eup %9041  ;;  %2617 = vrot.lane.b32.xlu0 %v2600_v23, %s9325_s24  ;;  %v2408_v46 = vpack.c.bf16 %v10170_v43, %v10170_v43  ;;  %v1344_v47 = vmul.f32 %v9111_v19, %v9747_v35  ;;  %v1345_v32 = vmul.f32 %v9747_v35, %v9688_v11  ;;  %v1342_v24 = vmul.f32 %v9112_v58, %v9747_v35 }
 0x205   : > { %v2583_v39 = vunpack.c.l.b16 %v2407_v44  ;;  %v1735_v5 = vsel %vm1734_vm14, %v9040_v25, %v1731_v34  ;;  %v1743_v55 = vmul.f32 %v9042_v56, %v10140_v18  ;;  %v1343_v50 = vmul.f32 %v9113_v14, %v9747_v35 }
 0x206   : > { %v9044_v1 = vpop.eup %9043  ;;  %v2584_v8 = vunpack.c.l.b16 %v2408_v46  ;;  %v1740_v49 = vsel %vm10158_vm12, %v1739_v30, %v1735_v5  ;;  %v10193_v31 = vadd.f32 %v9751_v40, %v1344_v47  ;;  %v10196_v11 = vadd.f32 %v9751_v40, %v1345_v32  ;;  %v9115_v30 = vld [vmem:[%s9511_s23 + $0x98] sm:$0xff] }
 0x207   : > { %v1744_v27 = vsub.f32 1.0, %v1743_v55  ;;  %vm1748_vm15 = vweird.f32 %v9042_v56  ;;  %v10199_v9 = vmul.f32 %v1740_v49, %v10024_v29  ;;  %v10201_v25 = vadd.f32 1.0, %v9044_v1 }
 0x208   : > { %v9046_v41 = vpop.eup %9045  ;;  %v2607_v21 = vpack.c.b16 %v2584_v8, %v2583_v39  ;;  %v7422_v7 = vmul.f32 -1.442695, %v10193_v31  ;;  %v7423_v38 = vmul.f32 -1.442695, %v10196_v11  ;;  %v10206_v33 = vadd.f32 %v9751_v40, %v1342_v24 }
 0x209   : > { %v1745_v26 = vmul.f32 %v9042_v56, %v1744_v27  ;;  %v10208_v54 = vadd.f32 1.0, %v9046_v41  ;;  %9047 = vrcp.f32 %v10201_v25  ;;  %v10212_v29 = vadd.f32 %v9751_v40, %v1343_v50  ;;  %v9116_v27 = vld [vmem:[%s9511_s23 + $0xe0] sm:$0xff] }
 0x20a   : > { %2631 = vrot.lane.b32.xlu2 %v2607_v21, %s9325_s24  ;;  %vm1747_vm3 = vweird.f32 %v10140_v18  ;;  %9049 = vpow2.f32 %v7422_v7  ;;  %vm1752_vm4 = vcmp.eq.f32.partialorder %v1751_v45, 8.507059e+37  ;;  %v2405_v10 = vpack.c.bf16 %v10199_v9, %v10199_v9 }
 0x20b   : > { %v1746_v3 = vadd.f32 %v9042_v56, %v1745_v26  ;;  %9051 = vrcp.f32 %v10208_v54  ;;  %vm1749_vm5 = vmor %vm1747_vm3, %vm1748_vm15  ;;  %v1754_v42 = vor.u32 1.1754944e-38, %v1753_v6  ;;  %v1706_v61 = vand.u32 2147483647, %v10201_v25 }
 0x20c   : > { %v1708_v62 = vand.u32 2147483648, %v10201_v25  ;;  %v1340_v51 = vmul.f32 %v9114_v48, %v9747_v35  ;;  %9053 = vpow2.f32 %v7423_v38  ;;  %v7420_v59 = vmul.f32 -1.442695, %v10206_v33 }
 0x20d   : > { %v1750_v18 = vsel %vm1749_vm5, %v9042_v56, %v1746_v3  ;;  %v7421_v57 = vmul.f32 -1.442695, %v10212_v29  ;;  %vm1702_vm6 = vweird.f32 %v10201_v25  ;;  %v1721_v23 = vand.u32 2147483647, %v10208_v54 }
 0x20e   : > { %v1755_v28 = vsel %vm1752_vm4, %v1754_v42, %v1750_v18  ;;  %v1341_v44 = vmul.f32 %v9115_v30, %v9747_v35  ;;  %v2581_v6 = vunpack.c.l.b16 %v2405_v10  ;;  %9055 = vpow2.f32 %v7420_v59 }
 0x20f   : > { %v9048_v34 = vpop.eup %9047  ;;  %v10231_v45 = vmul.f32 %v1755_v28, %v10063_v13  ;;  %v10234_v56 = vadd.f32 %v9751_v40, %v1340_v51  ;;  %vm10237_vm0 = vcmp.eq.f32.partialorder %v1706_v61, 8.507059e+37  ;;  %vm1717_vm2 = vweird.f32 %v10208_v54 }
 0x210   : > { %v9050_v46 = vpop.eup %9049  ;;  %v1698_v19 = vmul.f32 %v9048_v34, %v10201_v25  ;;  %9057 = vpow2.f32 %v7421_v57  ;;  %v10243_v32 = vadd.f32 %v9751_v40, %v1341_v44  ;;  %v1709_v24 = vor.u32 1.1754944e-38, %v1708_v62  ;;  %v9117_v57 = vld [vmem:[%s9511_s23 + $0xe8] sm:$0xff] }
 0x211   : > { %v9052_v13 = vpop.eup %9051  ;;  %v2406_v58 = vpack.c.bf16 %v10231_v45, %v10231_v45  ;;  %v10247_v39 = vadd.f32 1.0, %v9050_v46  ;;  %v7418_v5 = vmul.f32 -1.442695, %v10234_v56  ;;  %vm10251_vm7 = vcmp.eq.f32.partialorder %v1721_v23, 8.507059e+37 }
 0x212   : > { %v1699_v55 = vsub.f32 1.0, %v1698_v19  ;;  %v1713_v14 = vmul.f32 %v9052_v13, %v10208_v54  ;;  %v1723_v1 = vand.u32 2147483648, %v10208_v54  ;;  %v9054_v8 = vpop.eup %9053  ;;  %vm1703_vm8 = vweird.f32 %v9048_v34 }
 0x213   : > { %v2582_v49 = vunpack.c.l.b16 %v2406_v58  ;;  %9059 = vrcp.f32 %v10247_v39  ;;  %v1350_v41 = vmul.f32 %v9116_v27, %v9747_v35  ;;  %v10259_v38 = vadd.f32 1.0, %v9054_v8  ;;  %vm1704_vm9 = vmor %vm1702_vm6, %vm1703_vm8 }
 0x214   : > { %v1700_v21 = vmul.f32 %v9048_v34, %v1699_v55  ;;  %v1714_v7 = vsub.f32 1.0, %v1713_v14  ;;  %v7419_v26 = vmul.f32 -1.442695, %v10243_v32  ;;  %v9056_v3 = vpop.eup %9055  ;;  %vm1718_vm1 = vweird.f32 %v9052_v13 }
 0x215   : > { %v2606_v10 = vpack.c.b16 %v2582_v49, %v2581_v6  ;;  %v1856_v42 = vand.u32 2147483647, %v10247_v39  ;;  %9061 = vpow2.f32 %v7418_v5  ;;  %v1858_v51 = vand.u32 2147483648, %v10247_v39  ;;  %vm1719_vm11 = vmor %vm1717_vm2, %vm1718_vm1 }
 0x216   : > { %v9058_v61 = vpop.eup %9057  ;;  %v1701_v62 = vadd.f32 %v9048_v34, %v1700_v21  ;;  %v1715_v48 = vmul.f32 %v9052_v13, %v1714_v7  ;;  %9063 = vrcp.f32 %v10259_v38  ;;  %v1724_v18 = vor.u32 1.1754944e-38, %v1723_v1 }
 0x217   : > { %2629 = vrot.lane.b32.xlu1 %v2606_v10, %s9325_s24  ;;  %v10269_v59 = vadd.f32 1.0, %v9056_v3  ;;  %v10273_v28 = vmul.f32 %v9117_v57, %v9747_v35  ;;  %v10276_v23 = vadd.f32 %v9751_v40, %v1350_v41  ;;  %vm1852_vm10 = vweird.f32 %v10247_v39 }
 0x218   : > { %v1705_v30 = vsel %vm1704_vm9, %v9048_v34, %v1701_v62  ;;  %v1716_v44 = vadd.f32 %v9052_v13, %v1715_v48  ;;  %v10279_v6 = vadd.f32 1.0, %v9058_v61  ;;  %9065 = vpow2.f32 %v7419_v26 }
 0x219   : > { %v9060_v46 = vpop.eup %9059  ;;  %v1710_v25 = vsel %vm10237_vm0, %v1709_v24, %v1705_v30  ;;  %v1871_v19 = vand.u32 2147483647, %v10259_v38  ;;  %v1873_v58 = vand.u32 2147483648, %v10259_v38  ;;  %9067 = vrcp.f32 %v10269_v59 }
 0x21a   : > { %v1720_v34 = vsel %vm1719_vm11, %v9052_v13, %v1716_v44  ;;  %v10290_v5 = vmul.f32 %v1710_v25, %v10131_v37  ;;  %v1848_v55 = vmul.f32 %v9060_v46, %v10247_v39  ;;  %vm10293_vm12 = vcmp.eq.f32.partialorder %v1856_v42, 8.507059e+37 }
 0x21b   : > { %v1859_v47 = vor.u32 1.1754944e-38, %v1858_v51  ;;  %v9062_v24 = vpop.eup %9061  ;;  %v1725_v54 = vsel %vm10251_vm7, %v1724_v18, %v1720_v34  ;;  %vm1867_vm13 = vweird.f32 %v10259_v38  ;;  %v1826_v1 = vand.u32 2147483647, %v10269_v59 }
 0x21c   : > { %v1828_v13 = vand.u32 2147483648, %v10269_v59  ;;  %v9064_v8 = vpop.eup %9063  ;;  %v10303_v37 = vmul.f32 %v1725_v54, %v10134_v2  ;;  %v2403_v49 = vpack.c.bf16 %v10290_v5, %v10290_v5  ;;  %v1849_v27 = vsub.f32 1.0, %v1848_v55 }
 0x21d   : > { %9069 = vrcp.f32 %v10279_v6  ;;  %vm1853_vm14 = vweird.f32 %v9060_v46  ;;  %v1863_v50 = vmul.f32 %v9064_v8, %v10259_v38  ;;  %vm10309_vm15 = vcmp.eq.f32.partialorder %v1871_v19, 8.507059e+37 }
 0x21e   : > { %v1874_v21 = vor.u32 1.1754944e-38, %v1873_v58  ;;  %v9066_v7 = vpop.eup %9065  ;;  %v2404_v26 = vpack.c.bf16 %v10303_v37, %v10303_v37  ;;  %v2579_v2 = vunpack.c.l.b16 %v2403_v49  ;;  %v1850_v3 = vmul.f32 %v9060_v46, %v1849_v27  ;;  %vm1854_vm6 = vmor %vm1852_vm10, %vm1853_vm14 }
 0x21f   : > { %vm1822_vm3 = vweird.f32 %v10269_v59  ;;  %v9068_v10 = vpop.eup %9067  ;;  %v1864_v42 = vsub.f32 1.0, %v1863_v50  ;;  %vm1868_vm4 = vweird.f32 %v9064_v8  ;;  %v1829_v61 = vor.u32 1.1754944e-38, %v1828_v13 }
 0x220   : > { %v10316_v62 = vadd.f32 1.0, %v9062_v24  ;;  %v2580_v48 = vunpack.c.l.b16 %v2404_v26  ;;  %v1851_v51 = vadd.f32 %v9060_v46, %v1850_v3  ;;  %v1818_v18 = vmul.f32 %v9068_v10, %v10269_v59  ;;  %vm1869_vm7 = vmor %vm1867_vm13, %vm1868_vm4 }
 0x221   : > { %vm10319_vm5 = vcmp.eq.f32.partialorder %v1826_v1, 8.507059e+37  ;;  %v1841_v30 = vand.u32 2147483647, %v10279_v6  ;;  %v1865_v44 = vmul.f32 %v9064_v8, %v1864_v42  ;;  %vm1837_vm0 = vweird.f32 %v10279_v6 }
 0x222   : > { %v1843_v25 = vand.u32 2147483648, %v10279_v6  ;;  %v10329_v19 = vadd.f32 1.0, %v9066_v7  ;;  %v2605_v34 = vpack.c.b16 %v2580_v48, %v2579_v2  ;;  %v1855_v55 = vsel %vm1854_vm6, %v9060_v46, %v1851_v51 }
 0x223   : > { %v9070_v58 = vpop.eup %9069  ;;  %v1819_v24 = vsub.f32 1.0, %v1818_v18  ;;  %9071 = vrcp.f32 %v10316_v62  ;;  %v1860_v54 = vsel %vm10293_vm12, %v1859_v47, %v1855_v55  ;;  %v1866_v1 = vadd.f32 %v9064_v8, %v1865_v44 }
 0x224   : > { %vm1823_vm2 = vweird.f32 %v9068_v10  ;;  %v1833_v39 = vmul.f32 %v9070_v58, %v10279_v6  ;;  %2627 = vrot.lane.b32.xlu0 %v2605_v34, %s9325_s24  ;;  %v10340_v13 = vmul.f32 %v1860_v54, %v10193_v31  ;;  %vm10342_vm8 = vcmp.eq.f32.partialorder %v1841_v30, 8.507059e+37 }
 0x225   : > { %v1820_v46 = vmul.f32 %v9068_v10, %v1819_v24  ;;  %v1796_v14 = vand.u32 2147483647, %v10316_v62  ;;  %v1870_v47 = vsel %vm1869_vm7, %v9064_v8, %v1866_v1  ;;  %v1798_v50 = vand.u32 2147483648, %v10316_v62  ;;  %vm1824_vm1 = vmor %vm1822_vm3, %vm1823_vm2 }
 0x226   : > { %v1834_v27 = vsub.f32 1.0, %v1833_v39  ;;  %9073 = vrcp.f32 %v10329_v19  ;;  %v1875_v38 = vsel %vm10309_vm15, %v1874_v21, %v1870_v47  ;;  %v2413_v31 = vpack.c.bf16 %v10340_v13, %v10340_v13  ;;  %v9118_v47 = vld [vmem:[%s9511_s23 + $0xd0] sm:$0xff] }
 0x227   : > { %v1821_v7 = vadd.f32 %v9068_v10, %v1820_v46  ;;  %v1844_v26 = vor.u32 1.1754944e-38, %v1843_v25  ;;  %v10354_v2 = vmul.f32 %v1875_v38, %v10196_v11  ;;  %vm1838_vm9 = vweird.f32 %v9070_v58 }
 0x228   : > { %v1835_v8 = vmul.f32 %v9070_v58, %v1834_v27  ;;  %vm1792_vm10 = vweird.f32 %v10316_v62  ;;  %v2589_v42 = vunpack.c.l.b16 %v2413_v31  ;;  %v1799_v21 = vor.u32 1.1754944e-38, %v1798_v50  ;;  %vm1839_vm12 = vmor %vm1837_vm0, %vm1838_vm9 }
 0x229   : > { %v9072_v3 = vpop.eup %9071  ;;  %v1825_v41 = vsel %vm1824_vm1, %v9068_v10, %v1821_v7  ;;  %v1813_v48 = vand.u32 2147483648, %v10329_v19  ;;  %v2414_v51 = vpack.c.bf16 %v10354_v2, %v10354_v2  ;;  %vm10366_vm11 = vcmp.eq.f32.partialorder %v1796_v14, 8.507059e+37 }
 0x22a   : > { %v1830_v11 = vsel %vm10319_vm5, %v1829_v61, %v1825_v41  ;;  %v1836_v18 = vadd.f32 %v9070_v58, %v1835_v8  ;;  %v1788_v59 = vmul.f32 %v9072_v3, %v10316_v62  ;;  %vm1793_vm13 = vweird.f32 %v9072_v3  ;;  %v9120_v8 = vld [vmem:[%s9511_s23 + $0xc0] sm:$0xff] }
 0x22b   : > { %v10373_v10 = vmul.f32 %v1830_v11, %v10206_v33  ;;  %vm1807_vm14 = vweird.f32 %v10329_v19  ;;  %v1811_v44 = vand.u32 2147483647, %v10329_v19  ;;  %v1814_v57 = vor.u32 1.1754944e-38, %v1813_v48  ;;  %vm1794_vm3 = vmor %vm1792_vm10, %vm1793_vm13  ;;  %v9121_v11 = vld [vmem:[%s9511_s23 + $0xc8] sm:$0xff] }
 0x22c   : > { %v9074_v61 = vpop.eup %9073  ;;  %v2590_v25 = vunpack.c.l.b16 %v2414_v51  ;;  %v1840_v34 = vsel %vm1839_vm12, %v9070_v58, %v1836_v18  ;;  %v1789_v55 = vsub.f32 1.0, %v1788_v59  ;;  %v10379_v24 = vadd.f32 %v9751_v40, %v10273_v28 }
 0x22d   : > { %13680 = vst [vmem:[#allocation18_spill] sm:$0xff] %v10373_v10  ;;  %v1845_v6 = vsel %vm10342_vm8, %v1844_v26, %v1840_v34  ;;  %v2411_v33 = vpack.c.bf16 %v10373_v10, %v10373_v10  ;;  %v1803_v54 = vmul.f32 %v9074_v61, %v10329_v19  ;;  %vm1808_vm15 = vweird.f32 %v9074_v61 }
 0x22e   : > { %v2610_v1 = vpack.c.b16 %v2590_v25, %v2589_v42  ;;  %v10387_v39 = vmul.f32 %v1845_v6, %v10212_v29  ;;  %v1790_v58 = vmul.f32 %v9072_v3, %v1789_v55  ;;  %v7428_v46 = vmul.f32 -1.442695, %v10276_v23  ;;  %v9119_v29 = vld [vmem:[%s9511_s23 + $0xd8] sm:$0xff]  ;;  %vm1809_vm4 = vmor %vm1807_vm14, %vm1808_vm15 }
 0x22f   : > { %v2587_v28 = vunpack.c.l.b16 %v2411_v33  ;;  %v1804_v14 = vsub.f32 1.0, %v1803_v54  ;;  %v7429_v49 = vmul.f32 -1.442695, %v10379_v24  ;;  %v1348_v27 = vmul.f32 %v9118_v47, %v9747_v35  ;;  %v9123_v47 = vld [vmem:[%s9511_s23 + $0xf8] sm:$0xff] }
 0x230   : > { %2637 = vrot.lane.b32.xlu2 %v2610_v1, %s9325_s24  ;;  %v2412_v50 = vpack.c.bf16 %v10387_v39, %v10387_v39  ;;  %v1791_v38 = vadd.f32 %v9072_v3, %v1790_v58  ;;  %9075 = vpow2.f32 %v7428_v46  ;;  %v1349_v31 = vmul.f32 %v9119_v29, %v9747_v35 }
 0x231   : > { %v1805_v7 = vmul.f32 %v9074_v61, %v1804_v14  ;;  %9077 = vpow2.f32 %v7429_v49  ;;  %v10402_v26 = vadd.f32 %v9751_v40, %v1348_v27  ;;  %v1346_v42 = vmul.f32 %v9120_v8, %v9747_v35 }
 0x232   : > { %v2588_v41 = vunpack.c.l.b16 %v2412_v50  ;;  %v1795_v48 = vsel %vm1794_vm3, %v9072_v3, %v1791_v38  ;;  %v10407_v51 = vadd.f32 %v9751_v40, %v1349_v31  ;;  %v1347_v18 = vmul.f32 %v9121_v11, %v9747_v35 }
 0x233   : > { %v1800_v62 = vsel %vm10366_vm11, %v1799_v21, %v1795_v48  ;;  %v1806_v59 = vadd.f32 %v9074_v61, %v1805_v7  ;;  %v7426_v25 = vmul.f32 -1.442695, %v10402_v26  ;;  %v10415_v34 = vadd.f32 %v9751_v40, %v1346_v42 }
 0x234   : > { %v2609_v55 = vpack.c.b16 %v2588_v41, %v2587_v28  ;;  %v10421_v3 = vmul.f32 %v1800_v62, %v10234_v56  ;;  %v7427_v6 = vmul.f32 -1.442695, %v10407_v51  ;;  %v10425_v33 = vadd.f32 %v9751_v40, %v1347_v18  ;;  %v9122_v28 = vld [vmem:[%s9511_s23 + $0xf0] sm:$0xff] }
 0x235   : > { %v1810_v21 = vsel %vm1809_vm4, %v9074_v61, %v1806_v59  ;;  %vm1812_vm5 = vcmp.eq.f32.partialorder %v1811_v44, 8.507059e+37  ;;  %9079 = vpow2.f32 %v7426_v25  ;;  %v7424_v30 = vmul.f32 -1.442695, %v10415_v34 }
 0x236   : > { %v9076_v54 = vpop.eup %9075  ;;  %2635 = vrot.lane.b32.xlu1 %v2609_v55, %s9325_s24  ;;  %v1815_v19 = vsel %vm1812_vm5, %v1814_v57, %v1810_v21  ;;  %v2409_v56 = vpack.c.bf16 %v10421_v3, %v10421_v3  ;;  %9081 = vpow2.f32 %v7427_v6  ;;  %v7425_v1 = vmul.f32 -1.442695, %v10425_v33 }
 0x237   : > { %v9078_v58 = vpop.eup %9077  ;;  %v10433_v46 = vmul.f32 %v1815_v19, %v10243_v32  ;;  %v10435_v61 = vadd.f32 1.0, %v9076_v54  ;;  %9083 = vpow2.f32 %v7424_v30  ;;  %v1352_v14 = vmul.f32 %v9122_v28, %v9747_v35 }
 0x238   : > { %v10437_v44 = vadd.f32 1.0, %v9078_v58  ;;  %9085 = vpow2.f32 %v7425_v1  ;;  %v2585_v49 = vunpack.c.l.b16 %v2409_v56  ;;  %v1353_v27 = vmul.f32 %v9123_v47, %v9747_v35 }
 0x239   : > { %v2410_v57 = vpack.c.bf16 %v10433_v46, %v10433_v46  ;;  %9087 = vrcp.f32 %v10435_v61  ;;  %v10449_v50 = vadd.f32 %v9751_v40, %v1352_v14  ;;  %v1946_v41 = vand.u32 2147483647, %v10435_v61 }
 0x23a   : > { %9089 = vrcp.f32 %v10437_v44  ;;  %v10454_v8 = vadd.f32 %v9751_v40, %v1353_v27  ;;  %v1948_v35 = vand.u32 2147483648, %v10435_v61  ;;  %v1963_v48 = vand.u32 2147483648, %v10437_v44 }
 0x23b   : > { %v9080_v38 = vpop.eup %9079  ;;  %v2586_v7 = vunpack.c.l.b16 %v2410_v57  ;;  %v1961_v25 = vand.u32 2147483647, %v10437_v44  ;;  %v7430_v30 = vmul.f32 -1.442695, %v10449_v50  ;;  %vm1942_vm6 = vweird.f32 %v10435_v61 }
 0x23c   : > { %v9082_v42 = vpop.eup %9081  ;;  %v10459_v11 = vadd.f32 1.0, %v9080_v38  ;;  %vm1957_vm0 = vweird.f32 %v10437_v44  ;;  %v7431_v19 = vmul.f32 -1.442695, %v10454_v8  ;;  %vm10475_vm2 = vcmp.eq.f32.partialorder %v1946_v41, 8.507059e+37 }
 0x23d   : > { %v9084_v18 = vpop.eup %9083  ;;  %v2608_v59 = vpack.c.b16 %v2586_v7, %v2585_v49  ;;  %v10463_v55 = vadd.f32 1.0, %v9082_v42  ;;  %v1949_v28 = vor.u32 1.1754944e-38, %v1948_v35  ;;  %v1964_v14 = vor.u32 1.1754944e-38, %v1963_v48 }
 0x23e   : > { %v9086_v6 = vpop.eup %9085  ;;  %9091 = vrcp.f32 %v10459_v11  ;;  %vm10480_vm7 = vcmp.eq.f32.partialorder %v1961_v25, 8.507059e+37  ;;  %v1916_v47 = vand.u32 2147483647, %v10459_v11  ;;  %v1918_v27 = vand.u32 2147483648, %v10459_v11 }
 0x23f   : > { %v9088_v54 = vpop.eup %9087  ;;  %2633 = vrot.lane.b32.xlu0 %v2608_v59, %s9325_s24  ;;  %9093 = vrcp.f32 %v10463_v55  ;;  %v1931_v38 = vand.u32 2147483647, %v10463_v55  ;;  %v1933_v42 = vand.u32 2147483648, %v10463_v55  ;;  %v10488_v41 = vadd.f32 1.0, %v9084_v18 }
 0x240   : > { %v9090_v56 = vpop.eup %9089  ;;  %v1938_v1 = vmul.f32 %v9088_v54, %v10435_v61  ;;  %9095 = vpow2.f32 %v7430_v30  ;;  %vm1912_vm8 = vweird.f32 %v10459_v11  ;;  %v10491_v48 = vadd.f32 1.0, %v9086_v6 }
 0x241   : > { %v1953_v57 = vmul.f32 %v9090_v56, %v10437_v44  ;;  %9097 = vpow2.f32 %v7431_v19  ;;  %vm1943_vm1 = vweird.f32 %v9088_v54  ;;  %vm1927_vm9 = vweird.f32 %v10463_v55 }
 0x242   : > { %v1939_v7 = vsub.f32 1.0, %v1938_v1  ;;  %9099 = vrcp.f32 %v10488_v41  ;;  %vm1958_vm10 = vweird.f32 %v9090_v56  ;;  %vm10496_vm11 = vcmp.eq.f32.partialorder %v1916_v47, 8.507059e+37  ;;  %vm1944_vm13 = vmor %vm1942_vm6, %vm1943_vm1 }
 0x243   : > { %v1954_v35 = vsub.f32 1.0, %v1953_v57  ;;  %v1919_v57 = vor.u32 1.1754944e-38, %v1918_v27  ;;  %vm10501_vm12 = vcmp.eq.f32.partialorder %v1931_v38, 8.507059e+37  ;;  %v1934_v40 = vor.u32 1.1754944e-38, %v1933_v42  ;;  %vm1959_vm14 = vmor %vm1957_vm0, %vm1958_vm10 }
 0x244   : > { %v9092_v59 = vpop.eup %9091  ;;  %v1940_v25 = vmul.f32 %v9088_v54, %v1939_v7  ;;  %v1888_v31 = vand.u32 2147483648, %v10488_v41  ;;  %v1886_v47 = vand.u32 2147483647, %v10488_v41  ;;  %9101 = vrcp.f32 %v10491_v48 }
 0x245   : > { %v9094_v21 = vpop.eup %9093  ;;  %v1955_v1 = vmul.f32 %v9090_v56, %v1954_v35  ;;  %v1908_v18 = vmul.f32 %v9092_v59, %v10459_v11  ;;  %vm1913_vm15 = vweird.f32 %v9092_v59  ;;  %vm1882_vm4 = vweird.f32 %v10488_v41 }
 0x246   : > { %v1941_v6 = vadd.f32 %v9088_v54, %v1940_v25  ;;  %v1923_v19 = vmul.f32 %v9094_v21, %v10463_v55  ;;  %v9096_v27 = vpop.eup %9095  ;;  %vm1928_vm3 = vweird.f32 %v9094_v21  ;;  %v1889_v10 = vor.u32 1.1754944e-38, %v1888_v31  ;;  %vm1914_vm6 = vmor %vm1912_vm8, %vm1913_vm15  ;;  %v8650_v31 = vld [vmem:[#allocation6 + $0x38] sm:$0xff] }
 0x247   : > { %v1956_v35 = vadd.f32 %v9090_v56, %v1955_v1  ;;  %v1909_v62 = vsub.f32 1.0, %v1908_v18  ;;  %v9098_v32 = vpop.eup %9097  ;;  %vm10525_vm5 = vcmp.eq.f32.partialorder %v1886_v47, 8.507059e+37  ;;  %3515 = vmatpush.bf16.msrb.mxu1 %v8650_v31  ;;  %v1903_v7 = vand.u32 2147483648, %v10491_v48 }
 0x248   : > { %v1945_v25 = vsel %vm1944_vm13, %v9088_v54, %v1941_v6  ;;  %v1924_v38 = vsub.f32 1.0, %v1923_v19  ;;  %v9100_v18 = vpop.eup %9099  ;;  %v10542_v47 = vadd.f32 1.0, %v9098_v32 }
 0x249   : > { %v1950_v61 = vsel %vm10475_vm2, %v1949_v28, %v1945_v25  ;;  %v1960_v29 = vsel %vm1959_vm14, %v9090_v56, %v1956_v35  ;;  %v1910_v1 = vmul.f32 %v9092_v59, %v1909_v62  ;;  %v1878_v58 = vmul.f32 %v9100_v18, %v10488_v41  ;;  %vm1929_vm2 = vmor %vm1927_vm9, %vm1928_vm3 }
 0x24a   : > { %v1965_v54 = vsel %vm10480_vm7, %v1964_v14, %v1960_v29  ;;  %v10519_v6 = vmul.f32 %v1950_v61, %v10276_v23  ;;  %v1925_v44 = vmul.f32 %v9094_v21, %v1924_v38  ;;  %v1901_v56 = vand.u32 2147483647, %v10491_v48  ;;  %v9102_v28 = vpop.eup %9101  ;;  %v8649_v61 = vld [vmem:[#allocation6 + $0x30] sm:$0xff] }
 0x24b   : > { %v10522_v19 = vmul.f32 %v1965_v54, %v10379_v24  ;;  %v1911_v42 = vadd.f32 %v9092_v59, %v1910_v1  ;;  %vm1883_vm0 = vweird.f32 %v9100_v18  ;;  %v10535_v24 = vadd.f32 1.0, %v9096_v27  ;;  %3516 = vmatpush.bf16.msrb.mxu1 %v8649_v61  ;;  %v8664_v61 = vld [vmem:[#allocation6 + $0x98] sm:$0xff] }
 0x24c   : > { %v2419_v29 = vpack.c.bf16 %v10519_v6, %v10519_v6  ;;  %v1926_v23 = vadd.f32 %v9094_v21, %v1925_v44  ;;  %v1879_v35 = vsub.f32 1.0, %v1878_v58  ;;  %v1893_v27 = vmul.f32 %v9102_v28, %v10491_v48  ;;  %vm1884_vm8 = vmor %vm1882_vm4, %vm1883_vm0  ;;  %v8648_v44 = vld [vmem:[#allocation6 + $0x28] sm:$0xff]  ;;  %3253 = vmatpush.bf16.msra.mxu2 %v8664_v61 }
 0x24d   : > { %v2420_v14 = vpack.c.bf16 %v10522_v19, %v10522_v19  ;;  %v1915_v49 = vsel %vm1914_vm6, %v9092_v59, %v1911_v42  ;;  %vm1897_vm7 = vweird.f32 %v10491_v48  ;;  %9103 = vrcp.f32 %v10535_v24  ;;  %v8647_v48 = vld [vmem:[#allocation6 + $0x20] sm:$0xff] }
 0x24e   : > { %v2595_v25 = vunpack.c.l.b16 %v2419_v29  ;;  %v1920_v11 = vsel %vm10496_vm11, %v1919_v57, %v1915_v49  ;;  %v1930_v38 = vsel %vm1929_vm2, %v9094_v21, %v1926_v23  ;;  %v1880_v55 = vmul.f32 %v9100_v18, %v1879_v35 }
 0x24f   : > { %v2596_v1 = vunpack.c.l.b16 %v2420_v14  ;;  %v1935_v59 = vsel %vm10501_vm12, %v1934_v40, %v1930_v38  ;;  %v10550_v42 = vmul.f32 %v1920_v11, %v10402_v26  ;;  %v1894_v54 = vsub.f32 1.0, %v1893_v27  ;;  %3517 = vmatpush.bf16.msrb.mxu1 %v8648_v44 }
 0x250   : > { %v10553_v32 = vmul.f32 %v1935_v59, %v10407_v51  ;;  %v1881_v57 = vadd.f32 %v9100_v18, %v1880_v55  ;;  %vm1898_vm1 = vweird.f32 %v9102_v28  ;;  %vm10565_vm9 = vcmp.eq.f32.partialorder %v1901_v56, 8.507059e+37 }
 0x251   : > { %v2613_v21 = vpack.c.b16 %v2596_v1, %v2595_v25  ;;  %v2417_v30 = vpack.c.bf16 %v10550_v42, %v10550_v42  ;;  %v1895_v51 = vmul.f32 %v9102_v28, %v1894_v54  ;;  %v1976_v23 = vand.u32 2147483647, %v10535_v24  ;;  %vm1899_vm10 = vmor %vm1897_vm7, %vm1898_vm1  ;;  %v8654_v1 = vld [vmem:[#allocation6 + $0x58] sm:$0xff] }
 0x252   : > { %v2418_v26 = vpack.c.bf16 %v10553_v32, %v10553_v32  ;;  %v1885_v29 = vsel %vm1884_vm8, %v9100_v18, %v1881_v57  ;;  %9105 = vrcp.f32 %v10542_v47  ;;  %v1978_v56 = vand.u32 2147483648, %v10535_v24  ;;  %3608 = vmatpush.bf16.msrb.mxu0 %v8654_v1 }
 0x253   : > { %2643 = vrot.lane.b32.xlu2 %v2613_v21, %s9325_s24  ;;  %v2593_v58 = vunpack.c.l.b16 %v2417_v30  ;;  %v1890_v41 = vsel %vm10525_vm5, %v1889_v10, %v1885_v29  ;;  %v1896_v14 = vadd.f32 %v9102_v28, %v1895_v51  ;;  %v1904_v49 = vor.u32 1.1754944e-38, %v1903_v7  ;;  %v10582_v25 = vpop.eup %9103  ;;  %v8663_v7 = vld [vmem:[#allocation6 + $0x90] sm:$0xff]  ;;  %3518 = vmatpush.bf16.msrb.mxu1 %v8647_v48 }
 0x254   : > { %v2594_v31 = vunpack.c.l.b16 %v2418_v26  ;;  %v10578_v35 = vmul.f32 %v1890_v41, %v10415_v34  ;;  %vm1972_vm11 = vweird.f32 %v10535_v24  ;;  %v1993_v18 = vand.u32 2147483648, %v10542_v47  ;;  %3254 = vmatpush.bf16.msra.mxu2 %v8663_v7  ;;  %v8645_v7 = vld [vmem:[#allocation6 + $0x10] sm:$0xff] }
 0x255   : > { %v1900_v38 = vsel %vm1899_vm10, %v9102_v28, %v1896_v14  ;;  %v1991_v10 = vand.u32 2147483647, %v10542_v47  ;;  %v13693_v62 = vlaneseq  ;;  %v1968_v55 = vmul.f32 %v10582_v25, %v10535_v24  ;;  %v8646_v14 = vld [vmem:[#allocation6 + $0x18] sm:$0xff] }
 0x256   : > { %v2612_v11 = vpack.c.b16 %v2594_v31, %v2593_v58  ;;  %v1905_v34 = vsel %vm10565_vm9, %v1904_v49, %v1900_v38  ;;  %v2415_v59 = vpack.c.bf16 %v10578_v35, %v10578_v35  ;;  %vm10594_vm12 = vcmp.eq.f32.partialorder %v1976_v23, 8.507059e+37 }
 0x257   : > { %v10586_v27 = vshrl.u32 %v13693_v62, 7  ;;  %v10600_v54 = vmul.f32 %v1905_v34, %v10425_v33  ;;  %v1979_v21 = vor.u32 1.1754944e-38, %v1978_v56  ;;  %vm1987_vm13 = vweird.f32 %v10542_v47  ;;  %v8653_v33 = vld [vmem:[#allocation6 + $0x50] sm:$0xff]  ;;  %3519 = vmatpush.bf16.msrb.mxu1 %v8646_v14  ;;  %v8651_v34 = vld [vmem:[#allocation6 + $0x40] sm:$0xff] }
 0x258   : > { %2641 = vrot.lane.b32.xlu1 %v2612_v11, %s9325_s24  ;;  %v2199_v57 = vrot.slane %v9899_v0, 1  ;;  %v10605_v26 = vpop.eup %9105  ;;  %v1969_v51 = vsub.f32 1.0, %v1968_v55  ;;  %vm1973_vm14 = vweird.f32 %v10582_v25  ;;  %v1994_v40 = vor.u32 1.1754944e-38, %v1993_v18  ;;  %3609 = vmatpush.bf16.msrb.mxu0 %v8653_v33 }
 0x259   : > { %13694 = vst [vmem:[#allocation19_spill] sm:$0xff] %v10586_v27  ;;  %v590_v30 = vadd.s32 64, %v10586_v27  ;;  %v591_v44 = vadd.s32 72, %v10586_v27  ;;  %v2416_v58 = vpack.c.bf16 %v10600_v54, %v10600_v54  ;;  %v2591_v29 = vunpack.c.l.b16 %v2415_v59  ;;  %vm10639_vm2 = vmor %vm1972_vm11, %vm1973_vm14 }
 0x25a   : > { %v1983_v23 = vmul.f32 %v10605_v26, %v10542_v47  ;;  %vm10613_vm15 = vcmp.eq.f32.partialorder %v1991_v10, 8.507059e+37  ;;  %v1970_v56 = vmul.f32 %v10582_v25, %v1969_v51  ;;  %v2200_v18 = vrot.slane %v10017_v16, 1  ;;  %v8662_v51 = vld [vmem:[#allocation6 + $0x88] sm:$0xff]  ;;  %v8661_v47 = vld [vmem:[#allocation6 + $0x80] sm:$0xff] }
 0x25b   : > { %v674_v41 = vand.u32 15, %v590_v30  ;;  %v681_v49 = vand.u32 15, %v591_v44  ;;  %vm13509_vm3 = vcmp.lt.s32.totalorder %v10586_v27, 7  ;;  %v2592_v11 = vunpack.c.l.b16 %v2416_v58  ;;  %3255 = vmatpush.bf16.msra.mxu2 %v8662_v51  ;;  %3520 = vmatpush.bf16.msrb.mxu1 %v8645_v7 }
 0x25c   : > { %v1984_v38 = vsub.f32 1.0, %v1983_v23  ;;  %vm1988_vm4 = vweird.f32 %v10605_v26  ;;  %vm13503_vm5 = vcmp.lt.s32.totalorder %v10586_v27, 1  ;;  %v1971_v10 = vadd.f32 %v10582_v25, %v1970_v56 }
 0x25d   : > { %vm10623_vm6 = vcmp.gt.s32.totalorder %v674_v41, 0  ;;  %v13699_v62 = vmov 0  ;;  %vm10627_vm0 = vcmp.lt.s32.totalorder %v681_v49, 15  ;;  %v13702_v48 = vmov 0  ;;  %v8652_v41 = vld [vmem:[#allocation6 + $0x48] sm:$0xff]  ;;  %vm10671_vm1 = vmor %vm1987_vm13, %vm1988_vm4 }
 0x25e   : > { %v13700_v62 = vsel %vm10623_vm6, 4294967295, %v13699_v62  ;;  %v13703_v48 = vsel %vm10627_vm0, 4294967295, %v13702_v48  ;;  %v2244_v61 = vsel %vm13509_vm3, %v2199_v57, %v2200_v18  ;;  %v2611_v1 = vpack.c.b16 %v2592_v11, %v2591_v29  ;;  %3610 = vmatpush.bf16.msrb.mxu0 %v8652_v41 }
 0x25f   : > { %13701 = vst [vmem:[#allocation20_spill] sm:$0xff] %v13700_v62  ;;  %v1985_v59 = vmul.f32 %v10605_v26, %v1984_v38  ;;  %v2328_v55 = vsel %vm10627_vm0, %v2244_v61, 0.0  ;;  %v13492_v30 = vrot.slane %v10066_v15, 7  ;;  %v1975_v44 = vsel %vm10639_vm2, %v10582_v25, %v1971_v10  ;;  %v2624_v10 = vpop.permute.xlu2 %2623  ;;  %3256 = vmatpush.bf16.msra.mxu2 %v8661_v47 }
 0x260   : > { %13704 = vst [vmem:[#allocation21_spill] sm:$0xff] %v13703_v48  ;;  %v2432_v33 = vpack.c.bf16 %v2328_v55, %v2328_v55  ;;  %vm2871_vm7 = vcmask 1043456   ;;  %vm2872_vm8 = vcmask 523268   ;;  %v13707_v24 = vrot.slane %v9899_v0, 7  ;;  %2639 = vrot.lane.b32.xlu0 %v2611_v1, %s9325_s24 }
 0x261   : > { %v13708_v58 = vrot.slane %v9896_v53, 7  ;;  %v13491_v23 = vrot.slane %v9896_v53, 1  ;;  %v1980_v14 = vsel %vm10594_vm12, %v1979_v21, %v1975_v44  ;;  %v1986_v25 = vadd.f32 %v10605_v26, %v1985_v59  ;;  %vm10731_vm12 = vmor %vm2872_vm8, %vm2871_vm7 }
 0x262   : > { %v10676_v28 = vmul.f32 %v1980_v14, %v10449_v50  ;;  %v2688_v21 = vunpack.c.l.b16 %v2432_v33  ;;  %v8644_v33 = vld [vmem:[#allocation6 + $0x8] sm:$0xff]  ;;  %v593_v51 = vadd.s32 88, %v10586_v27  ;;  %v2039_v14 = vrot.slane %v10017_v16, 7  ;;  %3611 = vmatpush.bf16.msrb.mxu0 %v8651_v34 }
 0x263   : > { %v2084_v29 = vsel %vm13503_vm5, %v13708_v58, %v13707_v24  ;;  %v13709_v56 = vmov %v13708_v58  ;;  %v2245_v1 = vsel %vm13509_vm3, %v13491_v23, %v2199_v57  ;;  %v1990_v59 = vsel %vm10671_vm1, %v10605_v26, %v1986_v25  ;;  %3521 = vmatpush.bf16.msrb.mxu1 %v8644_v33 }
 0x264   : > { %v2085_v49 = vsel %vm13503_vm5, %v13492_v30, %v13709_v56  ;;  %v2368_v11 = vpack.c.bf16 %v2084_v29, %v2084_v29  ;;  %v2431_v55 = vpack.c.bf16 %v2245_v1, %v2245_v1  ;;  %v1995_v24 = vsel %vm10613_vm15, %v1994_v40, %v1990_v59 }
 0x265   : > { %v2166_v61 = vsel %vm10623_vm6, %v2085_v49, 0.0  ;;  %v2421_v58 = vpack.c.bf16 %v10676_v28, %v10676_v28  ;;  %v592_v57 = vadd.s32 80, %v10586_v27  ;;  %v10694_v29 = vmul.f32 %v1995_v24, %v10454_v8 }
 0x266   : > { %v2367_v50 = vpack.c.bf16 %v2166_v61, %v2166_v61  ;;  %v2496_v44 = vunpack.c.l.b16 %v2368_v11  ;;  %v2687_v26 = vunpack.c.l.b16 %v2431_v55  ;;  %v695_v56 = vand.u32 15, %v593_v51  ;;  %v8643_v61 = vld [vmem:[#allocation6] sm:$0xff] }
 0x267   : > { %v2597_v25 = vunpack.c.l.b16 %v2421_v58  ;;  %v688_v7 = vand.u32 15, %v592_v57  ;;  %v13484_v31 = vrot.slane %v10034_v4, 7  ;;  %v2422_v40 = vpack.c.bf16 %v10694_v29, %v10694_v29  ;;  %3522 = vmatpush.bf16.msrb.mxu1 %v8643_v61 }
 0x268   : > { %v2495_v41 = vunpack.c.l.b16 %v2367_v50  ;;  %v13712_v11 = vrot.slane %v9899_v0, 7  ;;  %v2201_v38 = vrot.slane %v10034_v4, 1  ;;  %v13713_v1 = vmov 0 }
 0x269   : > { %vm10705_vm9 = vcmp.gt.s32.totalorder %v688_v7, 0  ;;  %vm10709_vm10 = vcmp.lt.s32.totalorder %v695_v56, 15  ;;  %v13716_v47 = vmov 0  ;;  %v2082_v0 = vsel %vm13503_vm5, %v2039_v14, %v13484_v31 }
 0x26a   : > { %v2523_v49 = vpack.c.b16 %v2496_v44, %v2495_v41  ;;  %v2083_v8 = vsel %vm13503_vm5, %v13712_v11, %v2039_v14  ;;  %v13714_v1 = vsel %vm10705_vm9, 4294967295, %v13713_v1  ;;  %v13717_v47 = vsel %vm10709_vm10, 4294967295, %v13716_v47 }
 0x26b   : > { %13715 = vst [vmem:[#allocation22_spill] sm:$0xff] %v13714_v1  ;;  %v13483_v34 = vrot.slane %v10290_v5, 1  ;;  %v2598_v59 = vunpack.c.l.b16 %v2422_v40  ;;  %vm13719_vm11 = vcmask 523264   ;;  %v2168_v55 = vsel %vm10705_vm9, %v2083_v8, 0.0 }
 0x26c   : > { %13718 = vst [vmem:[#allocation23_spill] sm:$0xff] %v13717_v47  ;;  %v2725_v50 = vsel %vm13719_vm11, %v2523_v49, %v2624_v10  ;;  %v2243_v44 = vsel %vm13509_vm3, %v2200_v18, %v2201_v38  ;;  %v2369_v57 = vpack.c.bf16 %v2168_v55, %v2168_v55  ;;  %v2370_v41 = vpack.c.bf16 %v2082_v0, %v2082_v0  ;;  %v2626_v49 = vpop.permute.xlu2 %2625  ;;  %vm13722_vm13 = vmmov %vm13719_vm11  ;;  %v8705_v10 = vld [vmem:[#allocation6 + $0xe0] sm:$0xff] }
 0x26d   : > { %v2783_v33 = vunpack.c.l.b16 %v2725_v50  ;;  %v2784_v24 = vunpack.c.h.b16 %v2725_v50  ;;  %v2242_v58 = vsel %vm13509_vm3, %v2201_v38, %v13483_v34  ;;  %v2614_v51 = vpack.c.b16 %v2598_v59, %v2597_v25  ;;  %vm13729_vm4 = vmmov %vm13719_vm11 }
 0x26e   : > { %v2330_v16 = vsel %vm10709_vm10, %v2242_v58, 0.0  ;;  %v2433_v18 = vpack.c.bf16 %v2243_v44, %v2243_v44  ;;  %v2497_v40 = vunpack.c.l.b16 %v2369_v57  ;;  %v2498_v25 = vunpack.c.l.b16 %v2370_v41  ;;  %vm13746_vm11 = vmmov %vm13729_vm4 }
 0x26f   : > { %v2815_v14 = vpack.c.b16 %v2687_v26, %v2783_v33  ;;  %v2816_v7 = vpack.c.b16 %v2688_v21, %v2784_v24  ;;  %v2434_v56 = vpack.c.bf16 %v2330_v16, %v2330_v16  ;;  %2645 = vrot.lane.b32.xlu0 %v2614_v51, %s9325_s24  ;;  %v598_v8 = vadd.s32 128, %v10586_v27  ;;  %s13219_s24 = scalar_lea.vmem [#allocation9], %s7394_s28  ;;  %s8888_s28 = sshll.u32 %s9430_s22, 8 }
 0x270   : > { %v2689_v11 = vunpack.c.l.b16 %v2433_v18  ;;  %v599_v38 = vadd.s32 136, %v10586_v27  ;;  %v13490_v0 = vrot.slane %v10231_v45, 7  ;;  %v2045_v26 = vrot.slane %v10167_v36, 7  ;;  %s7289_s26 = scalar_lea.hbm %s14213_s25, %s8888_s28  ;;  %s7290_s27 = sshll.u32 %s13219_s24, 4  ;;  %s7291_s27 = int_to_ptr.vmem [resolvable:$true] %s7290_s27 }
 0x271   : > { %2882 = vst.msk [vmem:[#allocation2 + $0x78] sm:$0xff] %vm10731_vm12, %v2815_v14  ;;  %v2690_v59 = vunpack.c.l.b16 %v2434_v56  ;;  %v13482_v21 = vrot.slane %v10170_v43, 7  ;;  %v2524_v61 = vpack.c.b16 %v2498_v25, %v2497_v40  ;;  %v730_v50 = vand.u32 15, %v598_v8  ;;  %s7292_s22 = sshll.u32 %s7289_s26, 4  ;;  %s7293_s22 = int_to_ptr.hbm [resolvable:$true] %s7292_s22 }
 0x272   : > { %2883 = vst.msk [vmem:[#allocation2 + $0x84] sm:$0xff] %vm10731_vm12, %v2816_v7  ;;  %v737_v55 = vand.u32 15, %v599_v38  ;;  %v13488_v44 = vrot.slane %v10167_v36, 1  ;;  %v2077_v24 = vsel %vm13503_vm5, %v13490_v0, %v2045_v26  ;;  %v2207_v58 = vrot.slane %v10170_v43, 1  ;;  %s9261_s30 = sshra.s32 %s7293_s22, 4  ;;  %s9262_s30 = int_to_ptr.hbm [resolvable:$true] %s9261_s30 }
 0x273   : > { %v2076_v33 = vsel %vm13503_vm5, %v2045_v26, %v13482_v21  ;;  %v13481_v57 = vrot.slane %v10421_v3, 1  ;;  %v2728_v51 = vsel %vm13722_vm13, %v2524_v61, %v2626_v49  ;;  %vm10759_vm14 = vcmp.gt.s32.totalorder %v730_v50, 0  ;;  %v8668_v21 = vld [vmem:[#allocation6 + $0xb8] sm:$0xff]  ;;  %s9263_s20 = scalar_lea.hbm %s9262_s30, 256  ;;  %p9268_p11 = scmp.lt.s32.totalorder %s9262_s30, %s14213_s25 }
 0x274   : > { %v13723_v16 = vmov 0  ;;  %vm10763_vm15 = vcmp.lt.s32.totalorder %v737_v55, 15  ;;  %v13726_v41 = vmov 0  ;;  %v2376_v18 = vpack.c.bf16 %v2076_v33, %v2076_v33  ;;  %v2632_v31 = vpop.permute.xlu2 %2631  ;;  %3346 = vmatpush.bf16.msra.mxu3 %v8668_v21  ;;  %p9264_p1 = scmp.ne.s32.totalorder %s9262_s30, %s9263_s20  ;;  %p9269_p2 = scmp.lt.s32.totalorder %s9267_s29, %s9263_s20 }
 0x275   : > { %v13724_v16 = vsel %vm10759_vm14, 4294967295, %v13723_v16  ;;  %v13727_v41 = vsel %vm10763_vm15, 4294967295, %v13726_v41  ;;  %v2785_v14 = vunpack.c.l.b16 %v2728_v51  ;;  %v2786_v7 = vunpack.c.h.b16 %v2728_v51 }
 0x276   : > { %13725 = vst [vmem:[#allocation24_spill] sm:$0xff] %v13724_v16  ;;  %v2174_v56 = vsel %vm10759_vm14, %v2077_v24, 0.0  ;;  %v2236_v40 = vsel %vm13509_vm3, %v2207_v58, %v13481_v57  ;;  %v2237_v49 = vsel %vm13509_vm3, %v13488_v44, %v2207_v58  ;;  %v2504_v38 = vunpack.c.l.b16 %v2376_v18  ;;  %v8660_v57 = vld [vmem:[#allocation6 + $0x78] sm:$0xff]  ;;  %p9265_p4 = pnand %p9264_p1, %p9475_p3  ;;  %p9270_p9 = por %p9269_p2, %p9268_p11 }
 0x277   : > { %13728 = vst [vmem:[#allocation25_spill] sm:$0xff] %v13727_v41  ;;  %v2336_v25 = vsel %vm10763_vm15, %v2236_v40, 0.0  ;;  %v2375_v8 = vpack.c.bf16 %v2174_v56, %v2174_v56  ;;  %v2817_v26 = vpack.c.b16 %v2689_v11, %v2785_v14  ;;  %v2818_v61 = vpack.c.b16 %v2690_v59, %v2786_v7  ;;  %3257 = vmatpush.bf16.msra.mxu2 %v8660_v57  ;;  %v8659_v40 = vld [vmem:[#allocation6 + $0x70] sm:$0xff] }
 0x278   : > { %v2439_v50 = vpack.c.bf16 %v2237_v49, %v2237_v49  ;;  %v2440_v55 = vpack.c.bf16 %v2336_v25, %v2336_v25  ;;  %v604_v24 = vadd.s32 176, %v10586_v27  ;;  %v605_v51 = vadd.s32 184, %v10586_v27  ;;  %p9266_p8 = pneg %p9265_p4 }
 0x279   : > { %v2503_v33 = vunpack.c.l.b16 %v2375_v8  ;;  %2884 = vst.msk [vmem:[#allocation2 + $0x90] sm:$0xff] %vm10731_vm12, %v2817_v26  ;;  %v13486_v56 = vrot.slane %v10387_v39, 7  ;;  %v2051_v11 = vrot.slane %v10340_v13, 7  ;;  %v13485_v7 = vrot.slane %v10354_v2, 7 }
 0x27a   : > { %v2695_v58 = vunpack.c.l.b16 %v2439_v50  ;;  %v2696_v34 = vunpack.c.l.b16 %v2440_v55  ;;  %2885 = vst.msk [vmem:[#allocation2 + $0x9c] sm:$0xff] %vm10731_vm12, %v2818_v61  ;;  %v772_v18 = vand.u32 15, %v604_v24  ;;  %v779_v14 = vand.u32 15, %v605_v51  ;;  %v8667_v55 = vld [vmem:[#allocation6 + $0xb0] sm:$0xff]  ;;  %p9271_p10 = pnand %p9270_p9, %p9266_p8 }
 0x27b   : > { %v2527_v59 = vpack.c.b16 %v2504_v38, %v2503_v33  ;;  %v9326_v49 = vmov 0   ;;  %v2071_v25 = vsel %vm13503_vm5, %v13486_v56, %v2051_v11  ;;  %v13489_v8 = vrot.slane %v10340_v13, 1  ;;  %3258 = vmatpush.bf16.msra.mxu2 %v8659_v40  ;;  %3347 = vmatpush.bf16.msra.mxu3 %v8667_v55 }
 0x27c   : > { %2351 = vst [vmem:[#allocation2] sm:$0xff] %v9326_v49  ;;  %v2213_v26 = vrot.slane %v10354_v2, 1  ;;  %v13487_v38 = vrot.slane %v10578_v35, 1  ;;  %vm10798_vm2 = vcmp.gt.s32.totalorder %v772_v18, 0  ;;  %v13730_v21 = vmov 0 }
 0x27d   : > { %v2737_v61 = vsel %vm13729_vm4, %v2527_v59, %v2632_v31  ;;  %2353 = vst [vmem:[#allocation2 + $0xc] sm:$0xff] %v9326_v49  ;;  %v13731_v21 = vsel %vm10798_vm2, 4294967295, %v13730_v21  ;;  %vm10802_vm7 = vcmp.lt.s32.totalorder %v779_v14, 15  ;;  %v13733_v57 = vmov 0 }
 0x27e   : > { %13732 = vst [vmem:[#allocation26_spill] sm:$0xff] %v13731_v21  ;;  %v13734_v57 = vsel %vm10802_vm7, 4294967295, %v13733_v57  ;;  %v2070_v50 = vsel %vm13503_vm5, %v2051_v11, %v13485_v7  ;;  %v2791_v33 = vunpack.c.l.b16 %v2737_v61  ;;  %v2792_v24 = vunpack.c.h.b16 %v2737_v61 }
 0x27f   : > { %13735 = vst [vmem:[#allocation27_spill] sm:$0xff] %v13734_v57  ;;  %v2180_v31 = vsel %vm10798_vm2, %v2071_v25, 0.0  ;;  %v2230_v51 = vsel %vm13509_vm3, %v2213_v26, %v13487_v38  ;;  %v2231_v11 = vsel %vm13509_vm3, %v13489_v8, %v2213_v26  ;;  %v2382_v14 = vpack.c.bf16 %v2070_v50, %v2070_v50 }
 0x280   : > { %2352 = vst [vmem:[#allocation2 + $0x8] sm:$0xf] %v9326_v49  ;;  %v2342_v59 = vsel %vm10802_vm7, %v2230_v51, 0.0  ;;  %v2381_v18 = vpack.c.bf16 %v2180_v31, %v2180_v31  ;;  %v2823_v61 = vpack.c.b16 %v2695_v58, %v2791_v33  ;;  %v2824_v25 = vpack.c.b16 %v2696_v34, %v2792_v24 }
 0x281   : > { %2354 = vst [vmem:[#allocation2 + $0x14] sm:$0xf] %v9326_v49  ;;  %v2445_v7 = vpack.c.bf16 %v2231_v11, %v2231_v11  ;;  %v2446_v56 = vpack.c.bf16 %v2342_v59, %v2342_v59  ;;  %v10828_v44 = vunpack.c.l.b16 %v2382_v14  ;;  %v586_v26 = vadd.s32 32, %v10586_v27 }
 0x282   : > { %2355 = vst [vmem:[#allocation2 + $0x198] sm:$0xff] %v9326_v49  ;;  %v10826_v38 = vunpack.c.l.b16 %v2381_v18  ;;  %v587_v8 = vadd.s32 40, %v10586_v27  ;;  %v2195_v40 = vrot.slane %v9926_v22, 1  ;;  %v13494_v50 = vrot.slane %v10056_v12, 1 }
 0x283   : > { %2356 = vst [vmem:[#allocation2 + $0x1a0] sm:$0xf] %v9326_v49  ;;  %v10834_v58 = vunpack.c.l.b16 %v2445_v7  ;;  %v10836_v34 = vunpack.c.l.b16 %v2446_v56  ;;  %v7626_v33 = vld [vmem:[#allocation2] sm:$0xf]  ;;  %v8611_v24 = vld [vmem:[#allocation2 + $0x4] sm:$0xf] }
 0x284   : > { %2890 = vst.msk [vmem:[#allocation2 + $0xd8] sm:$0xff] %vm10731_vm12, %v2823_v61  ;;  %v646_v55 = vand.u32 15, %v586_v26  ;;  %v13736_v51 = vrot.slane %v9926_v22, 7  ;;  %v13737_v7 = vrot.slane %v9923_v52, 7  ;;  %v13738_v11 = vrot.slane %v9952_v20, 7 }
 0x285   : > { %2891 = vst.msk [vmem:[#allocation2 + $0xe4] sm:$0xff] %vm10731_vm12, %v2824_v25  ;;  %v13739_v59 = vrot.slane %v9933_v60, 7  ;;  %v8612_v14 = vld [vmem:[#allocation2 + $0x8] sm:$0xf0]  ;;  %v7628_v61 = vld [vmem:[#allocation2 + $0xc] sm:$0xf0]  ;;  %v2248_v26 = vsel %vm13509_vm3, %v2195_v40, %v13494_v50 }
 0x286   : > { %v2088_v56 = vsel %vm13503_vm5, %v13737_v7, %v13736_v51  ;;  %2357 = vst [vmem:[#allocation2 + $0x1a4] sm:$0xff] %v9326_v49  ;;  %v653_v25 = vand.u32 15, %v587_v8  ;;  %v7627_v51 = vor.u32 %v8612_v14, %v7626_v33  ;;  %v7631_v7 = vor.u32 %v8611_v24, %v7628_v61 }
 0x287   : > { %v2092_v18 = vsel %vm13503_vm5, %v13739_v59, %v13738_v11  ;;  %v2364_v0 = vpack.c.bf16 %v2088_v56, %v2088_v56  ;;  %2358 = vst [vmem:[#allocation2 + $0x1ac] sm:$0xf] %v9326_v49  ;;  %vm10862_vm8 = vcmp.gt.s32.totalorder %v646_v55, 0  ;;  %v13740_v30 = vmov 0 }
 0x288   : > { %v2360_v23 = vpack.c.bf16 %v2092_v18, %v2092_v18  ;;  %v13741_v30 = vsel %vm10862_vm8, 4294967295, %v13740_v30  ;;  %v13493_v11 = vrot.slane %v10143_v17, 7  ;;  %4717 = vst [vmem:[#allocation2] sm:$0xff] %v9326_v49  ;;  %vm10868_vm1 = vcmp.lt.s32.totalorder %v653_v25, 15  ;;  %3523 = vmatmul.bf16.vlgmr.msrb.gmra.mxu1 %v7627_v51  ;;  %7680 = vmatmul.msk.bf16.vlgmr.msrb.gmra.mxu0 %vm13746_vm11, %v7631_v7 }
 0x289   : > { %13742 = vst [vmem:[#allocation28_spill] sm:$0xff] %v13741_v30  ;;  %v13743_v8 = vmov 0  ;;  %v13495_v59 = vrot.slane %v9923_v52, 1  ;;  %v2492_v56 = vunpack.c.l.b16 %v2364_v0  ;;  %v583_v33 = vadd.s32 8, %v10586_v27 }
 0x28a   : > { %v13744_v8 = vsel %vm10868_vm1, 4294967295, %v13743_v8  ;;  %4719 = vst [vmem:[#allocation2 + $0xc] sm:$0xff] %v9326_v49  ;;  %v2324_v24 = vsel %vm10868_vm1, %v2248_v26, 0.0  ;;  %v13747_v55 = vrot.slane %v9923_v52, 7  ;;  %v618_v14 = vand.u32 15, %v10586_v27 }
 0x28b   : > { %13745 = vst [vmem:[#allocation29_spill] sm:$0xff] %v13744_v8  ;;  %v13499_v0 = vrot.slane %v10694_v29, 7  ;;  %v2428_v61 = vpack.c.bf16 %v2324_v24, %v2324_v24  ;;  %v2249_v26 = vsel %vm13509_vm3, %v13495_v59, %v2195_v40  ;;  %v625_v51 = vand.u32 15, %v583_v33  ;;  %v2620_v59 = vpop.permute.xlu1 %2619 }
 0x28c   : > { %v2089_v18 = vsel %vm13503_vm5, %v13493_v11, %v13747_v55  ;;  %4718 = vst [vmem:[#allocation2 + $0x8] sm:$0xf] %v9326_v49  ;;  %v2427_v55 = vpack.c.bf16 %v2249_v26, %v2249_v26  ;;  %vm10894_vm13 = vcmp.gt.s32.totalorder %v618_v14, 0  ;;  %v13748_v11 = vmov 0 }
 0x28d   : > { %v2162_v25 = vsel %vm10862_vm8, %v2089_v18, 0.0  ;;  %4720 = vst [vmem:[#allocation2 + $0x14] sm:$0xf] %v9326_v49  ;;  %v13749_v11 = vsel %vm10894_vm13, 4294967295, %v13748_v11  ;;  %v2191_v50 = vrot.slane %v9952_v20, 1  ;;  %v2684_v24 = vunpack.c.l.b16 %v2428_v61 }
 0x28e   : > { %v2363_v7 = vpack.c.bf16 %v2162_v25, %v2162_v25  ;;  %13750 = vst [vmem:[#allocation30_spill] sm:$0xff] %v13749_v11  ;;  %vm10900_vm4 = vcmp.lt.s32.totalorder %v625_v51, 15  ;;  %v13751_v18 = vmov 0  ;;  %v13502_v40 = vrot.slane %v10127_v63, 1  ;;  %v8676_v11 = vld [vmem:[#allocation2 + $0x80] sm:$0xf0] }
 0x28f   : > { %4722 = vst [vmem:[#allocation2 + $0x1a0] sm:$0xf] %v9326_v49  ;;  %v13752_v18 = vsel %vm10900_vm4, 4294967295, %v13751_v18  ;;  %v13754_v33 = vrot.slane %v9933_v60, 7  ;;  %v2683_v26 = vunpack.c.l.b16 %v2427_v55  ;;  %v13505_v51 = vrot.slane %v9933_v60, 1 }
 0x290   : > { %13753 = vst [vmem:[#allocation31_spill] sm:$0xff] %v13752_v18  ;;  %v2491_v25 = vunpack.c.l.b16 %v2363_v7  ;;  %v2252_v31 = vsel %vm13509_vm3, %v2191_v50, %v13502_v40  ;;  %v2488_v41 = vunpack.c.l.b16 %v2360_v23  ;;  %v610_v47 = vadd.s32 224, %v10586_v27  ;;  %v2638_v40 = vpop.permute.xlu2 %2637 }
 0x291   : > { %v2093_v14 = vsel %vm13503_vm5, %v13499_v0, %v13754_v33  ;;  %4724 = vst [vmem:[#allocation2 + $0x1ac] sm:$0xf] %v9326_v49  ;;  %v2320_v49 = vsel %vm10900_vm4, %v2252_v31, 0.0  ;;  %v2253_v7 = vsel %vm13509_vm3, %v13505_v51, %v2191_v50  ;;  %v611_v55 = vadd.s32 232, %v10586_v27  ;;  %vm13756_vm5 = vmmov %vm13746_vm11 }
 0x292   : > { %v2158_v61 = vsel %vm10894_vm13, %v2093_v14, 0.0  ;;  %v2521_v33 = vpack.c.b16 %v2492_v56, %v2491_v25  ;;  %v2424_v14 = vpack.c.bf16 %v2320_v49, %v2320_v49  ;;  %v2423_v0 = vpack.c.bf16 %v2253_v7, %v2253_v7  ;;  %v2616_v49 = vpop.permute.xlu0 %2615 }
 0x293   : > { %v2359_v57 = vpack.c.bf16 %v2158_v61, %v2158_v61  ;;  %v814_v8 = vand.u32 15, %v610_v47  ;;  %v821_v61 = vand.u32 15, %v611_v55  ;;  %v13521_v56 = vrot.slane %v10553_v32, 7 }
 0x294   : > { %v2719_v23 = vsel %vm13746_vm11, %v2521_v33, %v2620_v59  ;;  %v2057_v25 = vrot.slane %v10519_v6, 7  ;;  %v13755_v31 = vpack.c.b16 %v10828_v44, %v10826_v38  ;;  %v2680_v21 = vunpack.c.l.b16 %v2424_v14 }
 0x295   : > { %v2487_v48 = vunpack.c.l.b16 %v2359_v57  ;;  %v2779_v50 = vunpack.c.l.b16 %v2719_v23  ;;  %v2780_v51 = vunpack.c.h.b16 %v2719_v23  ;;  %v2679_v16 = vunpack.c.l.b16 %v2423_v0 }
 0x296   : > { %v2746_v18 = vsel %vm13756_vm5, %v13755_v31, %v2638_v40  ;;  %vm10934_vm11 = vcmp.gt.s32.totalorder %v814_v8, 0  ;;  %v13757_v33 = vmov 0  ;;  %vm10938_vm3 = vcmp.lt.s32.totalorder %v821_v61, 15 }
 0x297   : > { %v2797_v7 = vunpack.c.l.b16 %v2746_v18  ;;  %v2798_v57 = vunpack.c.h.b16 %v2746_v18  ;;  %v2519_v47 = vpack.c.b16 %v2488_v41, %v2487_v48  ;;  %v2811_v1 = vpack.c.b16 %v2683_v26, %v2779_v50 }
 0x298   : > { %v2812_v59 = vpack.c.b16 %v2684_v24, %v2780_v51  ;;  %v13758_v33 = vsel %vm10934_vm11, 4294967295, %v13757_v33  ;;  %v13760_v55 = vmov 0  ;;  %v13518_v18 = vrot.slane %v10522_v19, 7 }
 0x299   : > { %13759 = vst [vmem:[#allocation32_spill] sm:$0xff] %v13758_v33  ;;  %v13761_v55 = vsel %vm10938_vm3, 4294967295, %v13760_v55  ;;  %v2829_v44 = vpack.c.b16 %v10834_v58, %v2797_v7  ;;  %v2830_v38 = vpack.c.b16 %v10836_v34, %v2798_v57  ;;  %v2713_v40 = vsel %vm13756_vm5, %v2519_v47, %v2616_v49 }
 0x29a   : > { %13762 = vst [vmem:[#allocation33_spill] sm:$0xff] %v13761_v55  ;;  %v2775_v48 = vunpack.c.l.b16 %v2713_v40  ;;  %v2776_v41 = vunpack.c.h.b16 %v2713_v40  ;;  %vm13763_vm7 = vcmp.lt.s32.totalorder %v10586_v27, 1  ;;  %v13519_v0 = vrot.slane %v10519_v6, 1  ;;  %v8666_v40 = vld [vmem:[#allocation6 + $0xa8] sm:$0xff] }
 0x29b   : > { %2878 = vst.msk [vmem:[#allocation2 + $0x48] sm:$0xff] %vm10731_vm12, %v2811_v1  ;;  %v2065_v8 = vsel %vm13763_vm7, %v13521_v56, %v2057_v25  ;;  %vm13764_vm5 = vmmov %vm13763_vm7  ;;  %v2219_v34 = vrot.slane %v10522_v19, 1  ;;  %v13515_v24 = vrot.slane %v10676_v28, 1  ;;  %vm13765_vm7 = vcmp.lt.s32.totalorder %v10586_v27, 7  ;;  %3348 = vmatpush.bf16.msra.mxu3 %v8666_v40 }
 0x29c   : > { %2896 = vst.msk [vmem:[#allocation2 + $0x120] sm:$0xff] %vm10731_vm12, %v2829_v44  ;;  %v2064_v58 = vsel %vm13764_vm5, %v2057_v25, %v13518_v18  ;;  %v2186_v1 = vsel %vm10934_vm11, %v2065_v8, 0.0  ;;  %v2807_v26 = vpack.c.b16 %v2679_v16, %v2775_v48  ;;  %v2808_v51 = vpack.c.b16 %v2680_v21, %v2776_v41  ;;  %vm13766_vm5 = vmmov %vm13765_vm7 }
 0x29d   : > { %2897 = vst.msk [vmem:[#allocation2 + $0x12c] sm:$0xff] %vm10731_vm12, %v2830_v38  ;;  %v2387_v14 = vpack.c.bf16 %v2186_v1, %v2186_v1  ;;  %v2388_v23 = vpack.c.bf16 %v2064_v58, %v2064_v58  ;;  %v2224_v61 = vsel %vm13765_vm7, %v2219_v34, %v13515_v24  ;;  %v2225_v25 = vsel %vm13766_vm5, %v13519_v0, %v2219_v34  ;;  %v8658_v38 = vld [vmem:[#allocation6 + $0x68] sm:$0xff] }
 0x29e   : > { %2879 = vst.msk [vmem:[#allocation2 + $0x54] sm:$0xff] %vm10731_vm12, %v2812_v59  ;;  %v588_v31 = vadd.s32 48, %v10586_v27  ;;  %v589_v16 = vadd.s32 56, %v10586_v27  ;;  %v2348_v21 = vsel %vm10938_vm3, %v2224_v61, 0.0  ;;  %v2451_v50 = vpack.c.bf16 %v2225_v25, %v2225_v25  ;;  %3259 = vmatpush.bf16.msra.mxu2 %v8658_v38  ;;  %v8665_v61 = vld [vmem:[#allocation6 + $0xa0] sm:$0xff] }
 0x29f   : > { %2874 = vst.msk [vmem:[#allocation2 + $0x18] sm:$0xff] %vm10731_vm12, %v2807_v26  ;;  %v10981_v49 = vunpack.c.l.b16 %v2387_v14  ;;  %v10983_v7 = vunpack.c.l.b16 %v2388_v23  ;;  %v2452_v57 = vpack.c.bf16 %v2348_v21, %v2348_v21  ;;  %v2035_v44 = vrot.slane %v10056_v12, 7  ;;  %v8657_v23 = vld [vmem:[#allocation6 + $0x60] sm:$0xff]  ;;  %3349 = vmatpush.bf16.msra.mxu3 %v8665_v61 }
 0x2a0   : > { %2875 = vst.msk [vmem:[#allocation2 + $0x24] sm:$0xff] %vm10731_vm12, %v2808_v51  ;;  %v660_v47 = vand.u32 15, %v588_v31  ;;  %v667_v59 = vand.u32 15, %v589_v16  ;;  %v10990_v41 = vunpack.c.l.b16 %v2451_v50  ;;  %v2197_v8 = vrot.slane %v10066_v15, 1 }
 0x2a1   : > { %v2533_v48 = vpack.c.b16 %v10983_v7, %v10981_v49  ;;  %v584_v58 = vadd.s32 16, %v10586_v27  ;;  %v10994_v1 = vunpack.c.l.b16 %v2452_v57  ;;  %v13767_v34 = vmov 0 }
 0x2a2   : > { %vm10996_vm7 = vcmp.gt.s32.totalorder %v660_v47, 0  ;;  %vm11000_vm5 = vcmp.lt.s32.totalorder %v667_v59, 15  ;;  %v13770_v26 = vmov 0  ;;  %v13773_v51 = vrot.slane %v10066_v15, 7  ;;  %v8708_v47 = vld [vmem:[#allocation6 + $0xf8] sm:$0xff]  ;;  %3260 = vmatpush.bf16.msra.mxu2 %v8657_v23 }
 0x2a3   : > { %v13768_v34 = vsel %vm10996_vm7, 4294967295, %v13767_v34  ;;  %v13771_v26 = vsel %vm11000_vm5, 4294967295, %v13770_v26  ;;  %vm13774_vm3 = vcmp.lt.s32.totalorder %v10586_v27, 1  ;;  %v13775_v25 = vrot.slane %v9926_v22, 7  ;;  %4014 = vmatpush.bf16.msrb.mxu3 %v8708_v47 }
 0x2a4   : > { %13769 = vst [vmem:[#allocation34_spill] sm:$0xff] %v13768_v34  ;;  %v2086_v14 = vsel %vm13774_vm3, %v2035_v44, %v13773_v51  ;;  %vm13776_vm15 = vmmov %vm13774_vm3  ;;  %v13777_v16 = vrot.slane %v9896_v53, 1  ;;  %vm13778_vm10 = vcmp.lt.s32.totalorder %v10586_v27, 7  ;;  %v13779_v50 = vrot.slane %v10056_v12, 1 }
 0x2a5   : > { %13772 = vst [vmem:[#allocation35_spill] sm:$0xff] %v13771_v26  ;;  %v2087_v31 = vsel %vm13776_vm15, %v13775_v25, %v2035_v44  ;;  %vm13780_vm0 = vmmov %vm13778_vm10  ;;  %v2366_v57 = vpack.c.bf16 %v2086_v14, %v2086_v14  ;;  %v585_v44 = vadd.s32 24, %v10586_v27  ;;  %v632_v25 = vand.u32 15, %v584_v58  ;;  %v8712_v14 = vld [vmem:[#allocation6 + $0x118] sm:$0xff] }
 0x2a6   : > { %v2246_v21 = vsel %vm13778_vm10, %v2197_v8, %v13777_v16  ;;  %v2247_v15 = vsel %vm13780_vm0, %v13779_v50, %v2197_v8  ;;  %v2164_v59 = vsel %vm10996_vm7, %v2087_v31, 0.0  ;;  %v2031_v24 = vrot.slane %v10127_v63, 7  ;;  %vm13788_vm10 = vmmov %vm13776_vm15  ;;  %4107 = vmatpush.bf16.msra.mxu0 %v8712_v14 }
 0x2a7   : > { %v2326_v22 = vsel %vm11000_vm5, %v2246_v21, 0.0  ;;  %v2429_v38 = vpack.c.bf16 %v2247_v15, %v2247_v15  ;;  %v2365_v53 = vpack.c.bf16 %v2164_v59, %v2164_v59  ;;  %v2494_v51 = vunpack.c.l.b16 %v2366_v57  ;;  %v2622_v57 = vpop.permute.xlu1 %2621  ;;  %vm13790_vm15 = vmmov %vm13788_vm10 }
 0x2a8   : > { %v2430_v40 = vpack.c.bf16 %v2326_v22, %v2326_v22  ;;  %v639_v12 = vand.u32 15, %v585_v44  ;;  %v2193_v8 = vrot.slane %v10143_v17, 1  ;;  %vm11027_vm3 = vcmp.gt.s32.totalorder %v632_v25, 0 }
 0x2a9   : > { %v2685_v16 = vunpack.c.l.b16 %v2429_v38  ;;  %v2493_v31 = vunpack.c.l.b16 %v2365_v53  ;;  %v13781_v21 = vmov 0  ;;  %v596_v15 = vadd.s32 112, %v10586_v27 }
 0x2aa   : > { %v2686_v50 = vunpack.c.l.b16 %v2430_v40  ;;  %v13782_v21 = vsel %vm11027_vm3, 4294967295, %v13781_v21  ;;  %vm11032_vm0 = vcmp.lt.s32.totalorder %v639_v12, 15  ;;  %v13784_v58 = vmov 0 }
 0x2ab   : > { %13783 = vst [vmem:[#allocation36_spill] sm:$0xff] %v13782_v21  ;;  %v13785_v58 = vsel %vm11032_vm0, 4294967295, %v13784_v58  ;;  %v13787_v59 = vrot.slane %v10143_v17, 7  ;;  %v13789_v61 = vrot.slane %v9952_v20, 7  ;;  %v13791_v38 = vrot.slane %v9923_v52, 1 }
 0x2ac   : > { %13786 = vst [vmem:[#allocation37_spill] sm:$0xff] %v13785_v58  ;;  %vm13792_vm5 = vcmp.lt.s32.totalorder %v10586_v27, 7  ;;  %v2522_v44 = vpack.c.b16 %v2494_v51, %v2493_v31  ;;  %v13793_v17 = vrot.slane %v10127_v63, 1  ;;  %v597_v14 = vadd.s32 120, %v10586_v27 }
 0x2ad   : > { %v2090_v23 = vsel %vm13788_vm10, %v2031_v24, %v13787_v59  ;;  %v2091_v22 = vsel %vm13790_vm15, %v13789_v61, %v2031_v24  ;;  %v2250_v47 = vsel %vm13792_vm5, %v2193_v8, %v13791_v38  ;;  %vm13794_vm1 = vmmov %vm13792_vm5  ;;  %vm13795_vm10 = vcmask 523264  }
 0x2ae   : > { %v2160_v53 = vsel %vm11027_vm3, %v2091_v22, 0.0  ;;  %v2251_v40 = vsel %vm13794_vm1, %v13793_v17, %v2193_v8  ;;  %v2322_v20 = vsel %vm11032_vm0, %v2250_v47, 0.0  ;;  %v2362_v24 = vpack.c.bf16 %v2090_v23, %v2090_v23  ;;  %v2618_v17 = vpop.permute.xlu0 %2617  ;;  %vm13802_vm15 = vmmov %vm13795_vm10 }
 0x2af   : > { %v2361_v25 = vpack.c.bf16 %v2160_v53, %v2160_v53  ;;  %v2425_v12 = vpack.c.bf16 %v2251_v40, %v2251_v40  ;;  %v2426_v52 = vpack.c.bf16 %v2322_v20, %v2322_v20  ;;  %v2722_v59 = vsel %vm13795_vm10, %v2522_v44, %v2622_v57  ;;  %v2630_v56 = vpop.permute.xlu1 %2629 }
 0x2b0   : > { %v716_v51 = vand.u32 15, %v596_v15  ;;  %v2042_v31 = vrot.slane %v10303_v37, 7  ;;  %v2781_v61 = vunpack.c.l.b16 %v2722_v59  ;;  %v2782_v22 = vunpack.c.h.b16 %v2722_v59 }
 0x2b1   : > { %v2489_v63 = vunpack.c.l.b16 %v2361_v25  ;;  %v2490_v38 = vunpack.c.l.b16 %v2362_v24  ;;  %v2681_v18 = vunpack.c.l.b16 %v2425_v12  ;;  %v2682_v8 = vunpack.c.l.b16 %v2426_v52 }
 0x2b2   : > { %v723_v0 = vand.u32 15, %v597_v14  ;;  %vm11059_vm1 = vcmp.gt.s32.totalorder %v716_v51, 0  ;;  %v13796_v47 = vmov 0  ;;  %v2813_v23 = vpack.c.b16 %v2685_v16, %v2781_v61 }
 0x2b3   : > { %v13797_v47 = vsel %vm11059_vm1, 4294967295, %v13796_v47  ;;  %v2814_v53 = vpack.c.b16 %v2686_v50, %v2782_v22  ;;  %v2520_v57 = vpack.c.b16 %v2490_v38, %v2489_v63  ;;  %v2043_v44 = vrot.slane %v10199_v9, 7 }
 0x2b4   : > { %13798 = vst [vmem:[#allocation38_spill] sm:$0xff] %v13797_v47  ;;  %vm11064_vm5 = vcmp.lt.s32.totalorder %v723_v0, 15  ;;  %v13799_v15 = vmov 0  ;;  %v2204_v40 = vrot.slane %v10199_v9, 1  ;;  %v2205_v20 = vrot.slane %v10231_v45, 1 }
 0x2b5   : > { %v13800_v15 = vsel %vm11064_vm5, 4294967295, %v13799_v15  ;;  %v594_v25 = vadd.s32 96, %v10586_v27  ;;  %2880 = vst.msk [vmem:[#allocation2 + $0x60] sm:$0xff] %vm10731_vm12, %v2813_v23  ;;  %v2716_v24 = vsel %vm13802_vm15, %v2520_v57, %v2618_v17  ;;  %v13803_v16 = vrot.slane %v10231_v45, 7  ;;  %v7434_v57 = vld [vmem:[#allocation2 + $0x18] sm:$0xf] }
 0x2b6   : > { %13801 = vst [vmem:[#allocation39_spill] sm:$0xff] %v13800_v15  ;;  %vm13804_vm10 = vcmp.lt.s32.totalorder %v10586_v27, 1  ;;  %v595_v12 = vadd.s32 104, %v10586_v27  ;;  %v2777_v9 = vunpack.c.l.b16 %v2716_v24  ;;  %v2778_v52 = vunpack.c.h.b16 %v2716_v24 }
 0x2b7   : > { %v2078_v50 = vsel %vm13804_vm10, %v2043_v44, %v13803_v16  ;;  %vm13805_vm0 = vmmov %vm13804_vm10  ;;  %2881 = vst.msk [vmem:[#allocation2 + $0x6c] sm:$0xff] %vm10731_vm12, %v2814_v53  ;;  %v13806_v14 = vrot.slane %v10167_v36, 1  ;;  %vm13807_vm15 = vcmp.lt.s32.totalorder %v10586_v27, 7  ;;  %v702_v36 = vand.u32 15, %v594_v25 }
 0x2b8   : > { %v2079_v0 = vsel %vm13805_vm0, %v2042_v31, %v2043_v44  ;;  %vm13808_vm10 = vmmov %vm13807_vm15  ;;  %v2374_v63 = vpack.c.bf16 %v2078_v50, %v2078_v50  ;;  %v2809_v38 = vpack.c.b16 %v2681_v18, %v2777_v9  ;;  %v2810_v17 = vpack.c.b16 %v2682_v8, %v2778_v52  ;;  %v8614_v44 = vld [vmem:[#allocation2 + $0x20] sm:$0xf0] }
 0x2b9   : > { %v2172_v59 = vsel %vm11059_vm1, %v2079_v0, 0.0  ;;  %v2238_v45 = vsel %vm13807_vm15, %v2205_v20, %v13806_v14  ;;  %v2239_v51 = vsel %vm13808_vm10, %v2204_v40, %v2205_v20  ;;  %v709_v0 = vand.u32 15, %v595_v12 }
 0x2ba   : > { %v2334_v61 = vsel %vm11064_vm5, %v2238_v45, 0.0  ;;  %v2373_v22 = vpack.c.bf16 %v2172_v59, %v2172_v59  ;;  %v2437_v23 = vpack.c.bf16 %v2239_v51, %v2239_v51  ;;  %v2502_v16 = vunpack.c.l.b16 %v2374_v63  ;;  %2876 = vst.msk [vmem:[#allocation2 + $0x30] sm:$0xff] %vm10731_vm12, %v2809_v38  ;;  %v7436_v63 = vld [vmem:[#allocation2 + $0x24] sm:$0xf0] }
 0x2bb   : > { %v2438_v53 = vpack.c.bf16 %v2334_v61, %v2334_v61  ;;  %v2041_v45 = vrot.slane %v10290_v5, 7  ;;  %v2203_v50 = vrot.slane %v10303_v37, 1  ;;  %2877 = vst.msk [vmem:[#allocation2 + $0x3c] sm:$0xff] %vm10731_vm12, %v2810_v17  ;;  %vm11099_vm0 = vcmp.gt.s32.totalorder %v702_v36, 0 }
 0x2bc   : > { %v2501_v24 = vunpack.c.l.b16 %v2373_v22  ;;  %v2693_v14 = vunpack.c.l.b16 %v2437_v23  ;;  %v13809_v8 = vmov 0  ;;  %vm11103_vm15 = vcmp.lt.s32.totalorder %v709_v0, 15  ;;  %v8613_v22 = vld [vmem:[#allocation2 + $0x1c] sm:$0xf]  ;;  %v2644_v23 = vpop.permute.xlu2 %2643  ;;  %v7714_v62 = vld [vmem:[#allocation2 + $0x60] sm:$0xf] }
 0x2bd   : > { %v2694_v20 = vunpack.c.l.b16 %v2438_v53  ;;  %v13810_v8 = vsel %vm11099_vm0, 4294967295, %v13809_v8  ;;  %v13812_v25 = vmov 0  ;;  %v7435_v12 = vor.u32 %v8614_v44, %v7434_v57 }
 0x2be   : > { %v2526_v18 = vpack.c.b16 %v2502_v16, %v2501_v24  ;;  %13811 = vst [vmem:[#allocation40_spill] sm:$0xff] %v13810_v8  ;;  %v13813_v25 = vsel %vm11103_vm15, 4294967295, %v13812_v25  ;;  %vm13815_vm10 = vcmp.lt.s32.totalorder %v10586_v27, 1  ;;  %v13816_v52 = vrot.slane %v10034_v4, 7  ;;  %v8674_v34 = vld [vmem:[#allocation2 + $0x68] sm:$0xf0] }
 0x2bf   : > { %13814 = vst [vmem:[#allocation41_spill] sm:$0xff] %v13813_v25  ;;  %v2080_v9 = vsel %vm13815_vm10, %v2041_v45, %v2042_v31  ;;  %vm13817_vm5 = vmmov %vm13815_vm10  ;;  %vm13818_vm4 = vcmp.lt.s32.totalorder %v10586_v27, 7  ;;  %v13819_v51 = vrot.slane %v10290_v5, 1  ;;  %vm13821_vm2 = vcmask 523264   ;;  %3261 = vmatmul.bf16.vlgmr.msra.gmra.mxu2 %v7435_v12  ;;  %3528 = vmatmul.bf16.gmra.mxu1 %v7435_v12 }
 0x2c0   : > { %v2081_v37 = vsel %vm13817_vm5, %v13816_v52, %v2041_v45  ;;  %v2240_v59 = vsel %vm13818_vm4, %v2203_v50, %v2204_v40  ;;  %vm13820_vm11 = vmmov %vm13818_vm4  ;;  %v2734_v38 = vsel %vm13821_vm2, %v2526_v18, %v2630_v56  ;;  %v2372_v17 = vpack.c.bf16 %v2080_v9, %v2080_v9 }
 0x2c1   : > { %v2241_v61 = vsel %vm13820_vm11, %v13819_v51, %v2203_v50  ;;  %v2170_v31 = vsel %vm11099_vm0, %v2081_v37, 0.0  ;;  %v2332_v4 = vsel %vm11103_vm15, %v2240_v59, 0.0  ;;  %v2789_v40 = vunpack.c.l.b16 %v2734_v38  ;;  %vm13822_vm4 = vmmov %vm13821_vm2  ;;  %v13824_v51 = vld [vmem:[#allocation18_spill] sm:$0xff] }
 0x2c2   : > { %v2790_v53 = vunpack.c.h.b16 %v2734_v38  ;;  %v2371_v5 = vpack.c.bf16 %v2170_v31, %v2170_v31  ;;  %v2435_v57 = vpack.c.bf16 %v2241_v61, %v2241_v61  ;;  %v2755_v44 = vsel %vm13822_vm4, %v2533_v48, %v2644_v23  ;;  %vm13823_vm11 = vmmov %vm13821_vm2  ;;  %v2628_v48 = vpop.permute.xlu0 %2627 }
 0x2c3   : > { %v2436_v56 = vpack.c.bf16 %v2332_v4, %v2332_v4  ;;  %v2500_v24 = vunpack.c.l.b16 %v2372_v17  ;;  %v7439_v16 = vor.u32 %v8613_v22, %v7436_v63  ;;  %v2803_v36 = vunpack.c.l.b16 %v2755_v44  ;;  %vm13825_vm5 = vmmov %vm13821_vm2 }
 0x2c4   : > { %v2804_v0 = vunpack.c.h.b16 %v2755_v44  ;;  %v2821_v45 = vpack.c.b16 %v2693_v14, %v2789_v40  ;;  %v2822_v50 = vpack.c.b16 %v2694_v20, %v2790_v53  ;;  %v2499_v18 = vunpack.c.l.b16 %v2371_v5 }
 0x2c5   : > { %v2691_v9 = vunpack.c.l.b16 %v2435_v57  ;;  %v2692_v12 = vunpack.c.l.b16 %v2436_v56  ;;  %7608 = vmatmul.msk.bf16.vlgmr.msra.gmra.mxu3 %vm13821_vm2, %v7439_v16  ;;  %7681 = vmatmul.msk.bf16.gmra.mxu0 %vm13823_vm11, %v7439_v16  ;;  %v602_v52 = vadd.s32 160, %v10586_v27  ;;  %v2835_v49 = vpack.c.b16 %v10990_v41, %v2803_v36 }
 0x2c6   : > { %v2836_v7 = vpack.c.b16 %v10994_v1, %v2804_v0  ;;  %2888 = vst.msk [vmem:[#allocation2 + $0xc0] sm:$0xff] %vm10731_vm12, %v2821_v45  ;;  %v603_v14 = vadd.s32 168, %v10586_v27  ;;  %v2048_v20 = vrot.slane %v10433_v46, 7  ;;  %v2525_v37 = vpack.c.b16 %v2500_v24, %v2499_v18 }
 0x2c7   : > { %2889 = vst.msk [vmem:[#allocation2 + $0xcc] sm:$0xff] %vm10731_vm12, %v2822_v50  ;;  %v758_v59 = vand.u32 15, %v602_v52  ;;  %v2049_v61 = vrot.slane %v13824_v51, 7  ;;  %v2210_v22 = vrot.slane %v13824_v51, 1  ;;  %v2211_v1 = vrot.slane %v10387_v39, 1 }
 0x2c8   : > { %2902 = vst.msk [vmem:[#allocation2 + $0x168] sm:$0xff] %vm10731_vm12, %v2835_v49  ;;  %v765_v41 = vand.u32 15, %v603_v14  ;;  %v600_v63 = vadd.s32 144, %v10586_v27  ;;  %v601_v38 = vadd.s32 152, %v10586_v27  ;;  %v2731_v31 = vsel %vm13825_vm5, %v2525_v37, %v2628_v48  ;;  %v2636_v14 = vpop.permute.xlu1 %2635 }
 0x2c9   : > { %2903 = vst.msk [vmem:[#allocation2 + $0x174] sm:$0xff] %vm10731_vm12, %v2836_v7  ;;  %vm11149_vm10 = vcmp.gt.s32.totalorder %v758_v59, 0  ;;  %v13826_v4 = vmov 0  ;;  %v13829_v17 = vrot.slane %v10387_v39, 7  ;;  %vm13830_vm4 = vcmp.lt.s32.totalorder %v10586_v27, 1 }
 0x2ca   : > { %v13827_v4 = vsel %vm11149_vm10, 4294967295, %v13826_v4  ;;  %vm13831_vm2 = vmmov %vm13830_vm4  ;;  %v2787_v53 = vunpack.c.l.b16 %v2731_v31  ;;  %v2788_v5 = vunpack.c.h.b16 %v2731_v31  ;;  %vm11159_vm11 = vcmp.lt.s32.totalorder %v765_v41, 15 }
 0x2cb   : > { %13828 = vst [vmem:[#allocation18_spill] sm:$0xff] %v13827_v4  ;;  %v2072_v23 = vsel %vm13830_vm4, %v2049_v61, %v13829_v17  ;;  %v2073_v40 = vsel %vm13831_vm2, %v2048_v20, %v2049_v61  ;;  %v13832_v57 = vmov 0  ;;  %v13835_v56 = vrot.slane %v10340_v13, 1  ;;  %v7706_v4 = vld [vmem:[#allocation2 + $0x48] sm:$0xf] }
 0x2cc   : > { %v13833_v57 = vsel %vm11159_vm11, 4294967295, %v13832_v57  ;;  %v2178_v44 = vsel %vm11149_vm10, %v2073_v40, 0.0  ;;  %vm13836_vm5 = vcmp.lt.s32.totalorder %v10586_v27, 7  ;;  %v2380_v36 = vpack.c.bf16 %v2072_v23, %v2072_v23 }
 0x2cd   : > { %13834 = vst [vmem:[#allocation42_spill] sm:$0xff] %v13833_v57  ;;  %v2232_v39 = vsel %vm13836_vm5, %v2211_v1, %v13835_v56  ;;  %vm13837_vm15 = vmmov %vm13836_vm5  ;;  %v2379_v16 = vpack.c.bf16 %v2178_v44, %v2178_v44  ;;  %v2819_v0 = vpack.c.b16 %v2691_v9, %v2787_v53  ;;  %v2820_v45 = vpack.c.b16 %v2692_v12, %v2788_v5 }
 0x2ce   : > { %v2233_v24 = vsel %vm13837_vm15, %v2210_v22, %v2211_v1  ;;  %v2340_v50 = vsel %vm11159_vm11, %v2232_v39, 0.0  ;;  %v2508_v7 = vunpack.c.l.b16 %v2380_v36  ;;  %v744_v48 = vand.u32 15, %v600_v63  ;;  %vm13845_vm5 = vmmov %vm13831_vm2 }
 0x2cf   : > { %v2443_v18 = vpack.c.bf16 %v2233_v24, %v2233_v24  ;;  %v2444_v52 = vpack.c.bf16 %v2340_v50, %v2340_v50  ;;  %v2507_v49 = vunpack.c.l.b16 %v2379_v16  ;;  %2886 = vst.msk [vmem:[#allocation2 + $0xa8] sm:$0xff] %vm10731_vm12, %v2819_v0  ;;  %v751_v37 = vand.u32 15, %v601_v38 }
 0x2d0   : > { %v2047_v59 = vrot.slane %v10421_v3, 7  ;;  %v2209_v51 = vrot.slane %v10433_v46, 1  ;;  %2887 = vst.msk [vmem:[#allocation2 + $0xb4] sm:$0xff] %vm10731_vm12, %v2820_v45  ;;  %vm11179_vm15 = vcmp.gt.s32.totalorder %v744_v48, 0  ;;  %v13838_v61 = vmov 0 }
 0x2d1   : > { %v2699_v13 = vunpack.c.l.b16 %v2443_v18  ;;  %v2529_v9 = vpack.c.b16 %v2508_v7, %v2507_v49  ;;  %v2700_v12 = vunpack.c.l.b16 %v2444_v52  ;;  %v13839_v61 = vsel %vm11179_vm15, 4294967295, %v13838_v61  ;;  %v2634_v52 = vpop.permute.xlu0 %2633 }
 0x2d2   : > { %13840 = vst [vmem:[#allocation43_spill] sm:$0xff] %v13839_v61  ;;  %v608_v41 = vadd.s32 208, %v10586_v27  ;;  %vm11184_vm4 = vcmp.lt.s32.totalorder %v751_v37, 15  ;;  %v13841_v1 = vmov 0  ;;  %v2074_v63 = vsel %vm13831_vm2, %v2047_v59, %v2048_v20  ;;  %v8672_v61 = vld [vmem:[#allocation2 + $0x50] sm:$0xf0] }
 0x2d3   : > { %v13842_v1 = vsel %vm11184_vm4, 4294967295, %v13841_v1  ;;  %v13844_v46 = vrot.slane %v10170_v43, 7  ;;  %vm13846_vm11 = vcmp.lt.s32.totalorder %v10586_v27, 7  ;;  %vm13847_vm10 = vcmask 523264  }
 0x2d4   : > { %13843 = vst [vmem:[#allocation44_spill] sm:$0xff] %v13842_v1  ;;  %v2234_v31 = vsel %vm13846_vm11, %v2209_v51, %v2210_v22  ;;  %v2743_v17 = vsel %vm13847_vm10, %v2529_v9, %v2636_v14  ;;  %v13848_v40 = vrot.slane %v10421_v3, 1  ;;  %vm13849_vm14 = vmmov %vm13846_vm11  ;;  %v2378_v56 = vpack.c.bf16 %v2074_v63, %v2074_v63 }
 0x2d5   : > { %v2075_v38 = vsel %vm13845_vm5, %v13844_v46, %v2047_v59  ;;  %v2338_v20 = vsel %vm11184_vm4, %v2234_v31, 0.0  ;;  %v2795_v43 = vunpack.c.l.b16 %v2743_v17  ;;  %v2796_v5 = vunpack.c.h.b16 %v2743_v17  ;;  %vm13858_vm5 = vmmov %vm13831_vm2 }
 0x2d6   : > { %v2176_v23 = vsel %vm11179_vm15, %v2075_v38, 0.0  ;;  %v2235_v53 = vsel %vm13849_vm14, %v13848_v40, %v2209_v51  ;;  %v2442_v24 = vpack.c.bf16 %v2338_v20, %v2338_v20  ;;  %v609_v22 = vadd.s32 216, %v10586_v27 }
 0x2d7   : > { %v2377_v44 = vpack.c.bf16 %v2176_v23, %v2176_v23  ;;  %v2441_v39 = vpack.c.bf16 %v2235_v53, %v2235_v53  ;;  %v800_v16 = vand.u32 15, %v608_v41  ;;  %v2827_v36 = vpack.c.b16 %v2699_v13, %v2795_v43 }
 0x2d8   : > { %v2828_v0 = vpack.c.b16 %v2700_v12, %v2796_v5  ;;  %v2506_v50 = vunpack.c.l.b16 %v2378_v56  ;;  %v2698_v18 = vunpack.c.l.b16 %v2442_v24  ;;  %v807_v49 = vand.u32 15, %v609_v22  ;;  %v7442_v22 = vld [vmem:[#allocation2 + $0x30] sm:$0xf] }
 0x2d9   : > { %v2505_v45 = vunpack.c.l.b16 %v2377_v44  ;;  %v2697_v3 = vunpack.c.l.b16 %v2441_v39  ;;  %vm11206_vm14 = vcmp.gt.s32.totalorder %v800_v16, 0  ;;  %v13850_v7 = vmov 0  ;;  %2894 = vst.msk [vmem:[#allocation2 + $0x108] sm:$0xff] %vm10731_vm12, %v2827_v36  ;;  %v8707_v44 = vld [vmem:[#allocation6 + $0xf0] sm:$0xff]  ;;  %v8616_v16 = vld [vmem:[#allocation2 + $0x38] sm:$0xf0] }
 0x2da   : > { %v13851_v7 = vsel %vm11206_vm14, 4294967295, %v13850_v7  ;;  %v2054_v14 = vrot.slane %v10600_v54, 7  ;;  %v2055_v37 = vrot.slane %v10550_v42, 7  ;;  %v2216_v13 = vrot.slane %v10550_v42, 1  ;;  %2895 = vst.msk [vmem:[#allocation2 + $0x114] sm:$0xff] %vm10731_vm12, %v2828_v0  ;;  %4015 = vmatpush.bf16.msrb.mxu3 %v8707_v44 }
 0x2db   : > { %13852 = vst [vmem:[#allocation45_spill] sm:$0xff] %v13851_v7  ;;  %v2528_v48 = vpack.c.b16 %v2506_v50, %v2505_v45  ;;  %vm11217_vm10 = vcmp.lt.s32.totalorder %v807_v49, 15  ;;  %v13853_v59 = vmov 0  ;;  %v2217_v51 = vrot.slane %v10553_v32, 1  ;;  %v8615_v50 = vld [vmem:[#allocation2 + $0x34] sm:$0xf] }
 0x2dc   : > { %v13854_v59 = vsel %vm11217_vm10, 4294967295, %v13853_v59  ;;  %v606_v9 = vadd.s32 192, %v10586_v27  ;;  %v607_v12 = vadd.s32 200, %v10586_v27  ;;  %vm13856_vm11 = vcmask 523264  }
 0x2dd   : > { %13855 = vst [vmem:[#allocation46_spill] sm:$0xff] %v13854_v59  ;;  %v2740_v41 = vsel %vm13856_vm11, %v2528_v48, %v2634_v52  ;;  %v13857_v63 = vrot.slane %v10553_v32, 7  ;;  %v2067_v46 = vsel %vm13858_vm5, %v2054_v14, %v2055_v37  ;;  %v2053_v38 = vrot.slane %v10578_v35, 7  ;;  %v7444_v52 = vld [vmem:[#allocation2 + $0x3c] sm:$0xf0] }
 0x2de   : > { %v2793_v31 = vunpack.c.l.b16 %v2740_v41  ;;  %v2794_v17 = vunpack.c.h.b16 %v2740_v41  ;;  %v2184_v23 = vsel %vm11206_vm14, %v2067_v46, 0.0  ;;  %v13859_v40 = vrot.slane %v10519_v6, 1 }
 0x2df   : > { %v2066_v42 = vsel %vm13831_vm2, %v2055_v37, %v13857_v63  ;;  %vm13860_vm4 = vcmp.lt.s32.totalorder %v10586_v27, 7  ;;  %v2385_v43 = vpack.c.bf16 %v2184_v23, %v2184_v23  ;;  %v786_v6 = vand.u32 15, %v606_v9 }
 0x2e0   : > { %v2226_v53 = vsel %vm13860_vm4, %v2217_v51, %v13859_v40  ;;  %vm13861_vm11 = vmmov %vm13860_vm4  ;;  %v2386_v5 = vpack.c.bf16 %v2066_v42, %v2066_v42  ;;  %v2825_v56 = vpack.c.b16 %v2697_v3, %v2793_v31  ;;  %v2826_v39 = vpack.c.b16 %v2698_v18, %v2794_v17 }
 0x2e1   : > { %v2227_v32 = vsel %vm13861_vm11, %v2216_v13, %v2217_v51  ;;  %v2346_v20 = vsel %vm11217_vm10, %v2226_v53, 0.0  ;;  %v2513_v36 = vunpack.c.l.b16 %v2385_v43  ;;  %v793_v45 = vand.u32 15, %v607_v12  ;;  %vm13862_vm4 = vmmov %vm13831_vm2 }
 0x2e2   : > { %v2449_v24 = vpack.c.bf16 %v2227_v32, %v2227_v32  ;;  %v2514_v0 = vunpack.c.l.b16 %v2386_v5  ;;  %2892 = vst.msk [vmem:[#allocation2 + $0xf0] sm:$0xff] %vm10731_vm12, %v2825_v56  ;;  %v2450_v49 = vpack.c.bf16 %v2346_v20, %v2346_v20  ;;  %v2068_v48 = vsel %vm13862_vm4, %v2053_v38, %v2054_v14  ;;  %v2642_v14 = vpop.permute.xlu1 %2641 }
 0x2e3   : > { %v13863_v3 = vrot.slane %v10354_v2, 7  ;;  %2893 = vst.msk [vmem:[#allocation2 + $0xfc] sm:$0xff] %vm10731_vm12, %v2826_v39  ;;  %vm11252_vm5 = vcmp.gt.s32.totalorder %v786_v6, 0  ;;  %v13864_v51 = vmov 0  ;;  %vm11256_vm11 = vcmp.lt.s32.totalorder %v793_v45, 15 }
 0x2e4   : > { %v2532_v37 = vpack.c.b16 %v2514_v0, %v2513_v36  ;;  %v13865_v51 = vsel %vm11252_vm5, 4294967295, %v13864_v51  ;;  %v13867_v9 = vmov 0  ;;  %v2215_v12 = vrot.slane %v10600_v54, 1 }
 0x2e5   : > { %v2069_v18 = vsel %vm13831_vm2, %v13863_v3, %v2053_v38  ;;  %13866 = vst [vmem:[#allocation47_spill] sm:$0xff] %v13865_v51  ;;  %v13868_v9 = vsel %vm11256_vm11, 4294967295, %v13867_v9  ;;  %v2384_v41 = vpack.c.bf16 %v2068_v48, %v2068_v48  ;;  %v7443_v63 = vor.u32 %v8616_v16, %v7442_v22 }
 0x2e6   : > { %13869 = vst [vmem:[#allocation48_spill] sm:$0xff] %v13868_v9  ;;  %v2182_v2 = vsel %vm11252_vm5, %v2069_v18, 0.0  ;;  %v7447_v42 = vor.u32 %v8615_v50, %v7444_v52  ;;  %v2705_v46 = vunpack.c.l.b16 %v2449_v24  ;;  %vm13870_vm4 = vcmask 523264   ;;  %v2640_v50 = vpop.permute.xlu0 %2639 }
 0x2e7   : > { %v2752_v38 = vsel %vm13870_vm4, %v2532_v37, %v2642_v14  ;;  %vm13871_vm2 = vcmp.lt.s32.totalorder %v10586_v27, 7  ;;  %v2383_v17 = vpack.c.bf16 %v2182_v2, %v2182_v2  ;;  %v2706_v23 = vunpack.c.l.b16 %v2450_v49  ;;  %3266 = vmatmul.bf16.gmra.mxu2 %v7443_v63  ;;  %vm13874_vm14 = vmmov %vm13870_vm4  ;;  %3533 = vmatmul.bf16.gmra.mxu1 %v7443_v63 }
 0x2e8   : > { %v2228_v31 = vsel %vm13871_vm2, %v2215_v12, %v2216_v13  ;;  %v2801_v40 = vunpack.c.l.b16 %v2752_v38  ;;  %v2802_v53 = vunpack.c.h.b16 %v2752_v38  ;;  %v13872_v32 = vrot.slane %v10578_v35, 1  ;;  %vm13873_vm10 = vmmov %vm13871_vm2  ;;  %7609 = vmatmul.msk.bf16.gmra.mxu3 %vm13874_vm14, %v7447_v42  ;;  %7682 = vmatmul.msk.bf16.gmra.mxu0 %vm13870_vm4, %v7447_v42 }
 0x2e9   : > { %v2344_v20 = vsel %vm11256_vm11, %v2228_v31, 0.0  ;;  %v2511_v43 = vunpack.c.l.b16 %v2383_v17  ;;  %v2512_v5 = vunpack.c.l.b16 %v2384_v41  ;;  %v612_v13 = vadd.s32 240, %v10586_v27 }
 0x2ea   : > { %v2229_v54 = vsel %vm13873_vm10, %v13872_v32, %v2215_v12  ;;  %v2833_v44 = vpack.c.b16 %v2705_v46, %v2801_v40  ;;  %v2834_v56 = vpack.c.b16 %v2706_v23, %v2802_v53  ;;  %v613_v35 = vadd.s32 248, %v10586_v27  ;;  %v8618_v23 = vld [vmem:[#allocation2 + $0x50] sm:$0xf0]  ;;  %v8617_v40 = vld [vmem:[#allocation2 + $0x4c] sm:$0xf] }
 0x2eb   : > { %v828_v39 = vand.u32 15, %v612_v13  ;;  %v2059_v24 = vrot.slane %v10676_v28, 7  ;;  %v2447_v22 = vpack.c.bf16 %v2229_v54, %v2229_v54  ;;  %v2448_v16 = vpack.c.bf16 %v2344_v20, %v2344_v20  ;;  %v7452_v53 = vld [vmem:[#allocation2 + $0x54] sm:$0xf0] }
 0x2ec   : > { %2900 = vst.msk [vmem:[#allocation2 + $0x150] sm:$0xff] %vm10731_vm12, %v2833_v44  ;;  %v2531_v36 = vpack.c.b16 %v2512_v5, %v2511_v43  ;;  %v13875_v0 = vmov 0  ;;  %v13878_v6 = vrot.slane %v10522_v19, 7  ;;  %vm13879_vm10 = vcmp.lt.s32.totalorder %v10586_v27, 1 }
 0x2ed   : > { %2901 = vst.msk [vmem:[#allocation2 + $0x15c] sm:$0xff] %vm10731_vm12, %v2834_v56  ;;  %vm11281_vm14 = vcmp.gt.s32.totalorder %v828_v39, 0  ;;  %v835_v52 = vand.u32 15, %v613_v35  ;;  %v13880_v49 = vrot.slane %v10694_v29, 7  ;;  %vm13881_vm2 = vmmov %vm13879_vm10  ;;  %v2221_v18 = vrot.slane %v10694_v29, 1  ;;  %v8711_v39 = vld [vmem:[#allocation6 + $0x110] sm:$0xff] }
 0x2ee   : > { %v13876_v0 = vsel %vm11281_vm14, 4294967295, %v13875_v0  ;;  %v2063_v45 = vsel %vm13879_vm10, %v13878_v6, %v2059_v24  ;;  %v2749_v37 = vsel %vm13870_vm4, %v2531_v36, %v2640_v50  ;;  %v2703_v12 = vunpack.c.l.b16 %v2447_v22  ;;  %v7450_v29 = vld [vmem:[#allocation2 + $0x48] sm:$0xf]  ;;  %4108 = vmatpush.bf16.msra.mxu0 %v8711_v39  ;;  %v8627_v39 = vld [vmem:[#allocation2 + $0xc4] sm:$0xf] }
 0x2ef   : > { %13877 = vst [vmem:[#allocation49_spill] sm:$0xff] %v13876_v0  ;;  %v2062_v48 = vsel %vm13881_vm2, %v2059_v24, %v13880_v49  ;;  %v2188_v3 = vsel %vm11281_vm14, %v2063_v45, 0.0  ;;  %v2704_v14 = vunpack.c.l.b16 %v2448_v16  ;;  %v2799_v19 = vunpack.c.l.b16 %v2749_v37  ;;  %v2646_v24 = vpop.permute.xlu0 %2645  ;;  %v7458_v49 = vld [vmem:[#allocation2 + $0x60] sm:$0xf] }
 0x2f0   : > { %v2800_v2 = vunpack.c.h.b16 %v2749_v37  ;;  %v2389_v41 = vpack.c.bf16 %v2188_v3, %v2188_v3  ;;  %v2390_v63 = vpack.c.bf16 %v2062_v48, %v2062_v48  ;;  %vm11297_vm10 = vcmp.lt.s32.totalorder %v835_v52, 15  ;;  %v8620_v48 = vld [vmem:[#allocation2 + $0x68] sm:$0xf0]  ;;  %v8619_v3 = vld [vmem:[#allocation2 + $0x64] sm:$0xf] }
 0x2f1   : > { %v2831_v42 = vpack.c.b16 %v2703_v12, %v2799_v19  ;;  %v13882_v38 = vmov 0  ;;  %v13885_v31 = vrot.slane %v9933_v60, 1  ;;  %vm13886_vm2 = vcmp.lt.s32.totalorder %v10586_v27, 7  ;;  %v8622_v19 = vld [vmem:[#allocation2 + $0x80] sm:$0xf0] }
 0x2f2   : > { %v2832_v46 = vpack.c.b16 %v2704_v14, %v2800_v2  ;;  %v13883_v38 = vsel %vm11297_vm10, 4294967295, %v13882_v38  ;;  %v13887_v32 = vrot.slane %v10676_v28, 1  ;;  %vm13888_vm4 = vmmov %vm13886_vm2  ;;  %v2517_v20 = vunpack.c.l.b16 %v2389_v41  ;;  %v8706_v28 = vld [vmem:[#allocation6 + $0xe8] sm:$0xff]  ;;  %v7468_v41 = vld [vmem:[#allocation2 + $0x84] sm:$0xf0] }
 0x2f3   : > { %13884 = vst [vmem:[#allocation50_spill] sm:$0xff] %v13883_v38  ;;  %v2254_v17 = vsel %vm13886_vm2, %v2221_v18, %v13885_v31  ;;  %v2518_v60 = vunpack.c.l.b16 %v2390_v63  ;;  %v7451_v5 = vor.u32 %v8618_v23, %v7450_v29  ;;  %v7455_v13 = vor.u32 %v8617_v40, %v7452_v53  ;;  %4016 = vmatpush.bf16.msrb.mxu3 %v8706_v28  ;;  %v7466_v14 = vld [vmem:[#allocation2 + $0x78] sm:$0xf]  ;;  %v8621_v2 = vld [vmem:[#allocation2 + $0x7c] sm:$0xf] }
 0x2f4   : > { %2898 = vst.msk [vmem:[#allocation2 + $0x138] sm:$0xff] %vm10731_vm12, %v2831_v42  ;;  %v2223_v54 = vsel %vm13888_vm4, %v13887_v32, %v2221_v18  ;;  %v2350_v43 = vsel %vm11297_vm10, %v2254_v17, 0.0  ;;  %vm13889_vm2 = vcmask 523264   ;;  %v7460_v18 = vld [vmem:[#allocation2 + $0x6c] sm:$0xf0]  ;;  %v7459_v37 = vor.u32 %v8620_v48, %v7458_v49 }
 0x2f5   : > { %2899 = vst.msk [vmem:[#allocation2 + $0x144] sm:$0xff] %vm10731_vm12, %v2832_v46  ;;  %v2453_v44 = vpack.c.bf16 %v2223_v54, %v2223_v54  ;;  %v2454_v56 = vpack.c.bf16 %v2350_v43, %v2350_v43  ;;  %v2534_v35 = vpack.c.b16 %v2518_v60, %v2517_v20  ;;  %vm13890_vm11 = vmmov %vm13889_vm2  ;;  %v7463_v12 = vor.u32 %v8619_v3, %v7460_v18  ;;  %v7474_v46 = vld [vmem:[#allocation2 + $0x90] sm:$0xf]  ;;  %v8624_v31 = vld [vmem:[#allocation2 + $0x98] sm:$0xf0] }
 0x2f6   : > { %vm13891_vm4 = vmmov %vm13889_vm2  ;;  %v7467_v63 = vor.u32 %v8622_v19, %v7466_v14  ;;  %v7471_v42 = vor.u32 %v8621_v2, %v7468_v41  ;;  %v8623_v17 = vld [vmem:[#allocation2 + $0x94] sm:$0xf]  ;;  %v7476_v29 = vld [vmem:[#allocation2 + $0x9c] sm:$0xf0]  ;;  %v7475_v23 = vor.u32 %v8624_v31, %v7474_v46 }
 0x2f7   : > { %3271 = vmatmul.bf16.gmra.mxu2 %v7451_v5  ;;  %3538 = vmatmul.bf16.gmra.mxu1 %v7451_v5  ;;  %v2758_v22 = vsel %vm13891_vm4, %v2534_v35, %v2646_v24  ;;  %v2709_v16 = vunpack.c.l.b16 %v2453_v44  ;;  %v2710_v36 = vunpack.c.l.b16 %v2454_v56  ;;  %vm13894_vm4 = vmmov %vm13889_vm2  ;;  %v7479_v40 = vor.u32 %v8623_v17, %v7476_v29  ;;  %v7482_v53 = vld [vmem:[#allocation2 + $0xa8] sm:$0xf]  ;;  %v8626_v32 = vld [vmem:[#allocation2 + $0xb0] sm:$0xf0] }
 0x2f8   : > { %7610 = vmatmul.msk.bf16.gmra.mxu3 %vm13889_vm2, %v7455_v13  ;;  %7683 = vmatmul.msk.bf16.gmra.mxu0 %vm13890_vm11, %v7455_v13  ;;  %v2805_v6 = vunpack.c.l.b16 %v2758_v22  ;;  %v2806_v45 = vunpack.c.h.b16 %v2758_v22  ;;  %vm13892_vm11 = vmmov %vm13889_vm2  ;;  %v8625_v54 = vld [vmem:[#allocation2 + $0xac] sm:$0xf]  ;;  %v7484_v20 = vld [vmem:[#allocation2 + $0xb4] sm:$0xf0]  ;;  %v7483_v60 = vor.u32 %v8626_v32, %v7482_v53 }
 0x2f9   : > { %4017 = vmatpush.bf16.msrb.mxu3 %v8705_v10  ;;  %v7487_v43 = vor.u32 %v8625_v54, %v7484_v20  ;;  %v8704_v5 = vld [vmem:[#allocation6 + $0xd8] sm:$0xff]  ;;  %v8710_v13 = vld [vmem:[#allocation6 + $0x108] sm:$0xff]  ;;  %v7490_v35 = vld [vmem:[#allocation2 + $0xc0] sm:$0xf] }
 0x2fa   : > { %v2837_v50 = vpack.c.b16 %v2709_v16, %v2805_v6  ;;  %v2838_v52 = vpack.c.b16 %v2710_v36, %v2806_v45  ;;  %4109 = vmatpush.bf16.msra.mxu0 %v8710_v13  ;;  %v8628_v28 = vld [vmem:[#allocation2 + $0xc8] sm:$0xf0]  ;;  %v7492_v24 = vld [vmem:[#allocation2 + $0xcc] sm:$0xf0]  ;;  %v7498_v3 = vld [vmem:[#allocation2 + $0xd8] sm:$0xf] }
 0x2fb   : > { %v7491_v22 = vor.u32 %v8628_v28, %v7490_v35  ;;  %v7495_v16 = vor.u32 %v8627_v39, %v7492_v24  ;;  %v7500_v14 = vld [vmem:[#allocation2 + $0xe4] sm:$0xf0]  ;;  %v8703_v10 = vld [vmem:[#allocation6 + $0xd0] sm:$0xff]  ;;  %v7506_v17 = vld [vmem:[#allocation2 + $0xf0] sm:$0xf] }
 0x2fc   : > { %2904 = vst.msk [vmem:[#allocation2 + $0x180] sm:$0xff] %vm10731_vm12, %v2837_v50  ;;  %v8632_v29 = vld [vmem:[#allocation2 + $0xf8] sm:$0xf0]  ;;  %v7514_v28 = vld [vmem:[#allocation2 + $0x108] sm:$0xf] }
 0x2fd   : > { %2905 = vst.msk [vmem:[#allocation2 + $0x18c] sm:$0xff] %vm10731_vm12, %v2838_v52  ;;  %vm13893_vm12 = vmmov %vm13889_vm2  ;;  %4018 = vmatpush.bf16.msrb.mxu3 %v8704_v5  ;;  %v7507_v54 = vor.u32 %v8632_v29, %v7506_v17  ;;  %v8709_v17 = vld [vmem:[#allocation6 + $0x100] sm:$0xff]  ;;  %v7522_v29 = vld [vmem:[#allocation2 + $0x120] sm:$0xf] }
 0x2fe   : > { %4110 = vmatpush.bf16.msra.mxu0 %v8709_v17  ;;  %v7532_v17 = vld [vmem:[#allocation2 + $0x144] sm:$0xf0] }
 0x301   : > { %4019 = vmatpush.bf16.msrb.mxu3 %v8703_v10 }
 0x305   : > { %v3524_v44 = vpop.f32.mrf.mxu1  ;;  %v11330_v56 = vpop.f32.mrf.mxu0 }
 0x307   : > { %3276 = vmatmul.bf16.gmra.mxu2 %v7459_v37  ;;  %3543 = vmatmul.bf16.gmra.mxu1 %v7459_v37  ;;  %v8630_v37 = vld [vmem:[#allocation2 + $0xe0] sm:$0xf0] }
 0x308   : > { %7611 = vmatmul.msk.bf16.gmra.mxu3 %vm13892_vm11, %v7463_v12  ;;  %7684 = vmatmul.msk.bf16.gmra.mxu0 %vm13889_vm2, %v7463_v12  ;;  %vm13895_vm11 = vmmov %vm13889_vm2  ;;  %v8629_v12 = vld [vmem:[#allocation2 + $0xdc] sm:$0xf]  ;;  %v7499_v2 = vor.u32 %v8630_v37, %v7498_v3 }
 0x309   : > { %v7503_v41 = vor.u32 %v8629_v12, %v7500_v14 }
 0x30d   : > { %v11333_v36 = vpop.f32.mrf.mxu1  ;;  %v11335_v6 = vpop.f32.mrf.mxu0 }
 0x317   : > { %3281 = vmatmul.bf16.gmra.mxu2 %v7467_v63  ;;  %3548 = vmatmul.bf16.gmra.mxu1 %v7467_v63 }
 0x318   : > { %7612 = vmatmul.msk.bf16.gmra.mxu3 %vm13893_vm12, %v7471_v42  ;;  %7685 = vmatmul.msk.bf16.gmra.mxu0 %vm13894_vm4, %v7471_v42  ;;  %vm13896_vm12 = vmmov %vm13889_vm2 }
 0x319   : > { %vm13897_vm4 = vmmov %vm13889_vm2 }
 0x327   : > { %3286 = vmatmul.bf16.gmra.mxu2 %v7475_v23  ;;  %3553 = vmatmul.bf16.gmra.mxu1 %v7475_v23  ;;  %v8631_v23 = vld [vmem:[#allocation2 + $0xf4] sm:$0xf] }
 0x328   : > { %7613 = vmatmul.msk.bf16.gmra.mxu3 %vm13895_vm11, %v7479_v40  ;;  %7686 = vmatmul.msk.bf16.gmra.mxu0 %vm13889_vm2, %v7479_v40  ;;  %vm13898_vm11 = vmmov %vm13889_vm2  ;;  %v7508_v40 = vld [vmem:[#allocation2 + $0xfc] sm:$0xf0] }
 0x329   : > { %v7511_v20 = vor.u32 %v8631_v23, %v7508_v40 }
 0x337   : > { %3291 = vmatmul.bf16.gmra.mxu2 %v7483_v60  ;;  %3558 = vmatmul.bf16.gmra.mxu1 %v7483_v60 }
 0x338   : > { %7614 = vmatmul.msk.bf16.gmra.mxu3 %vm13896_vm12, %v7487_v43  ;;  %7687 = vmatmul.msk.bf16.gmra.mxu0 %vm13897_vm4, %v7487_v43  ;;  %vm13899_vm12 = vmmov %vm13889_vm2 }
 0x339   : > { %vm13900_vm4 = vmmov %vm13889_vm2 }
 0x33c   : > { %v3529_v49 = vpop.f32.mrf.mxu1 }
 0x342   : > { %v3262_v45 = vpop.f32.mrf.mxu2  ;;  %v11338_v48 = vpop.f32.mrf.mxu0 }
 0x344   : > { %v3531_v46 = vpop.f32.mrf.mxu1 }
 0x347   : > { %3296 = vmatmul.bf16.gmra.mxu2 %v7491_v22  ;;  %3563 = vmatmul.bf16.gmra.mxu1 %v7491_v22  ;;  %v8634_v22 = vld [vmem:[#allocation2 + $0x110] sm:$0xf0] }
 0x348   : > { %7615 = vmatmul.msk.bf16.gmra.mxu3 %vm13898_vm11, %v7495_v16  ;;  %7688 = vmatmul.msk.bf16.gmra.mxu0 %vm13889_vm2, %v7495_v16  ;;  %v3351_v50 = vpop.f32.mrf.mxu3  ;;  %vm13901_vm11 = vmmov %vm13889_vm2  ;;  %v8633_v16 = vld [vmem:[#allocation2 + $0x10c] sm:$0xf]  ;;  %v7515_v12 = vor.u32 %v8634_v22, %v7514_v28 }
 0x349   : > { %v3352_v52 = vadd.f32 %v3351_v50, %v3262_v45  ;;  %v7516_v45 = vld [vmem:[#allocation2 + $0x114] sm:$0xf0] }
 0x34a   : > { %v3264_v19 = vpop.f32.mrf.mxu2  ;;  %v11346_v31 = vpop.f32.mrf.mxu0  ;;  %v7519_v14 = vor.u32 %v8633_v16, %v7516_v45 }
 0x34b   : > { %v11340_v18 = vadd.f32 %v3524_v44, %v3352_v52 }
 0x350   : > { %v3353_v63 = vpop.f32.mrf.mxu3 }
 0x351   : > { %v11343_v42 = vadd.f32 %v3353_v63, %v3264_v19 }
 0x357   : > { %3301 = vmatmul.bf16.gmra.mxu2 %v7499_v2  ;;  %3568 = vmatmul.bf16.gmra.mxu1 %v7499_v2 }
 0x358   : > { %7616 = vmatmul.msk.bf16.gmra.mxu3 %vm13899_vm12, %v7503_v41  ;;  %7689 = vmatmul.msk.bf16.gmra.mxu0 %vm13900_vm4, %v7503_v41  ;;  %vm13902_vm12 = vmmov %vm13889_vm2 }
 0x359   : > { %vm13903_vm4 = vmmov %vm13889_vm2 }
 0x364   : > { %v3534_v53 = vpop.f32.mrf.mxu1 }
 0x365   : > { %v11348_v32 = vpop.f32.mrf.mxu0 }
 0x367   : > { %3306 = vmatmul.bf16.gmra.mxu2 %v7507_v54  ;;  %3573 = vmatmul.bf16.gmra.mxu1 %v7507_v54  ;;  %v8636_v54 = vld [vmem:[#allocation2 + $0x128] sm:$0xf0] }
 0x368   : > { %7617 = vmatmul.msk.bf16.gmra.mxu3 %vm13901_vm11, %v7511_v20  ;;  %7690 = vmatmul.msk.bf16.gmra.mxu0 %vm13889_vm2, %v7511_v20  ;;  %v8635_v20 = vld [vmem:[#allocation2 + $0x124] sm:$0xf]  ;;  %vm13904_vm11 = vmmov %vm13889_vm2 }
 0x36a   : > { %v3267_v60 = vpop.f32.mrf.mxu2 }
 0x36b   : > { %v3356_v43 = vpop.f32.mrf.mxu3 }
 0x36c   : > { %v3357_v5 = vadd.f32 %v3356_v43, %v3267_v60  ;;  %v3536_v44 = vpop.f32.mrf.mxu1  ;;  %v7524_v60 = vld [vmem:[#allocation2 + $0x12c] sm:$0xf0] }
 0x36d   : > { %v11354_v35 = vpop.f32.mrf.mxu0  ;;  %v7527_v22 = vor.u32 %v8635_v20, %v7524_v60 }
 0x36e   : > { %v11352_v13 = vadd.f32 %v3529_v49, %v3357_v5  ;;  %v8702_v49 = vld [vmem:[#allocation6 + $0xc8] sm:$0xff] }
 0x36f   : > { %4020 = vmatpush.bf16.msrb.mxu3 %v8702_v49 }
 0x372   : > { %v3269_v39 = vpop.f32.mrf.mxu2 }
 0x373   : > { %v3358_v24 = vpop.f32.mrf.mxu3 }
 0x374   : > { %v3359_v50 = vadd.f32 %v3358_v24, %v3269_v39  ;;  %v3539_v3 = vpop.f32.mrf.mxu1  ;;  %v7523_v24 = vor.u32 %v8636_v54, %v7522_v29 }
 0x375   : > { %v11358_v37 = vpop.f32.mrf.mxu0 }
 0x376   : > { %v11356_v52 = vadd.f32 %v3531_v46, %v3359_v50 }
 0x377   : > { %3311 = vmatmul.bf16.gmra.mxu2 %v7515_v12  ;;  %3578 = vmatmul.bf16.gmra.mxu1 %v7515_v12 }
 0x378   : > { %7618 = vmatmul.msk.bf16.gmra.mxu3 %vm13902_vm12, %v7519_v14  ;;  %7691 = vmatmul.msk.bf16.gmra.mxu0 %vm13903_vm4, %v7519_v14  ;;  %vm13905_vm12 = vmmov %vm13889_vm2 }
 0x379   : > { %vm13906_vm4 = vmmov %vm13889_vm2 }
 0x37a   : > { %v3272_v19 = vpop.f32.mrf.mxu2 }
 0x37b   : > { %v3361_v2 = vpop.f32.mrf.mxu3 }
 0x37c   : > { %v3362_v41 = vadd.f32 %v3361_v2, %v3272_v19  ;;  %v3541_v10 = vpop.f32.mrf.mxu1  ;;  %v8638_v2 = vld [vmem:[#allocation2 + $0x140] sm:$0xf0] }
 0x37d   : > { %v11364_v46 = vpop.f32.mrf.mxu0 }
 0x37e   : > { %v11362_v63 = vadd.f32 %v3534_v53, %v3362_v41  ;;  %v8637_v41 = vld [vmem:[#allocation2 + $0x13c] sm:$0xf] }
 0x37f   : > { %v7535_v60 = vor.u32 %v8637_v41, %v7532_v17  ;;  %v8639_v41 = vld [vmem:[#allocation2 + $0x154] sm:$0xf]  ;;  %v7540_v17 = vld [vmem:[#allocation2 + $0x15c] sm:$0xf0] }
 0x382   : > { %v3274_v23 = vpop.f32.mrf.mxu2 }
 0x383   : > { %v3363_v40 = vpop.f32.mrf.mxu3 }
 0x384   : > { %v3364_v43 = vadd.f32 %v3363_v40, %v3274_v23  ;;  %v3544_v28 = vpop.f32.mrf.mxu1 }
 0x385   : > { %v3633_v39 = vpop.f32.mrf.mxu0 }
 0x386   : > { %v11366_v5 = vadd.f32 %v3536_v44, %v3364_v43  ;;  %v7530_v44 = vld [vmem:[#allocation2 + $0x138] sm:$0xf] }
 0x387   : > { %3316 = vmatmul.bf16.gmra.mxu2 %v7523_v24  ;;  %3583 = vmatmul.bf16.gmra.mxu1 %v7523_v24  ;;  %v7531_v20 = vor.u32 %v8638_v2, %v7530_v44  ;;  %v7538_v44 = vld [vmem:[#allocation2 + $0x150] sm:$0xf]  ;;  %v8640_v2 = vld [vmem:[#allocation2 + $0x158] sm:$0xf0] }
 0x388   : > { %7619 = vmatmul.msk.bf16.gmra.mxu3 %vm13904_vm11, %v7527_v22  ;;  %7692 = vmatmul.msk.bf16.gmra.mxu0 %vm13889_vm2, %v7527_v22  ;;  %v7539_v38 = vor.u32 %v8640_v2, %v7538_v44  ;;  %vm13907_vm11 = vmmov %vm13889_vm2  ;;  %v8642_v2 = vld [vmem:[#allocation2 + $0x170] sm:$0xf0] }
 0x38a   : > { %v3277_v53 = vpop.f32.mrf.mxu2 }
 0x38b   : > { %v3366_v16 = vpop.f32.mrf.mxu3 }
 0x38c   : > { %v3367_v45 = vadd.f32 %v3366_v16, %v3277_v53  ;;  %v11372_v12 = vpop.f32.mrf.mxu1 }
 0x38d   : > { %v11374_v14 = vpop.f32.mrf.mxu0 }
 0x38e   : > { %v11370_v50 = vadd.f32 %v3539_v3, %v3367_v45  ;;  %v8701_v3 = vld [vmem:[#allocation6 + $0xc0] sm:$0xff] }
 0x38f   : > { %4021 = vmatpush.bf16.msrb.mxu3 %v8701_v3  ;;  %v7543_v3 = vor.u32 %v8639_v41, %v7540_v17  ;;  %v8641_v41 = vld [vmem:[#allocation2 + $0x16c] sm:$0xf]  ;;  %v7548_v17 = vld [vmem:[#allocation2 + $0x174] sm:$0xf0] }
 0x390   : > { %v7551_v57 = vor.u32 %v8641_v41, %v7548_v17  ;;  %v8655_v41 = vld [vmem:[#allocation2 + $0x184] sm:$0xf]  ;;  %v7556_v17 = vld [vmem:[#allocation2 + $0x18c] sm:$0xf0] }
 0x392   : > { %v3279_v49 = vpop.f32.mrf.mxu2 }
 0x393   : > { %v3368_v19 = vpop.f32.mrf.mxu3 }
 0x394   : > { %v3369_v29 = vadd.f32 %v3368_v19, %v3279_v49  ;;  %v3549_v40 = vpop.f32.mrf.mxu1 }
 0x395   : > { %v3638_v54 = vpop.f32.mrf.mxu0 }
 0x396   : > { %v11376_v23 = vadd.f32 %v3541_v10, %v3369_v29 }
 0x397   : > { %3321 = vmatmul.bf16.gmra.mxu2 %v7531_v20  ;;  %3588 = vmatmul.bf16.gmra.mxu1 %v7531_v20 }
 0x398   : > { %7620 = vmatmul.msk.bf16.gmra.mxu3 %vm13905_vm12, %v7535_v60  ;;  %7693 = vmatmul.msk.bf16.gmra.mxu0 %vm13906_vm4, %v7535_v60  ;;  %vm13908_vm12 = vmmov %vm13889_vm2 }
 0x399   : > { %vm13909_vm4 = vmmov %vm13889_vm2 }
 0x39a   : > { %v3282_v43 = vpop.f32.mrf.mxu2 }
 0x39b   : > { %v3371_v24 = vpop.f32.mrf.mxu3 }
 0x39c   : > { %v3372_v22 = vadd.f32 %v3371_v24, %v3282_v43  ;;  %v11380_v16 = vpop.f32.mrf.mxu1 }
 0x39d   : > { %v11382_v10 = vpop.f32.mrf.mxu0 }
 0x39e   : > { %v3545_v53 = vadd.f32 %v3544_v28, %v3372_v22 }
 0x3a0   : > { %v11384_v45 = vadd.f32 %v3633_v39, %v3545_v53 }
 0x3a2   : > { %v3284_v49 = vpop.f32.mrf.mxu2 }
 0x3a3   : > { %v3373_v19 = vpop.f32.mrf.mxu3 }
 0x3a4   : > { %v11386_v29 = vadd.f32 %v3373_v19, %v3284_v49  ;;  %v3554_v20 = vpop.f32.mrf.mxu1  ;;  %v7546_v19 = vld [vmem:[#allocation2 + $0x168] sm:$0xf] }
 0x3a5   : > { %v3643_v60 = vpop.f32.mrf.mxu0  ;;  %v7547_v9 = vor.u32 %v8642_v2, %v7546_v19  ;;  %v8656_v2 = vld [vmem:[#allocation2 + $0x188] sm:$0xf0] }
 0x3a7   : > { %3326 = vmatmul.bf16.gmra.mxu2 %v7539_v38  ;;  %3593 = vmatmul.bf16.gmra.mxu1 %v7539_v38 }
 0x3a8   : > { %7621 = vmatmul.msk.bf16.gmra.mxu3 %vm13907_vm11, %v7543_v3  ;;  %7694 = vmatmul.msk.bf16.gmra.mxu0 %vm13889_vm2, %v7543_v3  ;;  %vm13910_vm11 = vmmov %vm13889_vm2 }
 0x3aa   : > { %v3287_v28 = vpop.f32.mrf.mxu2 }
 0x3ab   : > { %v3376_v39 = vpop.f32.mrf.mxu3 }
 0x3ac   : > { %v3377_v43 = vadd.f32 %v3376_v39, %v3287_v28  ;;  %v11390_v22 = vpop.f32.mrf.mxu1 }
 0x3ad   : > { %v11392_v53 = vpop.f32.mrf.mxu0 }
 0x3ae   : > { %v3550_v24 = vadd.f32 %v3549_v40, %v3377_v43 }
 0x3b0   : > { %v11394_v49 = vadd.f32 %v3638_v54, %v3550_v24 }
 0x3b2   : > { %v3289_v55 = vpop.f32.mrf.mxu2 }
 0x3b3   : > { %v3378_v44 = vpop.f32.mrf.mxu3 }
 0x3b4   : > { %v11396_v59 = vadd.f32 %v3378_v44, %v3289_v55  ;;  %v3559_v38 = vpop.f32.mrf.mxu1  ;;  %v7554_v44 = vld [vmem:[#allocation2 + $0x180] sm:$0xf] }
 0x3b5   : > { %v3648_v3 = vpop.f32.mrf.mxu0 }
 0x3b7   : > { %3331 = vmatmul.bf16.gmra.mxu2 %v7547_v9  ;;  %3598 = vmatmul.bf16.gmra.mxu1 %v7547_v9  ;;  %v8669_v9 = vld [vmem:[#allocation2 + $0x34] sm:$0xf] }
 0x3b8   : > { %7622 = vmatmul.msk.bf16.gmra.mxu3 %vm13908_vm12, %v7551_v57  ;;  %7695 = vmatmul.msk.bf16.gmra.mxu0 %vm13909_vm4, %v7551_v57  ;;  %v7700_v57 = vld [vmem:[#allocation2 + $0x3c] sm:$0xf0]  ;;  %vm13911_vm12 = vmmov %vm13889_vm2 }
 0x3b9   : > { %vm13912_vm4 = vmmov %vm13889_vm2 }
 0x3ba   : > { %v3292_v40 = vpop.f32.mrf.mxu2 }
 0x3bb   : > { %v3381_v54 = vpop.f32.mrf.mxu3 }
 0x3bc   : > { %v3382_v28 = vadd.f32 %v3381_v54, %v3292_v40  ;;  %v11400_v43 = vpop.f32.mrf.mxu1  ;;  %v7555_v40 = vor.u32 %v8656_v2, %v7554_v44  ;;  %v7703_v54 = vor.u32 %v8669_v9, %v7700_v57  ;;  %v7698_v44 = vld [vmem:[#allocation2 + $0x30] sm:$0xf]  ;;  %v8670_v2 = vld [vmem:[#allocation2 + $0x38] sm:$0xf0]  ;;  %v7708_v9 = vld [vmem:[#allocation2 + $0x54] sm:$0xf0] }
 0x3bd   : > { %v11402_v24 = vpop.f32.mrf.mxu0 }
 0x3be   : > { %v3555_v39 = vadd.f32 %v3554_v20, %v3382_v28  ;;  %v7559_v20 = vor.u32 %v8655_v41, %v7556_v17  ;;  %v8671_v17 = vld [vmem:[#allocation2 + $0x4c] sm:$0xf] }
 0x3c0   : > { %v11404_v55 = vadd.f32 %v3643_v60, %v3555_v39 }
 0x3c2   : > { %v3294_v1 = vpop.f32.mrf.mxu2 }
 0x3c3   : > { %v3383_v19 = vpop.f32.mrf.mxu3 }
 0x3c4   : > { %v11406_v15 = vadd.f32 %v3383_v19, %v3294_v1  ;;  %v3564_v25 = vpop.f32.mrf.mxu1 }
 0x3c5   : > { %v3653_v26 = vpop.f32.mrf.mxu0 }
 0x3c7   : > { %3336 = vmatmul.bf16.gmra.mxu2 %v7555_v40 }
 0x3c8   : > { %7623 = vmatmul.msk.bf16.gmra.mxu3 %vm13910_vm11, %v7559_v20  ;;  %7872 = vmatmul.msk.bf16.vlgmr.msra.gmra.mxu0 %vm13889_vm2, %v7703_v54  ;;  %v7699_v20 = vor.u32 %v8670_v2, %v7698_v44  ;;  %v7711_v54 = vor.u32 %v8671_v17, %v7708_v9  ;;  %v8673_v44 = vld [vmem:[#allocation2 + $0x64] sm:$0xf]  ;;  %v7716_v2 = vld [vmem:[#allocation2 + $0x6c] sm:$0xf0]  ;;  %v7707_v9 = vor.u32 %v8672_v61, %v7706_v4  ;;  %v8675_v61 = vld [vmem:[#allocation2 + $0x7c] sm:$0xf] }
 0x3c9   : > { %vm13915_vm11 = vmmov %vm13889_vm2 }
 0x3ca   : > { %v3297_v60 = vpop.f32.mrf.mxu2 }
 0x3cb   : > { %v3386_v28 = vpop.f32.mrf.mxu3 }
 0x3cc   : > { %v3387_v39 = vadd.f32 %v3386_v28, %v3297_v60  ;;  %v11410_v0 = vpop.f32.mrf.mxu1 }
 0x3cd   : > { %v11412_v1 = vpop.f32.mrf.mxu0 }
 0x3ce   : > { %v3560_v58 = vadd.f32 %v3559_v38, %v3387_v39 }
 0x3d0   : > { %v11414_v19 = vadd.f32 %v3648_v3, %v3560_v58 }
 0x3d2   : > { %v3299_v33 = vpop.f32.mrf.mxu2 }
 0x3d3   : > { %v3388_v7 = vpop.f32.mrf.mxu3 }
 0x3d4   : > { %v11416_v41 = vadd.f32 %v3388_v7, %v3299_v33  ;;  %v3569_v57 = vpop.f32.mrf.mxu1 }
 0x3d5   : > { %v3658_v40 = vpop.f32.mrf.mxu0 }
 0x3d8   : > { %4022 = vmatmul.bf16.vlgmr.msrb.gmra.mxu3 %v7699_v20  ;;  %7873 = vmatmul.msk.bf16.gmra.mxu0 %vm13911_vm12, %v7711_v54  ;;  %v7719_v20 = vor.u32 %v8673_v44, %v7716_v2  ;;  %v7724_v44 = vld [vmem:[#allocation2 + $0x84] sm:$0xf0]  ;;  %vm13922_vm12 = vmmov %vm13889_vm2 }
 0x3da   : > { %v3302_v38 = vpop.f32.mrf.mxu2 }
 0x3db   : > { %v3391_v60 = vpop.f32.mrf.mxu3 }
 0x3dc   : > { %v3392_v28 = vadd.f32 %v3391_v60, %v3302_v38  ;;  %v11419_v3 = vpop.f32.mrf.mxu1 }
 0x3dd   : > { %v11421_v39 = vpop.f32.mrf.mxu0 }
 0x3de   : > { %v3565_v58 = vadd.f32 %v3564_v25, %v3392_v28 }
 0x3e0   : > { %v11423_v51 = vadd.f32 %v3653_v26, %v3565_v58 }
 0x3e2   : > { %v3304_v33 = vpop.f32.mrf.mxu2 }
 0x3e3   : > { %v3393_v7 = vpop.f32.mrf.mxu3 }
 0x3e4   : > { %v11425_v47 = vadd.f32 %v3393_v7, %v3304_v33  ;;  %v3574_v54 = vpop.f32.mrf.mxu1 }
 0x3e5   : > { %v3663_v17 = vpop.f32.mrf.mxu0 }
 0x3e8   : > { %4027 = vmatmul.bf16.gmra.mxu3 %v7707_v9  ;;  %7874 = vmatmul.msk.bf16.gmra.mxu0 %vm13912_vm4, %v7719_v20  ;;  %v7715_v9 = vor.u32 %v8674_v34, %v7714_v62  ;;  %v7727_v20 = vor.u32 %v8675_v61, %v7724_v44  ;;  %v8677_v62 = vld [vmem:[#allocation2 + $0x94] sm:$0xf]  ;;  %v7732_v34 = vld [vmem:[#allocation2 + $0x9c] sm:$0xf0]  ;;  %vm13928_vm4 = vmmov %vm13889_vm2 }
 0x3ea   : > { %v3307_v25 = vpop.f32.mrf.mxu2 }
 0x3eb   : > { %v3396_v38 = vpop.f32.mrf.mxu3 }
 0x3ec   : > { %v3397_v60 = vadd.f32 %v3396_v38, %v3307_v25  ;;  %v11432_v8 = vpop.f32.mrf.mxu1 }
 0x3ed   : > { %v11428_v28 = vpop.f32.mrf.mxu0  ;;  %13914 = vst [vmem:[#allocation52_spill] sm:$0xff] %v11432_v8  ;;  %v8678_v8 = vld [vmem:[#allocation2 + $0x98] sm:$0xf0] }
 0x3ee   : > { %v3570_v26 = vadd.f32 %v3569_v57, %v3397_v60  ;;  %13913 = vst [vmem:[#allocation51_spill] sm:$0xff] %v11428_v28 }
 0x3f0   : > { %v11430_v58 = vadd.f32 %v3658_v40, %v3570_v26 }
 0x3f2   : > { %v3309_v33 = vpop.f32.mrf.mxu2 }
 0x3f3   : > { %v3398_v7 = vpop.f32.mrf.mxu3 }
 0x3f4   : > { %v11434_v4 = vadd.f32 %v3398_v7, %v3309_v33  ;;  %v3579_v40 = vpop.f32.mrf.mxu1  ;;  %v7722_v7 = vld [vmem:[#allocation2 + $0x78] sm:$0xf] }
 0x3f5   : > { %v3668_v2 = vpop.f32.mrf.mxu0 }
 0x3f8   : > { %4032 = vmatmul.bf16.gmra.mxu3 %v7715_v9  ;;  %7875 = vmatmul.msk.bf16.gmra.mxu0 %vm13915_vm11, %v7727_v20  ;;  %v7723_v9 = vor.u32 %v8676_v11, %v7722_v7  ;;  %v7735_v20 = vor.u32 %v8677_v62, %v7732_v34  ;;  %v8679_v11 = vld [vmem:[#allocation2 + $0xac] sm:$0xf]  ;;  %v7740_v7 = vld [vmem:[#allocation2 + $0xb4] sm:$0xf0]  ;;  %vm13934_vm11 = vmmov %vm13889_vm2 }
 0x3fa   : > { %v3312_v57 = vpop.f32.mrf.mxu2 }
 0x3fb   : > { %v3401_v25 = vpop.f32.mrf.mxu3 }
 0x3fc   : > { %v3402_v38 = vadd.f32 %v3401_v25, %v3312_v57  ;;  %v11445_v61 = vpop.f32.mrf.mxu1 }
 0x3fd   : > { %v11437_v26 = vpop.f32.mrf.mxu0  ;;  %13917 = vst [vmem:[#allocation54_spill] sm:$0xff] %v11445_v61  ;;  %v7730_v61 = vld [vmem:[#allocation2 + $0x90] sm:$0xf] }
 0x3fe   : > { %v3575_v60 = vadd.f32 %v3574_v54, %v3402_v38  ;;  %13916 = vst [vmem:[#allocation53_spill] sm:$0xff] %v11437_v26  ;;  %v7731_v34 = vor.u32 %v8678_v8, %v7730_v61  ;;  %v8680_v8 = vld [vmem:[#allocation2 + $0xb0] sm:$0xf0] }
 0x400   : > { %v11439_v30 = vadd.f32 %v3663_v17, %v3575_v60 }
 0x402   : > { %v11441_v21 = vpop.f32.mrf.mxu2 }
 0x403   : > { %v11443_v33 = vpop.f32.mrf.mxu3 }
 0x404   : > { %v3584_v60 = vpop.f32.mrf.mxu1 }
 0x405   : > { %v3673_v44 = vpop.f32.mrf.mxu0 }
 0x408   : > { %4037 = vmatmul.bf16.gmra.mxu3 %v7723_v9  ;;  %7876 = vmatmul.msk.bf16.gmra.mxu0 %vm13889_vm2, %v7735_v20  ;;  %v7743_v9 = vor.u32 %v8679_v11, %v7740_v7  ;;  %v8681_v11 = vld [vmem:[#allocation2 + $0xc4] sm:$0xf]  ;;  %v7748_v7 = vld [vmem:[#allocation2 + $0xcc] sm:$0xf0] }
 0x40a   : > { %v3317_v54 = vpop.f32.mrf.mxu2 }
 0x40b   : > { %v3406_v57 = vpop.f32.mrf.mxu3 }
 0x40c   : > { %v3407_v17 = vadd.f32 %v3406_v57, %v3317_v54 }
 0x40d   : > { %v11448_v38 = vpop.f32.mrf.mxu0 }
 0x40e   : > { %v3580_v25 = vadd.f32 %v3579_v40, %v3407_v17  ;;  %13918 = vst [vmem:[#allocation55_spill] sm:$0xff] %v11448_v38  ;;  %v11457_v40 = vpop.f32.mrf.mxu1 }
 0x40f   : > { %13923 = vst [vmem:[#allocation59_spill] sm:$0xff] %v11457_v40  ;;  %v7751_v40 = vor.u32 %v8681_v11, %v7748_v7  ;;  %v7756_v11 = vld [vmem:[#allocation2 + $0xe4] sm:$0xf0] }
 0x410   : > { %v11450_v27 = vadd.f32 %v3668_v2, %v3580_v25 }
 0x412   : > { %13919 = vst [vmem:[#allocation56_spill] sm:$0xff] %v11450_v27  ;;  %v11452_v26 = vpop.f32.mrf.mxu2 }
 0x413   : > { %13920 = vst [vmem:[#allocation57_spill] sm:$0xff] %v11452_v26  ;;  %v11454_v28 = vpop.f32.mrf.mxu3 }
 0x414   : > { %13921 = vst [vmem:[#allocation58_spill] sm:$0xff] %v11454_v28  ;;  %v7738_v28 = vld [vmem:[#allocation2 + $0xa8] sm:$0xf] }
 0x415   : > { %v3678_v62 = vpop.f32.mrf.mxu0 }
 0x416   : > { %v3589_v61 = vpop.f32.mrf.mxu1 }
 0x418   : > { %4042 = vmatmul.bf16.gmra.mxu3 %v7731_v34  ;;  %7877 = vmatmul.msk.bf16.gmra.mxu0 %vm13922_vm12, %v7743_v9  ;;  %v7739_v9 = vor.u32 %v8680_v8, %v7738_v28  ;;  %v8682_v28 = vld [vmem:[#allocation2 + $0xc8] sm:$0xf0]  ;;  %v8683_v8 = vld [vmem:[#allocation2 + $0xdc] sm:$0xf]  ;;  %vm13940_vm12 = vmmov %vm13889_vm2 }
 0x41a   : > { %v3322_v20 = vpop.f32.mrf.mxu2 }
 0x41b   : > { %v3411_v54 = vpop.f32.mrf.mxu3 }
 0x41c   : > { %v3412_v2 = vadd.f32 %v3411_v54, %v3322_v20 }
 0x41d   : > { %v11459_v17 = vpop.f32.mrf.mxu0 }
 0x41e   : > { %v3585_v57 = vadd.f32 %v3584_v60, %v3412_v2  ;;  %13924 = vst [vmem:[#allocation60_spill] sm:$0xff] %v11459_v17 }
 0x420   : > { %v11461_v25 = vadd.f32 %v3673_v44, %v3585_v57  ;;  %v11468_v44 = vpop.f32.mrf.mxu1 }
 0x421   : > { %13929 = vst [vmem:[#allocation64_spill] sm:$0xff] %v11468_v44 }
 0x422   : > { %13925 = vst [vmem:[#allocation61_spill] sm:$0xff] %v11461_v25  ;;  %v11463_v38 = vpop.f32.mrf.mxu2 }
 0x423   : > { %13926 = vst [vmem:[#allocation62_spill] sm:$0xff] %v11463_v38  ;;  %v11465_v27 = vpop.f32.mrf.mxu3  ;;  %v7746_v38 = vld [vmem:[#allocation2 + $0xc0] sm:$0xf] }
 0x424   : > { %13927 = vst [vmem:[#allocation63_spill] sm:$0xff] %v11465_v27 }
 0x425   : > { %v3683_v34 = vpop.f32.mrf.mxu0 }
 0x428   : > { %4047 = vmatmul.bf16.gmra.mxu3 %v7739_v9  ;;  %7878 = vmatmul.msk.bf16.gmra.mxu0 %vm13928_vm4, %v7751_v40  ;;  %v7747_v40 = vor.u32 %v8682_v28, %v7746_v38  ;;  %v7759_v9 = vor.u32 %v8683_v8, %v7756_v11  ;;  %v3594_v26 = vpop.f32.mrf.mxu1  ;;  %v7754_v38 = vld [vmem:[#allocation2 + $0xd8] sm:$0xf]  ;;  %v8684_v28 = vld [vmem:[#allocation2 + $0xe0] sm:$0xf0]  ;;  %v8685_v8 = vld [vmem:[#allocation2 + $0xf4] sm:$0xf] }
 0x429   : > { %v7764_v11 = vld [vmem:[#allocation2 + $0xfc] sm:$0xf0]  ;;  %vm13941_vm4 = vmmov %vm13889_vm2 }
 0x42a   : > { %v3327_v60 = vpop.f32.mrf.mxu2 }
 0x42b   : > { %v3416_v20 = vpop.f32.mrf.mxu3 }
 0x42c   : > { %v3417_v54 = vadd.f32 %v3416_v20, %v3327_v60 }
 0x42d   : > { %v11470_v57 = vpop.f32.mrf.mxu0 }
 0x42e   : > { %v3590_v2 = vadd.f32 %v3589_v61, %v3417_v54  ;;  %13930 = vst [vmem:[#allocation65_spill] sm:$0xff] %v11470_v57 }
 0x430   : > { %v11472_v17 = vadd.f32 %v3678_v62, %v3590_v2  ;;  %v11483_v57 = vpop.f32.mrf.mxu1 }
 0x431   : > { %13937 = vst [vmem:[#allocation71_spill] sm:$0xff] %v11483_v57  ;;  %v7762_v57 = vld [vmem:[#allocation2 + $0xf0] sm:$0xf] }
 0x432   : > { %13931 = vst [vmem:[#allocation66_spill] sm:$0xff] %v11472_v17  ;;  %v11474_v25 = vpop.f32.mrf.mxu2 }
 0x433   : > { %13932 = vst [vmem:[#allocation67_spill] sm:$0xff] %v11474_v25  ;;  %v11476_v27 = vpop.f32.mrf.mxu3  ;;  %v7772_v25 = vld [vmem:[#allocation2 + $0x114] sm:$0xf0] }
 0x434   : > { %13933 = vst [vmem:[#allocation68_spill] sm:$0xff] %v11476_v27  ;;  %v7767_v27 = vor.u32 %v8685_v8, %v7764_v11 }
 0x435   : > { %v3688_v7 = vpop.f32.mrf.mxu0 }
 0x438   : > { %4052 = vmatmul.bf16.gmra.mxu3 %v7747_v40  ;;  %7879 = vmatmul.msk.bf16.gmra.mxu0 %vm13934_vm11, %v7759_v9  ;;  %v7755_v9 = vor.u32 %v8684_v28, %v7754_v38  ;;  %v4382_v38 = vld [vmem:[%s13463_s9 + $0x78] sm:$0xff]  ;;  %vm13942_vm11 = vmmov %vm13889_vm2 }
 0x439   : > { %4383 = vmatpush.msrb.mxu2 %v4382_v38  ;;  %v8688_v38 = vld [vmem:[#allocation2 + $0x110] sm:$0xf0] }
 0x43a   : > { %v3332_v61 = vpop.f32.mrf.mxu2 }
 0x43b   : > { %v3421_v60 = vpop.f32.mrf.mxu3 }
 0x43c   : > { %v3422_v20 = vadd.f32 %v3421_v60, %v3332_v61  ;;  %v3599_v60 = vpop.f32.mrf.mxu1 }
 0x43d   : > { %v11479_v54 = vpop.f32.mrf.mxu0 }
 0x43e   : > { %v3595_v62 = vadd.f32 %v3594_v26, %v3422_v20  ;;  %13935 = vst [vmem:[#allocation69_spill] sm:$0xff] %v11479_v54 }
 0x440   : > { %v11481_v2 = vadd.f32 %v3683_v34, %v3595_v62 }
 0x442   : > { %13936 = vst [vmem:[#allocation70_spill] sm:$0xff] %v11481_v2  ;;  %v11485_v17 = vpop.f32.mrf.mxu2 }
 0x443   : > { %13938 = vst [vmem:[#allocation72_spill] sm:$0xff] %v11485_v17  ;;  %v11487_v44 = vpop.f32.mrf.mxu3  ;;  %v8687_v17 = vld [vmem:[#allocation2 + $0x10c] sm:$0xf] }
 0x444   : > { %13939 = vst [vmem:[#allocation73_spill] sm:$0xff] %v11487_v44  ;;  %v8686_v44 = vld [vmem:[#allocation2 + $0xf8] sm:$0xf0]  ;;  %v7775_v8 = vor.u32 %v8687_v17, %v7772_v25  ;;  %v8689_v25 = vld [vmem:[#allocation2 + $0x124] sm:$0xf] }
 0x445   : > { %v4112_v40 = vpop.f32.mrf.mxu0  ;;  %v7763_v28 = vor.u32 %v8686_v44, %v7762_v57  ;;  %v7780_v57 = vld [vmem:[#allocation2 + $0x12c] sm:$0xf0] }
 0x448   : > { %4057 = vmatmul.bf16.gmra.mxu3 %v7755_v9  ;;  %7880 = vmatmul.msk.bf16.gmra.mxu0 %vm13889_vm2, %v7767_v27 }
 0x44a   : > { %v3337_v26 = vpop.f32.mrf.mxu2 }
 0x44b   : > { %v3426_v61 = vpop.f32.mrf.mxu3 }
 0x44c   : > { %v3427_v34 = vadd.f32 %v3426_v61, %v3337_v26 }
 0x44d   : > { %v4114_v62 = vpop.f32.mrf.mxu0 }
 0x44e   : > { %v3600_v20 = vadd.f32 %v3599_v60, %v3427_v34  ;;  %v3527_v34 = vadd.f32 %v11333_v36, %v11343_v42 }
 0x450   : > { %v11490_v54 = vadd.f32 %v3688_v7, %v3600_v20  ;;  %v3614_v7 = vadd.f32 %v11330_v56, %v11340_v18  ;;  %v7770_v20 = vld [vmem:[#allocation2 + $0x108] sm:$0xf]  ;;  %v3616_v44 = vadd.f32 %v11335_v6, %v3527_v34  ;;  %v3619_v6 = vadd.f32 %v11338_v48, %v11352_v13  ;;  %v8690_v34 = vld [vmem:[#allocation2 + $0x128] sm:$0xf0] }
 0x453   : > { %v11492_v2 = vpop.f32.mrf.mxu3 }
 0x455   : > { %v4117_v27 = vpop.f32.mrf.mxu0 }
 0x458   : > { %4062 = vmatmul.bf16.gmra.mxu3 %v7763_v28  ;;  %7881 = vmatmul.msk.bf16.gmra.mxu0 %vm13940_vm12, %v7775_v8  ;;  %v4381_v28 = vld [vmem:[%s13463_s9 + $0x70] sm:$0xff]  ;;  %v7783_v8 = vor.u32 %v8689_v25, %v7780_v57  ;;  %vm13943_vm12 = vmmov %vm13889_vm2 }
 0x459   : > { %4384 = vmatpush.msrb.mxu2 %v4381_v28 }
 0x45b   : > { %v4023_v11 = vpop.f32.mrf.mxu3 }
 0x45c   : > { %v4113_v9 = vadd.f32 %v4112_v40, %v4023_v11  ;;  %v7771_v40 = vor.u32 %v8688_v38, %v7770_v20  ;;  %v8691_v20 = vld [vmem:[#allocation2 + $0x13c] sm:$0xf]  ;;  %v7788_v38 = vld [vmem:[#allocation2 + $0x144] sm:$0xf0] }
 0x45d   : > { %v4119_v61 = vpop.f32.mrf.mxu0 }
 0x45e   : > { %v11500_v26 = vadd.f32 %v4113_v9, %v3614_v7  ;;  %v7778_v9 = vld [vmem:[#allocation2 + $0x120] sm:$0xf] }
 0x45f   : > { %v7779_v13 = vor.u32 %v8690_v34, %v7778_v9  ;;  %v7796_v9 = vld [vmem:[#allocation2 + $0x15c] sm:$0xf0] }
 0x460   : > { %v4379_v34 = vld [vmem:[%s13463_s9 + $0x60] sm:$0xff] }
 0x463   : > { %v4025_v60 = vpop.f32.mrf.mxu3 }
 0x464   : > { %v4115_v17 = vadd.f32 %v4114_v62, %v4025_v60  ;;  %v3621_v60 = vadd.f32 %v11346_v31, %v11356_v52  ;;  %v3624_v31 = vadd.f32 %v11348_v32, %v11362_v63 }
 0x465   : > { %v4122_v18 = vpop.f32.mrf.mxu0 }
 0x466   : > { %v11508_v56 = vadd.f32 %v4115_v17, %v3616_v44  ;;  %v4380_v17 = vld [vmem:[%s13463_s9 + $0x68] sm:$0xff] }
 0x467   : > { %4385 = vmatpush.msrb.mxu2 %v4380_v17  ;;  %v7794_v17 = vld [vmem:[#allocation2 + $0x150] sm:$0xf] }
 0x468   : > { %4067 = vmatmul.bf16.gmra.mxu3 %v7771_v40  ;;  %7882 = vmatmul.msk.bf16.gmra.mxu0 %vm13941_vm4, %v7783_v8  ;;  %v7786_v8 = vld [vmem:[#allocation2 + $0x138] sm:$0xf]  ;;  %vm13944_vm4 = vmmov %vm13889_vm2 }
 0x469   : > { %4386 = vmatpush.msrb.mxu2 %v4379_v34 }
 0x46b   : > { %v4028_v36 = vpop.f32.mrf.mxu3 }
 0x46c   : > { %v4118_v42 = vadd.f32 %v4117_v27, %v4028_v36  ;;  %v7791_v27 = vor.u32 %v8691_v20, %v7788_v38  ;;  %v8692_v36 = vld [vmem:[#allocation2 + $0x140] sm:$0xf0] }
 0x46d   : > { %v4124_v11 = vpop.f32.mrf.mxu0  ;;  %v7787_v63 = vor.u32 %v8692_v36, %v7786_v8 }
 0x46e   : > { %v11513_v62 = vadd.f32 %v4118_v42, %v3619_v6  ;;  %v3626_v6 = vadd.f32 %v11354_v35, %v11366_v5  ;;  %v3629_v35 = vadd.f32 %v11358_v37, %v11370_v50 }
 0x473   : > { %v4030_v7 = vpop.f32.mrf.mxu3 }
 0x474   : > { %v4120_v44 = vadd.f32 %v4119_v61, %v4030_v7  ;;  %v8693_v7 = vld [vmem:[#allocation2 + $0x154] sm:$0xf] }
 0x475   : > { %v4127_v48 = vpop.f32.mrf.mxu0 }
 0x476   : > { %v11520_v25 = vadd.f32 %v4120_v44, %v3621_v60 }
 0x478   : > { %4072 = vmatmul.bf16.gmra.mxu3 %v7779_v13  ;;  %7883 = vmatmul.msk.bf16.gmra.mxu0 %vm13942_vm11, %v7791_v27  ;;  %v8694_v13 = vld [vmem:[#allocation2 + $0x158] sm:$0xf0]  ;;  %v3631_v27 = vadd.f32 %v11364_v46, %v11376_v23  ;;  %vm13945_vm11 = vmmov %vm13889_vm2 }
 0x479   : > { %v7795_v50 = vor.u32 %v8694_v13, %v7794_v17  ;;  %v8699_v17 = vld [vmem:[#allocation2 + $0x19c] sm:$0xf]  ;;  %v8700_v13 = vld [vmem:[#allocation2 + $0x1a0] sm:$0xf0] }
 0x47b   : > { %v4033_v57 = vpop.f32.mrf.mxu3 }
 0x47c   : > { %v4123_v52 = vadd.f32 %v4122_v18, %v4033_v57  ;;  %v7799_v18 = vor.u32 %v8693_v7, %v7796_v9  ;;  %v7802_v7 = vld [vmem:[#allocation2 + $0x168] sm:$0xf]  ;;  %v8696_v9 = vld [vmem:[#allocation2 + $0x170] sm:$0xf0] }
 0x47d   : > { %v4129_v28 = vpop.f32.mrf.mxu0 }
 0x47e   : > { %v11525_v61 = vadd.f32 %v4123_v52, %v3624_v31  ;;  %v8695_v31 = vld [vmem:[#allocation2 + $0x16c] sm:$0xf]  ;;  %v7804_v52 = vld [vmem:[#allocation2 + $0x174] sm:$0xf0] }
 0x483   : > { %v4035_v40 = vpop.f32.mrf.mxu3 }
 0x484   : > { %v4125_v42 = vadd.f32 %v4124_v11, %v4035_v40  ;;  %v4378_v40 = vld [vmem:[%s13463_s9 + $0x58] sm:$0xff] }
 0x485   : > { %v4132_v32 = vpop.f32.mrf.mxu0  ;;  %4387 = vmatpush.msrb.mxu2 %v4378_v40 }
 0x486   : > { %v11532_v60 = vadd.f32 %v4125_v42, %v3626_v6 }
 0x488   : > { %4077 = vmatmul.bf16.gmra.mxu3 %v7787_v63  ;;  %7884 = vmatmul.msk.bf16.gmra.mxu0 %vm13889_vm2, %v7799_v18  ;;  %v8697_v18 = vld [vmem:[#allocation2 + $0x184] sm:$0xf]  ;;  %vm13969_vm2 = vcmask 1040384  }
 0x48b   : > { %v4038_v44 = vpop.f32.mrf.mxu3 }
 0x48c   : > { %v4128_v5 = vadd.f32 %v4127_v48, %v4038_v44  ;;  %v7807_v48 = vor.u32 %v8695_v31, %v7804_v52  ;;  %v7812_v44 = vld [vmem:[#allocation2 + $0x18c] sm:$0xf0]  ;;  %v3552_v52 = vadd.f32 %v11380_v16, %v11396_v59 }
 0x48d   : > { %v4134_v20 = vpop.f32.mrf.mxu0 }
 0x48e   : > { %v11537_v11 = vadd.f32 %v4128_v5, %v3629_v35  ;;  %v4377_v35 = vld [vmem:[%s13463_s9 + $0x50] sm:$0xff]  ;;  %v7803_v5 = vor.u32 %v8696_v9, %v7802_v7 }
 0x48f   : > { %4388 = vmatpush.msrb.mxu2 %v4377_v35  ;;  %v4375_v35 = vld [vmem:[%s13463_s9 + $0x40] sm:$0xff] }
 0x493   : > { %v4040_v38 = vpop.f32.mrf.mxu3 }
 0x494   : > { %v4130_v57 = vadd.f32 %v4129_v28, %v4040_v38  ;;  %v3547_v28 = vadd.f32 %v11372_v12, %v11386_v29  ;;  %v7815_v38 = vor.u32 %v8697_v18, %v7812_v44 }
 0x495   : > { %v4137_v37 = vpop.f32.mrf.mxu0 }
 0x496   : > { %v11544_v8 = vadd.f32 %v4130_v57, %v3631_v27  ;;  %v3636_v34 = vadd.f32 %v11374_v14, %v3547_v28  ;;  %v7818_v14 = vld [vmem:[#allocation2 + $0x198] sm:$0xf]  ;;  %v9124_v27 = vld [vmem:[#allocation2 + $0x1a4] sm:$0xff] }
 0x497   : > { %4721 = vst [vmem:[#allocation2 + $0x198] sm:$0xff] %v9124_v27  ;;  %v7819_v44 = vor.u32 %v8700_v13, %v7818_v14  ;;  %v4374_v14 = vld [vmem:[%s13463_s9 + $0x38] sm:$0xff] }
 0x498   : > { %4082 = vmatmul.bf16.gmra.mxu3 %v7795_v50  ;;  %7885 = vmatmul.msk.bf16.gmra.mxu0 %vm13943_vm12, %v7807_v48  ;;  %v7810_v50 = vld [vmem:[#allocation2 + $0x180] sm:$0xf]  ;;  %v8698_v48 = vld [vmem:[#allocation2 + $0x188] sm:$0xf0]  ;;  %vm13970_vm12 = vcmask 261120  }
 0x499   : > { %v7811_v7 = vor.u32 %v8698_v48, %v7810_v50  ;;  %v4373_v48 = vld [vmem:[%s13463_s9 + $0x30] sm:$0xff] }
 0x49b   : > { %v4043_v36 = vpop.f32.mrf.mxu3 }
 0x49c   : > { %v4133_v6 = vadd.f32 %v4132_v32, %v4043_v36  ;;  %v3641_v36 = vadd.f32 %v11382_v10, %v3552_v52 }
 0x49d   : > { %v4139_v23 = vpop.f32.mrf.mxu0 }
 0x49e   : > { %v11548_v46 = vadd.f32 %v4133_v6, %v11384_v45  ;;  %v4376_v6 = vld [vmem:[%s13463_s9 + $0x48] sm:$0xff] }
 0x49f   : > { %4389 = vmatpush.msrb.mxu2 %v4376_v6 }
 0x4a1   : > { %4390 = vmatpush.msrb.mxu2 %v4375_v35  ;;  %v4370_v35 = vld [vmem:[%s13463_s9 + $0x18] sm:$0xff] }
 0x4a3   : > { %v4045_v42 = vpop.f32.mrf.mxu3  ;;  %4391 = vmatpush.msrb.mxu2 %v4374_v14 }
 0x4a4   : > { %v4135_v63 = vadd.f32 %v4134_v20, %v4045_v42  ;;  %v7820_v20 = vld [vmem:[#allocation2 + $0x1a4] sm:$0xf0] }
 0x4a5   : > { %v4142_v45 = vpop.f32.mrf.mxu0  ;;  %4723 = vst [vmem:[#allocation2 + $0x1a4] sm:$0xff] %v9124_v27  ;;  %v7823_v28 = vor.u32 %v8699_v17, %v7820_v20  ;;  %v4406_v20 = vld [vmem:[%s13464_s10 + $0x18] sm:$0xff]  ;;  %4392 = vmatpush.msrb.mxu2 %v4373_v48 }
 0x4a6   : > { %v11556_v32 = vadd.f32 %v4135_v63, %v3636_v34  ;;  %4422 = vmatpush.msra.mxu3 %v4406_v20 }
 0x4a8   : > { %4087 = vmatmul.bf16.gmra.mxu3 %v7803_v5  ;;  %7886 = vmatmul.msk.bf16.gmra.mxu0 %vm13944_vm4, %v7815_v38 }
 0x4ab   : > { %v4048_v12 = vpop.f32.mrf.mxu3 }
 0x4ac   : > { %v4138_v29 = vadd.f32 %v4137_v37, %v4048_v12 }
 0x4ad   : > { %v4144_v31 = vpop.f32.mrf.mxu0 }
 0x4ae   : > { %v11560_v57 = vadd.f32 %v4138_v29, %v11394_v49 }
 0x4b3   : > { %v4050_v40 = vpop.f32.mrf.mxu3 }
 0x4b4   : > { %v4140_v37 = vadd.f32 %v4139_v23, %v4050_v40  ;;  %v3557_v23 = vadd.f32 %v11390_v22, %v11406_v15  ;;  %v3562_v22 = vadd.f32 %v11400_v43, %v11416_v41  ;;  %v3567_v41 = vadd.f32 %v11410_v0, %v11425_v47 }
 0x4b5   : > { %v4147_v49 = vpop.f32.mrf.mxu0  ;;  %v3572_v47 = vadd.f32 %v11419_v3, %v11434_v4 }
 0x4b6   : > { %v11568_v42 = vadd.f32 %v4140_v37, %v3641_v36  ;;  %v3646_v63 = vadd.f32 %v11392_v53, %v3557_v23  ;;  %v3651_v29 = vadd.f32 %v11402_v24, %v3562_v22  ;;  %v3656_v40 = vadd.f32 %v11412_v1, %v3567_v41 }
 0x4b8   : > { %4092 = vmatmul.bf16.gmra.mxu3 %v7811_v7  ;;  %7887 = vmatmul.msk.bf16.gmra.mxu0 %vm13945_vm11, %v7823_v28 }
 0x4bb   : > { %v4053_v59 = vpop.f32.mrf.mxu3 }
 0x4bc   : > { %v4143_v16 = vadd.f32 %v4142_v45, %v4053_v59  ;;  %v4372_v59 = vld [vmem:[%s13463_s9 + $0x28] sm:$0xff] }
 0x4bd   : > { %v4149_v10 = vpop.f32.mrf.mxu0  ;;  %4393 = vmatpush.msrb.mxu2 %v4372_v59 }
 0x4be   : > { %v11572_v9 = vadd.f32 %v4143_v16, %v11404_v55 }
 0x4c3   : > { %v4055_v34 = vpop.f32.mrf.mxu3 }
 0x4c4   : > { %v4145_v18 = vadd.f32 %v4144_v31, %v4055_v34 }
 0x4c5   : > { %v4152_v45 = vpop.f32.mrf.mxu0 }
 0x4c6   : > { %v11580_v5 = vadd.f32 %v4145_v18, %v3646_v63 }
 0x4c8   : > { %4097 = vmatmul.bf16.gmra.mxu3 %v7819_v44 }
 0x4cb   : > { %v4058_v55 = vpop.f32.mrf.mxu3 }
 0x4cc   : > { %v4148_v38 = vadd.f32 %v4147_v49, %v4058_v55  ;;  %v3661_v49 = vadd.f32 %v11421_v39, %v3572_v47  ;;  %v4371_v39 = vld [vmem:[%s13463_s9 + $0x20] sm:$0xff]  ;;  %v4369_v47 = vld [vmem:[%s13463_s9 + $0x10] sm:$0xff] }
 0x4cd   : > { %v4154_v15 = vpop.f32.mrf.mxu0  ;;  %4394 = vmatpush.msrb.mxu2 %v4371_v39 }
 0x4ce   : > { %v11583_v12 = vadd.f32 %v4148_v38, %v11414_v19 }
 0x4cf   : > { %4395 = vmatpush.msrb.mxu2 %v4370_v35 }
 0x4d1   : > { %4396 = vmatpush.msrb.mxu2 %v4369_v47 }
 0x4d3   : > { %v4060_v53 = vpop.f32.mrf.mxu3 }
 0x4d4   : > { %v4150_v17 = vadd.f32 %v4149_v10, %v4060_v53 }
 0x4d5   : > { %v4157_v13 = vpop.f32.mrf.mxu0 }
 0x4d6   : > { %v11594_v19 = vadd.f32 %v4150_v17, %v3651_v29 }
 0x4db   : > { %v4063_v27 = vpop.f32.mrf.mxu3 }
 0x4dc   : > { %v4153_v31 = vadd.f32 %v4152_v45, %v4063_v27  ;;  %v4405_v45 = vld [vmem:[%s13464_s10 + $0x10] sm:$0xff] }
 0x4dd   : > { %v4159_v24 = vpop.f32.mrf.mxu0  ;;  %4423 = vmatpush.msra.mxu3 %v4405_v45 }
 0x4de   : > { %v11597_v43 = vadd.f32 %v4153_v31, %v11423_v51 }
 0x4e3   : > { %v4065_v52 = vpop.f32.mrf.mxu3 }
 0x4e4   : > { %v4155_v50 = vadd.f32 %v4154_v15, %v4065_v52 }
 0x4e5   : > { %v4162_v37 = vpop.f32.mrf.mxu0 }
 0x4e6   : > { %v11605_v36 = vadd.f32 %v4155_v50, %v3656_v40 }
 0x4eb   : > { %v4068_v6 = vpop.f32.mrf.mxu3 }
 0x4ec   : > { %v4158_v28 = vadd.f32 %v4157_v13, %v4068_v6 }
 0x4ed   : > { %v11612_v0 = vpop.f32.mrf.mxu0 }
 0x4ee   : > { %v11608_v51 = vadd.f32 %v4158_v28, %v11430_v58 }
 0x4f3   : > { %v4070_v1 = vpop.f32.mrf.mxu3 }
 0x4f4   : > { %v4160_v7 = vadd.f32 %v4159_v24, %v4070_v1 }
 0x4f5   : > { %v11620_v10 = vpop.f32.mrf.mxu0 }
 0x4f6   : > { %v11618_v16 = vadd.f32 %v4160_v7, %v3661_v49 }
 0x4fb   : > { %v4073_v58 = vpop.f32.mrf.mxu3 }
 0x4fc   : > { %v4163_v23 = vadd.f32 %v4162_v37, %v4073_v58 }
 0x4fd   : > { %v11630_v4 = vpop.f32.mrf.mxu0 }
 0x4fe   : > { %v11623_v34 = vadd.f32 %v4163_v23, %v11439_v30  ;;  %v11641_v30 = vld [vmem:[%s13460_s6] ss:$0 sm:$0xff] }
 0x4ff   : > { %v11651_v55 = vadd.f32 %v11641_v30, %v11508_v56  ;;  %v11655_v38 = vadd.f32 %v11641_v30, %v11500_v26  ;;  %v11659_v15 = vadd.f32 %v11641_v30, %v11513_v62  ;;  %v11667_v29 = vadd.f32 %v11641_v30, %v11520_v25 }
 0x500   : > { %v11677_v62 = vadd.f32 %v11641_v30, %v11525_v61  ;;  %v11685_v13 = vadd.f32 %v11641_v30, %v11532_v60  ;;  %v11692_v61 = vadd.f32 %v11641_v30, %v11537_v11  ;;  %v11699_v60 = vadd.f32 %v11641_v30, %v11544_v8 }
 0x501   : > { %v4298_v53 = vmul.f32 %v11651_v55, %v11651_v55  ;;  %v4297_v56 = vmul.f32 %v11655_v38, %v11655_v38  ;;  %v4299_v26 = vmul.f32 %v11659_v15, %v11659_v15  ;;  %v4260_v14 = vadd.f32 %v11651_v55, %v11655_v38 }
 0x502   : > { %v4300_v25 = vmul.f32 %v11667_v29, %v11667_v29  ;;  %v4301_v24 = vmul.f32 %v11677_v62, %v11677_v62  ;;  %v4302_v40 = vmul.f32 %v11685_v13, %v11685_v13  ;;  %v4303_v11 = vmul.f32 %v11692_v61, %v11692_v61 }
 0x503   : > { %v11625_v3 = vpop.f32.mrf.mxu3  ;;  %v4329_v20 = vadd.f32 %v4298_v53, %v4297_v56  ;;  %v4261_v27 = vadd.f32 %v4260_v14, %v11659_v15  ;;  %v11710_v28 = vadd.f32 %v11641_v30, %v11548_v46  ;;  %v4304_v49 = vmul.f32 %v11699_v60, %v11699_v60 }
 0x504   : > { %v11720_v7 = vadd.f32 %v11641_v30, %v11556_v32  ;;  %v11727_v23 = vadd.f32 %v11641_v30, %v11560_v57  ;;  %v11734_v32 = vadd.f32 %v11641_v30, %v11568_v42  ;;  %v11743_v57 = vadd.f32 %v11641_v30, %v11572_v9 }
 0x505   : > { %v11634_v18 = vpop.f32.mrf.mxu0  ;;  %v4330_v31 = vadd.f32 %v4329_v20, %v4299_v26  ;;  %v4262_v41 = vadd.f32 %v4261_v27, %v11667_v29  ;;  %v4305_v46 = vmul.f32 %v11710_v28, %v11710_v28  ;;  %v11759_v9 = vadd.f32 %v11641_v30, %v11583_v12  ;;  %v13947_v12 = vld [vmem:[#allocation58_spill] sm:$0xff] }
 0x506   : > { %v4306_v45 = vmul.f32 %v11720_v7, %v11720_v7  ;;  %v4307_v14 = vmul.f32 %v11727_v23, %v11727_v23  ;;  %v4308_v42 = vmul.f32 %v11734_v32, %v11734_v32 }
 0x507   : > { %v4331_v52 = vadd.f32 %v4330_v31, %v4300_v25  ;;  %v4263_v50 = vadd.f32 %v4262_v41, %v11677_v62  ;;  %v11752_v31 = vadd.f32 %v11641_v30, %v11580_v5 }
 0x509   : > { %v4332_v6 = vadd.f32 %v4331_v52, %v4301_v24  ;;  %v4264_v8 = vadd.f32 %v4263_v50, %v11685_v13  ;;  %v4309_v52 = vmul.f32 %v11743_v57, %v11743_v57  ;;  %v4310_v5 = vmul.f32 %v11752_v31, %v11752_v31 }
 0x50b   : > { %v11632_v63 = vpop.f32.mrf.mxu3  ;;  %v4333_v1 = vadd.f32 %v4332_v6, %v4302_v40  ;;  %v4265_v59 = vadd.f32 %v4264_v8, %v11692_v61  ;;  %v3404_v40 = vadd.f32 %v11443_v33, %v11441_v21  ;;  %v4311_v21 = vmul.f32 %v11759_v9, %v11759_v9 }
 0x50c   : > { %v11779_v33 = vadd.f32 %v11641_v30, %v11597_v43 }
 0x50d   : > { %v11661_v22 = vpop.f32.mrf.mxu0  ;;  %v4334_v58 = vadd.f32 %v4333_v1, %v4303_v11  ;;  %v4266_v39 = vadd.f32 %v4265_v59, %v11699_v60  ;;  %v11768_v11 = vadd.f32 %v11641_v30, %v11594_v19  ;;  %v13946_v1 = vld [vmem:[#allocation57_spill] sm:$0xff] }
 0x50e   : > { %v4368_v19 = vld [vmem:[%s13463_s9 + $0x8] sm:$0xff] }
 0x50f   : > { %v4335_v35 = vadd.f32 %v4334_v58, %v4304_v49  ;;  %v4267_v53 = vadd.f32 %v4266_v39, %v11710_v28  ;;  %v3409_v49 = vadd.f32 %v13947_v12, %v13946_v1  ;;  %v13948_v58 = vld [vmem:[#allocation52_spill] sm:$0xff]  ;;  %4397 = vmatpush.msrb.mxu2 %v4368_v19 }
 0x511   : > { %v4336_v26 = vadd.f32 %v4335_v35, %v4305_v46  ;;  %v4268_v20 = vadd.f32 %v4267_v53, %v11720_v7  ;;  %v3577_v46 = vadd.f32 %v13948_v58, %v3404_v40  ;;  %v11790_v53 = vadd.f32 %v11641_v30, %v11605_v36  ;;  %v13950_v36 = vld [vmem:[#allocation51_spill] sm:$0xff] }
 0x513   : > { %v11636_v44 = vpop.f32.mrf.mxu3  ;;  %v4337_v27 = vadd.f32 %v4336_v26, %v4306_v45  ;;  %v4269_v24 = vadd.f32 %v4268_v20, %v11727_v23  ;;  %v4312_v45 = vmul.f32 %v11768_v11, %v11768_v11  ;;  %v4165_v26 = vadd.f32 %v11612_v0, %v11625_v3  ;;  %v13949_v20 = vld [vmem:[#allocation54_spill] sm:$0xff]  ;;  %v13952_v0 = vld [vmem:[#allocation63_spill] sm:$0xff] }
 0x514   : > { %v3666_v40 = vadd.f32 %v13950_v36, %v3577_v46  ;;  %v11823_v46 = vadd.f32 %v11641_v30, %v11623_v34 }
 0x515   : > { %v11702_v48 = vpop.f32.mrf.mxu0  ;;  %v4338_v41 = vadd.f32 %v4337_v27, %v4307_v14  ;;  %v4270_v50 = vadd.f32 %v4269_v24, %v11734_v32  ;;  %v3582_v27 = vadd.f32 %v13949_v20, %v3409_v49  ;;  %v4313_v24 = vmul.f32 %v11779_v33, %v11779_v33 }
 0x516   : > { %v4213_v12 = vadd.f32 %v4165_v26, %v3666_v40  ;;  %v4170_v49 = vadd.f32 %v11630_v4, %v11636_v44  ;;  %v13956_v44 = vld [vmem:[#allocation67_spill] sm:$0xff]  ;;  %v4317_v40 = vmul.f32 %v11823_v46, %v11823_v46 }
 0x517   : > { %v4339_v6 = vadd.f32 %v4338_v41, %v4308_v42  ;;  %v4271_v47 = vadd.f32 %v4270_v50, %v11743_v57  ;;  %v11800_v41 = vadd.f32 %v11641_v30, %v11608_v51  ;;  %v4168_v50 = vadd.f32 %v11620_v10, %v11632_v63  ;;  %v13953_v63 = vld [vmem:[#allocation53_spill] sm:$0xff] }
 0x518   : > { %v11813_v51 = vadd.f32 %v11641_v30, %v11618_v16  ;;  %v3671_v19 = vadd.f32 %v13953_v63, %v3582_v27  ;;  %v4367_v27 = vld [vmem:[%s13463_s9] sm:$0xff] }
 0x519   : > { %v4340_v59 = vadd.f32 %v4339_v6, %v4309_v52  ;;  %v4272_v39 = vadd.f32 %v4271_v47, %v11752_v31  ;;  %v13951_v6 = vld [vmem:[#allocation62_spill] sm:$0xff]  ;;  %v4314_v47 = vmul.f32 %v11790_v53, %v11790_v53  ;;  %v4315_v10 = vmul.f32 %v11800_v41, %v11800_v41  ;;  %4398 = vmatpush.msrb.mxu2 %v4367_v27  ;;  %v13965_v27 = vld [vmem:[#allocation60_spill] sm:$0xff] }
 0x51a   : > { %v3414_v3 = vadd.f32 %v13952_v0, %v13951_v6  ;;  %v4316_v34 = vmul.f32 %v11813_v51, %v11813_v51  ;;  %v13958_v6 = vld [vmem:[#allocation61_spill] sm:$0xff] }
 0x51b   : > { %v11669_v17 = vpop.f32.mrf.mxu3  ;;  %v4341_v35 = vadd.f32 %v4340_v59, %v4310_v5  ;;  %v4273_v43 = vadd.f32 %v4272_v39, %v11759_v9  ;;  %v13954_v39 = vld [vmem:[#allocation56_spill] sm:$0xff] }
 0x51c   : > { %v4214_v16 = vadd.f32 %v4168_v50, %v13954_v39 }
 0x51d   : > { %v11746_v25 = vpop.f32.mrf.mxu0  ;;  %v4342_v42 = vadd.f32 %v4341_v35, %v4311_v21  ;;  %v4274_v52 = vadd.f32 %v4273_v43, %v11768_v11  ;;  %v4173_v35 = vadd.f32 %v11634_v18, %v11669_v17  ;;  %v13957_v43 = vld [vmem:[#allocation68_spill] sm:$0xff] }
 0x51e   : > { %v3419_v26 = vadd.f32 %v13957_v43, %v13956_v44  ;;  %v11846_v50 = vadd.f32 %v11641_v30, %v4214_v16  ;;  %v13963_v44 = vld [vmem:[#allocation71_spill] sm:$0xff] }
 0x51f   : > { %v4343_v5 = vadd.f32 %v4342_v42, %v4312_v45  ;;  %v4275_v1 = vadd.f32 %v4274_v52, %v11779_v33  ;;  %v13955_v45 = vld [vmem:[#allocation59_spill] sm:$0xff]  ;;  %v4215_v52 = vadd.f32 %v4170_v49, %v3671_v19  ;;  %v4216_v0 = vadd.f32 %v4173_v35, %v13958_v6 }
 0x520   : > { %v3587_v4 = vadd.f32 %v13955_v45, %v3414_v3 }
 0x521   : > { %v4344_v21 = vadd.f32 %v4343_v5, %v4313_v24  ;;  %v4276_v58 = vadd.f32 %v4275_v1, %v11790_v53  ;;  %v11838_v24 = vadd.f32 %v11641_v30, %v4213_v12  ;;  %v13959_v5 = vld [vmem:[#allocation64_spill] sm:$0xff]  ;;  %v13961_v12 = vld [vmem:[#allocation73_spill] sm:$0xff] }
 0x522   : > { %v13960_v1 = vld [vmem:[#allocation72_spill] sm:$0xff] }
 0x523   : > { %v11704_v37 = vpop.f32.mrf.mxu3  ;;  %v4345_v20 = vadd.f32 %v4344_v21, %v4314_v47  ;;  %v4277_v42 = vadd.f32 %v4276_v58, %v11800_v41  ;;  %v3592_v47 = vadd.f32 %v13959_v5, %v3419_v26  ;;  %v3424_v49 = vadd.f32 %v13961_v12, %v13960_v1  ;;  %v13962_v21 = vld [vmem:[#allocation55_spill] sm:$0xff]  ;;  %v13964_v26 = vld [vmem:[#allocation66_spill] sm:$0xff]  ;;  %v13967_v12 = vld [vmem:[#allocation65_spill] sm:$0xff] }
 0x524   : > { %v4175_v17 = vadd.f32 %v11661_v22, %v11704_v37  ;;  %v4318_v19 = vmul.f32 %v11838_v24, %v11838_v24  ;;  %v11859_v58 = vadd.f32 %v11641_v30, %v4215_v52 }
 0x525   : > { %v4182_v14 = vpop.f32.mrf.mxu0  ;;  %v4346_v18 = vadd.f32 %v4345_v20, %v4315_v10  ;;  %v4278_v36 = vadd.f32 %v4277_v42, %v11813_v51  ;;  %v3676_v10 = vadd.f32 %v13962_v21, %v3587_v4  ;;  %v3597_v43 = vadd.f32 %v13963_v44, %v3424_v49 }
 0x526   : > { %v3681_v42 = vadd.f32 %v13965_v27, %v3592_v47 }
 0x527   : > { %v4347_v37 = vadd.f32 %v4346_v18, %v4316_v34  ;;  %v4279_v63 = vadd.f32 %v4278_v36, %v11823_v46  ;;  %v4217_v16 = vadd.f32 %v4175_v17, %v3676_v10  ;;  %v3686_v49 = vadd.f32 %v13967_v12, %v3597_v43 }
 0x529   : > { %v4348_v45 = vadd.f32 %v4347_v37, %v4317_v40  ;;  %v4280_v4 = vadd.f32 %v4279_v63, %v11838_v24  ;;  %v11876_v17 = vadd.f32 %v11641_v30, %v4217_v16  ;;  %v4404_v37 = vld [vmem:[%s13464_s10 + $0x8] sm:$0xff] }
 0x52a   : > { %v8803_v63 = vld [vmem:[#allocation8 + $0x138] sm:$0xff]  ;;  %4424 = vmatpush.msra.mxu3 %v4404_v37 }
 0x52b   : > { %v11737_v56 = vpop.f32.mrf.mxu3  ;;  %v4349_v52 = vadd.f32 %v4348_v45, %v4318_v19  ;;  %v4281_v18 = vadd.f32 %v4280_v4, %v11846_v50  ;;  %v4403_v19 = vld [vmem:[%s13464_s10] sm:$0xff]  ;;  %5571 = vmatpush.bf16.msra.mxu1 %v8803_v63 }
 0x52c   : > { %v4178_v22 = vadd.f32 %v11702_v48, %v11737_v56  ;;  %v4319_v48 = vmul.f32 %v11846_v50, %v11846_v50  ;;  %v11867_v56 = vadd.f32 %v11641_v30, %v4216_v0  ;;  %v8802_v4 = vld [vmem:[#allocation8 + $0x130] sm:$0xff]  ;;  %4425 = vmatpush.msra.mxu3 %v4403_v19 }
 0x52d   : > { %v4184_v3 = vpop.f32.mrf.mxu0  ;;  %v4282_v0 = vadd.f32 %v4281_v18, %v11859_v58 }
 0x52e   : > { %v4218_v20 = vadd.f32 %v4178_v22, %v13964_v26  ;;  %v4350_v6 = vadd.f32 %v4349_v52, %v4319_v48  ;;  %v4321_v5 = vmul.f32 %v11867_v56, %v11867_v56  ;;  %v3601_v48 = vpop.f32.mrf.mxu1 }
 0x52f   : > { %v4283_v22 = vadd.f32 %v4282_v0, %v11867_v56  ;;  %5572 = vmatpush.bf16.msra.mxu1 %v8802_v4  ;;  %v13968_v0 = vld [vmem:[#allocation69_spill] sm:$0xff] }
 0x531   : > { %v4284_v44 = vadd.f32 %v4283_v22, %v11876_v17 }
 0x533   : > { %v11771_v8 = vpop.f32.mrf.mxu3 }
 0x534   : > { %v4180_v35 = vadd.f32 %v11746_v25, %v11771_v8  ;;  %v4320_v25 = vmul.f32 %v11859_v58, %v11859_v58  ;;  %v3339_v8 = vpop.f32.mrf.mxu2 }
 0x535   : > { %v4187_v47 = vpop.f32.mrf.mxu0  ;;  %v3429_v21 = vadd.f32 %v11492_v2, %v3339_v8 }
 0x536   : > { %v4219_v36 = vadd.f32 %v4180_v35, %v3681_v42  ;;  %v4351_v10 = vadd.f32 %v4350_v6, %v4320_v25  ;;  %v8801_v25 = vld [vmem:[#allocation8 + $0x128] sm:$0xff] }
 0x537   : > { %v3602_v27 = vadd.f32 %v3601_v48, %v3429_v21  ;;  %5573 = vmatpush.bf16.msra.mxu1 %v8801_v25 }
 0x538   : > { %v11897_v16 = vadd.f32 %v11641_v30, %v4219_v36  ;;  %v4352_v45 = vadd.f32 %v4351_v10, %v4321_v5 }
 0x539   : > { %v3691_v5 = vadd.f32 %v13968_v0, %v3602_v27  ;;  %v8798_v0 = vld [vmem:[#allocation8 + $0x110] sm:$0xff] }
 0x53a   : > { %v4324_v52 = vmul.f32 %v11897_v16, %v11897_v16 }
 0x53b   : > { %v4093_v59 = vpop.f32.mrf.mxu3 }
 0x53c   : > { %v4183_v34 = vadd.f32 %v4182_v14, %v4093_v59  ;;  %v11882_v14 = vadd.f32 %v11641_v30, %v4218_v20  ;;  %v13966_v59 = vld [vmem:[#allocation70_spill] sm:$0xff] }
 0x53d   : > { %v4189_v6 = vpop.f32.mrf.mxu0 }
 0x53e   : > { %v4220_v1 = vadd.f32 %v4183_v34, %v13966_v59  ;;  %v4323_v43 = vmul.f32 %v11882_v14, %v11882_v14  ;;  %v4285_v34 = vadd.f32 %v4284_v44, %v11882_v14 }
 0x540   : > { %v11903_v26 = vadd.f32 %v11641_v30, %v4220_v1  ;;  %v4286_v36 = vadd.f32 %v4285_v34, %v11897_v16 }
 0x542   : > { %v4287_v1 = vadd.f32 %v4286_v36, %v11903_v26 }
 0x543   : > { %v4095_v39 = vpop.f32.mrf.mxu3 }
 0x544   : > { %v4185_v40 = vadd.f32 %v4184_v3, %v4095_v39  ;;  %v4322_v39 = vmul.f32 %v11876_v17, %v11876_v17 }
 0x546   : > { %v4221_v2 = vadd.f32 %v4185_v40, %v3686_v49  ;;  %v4353_v42 = vadd.f32 %v4352_v45, %v4322_v39  ;;  %v4325_v40 = vmul.f32 %v11903_v26, %v11903_v26 }
 0x548   : > { %v11910_v18 = vadd.f32 %v11641_v30, %v4221_v2  ;;  %v4354_v8 = vadd.f32 %v4353_v42, %v4323_v43 }
 0x54a   : > { %v4355_v59 = vadd.f32 %v4354_v8, %v4324_v52  ;;  %v4326_v12 = vmul.f32 %v11910_v18, %v11910_v18  ;;  %v4288_v10 = vadd.f32 %v4287_v1, %v11910_v18 }
 0x54b   : > { %v4098_v3 = vpop.f32.mrf.mxu3 }
 0x54c   : > { %v4188_v35 = vadd.f32 %v4187_v47, %v4098_v3  ;;  %v4356_v21 = vadd.f32 %v4355_v59, %v4325_v40  ;;  %v8800_v40 = vld [vmem:[#allocation8 + $0x120] sm:$0xff] }
 0x54d   : > { %5574 = vmatpush.bf16.msra.mxu1 %v8800_v40 }
 0x54e   : > { %v4222_v20 = vadd.f32 %v4188_v35, %v11490_v54  ;;  %v4357_v37 = vadd.f32 %v4356_v21, %v4326_v12 }
 0x550   : > { %v11916_v54 = vadd.f32 %v11641_v30, %v4222_v20 }
 0x552   : > { %v4327_v22 = vmul.f32 %v11916_v54, %v11916_v54  ;;  %v4289_v63 = vadd.f32 %v4288_v10, %v11916_v54  ;;  %v8768_v10 = vld [vmem:[#allocation8 + $0x38] sm:$0xff] }
 0x553   : > { %v4100_v47 = vpop.f32.mrf.mxu3  ;;  %5909 = vmatpush.bf16.msrb.mxu0 %v8768_v10 }
 0x554   : > { %v4190_v49 = vadd.f32 %v4189_v6, %v4100_v47  ;;  %v4358_v39 = vadd.f32 %v4357_v37, %v4327_v22  ;;  %v8799_v6 = vld [vmem:[#allocation8 + $0x118] sm:$0xff] }
 0x555   : > { %5575 = vmatpush.bf16.msra.mxu1 %v8799_v6 }
 0x556   : > { %v4223_v3 = vadd.f32 %v4190_v49, %v3691_v5  ;;  %v8797_v5 = vld [vmem:[#allocation8 + $0x108] sm:$0xff] }
 0x558   : > { %v11927_v19 = vadd.f32 %v11641_v30, %v4223_v3  ;;  %v8767_v3 = vld [vmem:[#allocation8 + $0x30] sm:$0xff] }
 0x559   : > { %5576 = vmatpush.bf16.msra.mxu1 %v8798_v0  ;;  %5910 = vmatpush.bf16.msrb.mxu0 %v8767_v3 }
 0x55a   : > { %v4290_v2 = vadd.f32 %v4289_v63, %v11927_v19  ;;  %v4328_v35 = vmul.f32 %v11927_v19, %v11927_v19 }
 0x55c   : > { %v4291_v45 = vrot.slane %v4290_v2, 4  ;;  %v4359_v4 = vadd.f32 %v4358_v39, %v4328_v35 }
 0x55d   : > { %5577 = vmatpush.bf16.msra.mxu1 %v8797_v5 }
 0x55e   : > { %v4292_v48 = vadd.f32 %v4291_v45, %v4290_v2  ;;  %v4360_v44 = vrot.slane %v4359_v4, 4  ;;  %v8974_v45 = vld [vmem:[%s13461_s7] ss:$0 sm:$0xff] }
 0x560   : > { %v4293_v43 = vrot.slane %v4292_v48, 2  ;;  %v4361_v20 = vadd.f32 %v4360_v44, %v4359_v4  ;;  %v8766_v44 = vld [vmem:[#allocation8 + $0x28] sm:$0xff] }
 0x561   : > { %5911 = vmatpush.bf16.msrb.mxu0 %v8766_v44 }
 0x562   : > { %v4294_v27 = vadd.f32 %v4293_v43, %v4292_v48  ;;  %v4362_v42 = vrot.slane %v4361_v20, 2 }
 0x564   : > { %v4295_v34 = vrot.slane %v4294_v27, 1  ;;  %v4363_v52 = vadd.f32 %v4362_v42, %v4361_v20 }
 0x566   : > { %v4364_v25 = vrot.slane %v4363_v52, 1  ;;  %v4296_v8 = vadd.f32 %v4295_v34, %v4294_v27  ;;  %v4451_v27 = vld [vmem:[%s13462_s8] sm:$0x1] }
 0x568   : > { %v4365_v30 = vadd.f32 %v4364_v25, %v4363_v52 }
 0x56a   : > { %v4366_v36 = vsel %vm13969_vm2, %v4296_v8, %v4365_v30 }
 0x56b   : > { %4399 = vmatmul.f32.vlgmr.msrb.gmra.mxu2 %v4366_v36 }
 0x5ee   : > { %v4400_v47 = vpop.f32.mrf.mxu2 }
 0x5ef   : > { %7888 = vmatmul.msk.f32.vlgmr.msra.gmra.mxu3 %vm13970_vm12, %v4400_v47 }
 0x672   : > { %v4427_v59 = vpop.f32.mrf.mxu3 }
 0x673   : > { %v4430_v1 = vmul.f32 %v4427_v59, %v4427_v59 }
 0x675   : > { %v4432_v12 = vrot.slane %v4430_v1, 7 }
 0x677   : > { %v4434_v49 = vsub.f32 %v4427_v59, %v4432_v12 }
 0x679   : > { %v4435_v21 = vadd.f32 1e-05, %v4434_v49 }
 0x67b   : > { %9107 = vrsqrt.f32 %v4435_v21  ;;  %vm4442_vm11 = vweird.f32 %v4435_v21 }
 0x681   : > { %v9108_v22 = vpop.eup %9107 }
 0x682   : > { %v4437_v37 = vmul.f32 %v9108_v22, %v4435_v21  ;;  %vm4443_vm4 = vweird.f32 %v9108_v22 }
 0x683   : > { %vm4444_vm2 = vmor %vm4442_vm11, %vm4443_vm4 }
 0x684   : > { %v4438_v63 = vmul.f32 %v9108_v22, %v4437_v37 }
 0x686   : > { %v4439_v39 = vmul.f32 0.5, %v4438_v63 }
 0x688   : > { %v4440_v2 = vsub.f32 1.5, %v4439_v39 }
 0x68a   : > { %v4441_v35 = vmul.f32 %v9108_v22, %v4440_v2 }
 0x68c   : > { %v4445_v4 = vsel %vm4444_vm2, %v9108_v22, %v4441_v35 }
 0x68d   : > { %v4450_v48 = vmul.f32 %v8974_v45, %v4445_v4 }
 0x68f   : > { %v4453_v43 = vrot.slane %v4450_v48, 1  ;;  %v11940_v34 = vperm.slane %v4450_v48, 1 }
 0x691   : > { %v4455_v20 = vmul.f32 %v4453_v43, %v4427_v59  ;;  %v4458_v25 = vmul.f32 %v11940_v34, %v11655_v38  ;;  %v4459_v8 = vmul.f32 %v11940_v34, %v11651_v55  ;;  %v4460_v30 = vmul.f32 %v11940_v34, %v11659_v15 }
 0x692   : > { %v4461_v36 = vmul.f32 %v11940_v34, %v11667_v29  ;;  %v4462_v40 = vmul.f32 %v11940_v34, %v11677_v62  ;;  %v4463_v0 = vmul.f32 %v11940_v34, %v11685_v13  ;;  %v4464_v29 = vmul.f32 %v11940_v34, %v11692_v61 }
 0x693   : > { %v4456_v42 = vsub.f32 %v4451_v27, %v4455_v20  ;;  %v4465_v5 = vmul.f32 %v11940_v34, %v11699_v60  ;;  %v4466_v47 = vmul.f32 %v11940_v34, %v11710_v28  ;;  %v4467_v59 = vmul.f32 %v11940_v34, %v11720_v7 }
 0x694   : > { %v4468_v7 = vmul.f32 %v11940_v34, %v11727_v23  ;;  %v4469_v22 = vmul.f32 %v11940_v34, %v11734_v32  ;;  %v4470_v23 = vmul.f32 %v11940_v34, %v11743_v57  ;;  %v4471_v32 = vmul.f32 %v11940_v34, %v11752_v31 }
 0x695   : > { %v11942_v52 = vperm.slane %v4456_v42, 0  ;;  %v4472_v57 = vmul.f32 %v11940_v34, %v11759_v9  ;;  %v4473_v31 = vmul.f32 %v11940_v34, %v11768_v11  ;;  %v4474_v9 = vmul.f32 %v11940_v34, %v11779_v33 }
 0x696   : > { %v4475_v11 = vmul.f32 %v11940_v34, %v11790_v53  ;;  %v4476_v33 = vmul.f32 %v11940_v34, %v11800_v41  ;;  %v4477_v53 = vmul.f32 %v11940_v34, %v11813_v51  ;;  %v4478_v41 = vmul.f32 %v11940_v34, %v11823_v46 }
 0x697   : > { %v11955_v6 = vadd.f32 %v11942_v52, %v4458_v25  ;;  %v11960_v38 = vadd.f32 %v11942_v52, %v4459_v8  ;;  %v11963_v55 = vadd.f32 %v11942_v52, %v4460_v30  ;;  %v11966_v15 = vadd.f32 %v11942_v52, %v4461_v36 }
 0x698   : > { %v11971_v62 = vadd.f32 %v11942_v52, %v4462_v40  ;;  %v11976_v13 = vadd.f32 %v11942_v52, %v4463_v0  ;;  %v11983_v1 = vadd.f32 %v11942_v52, %v4464_v29  ;;  %v11988_v12 = vadd.f32 %v11942_v52, %v4465_v5 }
 0x699   : > { %v4789_v61 = vpack.c.bf16 %v11955_v6, %v11955_v6  ;;  %v4790_v60 = vpack.c.bf16 %v11960_v38, %v11960_v38  ;;  %v4791_v49 = vpack.c.bf16 %v11963_v55, %v11963_v55  ;;  %v4792_v28 = vpack.c.bf16 %v11966_v15, %v11966_v15 }
 0x69a   : > { %v11999_v21 = vadd.f32 %v11942_v52, %v4466_v47  ;;  %v4793_v10 = vpack.c.bf16 %v11971_v62, %v11971_v62  ;;  %v12006_v3 = vadd.f32 %v11942_v52, %v4467_v59  ;;  %v4794_v37 = vpack.c.bf16 %v11976_v13, %v11976_v13 }
 0x69b   : > { %4821 = vst [vmem:[#allocation2 + $0x1c] sm:$0xf] %v4789_v61  ;;  %v12013_v63 = vadd.f32 %v11942_v52, %v4468_v7  ;;  %v4795_v39 = vpack.c.bf16 %v11983_v1, %v11983_v1  ;;  %v12020_v2 = vadd.f32 %v11942_v52, %v4469_v22  ;;  %v4796_v35 = vpack.c.bf16 %v11988_v12, %v11988_v12 }
 0x69c   : > { %4822 = vst [vmem:[#allocation2 + $0x28] sm:$0xf] %v4790_v60  ;;  %v12027_v45 = vadd.f32 %v11942_v52, %v4470_v23  ;;  %v4797_v4 = vpack.c.bf16 %v11999_v21, %v11999_v21  ;;  %v12034_v48 = vadd.f32 %v11942_v52, %v4471_v32  ;;  %v4798_v44 = vpack.c.bf16 %v12006_v3, %v12006_v3 }
 0x69d   : > { %4823 = vst [vmem:[#allocation2 + $0x34] sm:$0xf] %v4791_v49  ;;  %v12041_v43 = vadd.f32 %v11942_v52, %v4472_v57  ;;  %v4799_v20 = vpack.c.bf16 %v12013_v63, %v12013_v63  ;;  %v12048_v27 = vadd.f32 %v11942_v52, %v4473_v31  ;;  %v4800_v42 = vpack.c.bf16 %v12020_v2, %v12020_v2  ;;  %v8796_v57 = vld [vmem:[#allocation8 + $0x100] sm:$0xff] }
 0x69e   : > { %4824 = vst [vmem:[#allocation2 + $0x40] sm:$0xf] %v4792_v28  ;;  %v12055_v25 = vadd.f32 %v11942_v52, %v4474_v9  ;;  %v4801_v8 = vpack.c.bf16 %v12027_v45, %v12027_v45  ;;  %v12062_v30 = vadd.f32 %v11942_v52, %v4475_v11  ;;  %v4802_v36 = vpack.c.bf16 %v12034_v48, %v12034_v48 }
 0x69f   : > { %4825 = vst [vmem:[#allocation2 + $0x4c] sm:$0xf] %v4793_v10  ;;  %v12069_v40 = vadd.f32 %v11942_v52, %v4476_v33  ;;  %v4803_v0 = vpack.c.bf16 %v12041_v43, %v12041_v43  ;;  %v4479_v51 = vmul.f32 %v11940_v34, %v11838_v24  ;;  %v12076_v29 = vadd.f32 %v11942_v52, %v4477_v53 }
 0x6a0   : > { %4826 = vst [vmem:[#allocation2 + $0x58] sm:$0xf] %v4794_v37  ;;  %v4804_v5 = vpack.c.bf16 %v12048_v27, %v12048_v27  ;;  %v4480_v46 = vmul.f32 %v11940_v34, %v11846_v50  ;;  %v12083_v47 = vadd.f32 %v11942_v52, %v4478_v41  ;;  %v4805_v59 = vpack.c.bf16 %v12055_v25, %v12055_v25 }
 0x6a1   : > { %4827 = vst [vmem:[#allocation2 + $0x64] sm:$0xf] %v4795_v39  ;;  %v4481_v24 = vmul.f32 %v11940_v34, %v11859_v58  ;;  %v12090_v61 = vadd.f32 %v11942_v52, %v4479_v51  ;;  %v4806_v60 = vpack.c.bf16 %v12062_v30, %v12062_v30  ;;  %v4482_v50 = vmul.f32 %v11940_v34, %v11867_v56 }
 0x6a2   : > { %4828 = vst [vmem:[#allocation2 + $0x70] sm:$0xf] %v4796_v35  ;;  %v12097_v49 = vadd.f32 %v11942_v52, %v4480_v46  ;;  %v4807_v28 = vpack.c.bf16 %v12069_v40, %v12069_v40  ;;  %v4483_v58 = vmul.f32 %v11940_v34, %v11876_v17  ;;  %v4808_v10 = vpack.c.bf16 %v12076_v29, %v12076_v29 }
 0x6a3   : > { %4829 = vst [vmem:[#allocation2 + $0x7c] sm:$0xf] %v4797_v4  ;;  %v12104_v7 = vadd.f32 %v11942_v52, %v4481_v24  ;;  %v4484_v56 = vmul.f32 %v11940_v34, %v11882_v14  ;;  %v12111_v22 = vadd.f32 %v11942_v52, %v4482_v50  ;;  %v4809_v37 = vpack.c.bf16 %v12083_v47, %v12083_v47 }
 0x6a4   : > { %4830 = vst [vmem:[#allocation2 + $0x88] sm:$0xf] %v4798_v44  ;;  %v4485_v17 = vmul.f32 %v11940_v34, %v11897_v16  ;;  %v12118_v23 = vadd.f32 %v11942_v52, %v4483_v58  ;;  %v4810_v39 = vpack.c.bf16 %v12090_v61, %v12090_v61  ;;  %v4486_v14 = vmul.f32 %v11940_v34, %v11903_v26  ;;  %v8765_v44 = vld [vmem:[#allocation8 + $0x20] sm:$0xff] }
 0x6a5   : > { %4831 = vst [vmem:[#allocation2 + $0x94] sm:$0xf] %v4799_v20  ;;  %v12125_v32 = vadd.f32 %v11942_v52, %v4484_v56  ;;  %v4811_v35 = vpack.c.bf16 %v12097_v49, %v12097_v49  ;;  %v4487_v16 = vmul.f32 %v11940_v34, %v11910_v18  ;;  %v4488_v4 = vmul.f32 %v11940_v34, %v11916_v54 }
 0x6a6   : > { %4832 = vst [vmem:[#allocation2 + $0xa0] sm:$0xf] %v4800_v42  ;;  %v12134_v31 = vadd.f32 %v11942_v52, %v4485_v17  ;;  %v4812_v26 = vpack.c.bf16 %v12104_v7, %v12104_v7  ;;  %v4489_v9 = vmul.f32 %v11940_v34, %v11927_v19  ;;  %v12141_v20 = vadd.f32 %v11942_v52, %v4486_v14  ;;  %v13971_v14 = vld [vmem:[#allocation19_spill] sm:$0xff] }
 0x6a7   : > { %4833 = vst [vmem:[#allocation2 + $0xac] sm:$0xf] %v4801_v8  ;;  %v4813_v18 = vpack.c.bf16 %v12111_v22, %v12111_v22  ;;  %v12146_v54 = vadd.f32 %v11942_v52, %v4487_v16  ;;  %v12149_v11 = vadd.f32 %v11942_v52, %v4488_v4  ;;  %v4814_v42 = vpack.c.bf16 %v12118_v23, %v12118_v23 }
 0x6a8   : > { %4834 = vst [vmem:[#allocation2 + $0xb8] sm:$0xf] %v4802_v36  ;;  %v12154_v33 = vadd.f32 %v11942_v52, %v4489_v9  ;;  %v4525_v19 = vrot.slane %v11955_v6, 7  ;;  %v4526_v34 = vrot.slane %v11960_v38, 7  ;;  %v4815_v8 = vpack.c.bf16 %v12125_v32, %v12125_v32  ;;  %5578 = vmatpush.bf16.msra.mxu1 %v8796_v57  ;;  %5912 = vmatpush.bf16.msrb.mxu0 %v8765_v44 }
 0x6a9   : > { %4835 = vst [vmem:[#allocation2 + $0xc4] sm:$0xf] %v4803_v0  ;;  %v4527_v53 = vrot.slane %v11963_v55, 7  ;;  %v13564_v36 = vrot.slane %v11966_v15, 7  ;;  %v4529_v41 = vrot.slane %v11971_v62, 7  ;;  %v4816_v0 = vpack.c.bf16 %v12134_v31, %v12134_v31 }
 0x6aa   : > { %4836 = vst [vmem:[#allocation2 + $0xd0] sm:$0xf] %v4804_v5  ;;  %v13562_v52 = vrot.slane %v11976_v13, 7  ;;  %v13563_v51 = vrot.slane %v11983_v1, 7  ;;  %v13559_v5 = vrot.slane %v11988_v12, 7  ;;  %v4817_v46 = vpack.c.bf16 %v12141_v20, %v12141_v20 }
 0x6ab   : > { %4837 = vst [vmem:[#allocation2 + $0xdc] sm:$0xf] %v4805_v59  ;;  %v13561_v59 = vrot.slane %v11999_v21, 7  ;;  %v13560_v24 = vrot.slane %v12006_v3, 7  ;;  %v4818_v50 = vpack.c.bf16 %v12146_v54, %v12146_v54  ;;  %v13584_v58 = vrot.slane %v12027_v45, 7 }
 0x6ac   : > { %4838 = vst [vmem:[#allocation2 + $0xe8] sm:$0xf] %v4806_v60  ;;  %v4535_v60 = vrot.slane %v12013_v63, 7  ;;  %v4819_v56 = vpack.c.bf16 %v12149_v11, %v12149_v11  ;;  %v13567_v17 = vrot.slane %v12048_v27, 7  ;;  %vm13972_vm12 = vcmp.lt.s32.totalorder %v13971_v14, 1 }
 0x6ad   : > { %4839 = vst [vmem:[#allocation2 + $0xf4] sm:$0xf] %v4807_v28  ;;  %v13565_v28 = vrot.slane %v12020_v2, 7  ;;  %v13570_v57 = vrot.slane %v12055_v25, 7  ;;  %vm13973_vm4 = vmmov %vm13972_vm12  ;;  %v13569_v44 = vrot.slane %v12062_v30, 7  ;;  %v13572_v9 = vrot.slane %v12069_v40, 7 }
 0x6ae   : > { %4840 = vst [vmem:[#allocation2 + $0x100] sm:$0xf] %v4808_v10  ;;  %v13566_v10 = vrot.slane %v12034_v48, 7  ;;  %v4581_v16 = vsel %vm13973_vm4, %v13563_v51, %v13559_v5  ;;  %vm13974_vm11 = vmmov %vm13973_vm4  ;;  %v13575_v51 = vrot.slane %v12097_v49, 7 }
 0x6af   : > { %4841 = vst [vmem:[#allocation2 + $0x10c] sm:$0xf] %v4809_v37  ;;  %v13568_v37 = vrot.slane %v12041_v43, 7  ;;  %v4583_v4 = vsel %vm13974_vm11, %v4529_v41, %v13562_v52  ;;  %vm13975_vm2 = vmmov %vm13973_vm4  ;;  %v4732_v52 = vpack.c.bf16 %v4581_v16, %v4581_v16 }
 0x6b0   : > { %4842 = vst [vmem:[#allocation2 + $0x118] sm:$0xf] %v4810_v39  ;;  %v4820_v39 = vpack.c.bf16 %v12154_v33, %v12154_v33  ;;  %vm13977_vm4 = vmmov %vm13975_vm2 }
 0x6b1   : > { %4843 = vst [vmem:[#allocation2 + $0x124] sm:$0xf] %v4811_v35  ;;  %v4587_v35 = vsel %vm13972_vm12, %v4525_v19, %v4526_v34  ;;  %vm13976_vm12 = vmmov %vm13975_vm2 }
 0x6b2   : > { %4844 = vst [vmem:[#allocation2 + $0x130] sm:$0xf] %v4812_v26  ;;  %v4585_v26 = vsel %vm13975_vm2, %v4527_v53, %v13564_v36  ;;  %v4726_v5 = vpack.c.bf16 %v4587_v35, %v4587_v35  ;;  %vm13978_vm11 = vmmov %vm13975_vm2  ;;  %v13576_v36 = vrot.slane %v12104_v7, 7 }
 0x6b3   : > { %4845 = vst [vmem:[#allocation2 + $0x13c] sm:$0xf] %v4813_v18  ;;  %v13571_v18 = vrot.slane %v12076_v29, 7 }
 0x6b4   : > { %4846 = vst [vmem:[#allocation2 + $0x148] sm:$0xf] %v4814_v42  ;;  %v4579_v42 = vsel %vm13976_vm12, %v13561_v59, %v13560_v24  ;;  %v4728_v24 = vpack.c.bf16 %v4585_v26, %v4585_v26  ;;  %v4730_v59 = vpack.c.bf16 %v4583_v4, %v4583_v4  ;;  %vm13979_vm12 = vmmov %vm13975_vm2  ;;  %v13580_v26 = vrot.slane %v12125_v32, 7 }
 0x6b5   : > { %4847 = vst [vmem:[#allocation2 + $0x154] sm:$0xf] %v4815_v8  ;;  %v13574_v8 = vrot.slane %v12083_v47, 7  ;;  %v4734_v35 = vpack.c.bf16 %v4579_v42, %v4579_v42  ;;  %v4571_v16 = vsel %vm13979_vm12, %v13570_v57, %v13569_v44  ;;  %v13583_v44 = vrot.slane %v12149_v11, 7  ;;  %vm13982_vm12 = vmmov %vm13975_vm2 }
 0x6b6   : > { %4848 = vst [vmem:[#allocation2 + $0x160] sm:$0xf] %v4816_v0  ;;  %v13573_v0 = vrot.slane %v12090_v61, 7  ;;  %v4556_v57 = vrot.slane %v12154_v33, 7 }
 0x6b7   : > { %4849 = vst [vmem:[#allocation2 + $0x16c] sm:$0xf] %v4817_v46  ;;  %v4577_v46 = vsel %vm13977_vm4, %v4535_v60, %v13565_v28  ;;  %v13578_v28 = vrot.slane %v12111_v22, 7  ;;  %vm13980_vm4 = vmmov %vm13975_vm2 }
 0x6b8   : > { %4850 = vst [vmem:[#allocation2 + $0x178] sm:$0xf] %v4818_v50  ;;  %v4575_v50 = vsel %vm13978_vm11, %v13584_v58, %v13566_v10  ;;  %v4736_v4 = vpack.c.bf16 %v4577_v46, %v4577_v46  ;;  %v13579_v10 = vrot.slane %v12134_v31, 7  ;;  %vm13981_vm11 = vmmov %vm13975_vm2  ;;  %v13597_v58 = vrot.slane %v12034_v48, 1 }
 0x6b9   : > { %4851 = vst [vmem:[#allocation2 + $0x184] sm:$0xf] %v4819_v56  ;;  %v4573_v56 = vsel %vm13975_vm2, %v13568_v37, %v13567_v17  ;;  %v4738_v42 = vpack.c.bf16 %v4575_v50, %v4575_v50  ;;  %v13581_v17 = vrot.slane %v12141_v20, 7  ;;  %v13582_v37 = vrot.slane %v12146_v54, 7 }
 0x6ba   : > { %4852 = vst [vmem:[#allocation2 + $0x190] sm:$0xf] %v4820_v39  ;;  %v13577_v39 = vrot.slane %v12118_v23, 7  ;;  %v4740_v46 = vpack.c.bf16 %v4573_v56, %v4573_v56  ;;  %v4742_v50 = vpack.c.bf16 %v4571_v16, %v4571_v16 }
 0x6bb   : > { %4758 = vst [vmem:[#allocation2 + $0x24] sm:$0xf] %v4726_v5  ;;  %v4569_v5 = vsel %vm13980_vm4, %v13572_v9, %v13571_v18  ;;  %v13585_v18 = vrot.slane %v11955_v6, 1  ;;  %v13586_v9 = vrot.slane %v11960_v38, 1  ;;  %vm13983_vm4 = vmmov %vm13975_vm2 }
 0x6bc   : > { %4760 = vst [vmem:[#allocation2 + $0x3c] sm:$0xf] %v4728_v24  ;;  %v4567_v24 = vsel %vm13981_vm11, %v13574_v8, %v13573_v0  ;;  %v4744_v56 = vpack.c.bf16 %v4569_v5, %v4569_v5  ;;  %v13588_v0 = vrot.slane %v11963_v55, 1  ;;  %v13587_v8 = vrot.slane %v11966_v15, 1  ;;  %vm13984_vm11 = vmmov %vm13975_vm2 }
 0x6bd   : > { %4762 = vst [vmem:[#allocation2 + $0x54] sm:$0xf] %v4730_v59  ;;  %v4565_v59 = vsel %vm13975_vm2, %v13575_v51, %v13576_v36  ;;  %v4746_v16 = vpack.c.bf16 %v4567_v24, %v4567_v24  ;;  %v13590_v51 = vrot.slane %v11971_v62, 1  ;;  %v13589_v36 = vrot.slane %v11976_v13, 1 }
 0x6be   : > { %4764 = vst [vmem:[#allocation2 + $0x6c] sm:$0xf] %v4732_v52  ;;  %v4563_v52 = vsel %vm13982_vm12, %v13578_v28, %v13577_v39  ;;  %v4748_v5 = vpack.c.bf16 %v4565_v59, %v4565_v59  ;;  %v13592_v39 = vrot.slane %v11983_v1, 1  ;;  %v13591_v28 = vrot.slane %v11988_v12, 1 }
 0x6bf   : > { %4766 = vst [vmem:[#allocation2 + $0x84] sm:$0xf] %v4734_v35  ;;  %v4561_v35 = vsel %vm13983_vm4, %v13580_v26, %v13579_v10  ;;  %v4750_v24 = vpack.c.bf16 %v4563_v52, %v4563_v52  ;;  %v13594_v10 = vrot.slane %v11999_v21, 1  ;;  %v13593_v26 = vrot.slane %v12006_v3, 1 }
 0x6c0   : > { %4768 = vst [vmem:[#allocation2 + $0x9c] sm:$0xf] %v4736_v4  ;;  %v4559_v4 = vsel %vm13984_vm11, %v13581_v17, %v13582_v37  ;;  %vm13985_vm12 = vcmp.lt.s32.totalorder %v13971_v14, 7  ;;  %v4752_v59 = vpack.c.bf16 %v4561_v35, %v4561_v35  ;;  %v13596_v17 = vrot.slane %v12013_v63, 1 }
 0x6c1   : > { %4770 = vst [vmem:[#allocation2 + $0xb4] sm:$0xf] %v4738_v42  ;;  %v4557_v42 = vsel %vm13975_vm2, %v13583_v44, %v4556_v57  ;;  %v13595_v37 = vrot.slane %v12020_v2, 1  ;;  %vm13986_vm4 = vmmov %vm13985_vm12  ;;  %v4754_v52 = vpack.c.bf16 %v4559_v4, %v4559_v4  ;;  %v13598_v44 = vrot.slane %v12027_v45, 1 }
 0x6c2   : > { %4772 = vst [vmem:[#allocation2 + $0xcc] sm:$0xf] %v4740_v46  ;;  %v4683_v46 = vsel %vm13985_vm12, %v13585_v18, %v13586_v9  ;;  %vm13987_vm11 = vmmov %vm13986_vm4  ;;  %v4756_v35 = vpack.c.bf16 %v4557_v42, %v4557_v42  ;;  %v13599_v18 = vrot.slane %v12041_v43, 1  ;;  %v13600_v9 = vrot.slane %v12048_v27, 1 }
 0x6c3   : > { %4774 = vst [vmem:[#allocation2 + $0xe4] sm:$0xf] %v4742_v50  ;;  %v4681_v50 = vsel %vm13986_vm4, %v13588_v0, %v13587_v8  ;;  %vm13988_vm2 = vmmov %vm13986_vm4  ;;  %v4853_v4 = vpack.c.bf16 %v4683_v46, %v4683_v46  ;;  %v13602_v8 = vrot.slane %v12055_v25, 1  ;;  %v13601_v0 = vrot.slane %v12062_v30, 1 }
 0x6c4   : > { %4776 = vst [vmem:[#allocation2 + $0xfc] sm:$0xf] %v4744_v56  ;;  %v4679_v56 = vsel %vm13987_vm11, %v13590_v51, %v13589_v36  ;;  %vm13989_vm12 = vmmov %vm13988_vm2  ;;  %v4855_v42 = vpack.c.bf16 %v4681_v50, %v4681_v50  ;;  %v4639_v36 = vrot.slane %v12069_v40, 1  ;;  %v4640_v51 = vrot.slane %v12076_v29, 1 }
 0x6c5   : > { %4778 = vst [vmem:[#allocation2 + $0x114] sm:$0xf] %v4746_v16  ;;  %v4677_v16 = vsel %vm13988_vm2, %v13592_v39, %v13591_v28  ;;  %vm13990_vm4 = vmmov %vm13988_vm2  ;;  %v4857_v46 = vpack.c.bf16 %v4679_v56, %v4679_v56  ;;  %v4641_v28 = vrot.slane %v12083_v47, 1  ;;  %v13603_v39 = vrot.slane %v12090_v61, 1 }
 0x6c6   : > { %4780 = vst [vmem:[#allocation2 + $0x12c] sm:$0xf] %v4748_v5  ;;  %v4675_v5 = vsel %vm13989_vm12, %v13594_v10, %v13593_v26  ;;  %vm13991_vm11 = vmmov %vm13988_vm2  ;;  %v4859_v50 = vpack.c.bf16 %v4677_v16, %v4677_v16  ;;  %v13611_v26 = vrot.slane %v12097_v49, 1  ;;  %v13609_v10 = vrot.slane %v12104_v7, 1 }
 0x6c7   : > { %4782 = vst [vmem:[#allocation2 + $0x144] sm:$0xf] %v4750_v24  ;;  %v4673_v24 = vsel %vm13990_vm4, %v13596_v17, %v13595_v37  ;;  %v4861_v56 = vpack.c.bf16 %v4675_v5, %v4675_v5  ;;  %v13610_v37 = vrot.slane %v12111_v22, 1  ;;  %v13612_v17 = vrot.slane %v12118_v23, 1  ;;  %vm13992_vm12 = vmmov %vm13988_vm2 }
 0x6c8   : > { %4784 = vst [vmem:[#allocation2 + $0x15c] sm:$0xf] %v4752_v59  ;;  %v4671_v59 = vsel %vm13991_vm11, %v13598_v44, %v13597_v58  ;;  %v4863_v16 = vpack.c.bf16 %v4673_v24, %v4673_v24  ;;  %v13613_v58 = vrot.slane %v12125_v32, 1  ;;  %v13605_v44 = vrot.slane %v12134_v31, 1  ;;  %vm13993_vm4 = vmmov %vm13988_vm2 }
 0x6c9   : > { %4786 = vst [vmem:[#allocation2 + $0x174] sm:$0xf] %v4754_v52  ;;  %v4669_v52 = vsel %vm13988_vm2, %v13599_v18, %v13600_v9  ;;  %v4865_v5 = vpack.c.bf16 %v4671_v59, %v4671_v59  ;;  %v13606_v18 = vrot.slane %v12141_v20, 1  ;;  %v13604_v9 = vrot.slane %v12146_v54, 1  ;;  %vm13994_vm11 = vmmov %vm13988_vm2 }
 0x6ca   : > { %4788 = vst [vmem:[#allocation2 + $0x18c] sm:$0xf] %v4756_v35  ;;  %v4667_v35 = vsel %vm13992_vm12, %v13602_v8, %v13601_v0  ;;  %v4867_v24 = vpack.c.bf16 %v4669_v52, %v4669_v52  ;;  %v13608_v0 = vrot.slane %v12149_v11, 1  ;;  %v13607_v8 = vrot.slane %v12154_v33, 1  ;;  %vm13995_vm12 = vmmov %vm13988_vm2 }
 0x6cb   : > { %4885 = vst [vmem:[#allocation2 + $0x20] sm:$0xf] %v4853_v4  ;;  %v4665_v4 = vsel %vm13993_vm4, %v4639_v36, %v4640_v51  ;;  %v4869_v59 = vpack.c.bf16 %v4667_v35, %v4667_v35  ;;  %vm13996_vm4 = vcmp.lt.s32.totalorder %v13971_v14, 1 }
 0x6cc   : > { %4887 = vst [vmem:[#allocation2 + $0x38] sm:$0xf] %v4855_v42  ;;  %v4663_v42 = vsel %vm13994_vm11, %v4641_v28, %v13603_v39  ;;  %v4871_v52 = vpack.c.bf16 %v4665_v4, %v4665_v4  ;;  %v4588_v39 = vsel %vm13996_vm4, %v4556_v57, %v4525_v19  ;;  %vm13997_vm11 = vmmov %vm13988_vm2  ;;  %v14000_v4 = vrot.slane %v11966_v15, 7 }
 0x6cd   : > { %4889 = vst [vmem:[#allocation2 + $0x50] sm:$0xf] %v4857_v46  ;;  %v4661_v46 = vsel %vm13988_vm2, %v13611_v26, %v13609_v10  ;;  %v4873_v35 = vpack.c.bf16 %v4663_v42, %v4663_v42  ;;  %vm13998_vm2 = vmmov %vm13996_vm4  ;;  %v14002_v42 = vrot.slane %v11983_v1, 7  ;;  %v8811_v10 = vld [vmem:[#allocation8 + $0x178] sm:$0xff] }
 0x6ce   : > { %4891 = vst [vmem:[#allocation2 + $0x68] sm:$0xf] %v4859_v50  ;;  %v4659_v50 = vsel %vm13995_vm12, %v13610_v37, %v13612_v17  ;;  %vm13999_vm12 = vmmov %vm13997_vm11  ;;  %v4875_v57 = vpack.c.bf16 %v4661_v46, %v4661_v46  ;;  %5660 = vmatpush.bf16.msrb.mxu3 %v8811_v10  ;;  %v14045_v10 = vrot.slane %v12146_v54, 7 }
 0x6cf   : > { %4893 = vst [vmem:[#allocation2 + $0x80] sm:$0xf] %v4861_v56  ;;  %v4657_v56 = vsel %vm13997_vm11, %v13613_v58, %v13605_v44  ;;  %v4655_v19 = vsel %vm13999_vm12, %v13606_v18, %v13604_v9  ;;  %vm14001_vm4 = vmmov %vm13998_vm2  ;;  %v4589_v44 = vsel %vm10894_vm13, %v4588_v39, 0.0  ;;  %v14006_v18 = vrot.slane %v11988_v12, 7 }
 0x6d0   : > { %4895 = vst [vmem:[#allocation2 + $0x98] sm:$0xf] %v4863_v16  ;;  %v4586_v16 = vsel %vm13998_vm2, %v4526_v34, %v4527_v53  ;;  %v4653_v34 = vsel %vm13997_vm11, %v13608_v0, %v13607_v8  ;;  %v4877_v53 = vpack.c.bf16 %v4659_v50, %v4659_v50  ;;  %vm14007_vm12 = vmmov %vm13998_vm2  ;;  %v4881_v0 = vpack.c.bf16 %v4655_v19, %v4655_v19 }
 0x6d1   : > { %4897 = vst [vmem:[#allocation2 + $0xb0] sm:$0xf] %v4865_v5  ;;  %v4584_v5 = vsel %vm14001_vm4, %v14000_v4, %v4529_v41  ;;  %v4879_v41 = vpack.c.bf16 %v4657_v56, %v4657_v56  ;;  %v14005_v4 = vrot.slane %v11999_v21, 7  ;;  %v4591_v8 = vsel %vm11027_vm3, %v4586_v16, 0.0  ;;  %vm14010_vm13 = vmmov %vm13998_vm2 }
 0x6d2   : > { %4899 = vst [vmem:[#allocation2 + $0xc8] sm:$0xf] %v4867_v24  ;;  %v14003_v24 = vrot.slane %v11976_v13, 7  ;;  %v4883_v56 = vpack.c.bf16 %v4653_v34, %v4653_v34  ;;  %vm14014_vm3 = vmmov %vm13998_vm2  ;;  %v14020_v39 = vrot.slane %v12055_v25, 7 }
 0x6d3   : > { %4901 = vst [vmem:[#allocation2 + $0xe0] sm:$0xf] %v4869_v59  ;;  %v4580_v50 = vsel %vm14007_vm12, %v14006_v18, %v14005_v4  ;;  %v14013_v18 = vrot.slane %v12020_v2, 7  ;;  %v4725_v4 = vpack.c.bf16 %v4589_v44, %v4589_v44  ;;  %v14016_v59 = vrot.slane %v12041_v43, 7  ;;  %vm14033_vm4 = vmmov %vm13998_vm2 }
 0x6d4   : > { %v4582_v46 = vsel %vm13998_vm2, %v14003_v24, %v14002_v42  ;;  %4903 = vst [vmem:[#allocation2 + $0xf8] sm:$0xf] %v4871_v52  ;;  %v14009_v42 = vrot.slane %v12006_v3, 7  ;;  %v4593_v52 = vsel %vm10862_vm8, %v4584_v5, 0.0  ;;  %v14012_v24 = vrot.slane %v12027_v45, 7  ;;  %vm14018_vm8 = vmmov %vm13998_vm2 }
 0x6d5   : > { %4905 = vst [vmem:[#allocation2 + $0x110] sm:$0xf] %v4873_v35  ;;  %v4595_v19 = vsel %vm10996_vm7, %v4582_v46, 0.0  ;;  %v4597_v34 = vsel %vm10623_vm6, %v4580_v50, 0.0  ;;  %vm14022_vm7 = vmmov %vm13998_vm2  ;;  %v14024_v35 = vrot.slane %v12069_v40, 7  ;;  %v14099_v40 = vld [vmem:[#allocation41_spill] sm:$0xff] }
 0x6d6   : > { %v4578_v9 = vsel %vm14010_vm13, %v14009_v42, %v4535_v60  ;;  %4907 = vst [vmem:[#allocation2 + $0x128] sm:$0xf] %v4875_v57  ;;  %v4576_v16 = vsel %vm14014_vm3, %v14013_v18, %v14012_v24  ;;  %v14017_v60 = vrot.slane %v12034_v48, 7  ;;  %v4727_v42 = vpack.c.bf16 %v4591_v8, %v4591_v8  ;;  %vm14026_vm6 = vmmov %vm13998_vm2  ;;  %v8795_v57 = vld [vmem:[#allocation8 + $0xf8] sm:$0xff] }
 0x6d7   : > { %4909 = vst [vmem:[#allocation2 + $0x140] sm:$0xf] %v4877_v53  ;;  %v14021_v24 = vrot.slane %v12048_v27, 7  ;;  %v4599_v46 = vsel %vm10705_vm9, %v4578_v9, 0.0  ;;  %v4729_v18 = vpack.c.bf16 %v4593_v52, %v4593_v52  ;;  %v4601_v50 = vsel %vm11099_vm0, %v4576_v16, 0.0  ;;  %vm14030_vm9 = vmmov %vm13998_vm2  ;;  %5482 = vmatpush.bf16.msra.mxu2 %v8795_v57  ;;  %v14047_v57 = vld [vmem:[#allocation18_spill] sm:$0xff] }
 0x6d8   : > { %v4574_v5 = vsel %vm14018_vm8, %v14017_v60, %v14016_v59  ;;  %4911 = vst [vmem:[#allocation2 + $0x158] sm:$0xf] %v4879_v41  ;;  %v14025_v59 = vrot.slane %v12062_v30, 7  ;;  %v4731_v60 = vpack.c.bf16 %v4595_v19, %v4595_v19  ;;  %v14029_v9 = vrot.slane %v12104_v7, 7  ;;  %vm14037_vm0 = vmmov %vm13998_vm2 }
 0x6d9   : > { %v4572_v44 = vsel %vm14022_vm7, %v14021_v24, %v14020_v39  ;;  %4913 = vst [vmem:[#allocation2 + $0x170] sm:$0xf] %v4881_v0  ;;  %v8764_v39 = vld [vmem:[#allocation8 + $0x18] sm:$0xff]  ;;  %v14028_v24 = vrot.slane %v12111_v22, 7  ;;  %v14031_v52 = vrot.slane %v12083_v47, 7  ;;  %v14032_v53 = vrot.slane %v12076_v29, 7  ;;  %vm14046_vm2 = vmmov %vm14037_vm0 }
 0x6da   : > { %v4570_v8 = vsel %vm14026_vm6, %v14025_v59, %v14024_v35  ;;  %4915 = vst [vmem:[#allocation2 + $0x188] sm:$0xf] %v4883_v56  ;;  %v4603_v56 = vsel %vm11059_vm1, %v4574_v5, 0.0  ;;  %v4733_v19 = vpack.c.bf16 %v4597_v34, %v4597_v34  ;;  %v14035_v59 = vrot.slane %v12097_v49, 7  ;;  %vm14042_vm1 = vmmov %vm14037_vm0  ;;  %5913 = vmatpush.bf16.msrb.mxu0 %v8764_v39 }
 0x6db   : > { %v4564_v0 = vsel %vm14030_vm9, %v14029_v9, %v14028_v24  ;;  %v4568_v35 = vsel %vm14033_vm4, %v14032_v53, %v14031_v52  ;;  %4757 = vst [vmem:[#allocation2 + $0x18] sm:$0xf] %v4725_v4  ;;  %v14036_v41 = vrot.slane %v12090_v61, 7  ;;  %v14038_v24 = vld [vmem:[#allocation24_spill] sm:$0xff]  ;;  %v4735_v26 = vpack.c.bf16 %v4599_v46, %v4599_v46 }
 0x6dc   : > { %vm14039_vm11 = vnez %v14038_v24  ;;  %4759 = vst [vmem:[#allocation2 + $0x30] sm:$0xf] %v4727_v42  ;;  %v8794_v52 = vld [vmem:[#allocation8 + $0xf0] sm:$0xff]  ;;  %v14040_v5 = vrot.slane %v12125_v32, 7  ;;  %v14041_v4 = vrot.slane %v12118_v23, 7  ;;  %v4607_v17 = vsel %vm11179_vm15, %v4570_v8, 0.0  ;;  %vm14051_vm15 = vmmov %vm14037_vm0 }
 0x6dd   : > { %v4566_v37 = vsel %vm14037_vm0, %v14036_v41, %v14035_v59  ;;  %v4605_v9 = vsel %vm14039_vm11, %v4572_v44, 0.0  ;;  %v8810_v53 = vld [vmem:[#allocation8 + $0x170] sm:$0xff]  ;;  %v4737_v59 = vpack.c.bf16 %v4601_v50, %v4601_v50  ;;  %4761 = vst [vmem:[#allocation2 + $0x48] sm:$0xf] %v4729_v18  ;;  %v14044_v42 = vrot.slane %v12149_v11, 7  ;;  %v14052_v50 = vld [vmem:[#allocation26_spill] sm:$0xff]  ;;  %5483 = vmatpush.bf16.msra.mxu2 %v8794_v52 }
 0x6de   : > { %v4562_v34 = vsel %vm14042_vm1, %v14041_v4, %v14040_v5  ;;  %v8763_v44 = vld [vmem:[#allocation8 + $0x10] sm:$0xff]  ;;  %vm14048_vm12 = vnez %v14047_v57  ;;  %v4739_v24 = vpack.c.bf16 %v4603_v56, %v4603_v56  ;;  %4763 = vst [vmem:[#allocation2 + $0x60] sm:$0xf] %v4731_v60  ;;  %v14049_v5 = vrot.slane %v12141_v20, 7  ;;  %v14058_v56 = vld [vmem:[#allocation45_spill] sm:$0xff]  ;;  %5661 = vmatpush.bf16.msrb.mxu3 %v8810_v53 }
 0x6df   : > { %v4558_v46 = vsel %vm14046_vm2, %v14045_v10, %v14044_v42  ;;  %v4609_v41 = vsel %vm14048_vm12, %v4568_v35, 0.0  ;;  %v14050_v8 = vrot.slane %v12134_v31, 7  ;;  %vm14053_vm13 = vnez %v14052_v50  ;;  %4765 = vst [vmem:[#allocation2 + $0x78] sm:$0xf] %v4733_v19  ;;  %5914 = vmatpush.bf16.msrb.mxu0 %v8763_v44  ;;  %v7893_v50 = vld [vmem:[#allocation2 + $0x24] sm:$0xf0] }
 0x6e0   : > { %v4611_v39 = vsel %vm14053_vm13, %v4566_v37, 0.0  ;;  %v4613_v16 = vsel %vm11252_vm5, %v4564_v0, 0.0  ;;  %v4741_v58 = vpack.c.bf16 %v4605_v9, %v4605_v9  ;;  %v14055_v42 = vrot.slane %v11963_v55, 1  ;;  %4767 = vst [vmem:[#allocation2 + $0x90] sm:$0xf] %v4735_v26  ;;  %v8793_v37 = vld [vmem:[#allocation8 + $0xe8] sm:$0xff] }
 0x6e1   : > { %v4560_v18 = vsel %vm14051_vm15, %v14050_v8, %v14049_v5  ;;  %v14056_v35 = vrot.slane %v11960_v38, 1  ;;  %vm14057_vm3 = vcmp.lt.s32.totalorder %v13971_v14, 7  ;;  %vm14059_vm8 = vnez %v14058_v56  ;;  %v8809_v5 = vld [vmem:[#allocation8 + $0x168] sm:$0xff]  ;;  %4769 = vst [vmem:[#allocation2 + $0xa8] sm:$0xf] %v4737_v59  ;;  %v8784_v53 = vld [vmem:[#allocation8 + $0xb8] sm:$0xff]  ;;  %5484 = vmatpush.bf16.msra.mxu2 %v8793_v37 }
 0x6e2   : > { %v4615_v10 = vsel %vm14059_vm8, %v4562_v34, 0.0  ;;  %v4743_v57 = vpack.c.bf16 %v4607_v17, %v4607_v17  ;;  %v8762_v8 = vld [vmem:[#allocation8 + $0x8] sm:$0xff]  ;;  %v14060_v0 = vrot.slane %v11971_v62, 1  ;;  %v14061_v19 = vrot.slane %v11966_v15, 1  ;;  %vm14062_vm5 = vmmov %vm14057_vm3  ;;  %v14063_v34 = vld [vmem:[#allocation32_spill] sm:$0xff]  ;;  %5662 = vmatpush.bf16.msrb.mxu3 %v8809_v5  ;;  %6087 = vmatpush.bf16.msrb.mxu1 %v8784_v53 }
 0x6e3   : > { %v4682_v60 = vsel %vm14057_vm3, %v14056_v35, %v14055_v42  ;;  %v4745_v55 = vpack.c.bf16 %v4609_v41, %v4609_v41  ;;  %v8716_v9 = vld [vmem:[#allocation2 + $0x1c] sm:$0xf]  ;;  %vm14064_vm7 = vnez %v14063_v34  ;;  %v4747_v26 = vpack.c.bf16 %v4611_v39, %v4611_v39  ;;  %4771 = vst [vmem:[#allocation2 + $0xc0] sm:$0xf] %v4739_v24  ;;  %vm14067_vm6 = vmmov %vm14057_vm3  ;;  %v14074_v39 = vld [vmem:[#allocation37_spill] sm:$0xff]  ;;  %5915 = vmatpush.bf16.msrb.mxu0 %v8762_v8 }
 0x6e4   : > { %v4680_v38 = vsel %vm14062_vm5, %v14061_v19, %v14060_v0  ;;  %v4617_v17 = vsel %vm14064_vm7, %v4560_v18, 0.0  ;;  %v12562_v52 = vor.u32 %v8716_v9, %v7893_v50  ;;  %v14065_v62 = vrot.slane %v11983_v1, 1  ;;  %v14069_v44 = vld [vmem:[#allocation31_spill] sm:$0xff]  ;;  %4773 = vst [vmem:[#allocation2 + $0xd8] sm:$0xf] %v4741_v58  ;;  %vm14073_vm4 = vmmov %vm14057_vm3  ;;  %v8808_v0 = vld [vmem:[#allocation8 + $0x160] sm:$0xff] }
 0x6e5   : > { %v14066_v15 = vrot.slane %v11976_v13, 1  ;;  %v4619_v59 = vsel %vm11281_vm14, %v4558_v46, 0.0  ;;  %vm14070_vm9 = vnez %v14069_v44  ;;  %v4749_v35 = vpack.c.bf16 %v4613_v16, %v4613_v16  ;;  %4775 = vst [vmem:[#allocation2 + $0xf0] sm:$0xf] %v4743_v57  ;;  %v8792_v46 = vld [vmem:[#allocation8 + $0xe0] sm:$0xff]  ;;  %vm14078_vm14 = vmmov %vm14057_vm3  ;;  %v14090_v34 = vld [vmem:[#allocation35_spill] sm:$0xff] }
 0x6e6   : > { %v4686_v42 = vsel %vm14070_vm9, %v4682_v60, 0.0  ;;  %v14071_v24 = vrot.slane %v11999_v21, 1  ;;  %v14072_v18 = vrot.slane %v11988_v12, 1  ;;  %vm14075_vm0 = vnez %v14074_v39  ;;  %v8761_v19 = vld [vmem:[#allocation8] sm:$0xff]  ;;  %4777 = vst [vmem:[#allocation2 + $0x108] sm:$0xf] %v4745_v55  ;;  %5579 = vmatmul.bf16.vlgmr.msra.gmra.mxu1 %v12562_v52  ;;  %vm14081_vm11 = vmmov %vm14057_vm3  ;;  %5485 = vmatpush.bf16.msra.mxu2 %v8792_v46 }
 0x6e7   : > { %v4678_v4 = vsel %vm14067_vm6, %v14066_v15, %v14065_v62  ;;  %v4688_v13 = vsel %vm14075_vm0, %v4680_v38, 0.0  ;;  %v4751_v56 = vpack.c.bf16 %v4615_v10, %v4615_v10  ;;  %v14076_v16 = vrot.slane %v12013_v63, 1  ;;  %v8179_v60 = vld [vmem:[#allocation2] sm:$0xf]  ;;  %v8714_v9 = vld [vmem:[#allocation2 + $0x8] sm:$0xf0]  ;;  %vm14086_vm2 = vmmov %vm14057_vm3  ;;  %5663 = vmatpush.bf16.msrb.mxu3 %v8808_v0  ;;  %5916 = vmatpush.bf16.msrb.mxu0 %v8761_v19 }
 0x6e8   : > { %v4676_v1 = vsel %vm14073_vm4, %v14072_v18, %v14071_v24  ;;  %v14077_v58 = vrot.slane %v12006_v3, 1  ;;  %v4753_v21 = vpack.c.bf16 %v4617_v17, %v4617_v17  ;;  %v14079_v10 = vrot.slane %v12027_v45, 1  ;;  %v14082_v63 = vld [vmem:[#allocation29_spill] sm:$0xff]  ;;  %4779 = vst [vmem:[#allocation2 + $0x120] sm:$0xf] %v4747_v26  ;;  %vm14089_vm12 = vmmov %vm14086_vm2  ;;  %v14114_v0 = vld [vmem:[#allocation44_spill] sm:$0xff] }
 0x6e9   : > { %v14080_v57 = vrot.slane %v12020_v2, 1  ;;  %vm14083_vm1 = vnez %v14082_v63  ;;  %v4755_v5 = vpack.c.bf16 %v4619_v59, %v4619_v59  ;;  %v14084_v38 = vrot.slane %v12055_v25, 1  ;;  %4781 = vst [vmem:[#allocation2 + $0x138] sm:$0xf] %v4749_v35  ;;  %v14092_v26 = vld [vmem:[#allocation21_spill] sm:$0xff]  ;;  %vm14095_vm3 = vmmov %vm14086_vm2 }
 0x6ea   : > { %v4674_v12 = vsel %vm14078_vm14, %v14077_v58, %v14076_v16  ;;  %v4690_v3 = vsel %vm14083_vm1, %v4678_v4, 0.0  ;;  %v14085_v8 = vrot.slane %v12048_v27, 1  ;;  %v14087_v45 = vrot.slane %v12041_v43, 1  ;;  %4783 = vst [vmem:[#allocation2 + $0x150] sm:$0xf] %v4751_v56  ;;  %v8791_v15 = vld [vmem:[#allocation8 + $0xd8] sm:$0xff]  ;;  %vm14098_vm5 = vmmov %vm14086_vm2 }
 0x6eb   : > { %v4672_v37 = vsel %vm14081_vm11, %v14080_v57, %v14079_v10  ;;  %v14088_v2 = vrot.slane %v12034_v48, 1  ;;  %vm14091_vm15 = vnez %v14090_v34  ;;  %v4854_v62 = vpack.c.bf16 %v4686_v42, %v4686_v42  ;;  %v14096_v4 = vld [vmem:[#allocation23_spill] sm:$0xff]  ;;  %4785 = vst [vmem:[#allocation2 + $0x168] sm:$0xf] %v4753_v21  ;;  %v8807_v44 = vld [vmem:[#allocation8 + $0x158] sm:$0xff]  ;;  %vm14103_vm6 = vmmov %vm14086_vm2  ;;  %5486 = vmatpush.bf16.msra.mxu2 %v8791_v15 }
 0x6ec   : > { %v4668_v55 = vsel %vm14086_vm2, %v14085_v8, %v14084_v38  ;;  %v4692_v17 = vsel %vm14091_vm15, %v4676_v1, 0.0  ;;  %vm14093_vm13 = vnez %v14092_v26  ;;  %v4856_v53 = vpack.c.bf16 %v4688_v13, %v4688_v13  ;;  %4787 = vst [vmem:[#allocation2 + $0x180] sm:$0xf] %v4755_v5  ;;  %vm14106_vm9 = vmmov %vm14086_vm2  ;;  %v14112_v56 = vld [vmem:[#allocation25_spill] sm:$0xff]  ;;  %5664 = vmatpush.bf16.msrb.mxu3 %v8807_v44  ;;  %v8783_v58 = vld [vmem:[#allocation8 + $0xb0] sm:$0xff] }
 0x6ed   : > { %v4670_v50 = vsel %vm14089_vm12, %v14088_v2, %v14087_v45  ;;  %v4694_v25 = vsel %vm14093_vm13, %v4674_v12, 0.0  ;;  %v8180_v27 = vor.u32 %v8714_v9, %v8179_v60  ;;  %v14094_v48 = vrot.slane %v12062_v30, 1  ;;  %4886 = vst [vmem:[#allocation2 + $0x2c] sm:$0xf] %v4854_v62  ;;  %vm14111_vm0 = vmmov %vm14086_vm2  ;;  %v14119_v60 = vld [vmem:[#allocation42_spill] sm:$0xff]  ;;  %v14126_v5 = vld [vmem:[#allocation48_spill] sm:$0xff]  ;;  %6088 = vmatpush.bf16.msrb.mxu1 %v8783_v58 }
 0x6ee   : > { %vm14097_vm8 = vnez %v14096_v4  ;;  %v4858_v59 = vpack.c.bf16 %v4690_v3, %v4690_v3  ;;  %v4664_v42 = vsel %vm14098_vm5, %v4640_v51, %v4641_v28  ;;  %vm14100_vm7 = vnez %v14099_v40  ;;  %v14107_v51 = vld [vmem:[#allocation39_spill] sm:$0xff]  ;;  %4888 = vst [vmem:[#allocation2 + $0x44] sm:$0xf] %v4856_v53  ;;  %vm14118_vm1 = vmmov %vm14111_vm0  ;;  %v8719_v2 = vld [vmem:[#allocation2 + $0x34] sm:$0xf] }
 0x6ef   : > { %v4666_v43 = vsel %vm14095_vm3, %v14094_v48, %v4639_v36  ;;  %v4696_v41 = vsel %vm14097_vm8, %v4672_v37, 0.0  ;;  %v4698_v30 = vsel %vm14100_vm7, %v4670_v50, 0.0  ;;  %v4860_v35 = vpack.c.bf16 %v4692_v17, %v4692_v17  ;;  %5917 = vmatmul.bf16.vlgmr.msrb.gmra.mxu0 %v8180_v27  ;;  %vm14123_vm12 = vmmov %vm14111_vm0  ;;  %v14124_v3 = vld [vmem:[#allocation27_spill] sm:$0xff]  ;;  %v7905_v50 = vld [vmem:[#allocation2 + $0x3c] sm:$0xf0] }
 0x6f0   : > { %v14101_v36 = vrot.slane %v12125_v32, 1  ;;  %v14102_v24 = vrot.slane %v12118_v23, 1  ;;  %v14104_v1 = vrot.slane %v12097_v49, 1  ;;  %v14105_v47 = vrot.slane %v12090_v61, 1  ;;  %v8790_v61 = vld [vmem:[#allocation8 + $0xd0] sm:$0xff]  ;;  %v8789_v8 = vld [vmem:[#allocation8 + $0xc8] sm:$0xff]  ;;  %vm14130_vm3 = vmmov %vm14111_vm0 }
 0x6f1   : > { %vm14108_vm4 = vnez %v14107_v51  ;;  %v4862_v39 = vpack.c.bf16 %v4694_v25, %v4694_v25  ;;  %v14109_v13 = vrot.slane %v12111_v22, 1  ;;  %v14110_v32 = vrot.slane %v12104_v7, 1  ;;  %4890 = vst [vmem:[#allocation2 + $0x5c] sm:$0xf] %v4858_v59  ;;  %v8806_v22 = vld [vmem:[#allocation8 + $0x150] sm:$0xff]  ;;  %5487 = vmatpush.bf16.msra.mxu2 %v8790_v61  ;;  %v14131_v34 = vld [vmem:[#allocation46_spill] sm:$0xff] }
 0x6f2   : > { %v4658_v18 = vsel %vm14103_vm6, %v14102_v24, %v14101_v36  ;;  %v4662_v29 = vsel %vm14106_vm9, %v14105_v47, %v14104_v1  ;;  %v4700_v28 = vsel %vm14108_vm4, %v4668_v55, 0.0  ;;  %vm14113_vm14 = vnez %v14112_v56  ;;  %4892 = vst [vmem:[#allocation2 + $0x74] sm:$0xf] %v4860_v35  ;;  %5665 = vmatpush.bf16.msrb.mxu3 %v8806_v22  ;;  %v8805_v26 = vld [vmem:[#allocation8 + $0x148] sm:$0xff]  ;;  %v14133_v25 = vld [vmem:[#allocation33_spill] sm:$0xff]  ;;  %v8788_v15 = vld [vmem:[#allocation8 + $0xc0] sm:$0xff] }
 0x6f3   : > { %v4660_v23 = vsel %vm14111_vm0, %v14110_v32, %v14109_v13  ;;  %v4702_v49 = vsel %vm14113_vm14, %v4666_v43, 0.0  ;;  %v4864_v46 = vpack.c.bf16 %v4696_v41, %v4696_v41  ;;  %vm14115_vm11 = vnez %v14114_v0  ;;  %4894 = vst [vmem:[#allocation2 + $0x8c] sm:$0xf] %v4862_v39  ;;  %v7891_v48 = vld [vmem:[#allocation2 + $0x18] sm:$0xf] }
 0x6f4   : > { %v4704_v19 = vsel %vm14115_vm11, %v4664_v42, 0.0  ;;  %v4866_v16 = vpack.c.bf16 %v4698_v30, %v4698_v30  ;;  %v14116_v7 = vrot.slane %v12141_v20, 1  ;;  %v14117_v12 = vrot.slane %v12134_v31, 1  ;;  %v8717_v41 = vld [vmem:[#allocation2 + $0x20] sm:$0xf0]  ;;  %v8804_v42 = vld [vmem:[#allocation8 + $0x140] sm:$0xff] }
 0x6f5   : > { %vm14120_vm2 = vnez %v14119_v60  ;;  %v4868_v10 = vpack.c.bf16 %v4700_v28, %v4700_v28  ;;  %v14121_v57 = vrot.slane %v12149_v11, 1  ;;  %v14122_v37 = vrot.slane %v12146_v54, 1  ;;  %4896 = vst [vmem:[#allocation2 + $0xa4] sm:$0xf] %v4864_v46  ;;  %5488 = vmatpush.bf16.msra.mxu2 %v8789_v8  ;;  %v7899_v59 = vld [vmem:[#allocation2 + $0x20] sm:$0xf] }
 0x6f6   : > { %v4656_v21 = vsel %vm14118_vm1, %v14117_v12, %v14116_v7  ;;  %v4706_v9 = vsel %vm14120_vm2, %v4662_v29, 0.0  ;;  %vm14125_vm15 = vnez %v14124_v3  ;;  %vm14127_vm13 = vnez %v14126_v5  ;;  %4898 = vst [vmem:[#allocation2 + $0xbc] sm:$0xf] %v4866_v16  ;;  %5666 = vmatpush.bf16.msrb.mxu3 %v8805_v26  ;;  %v8718_v40 = vld [vmem:[#allocation2 + $0x28] sm:$0xf0]  ;;  %v8782_v56 = vld [vmem:[#allocation8 + $0xa8] sm:$0xff] }
 0x6f7   : > { %v4654_v63 = vsel %vm14123_vm12, %v14122_v37, %v14121_v57  ;;  %v4708_v20 = vsel %vm14125_vm15, %v4660_v23, 0.0  ;;  %v4710_v31 = vsel %vm14127_vm13, %v4658_v18, 0.0  ;;  %v4870_v38 = vpack.c.bf16 %v4702_v49, %v4702_v49  ;;  %4900 = vst [vmem:[#allocation2 + $0xd4] sm:$0xf] %v4868_v10  ;;  %v8776_v30 = vld [vmem:[#allocation8 + $0x78] sm:$0xff]  ;;  %v8775_v18 = vld [vmem:[#allocation8 + $0x70] sm:$0xff]  ;;  %6089 = vmatpush.bf16.msrb.mxu1 %v8782_v56 }
 0x6f8   : > { %v14128_v55 = vrot.slane %v11955_v6, 1  ;;  %v14129_v45 = vrot.slane %v12154_v33, 1  ;;  %v4872_v11 = vpack.c.bf16 %v4704_v19, %v4704_v19  ;;  %vm14132_vm8 = vnez %v14131_v34  ;;  %v8722_v1 = vld [vmem:[#allocation2 + $0x4c] sm:$0xf]  ;;  %v7917_v47 = vld [vmem:[#allocation2 + $0x54] sm:$0xf0] }
 0x6f9   : > { %v4712_v17 = vsel %vm14132_vm8, %v4656_v21, 0.0  ;;  %v4874_v62 = vpack.c.bf16 %v4706_v9, %v4706_v9  ;;  %vm14134_vm5 = vnez %v14133_v25  ;;  %v4876_v53 = vpack.c.bf16 %v4708_v20, %v4708_v20  ;;  %4902 = vst [vmem:[#allocation2 + $0xec] sm:$0xf] %v4870_v38  ;;  %5489 = vmatpush.bf16.msra.mxu2 %v8788_v15  ;;  %v7903_v51 = vld [vmem:[#allocation2 + $0x30] sm:$0xf]  ;;  %v8774_v12 = vld [vmem:[#allocation8 + $0x68] sm:$0xff] }
 0x6fa   : > { %v4684_v54 = vsel %vm14130_vm3, %v14129_v45, %v14128_v55  ;;  %v4714_v6 = vsel %vm14134_vm5, %v4654_v63, 0.0  ;;  %v4878_v27 = vpack.c.bf16 %v4710_v31, %v4710_v31  ;;  %v12683_v43 = vor.u32 %v8719_v2, %v7905_v50  ;;  %4904 = vst [vmem:[#allocation2 + $0x104] sm:$0xf] %v4872_v11  ;;  %5667 = vmatpush.bf16.msrb.mxu3 %v8804_v42  ;;  %v8720_v28 = vld [vmem:[#allocation2 + $0x38] sm:$0xf0]  ;;  %v8781_v5 = vld [vmem:[#allocation8 + $0xa0] sm:$0xff] }
 0x6fb   : > { %v4716_v14 = vsel %vm11297_vm10, %v4684_v54, 0.0  ;;  %v4880_v4 = vpack.c.bf16 %v4712_v17, %v4712_v17  ;;  %v4882_v44 = vpack.c.bf16 %v4714_v6, %v4714_v6  ;;  %4906 = vst [vmem:[#allocation2 + $0x11c] sm:$0xf] %v4874_v62  ;;  %v7892_v36 = vor.u32 %v8717_v41, %v7891_v48  ;;  %v7911_v39 = vld [vmem:[#allocation2 + $0x38] sm:$0xf]  ;;  %6090 = vmatpush.bf16.msrb.mxu1 %v8781_v5  ;;  %v8773_v34 = vld [vmem:[#allocation8 + $0x60] sm:$0xff] }
 0x6fc   : > { %5584 = vmatmul.bf16.gmra.mxu1 %v12683_v43  ;;  %v4884_v35 = vpack.c.bf16 %v4716_v14, %v4716_v14  ;;  %4908 = vst [vmem:[#allocation2 + $0x134] sm:$0xf] %v4876_v53  ;;  %v12686_v24 = vor.u32 %v8718_v40, %v7899_v59  ;;  %v12689_v29 = vor.u32 %v8722_v1, %v7917_v47  ;;  %v8721_v13 = vld [vmem:[#allocation2 + $0x40] sm:$0xf0]  ;;  %v7929_v46 = vld [vmem:[#allocation2 + $0x6c] sm:$0xf0] }
 0x6fd   : > { %4910 = vst [vmem:[#allocation2 + $0x14c] sm:$0xf] %v4878_v27  ;;  %5998 = vmatpush.bf16.msrb.mxu2 %v8776_v30  ;;  %v7904_v32 = vor.u32 %v8720_v28, %v7903_v51  ;;  %v12692_v23 = vor.u32 %v8721_v13, %v7911_v39  ;;  %v8725_v49 = vld [vmem:[#allocation2 + $0x64] sm:$0xf]  ;;  %v7915_v0 = vld [vmem:[#allocation2 + $0x48] sm:$0xf] }
 0x6fe   : > { %4912 = vst [vmem:[#allocation2 + $0x164] sm:$0xf] %v4880_v4  ;;  %5490 = vmatmul.bf16.vlgmr.msra.gmra.mxu2 %v7892_v36  ;;  %5668 = vmatmul.bf16.vlgmr.msrb.gmra.mxu3 %v12686_v24  ;;  %v12695_v61 = vor.u32 %v8725_v49, %v7929_v46  ;;  %v8723_v19 = vld [vmem:[#allocation2 + $0x50] sm:$0xf0]  ;;  %v7923_v16 = vld [vmem:[#allocation2 + $0x50] sm:$0xf] }
 0x6ff   : > { %4914 = vst [vmem:[#allocation2 + $0x17c] sm:$0xf] %v4882_v44  ;;  %5922 = vmatmul.bf16.gmra.mxu0 %v7892_v36  ;;  %v8724_v22 = vld [vmem:[#allocation2 + $0x58] sm:$0xf0]  ;;  %v7916_v58 = vor.u32 %v8723_v19, %v7915_v0  ;;  %v7941_v60 = vld [vmem:[#allocation2 + $0x84] sm:$0xf0] }
 0x700   : > { %4916 = vst [vmem:[#allocation2 + $0x194] sm:$0xf] %v4884_v35  ;;  %v12698_v7 = vor.u32 %v8724_v22, %v7923_v16  ;;  %v8728_v21 = vld [vmem:[#allocation2 + $0x7c] sm:$0xf]  ;;  %v7927_v10 = vld [vmem:[#allocation2 + $0x60] sm:$0xf] }
 0x701   : > { %5999 = vmatpush.bf16.msrb.mxu2 %v8775_v18  ;;  %v12701_v9 = vor.u32 %v8728_v21, %v7941_v60  ;;  %v8726_v57 = vld [vmem:[#allocation2 + $0x68] sm:$0xf0]  ;;  %v7935_v37 = vld [vmem:[#allocation2 + $0x68] sm:$0xf]  ;;  %v8727_v63 = vld [vmem:[#allocation2 + $0x70] sm:$0xf0] }
 0x702   : > { %v7928_v3 = vor.u32 %v8726_v57, %v7927_v10  ;;  %v12704_v20 = vor.u32 %v8727_v63, %v7935_v37  ;;  %v8731_v31 = vld [vmem:[#allocation2 + $0x94] sm:$0xf]  ;;  %v7953_v38 = vld [vmem:[#allocation2 + $0x9c] sm:$0xf0]  ;;  %v7939_v55 = vld [vmem:[#allocation2 + $0x78] sm:$0xf] }
 0x703   : > { %v12707_v8 = vor.u32 %v8731_v31, %v7953_v38  ;;  %v8729_v45 = vld [vmem:[#allocation2 + $0x80] sm:$0xf0]  ;;  %v7947_v54 = vld [vmem:[#allocation2 + $0x80] sm:$0xf]  ;;  %v8730_v11 = vld [vmem:[#allocation2 + $0x88] sm:$0xf0] }
 0x704   : > { %v7940_v2 = vor.u32 %v8729_v45, %v7939_v55  ;;  %v12710_v50 = vor.u32 %v8730_v11, %v7947_v54  ;;  %v8734_v17 = vld [vmem:[#allocation2 + $0xac] sm:$0xf]  ;;  %v7965_v62 = vld [vmem:[#allocation2 + $0xb4] sm:$0xf0]  ;;  %v7951_v25 = vld [vmem:[#allocation2 + $0x90] sm:$0xf] }
 0x705   : > { %6000 = vmatpush.bf16.msrb.mxu2 %v8774_v12  ;;  %v12713_v26 = vor.u32 %v8734_v17, %v7965_v62  ;;  %v8732_v6 = vld [vmem:[#allocation2 + $0x98] sm:$0xf0]  ;;  %v7959_v53 = vld [vmem:[#allocation2 + $0x98] sm:$0xf]  ;;  %v8733_v33 = vld [vmem:[#allocation2 + $0xa0] sm:$0xf0] }
 0x706   : > { %v7952_v14 = vor.u32 %v8732_v6, %v7951_v25  ;;  %v12716_v27 = vor.u32 %v8733_v33, %v7959_v53  ;;  %v8737_v15 = vld [vmem:[#allocation2 + $0xc4] sm:$0xf]  ;;  %v7977_v48 = vld [vmem:[#allocation2 + $0xcc] sm:$0xf0]  ;;  %v8780_v4 = vld [vmem:[#allocation8 + $0x98] sm:$0xff]  ;;  %vm14156_vm10 = vcmask 523264  }
 0x707   : > { %v12719_v41 = vor.u32 %v8737_v15, %v7977_v48  ;;  %6091 = vmatpush.bf16.msrb.mxu1 %v8780_v4  ;;  %v7963_v59 = vld [vmem:[#allocation2 + $0xa8] sm:$0xf]  ;;  %v8735_v44 = vld [vmem:[#allocation2 + $0xb0] sm:$0xf0]  ;;  %v7971_v42 = vld [vmem:[#allocation2 + $0xb0] sm:$0xf] }
 0x708   : > { %v8736_v40 = vld [vmem:[#allocation2 + $0xb8] sm:$0xf0]  ;;  %v7964_v30 = vor.u32 %v8735_v44, %v7963_v59  ;;  %v8772_v36 = vld [vmem:[#allocation8 + $0x58] sm:$0xff]  ;;  %v7975_v28 = vld [vmem:[#allocation2 + $0xc0] sm:$0xf] }
 0x709   : > { %6001 = vmatpush.bf16.msrb.mxu2 %v8773_v34  ;;  %v12722_v35 = vor.u32 %v8736_v40, %v7971_v42  ;;  %v8740_v18 = vld [vmem:[#allocation2 + $0xdc] sm:$0xf]  ;;  %v7989_v1 = vld [vmem:[#allocation2 + $0xe4] sm:$0xf0]  ;;  %v8738_v39 = vld [vmem:[#allocation2 + $0xc8] sm:$0xf0] }
 0x70a   : > { %v12725_v51 = vor.u32 %v8740_v18, %v7989_v1  ;;  %v7983_v13 = vld [vmem:[#allocation2 + $0xc8] sm:$0xf]  ;;  %v7976_v49 = vor.u32 %v8738_v39, %v7975_v28  ;;  %v8743_v19 = vld [vmem:[#allocation2 + $0xf4] sm:$0xf]  ;;  %v8001_v16 = vld [vmem:[#allocation2 + $0xfc] sm:$0xf0] }
 0x70b   : > { %v12735_v12 = vor.u32 %v8743_v19, %v8001_v16  ;;  %v7987_v21 = vld [vmem:[#allocation2 + $0xd8] sm:$0xf]  ;;  %v8741_v60 = vld [vmem:[#allocation2 + $0xe0] sm:$0xf0]  ;;  %v7995_v10 = vld [vmem:[#allocation2 + $0xe0] sm:$0xf] }
 0x70c   : > { %5589 = vmatmul.bf16.gmra.mxu1 %v12689_v29  ;;  %v8742_v57 = vld [vmem:[#allocation2 + $0xe8] sm:$0xf0]  ;;  %v7988_v63 = vor.u32 %v8741_v60, %v7987_v21  ;;  %v8771_v38 = vld [vmem:[#allocation8 + $0x50] sm:$0xff]  ;;  %v7999_v53 = vld [vmem:[#allocation2 + $0xf0] sm:$0xf] }
 0x70d   : > { %6002 = vmatpush.bf16.msrb.mxu2 %v8772_v36  ;;  %v12740_v5 = vor.u32 %v8742_v57, %v7995_v10  ;;  %v8746_v11 = vld [vmem:[#allocation2 + $0x10c] sm:$0xf]  ;;  %v8744_v33 = vld [vmem:[#allocation2 + $0xf8] sm:$0xf0]  ;;  %v8007_v48 = vld [vmem:[#allocation2 + $0xf8] sm:$0xf] }
 0x70e   : > { %5495 = vmatmul.bf16.gmra.mxu2 %v7904_v32  ;;  %5673 = vmatmul.bf16.gmra.mxu3 %v12692_v23  ;;  %v8745_v4 = vld [vmem:[#allocation2 + $0x100] sm:$0xf0]  ;;  %v8000_v42 = vor.u32 %v8744_v33, %v7999_v53  ;;  %v8025_v28 = vld [vmem:[#allocation2 + $0x12c] sm:$0xf0]  ;;  %v8011_v19 = vld [vmem:[#allocation2 + $0x108] sm:$0xf] }
 0x70f   : > { %5927 = vmatmul.bf16.gmra.mxu0 %v7904_v32  ;;  %v8739_v32 = vld [vmem:[#allocation2 + $0xd0] sm:$0xf0]  ;;  %v12750_v40 = vor.u32 %v8745_v4, %v8007_v48  ;;  %v8019_v10 = vld [vmem:[#allocation2 + $0x110] sm:$0xf]  ;;  %v8748_v57 = vld [vmem:[#allocation2 + $0x118] sm:$0xf0] }
 0x710   : > { %v12730_v46 = vor.u32 %v8739_v32, %v7983_v13  ;;  %v8747_v16 = vld [vmem:[#allocation2 + $0x110] sm:$0xf0]  ;;  %v8752_v53 = vld [vmem:[#allocation2 + $0x13c] sm:$0xf]  ;;  %v8037_v33 = vld [vmem:[#allocation2 + $0x144] sm:$0xf0] }
 0x711   : > { %6003 = vmatpush.bf16.msrb.mxu2 %v8771_v38  ;;  %v8778_v38 = vld [vmem:[#allocation8 + $0x88] sm:$0xff]  ;;  %v12772_v4 = vor.u32 %v8752_v53, %v8037_v33  ;;  %v8753_v33 = vld [vmem:[#allocation2 + $0x140] sm:$0xf0]  ;;  %vm14161_vm7 = vmmov %vm14156_vm10 }
 0x712   : > { %v8873_v53 = vld [vmem:[#allocation8 + $0x1e8] sm:$0xff]  ;;  %vm14164_vm6 = vmmov %vm14161_vm7 }
 0x713   : > { %14137 = vst [vmem:[#allocation58_spill] sm:$0xff] %v12772_v4  ;;  %vm14167_vm9 = vmmov %vm14164_vm6 }
 0x714   : > { %vm14170_vm4 = vmmov %vm14164_vm6 }
 0x715   : > { %vm14174_vm0 = vmmov %vm14170_vm4 }
 0x716   : > { %vm14178_vm14 = vmmov %vm14174_vm0 }
 0x717   : > { %vm14181_vm11 = vmmov %vm14174_vm0 }
 0x718   : > { %vm14184_vm1 = vmmov %vm14174_vm0 }
 0x719   : > { %vm14186_vm2 = vmmov %vm14174_vm0 }
 0x71a   : > { %vm14187_vm12 = vmmov %vm14174_vm0 }
 0x71b   : > { %vm14188_vm15 = vmmov %vm14174_vm0 }
 0x71c   : > { %5594 = vmatmul.bf16.gmra.mxu1 %v12695_v61  ;;  %vm14189_vm13 = vmmov %vm14174_vm0 }
 0x71d   : > { %vm14190_vm3 = vmmov %vm14174_vm0 }
 0x71e   : > { %5500 = vmatmul.bf16.gmra.mxu2 %v7916_v58  ;;  %5678 = vmatmul.bf16.gmra.mxu3 %v12698_v7  ;;  %vm14191_vm8 = vmmov %vm14174_vm0 }
 0x71f   : > { %5932 = vmatmul.bf16.gmra.mxu0 %v7916_v58  ;;  %vm14193_vm5 = vmmov %vm14174_vm0 }
 0x72c   : > { %5599 = vmatmul.bf16.gmra.mxu1 %v12701_v9 }
 0x72e   : > { %5505 = vmatmul.bf16.gmra.mxu2 %v7928_v3  ;;  %5683 = vmatmul.bf16.gmra.mxu3 %v12704_v20 }
 0x72f   : > { %5937 = vmatmul.bf16.gmra.mxu0 %v7928_v3  ;;  %v8779_v3 = vld [vmem:[#allocation8 + $0x90] sm:$0xff] }
 0x730   : > { %6092 = vmatpush.bf16.msrb.mxu1 %v8779_v3  ;;  %v8012_v3 = vor.u32 %v8747_v16, %v8011_v19 }
 0x734   : > { %6093 = vmatpush.bf16.msrb.mxu1 %v8778_v38 }
 0x73c   : > { %5604 = vmatmul.bf16.gmra.mxu1 %v12707_v8 }
 0x73e   : > { %5510 = vmatmul.bf16.gmra.mxu2 %v7940_v2  ;;  %5688 = vmatmul.bf16.gmra.mxu3 %v12710_v50 }
 0x73f   : > { %5942 = vmatmul.bf16.gmra.mxu0 %v7940_v2  ;;  %v8013_v2 = vld [vmem:[#allocation2 + $0x114] sm:$0xf0] }
 0x740   : > { %v12745_v25 = vor.u32 %v8746_v11, %v8013_v2 }
 0x74c   : > { %5609 = vmatmul.bf16.gmra.mxu1 %v12713_v26 }
 0x74e   : > { %5515 = vmatmul.bf16.gmra.mxu2 %v7952_v14  ;;  %5693 = vmatmul.bf16.gmra.mxu3 %v12716_v27 }
 0x74f   : > { %5947 = vmatmul.bf16.gmra.mxu0 %v7952_v14 }
 0x75c   : > { %5614 = vmatmul.bf16.gmra.mxu1 %v12719_v41 }
 0x75e   : > { %5520 = vmatmul.bf16.gmra.mxu2 %v7964_v30  ;;  %5698 = vmatmul.bf16.gmra.mxu3 %v12722_v35 }
 0x75f   : > { %5952 = vmatmul.bf16.gmra.mxu0 %v7964_v30 }
 0x763   : > { %v5580_v47 = vpop.f32.mrf.mxu1 }
 0x76b   : > { %v5582_v0 = vpop.f32.mrf.mxu1 }
 0x76c   : > { %5619 = vmatmul.bf16.gmra.mxu1 %v12725_v51  ;;  %v12728_v56 = vpop.f32.mrf.mxu0 }
 0x76e   : > { %5525 = vmatmul.bf16.gmra.mxu2 %v7976_v49  ;;  %5703 = vmatmul.bf16.gmra.mxu3 %v12730_v46 }
 0x76f   : > { %5957 = vmatmul.bf16.gmra.mxu0 %v7976_v49 }
 0x774   : > { %v12733_v22 = vpop.f32.mrf.mxu0 }
 0x779   : > { %v5585_v58 = vpop.f32.mrf.mxu1 }
 0x77c   : > { %5624 = vmatmul.bf16.gmra.mxu1 %v12735_v12  ;;  %v12738_v37 = vpop.f32.mrf.mxu0 }
 0x77e   : > { %5530 = vmatmul.bf16.gmra.mxu2 %v7988_v63  ;;  %5708 = vmatmul.bf16.gmra.mxu3 %v12740_v5 }
 0x77f   : > { %5962 = vmatmul.bf16.gmra.mxu0 %v7988_v63 }
 0x781   : > { %v5587_v31 = vpop.f32.mrf.mxu1  ;;  %v5491_v55 = vpop.f32.mrf.mxu2 }
 0x782   : > { %v5581_v45 = vadd.f32 %v5580_v47, %v5491_v55  ;;  %v5669_v54 = vpop.f32.mrf.mxu3  ;;  %v8749_v47 = vld [vmem:[#allocation2 + $0x124] sm:$0xf]  ;;  %v12760_v55 = vor.u32 %v8748_v57, %v8019_v10  ;;  %v8755_v57 = vld [vmem:[#allocation2 + $0x154] sm:$0xf] }
 0x783   : > { %v12755_v49 = vor.u32 %v8749_v47, %v8025_v28  ;;  %v8751_v47 = vld [vmem:[#allocation2 + $0x130] sm:$0xf0] }
 0x784   : > { %v5670_v34 = vadd.f32 %v5669_v54, %v5581_v45  ;;  %v12743_v17 = vpop.f32.mrf.mxu0  ;;  %v8770_v54 = vld [vmem:[#allocation8 + $0x48] sm:$0xff] }
 0x785   : > { %14136 = vst [vmem:[#allocation57_spill] sm:$0xff] %v12755_v49  ;;  %6004 = vmatpush.bf16.msrb.mxu2 %v8770_v54 }
 0x786   : > { %v12764_v11 = vadd.f32 %v12728_v56, %v5670_v34  ;;  %v8023_v34 = vld [vmem:[#allocation2 + $0x120] sm:$0xf] }
 0x789   : > { %v5590_v62 = vpop.f32.mrf.mxu1  ;;  %v5493_v6 = vpop.f32.mrf.mxu2 }
 0x78a   : > { %v5583_v14 = vadd.f32 %v5582_v0, %v5493_v6  ;;  %v5671_v15 = vpop.f32.mrf.mxu3 }
 0x78c   : > { %5629 = vmatmul.bf16.gmra.mxu1 %v12745_v25  ;;  %v5672_v59 = vadd.f32 %v5671_v15, %v5583_v14  ;;  %v12748_v44 = vpop.f32.mrf.mxu0 }
 0x78e   : > { %5535 = vmatmul.bf16.gmra.mxu2 %v8000_v42  ;;  %5713 = vmatmul.bf16.gmra.mxu3 %v12750_v40 }
 0x78f   : > { %5967 = vmatmul.bf16.gmra.mxu0 %v8000_v42  ;;  %v12775_v42 = vadd.f32 %v12733_v22, %v5672_v59  ;;  %v8875_v22 = vld [vmem:[#allocation8 + $0x1f8] sm:$0xff] }
 0x790   : > { %6778 = vmatpush.bf16.msra.mxu0 %v8875_v22  ;;  %v8872_v22 = vld [vmem:[#allocation8 + $0x1e0] sm:$0xff] }
 0x791   : > { %v5592_v30 = vpop.f32.mrf.mxu1  ;;  %v5496_v36 = vpop.f32.mrf.mxu2 }
 0x792   : > { %v5586_v18 = vadd.f32 %v5585_v58, %v5496_v36  ;;  %v5674_v1 = vpop.f32.mrf.mxu3  ;;  %v8750_v36 = vld [vmem:[#allocation2 + $0x128] sm:$0xf0] }
 0x793   : > { %v8024_v19 = vor.u32 %v8750_v36, %v8023_v34  ;;  %v8043_v36 = vld [vmem:[#allocation2 + $0x140] sm:$0xf] }
 0x794   : > { %v5675_v39 = vadd.f32 %v5674_v1, %v5586_v18  ;;  %v12753_v13 = vpop.f32.mrf.mxu0  ;;  %v8031_v1 = vld [vmem:[#allocation2 + $0x128] sm:$0xf] }
 0x795   : > { %v12782_v16 = vor.u32 %v8751_v47, %v8031_v1 }
 0x796   : > { %v12788_v59 = vadd.f32 %v12738_v37, %v5675_v39 }
 0x799   : > { %v5595_v32 = vpop.f32.mrf.mxu1  ;;  %v5498_v0 = vpop.f32.mrf.mxu2 }
 0x79a   : > { %v5588_v21 = vadd.f32 %v5587_v31, %v5498_v0  ;;  %v5676_v60 = vpop.f32.mrf.mxu3 }
 0x79c   : > { %5634 = vmatmul.bf16.gmra.mxu1 %v12755_v49  ;;  %v5677_v63 = vadd.f32 %v5676_v60, %v5588_v21  ;;  %v12758_v58 = vpop.f32.mrf.mxu0 }
 0x79e   : > { %5540 = vmatmul.bf16.gmra.mxu2 %v8012_v3  ;;  %5718 = vmatmul.bf16.gmra.mxu3 %v12760_v55  ;;  %v12800_v37 = vadd.f32 %v12743_v17, %v5677_v63  ;;  %v8867_v17 = vld [vmem:[#allocation8 + $0x1b8] sm:$0xff]  ;;  %v8769_v63 = vld [vmem:[#allocation8 + $0x40] sm:$0xff] }
 0x79f   : > { %5972 = vmatmul.bf16.gmra.mxu0 %v8012_v3  ;;  %v8049_v3 = vld [vmem:[#allocation2 + $0x15c] sm:$0xf0]  ;;  %6689 = vmatpush.bf16.msra.mxu3 %v8867_v17 }
 0x7a0   : > { %6005 = vmatpush.bf16.msrb.mxu2 %v8769_v63 }
 0x7a1   : > { %v5597_v45 = vpop.f32.mrf.mxu1  ;;  %v5501_v31 = vpop.f32.mrf.mxu2 }
 0x7a2   : > { %v5591_v2 = vadd.f32 %v5590_v62, %v5501_v31  ;;  %v5679_v6 = vpop.f32.mrf.mxu3  ;;  %v8874_v31 = vld [vmem:[#allocation8 + $0x1f0] sm:$0xff] }
 0x7a3   : > { %6779 = vmatpush.bf16.msra.mxu0 %v8874_v31 }
 0x7a4   : > { %v12766_v14 = vadd.f32 %v5679_v6, %v5591_v2  ;;  %v12768_v15 = vpop.f32.mrf.mxu0  ;;  %v12796_v6 = vor.u32 %v8755_v57, %v8049_v3 }
 0x7a6   : > { %14138 = vst [vmem:[#allocation52_spill] sm:$0xff] %v12796_v6  ;;  %v12813_v57 = vadd.f32 %v12748_v44, %v12766_v14  ;;  %v8869_v44 = vld [vmem:[#allocation8 + $0x1c8] sm:$0xff] }
 0x7a7   : > { %6780 = vmatpush.bf16.msra.mxu0 %v8873_v53  ;;  %v8758_v53 = vld [vmem:[#allocation2 + $0x16c] sm:$0xf] }
 0x7a9   : > { %v12770_v48 = vpop.f32.mrf.mxu1  ;;  %v5503_v56 = vpop.f32.mrf.mxu2 }
 0x7aa   : > { %v5593_v62 = vadd.f32 %v5592_v30, %v5503_v56  ;;  %v5681_v18 = vpop.f32.mrf.mxu3 }
 0x7ab   : > { %6781 = vmatpush.bf16.msra.mxu0 %v8872_v22 }
 0x7ac   : > { %5639 = vmatmul.bf16.gmra.mxu1 %v12772_v4  ;;  %v12778_v28 = vadd.f32 %v5681_v18, %v5593_v62  ;;  %v12780_v0 = vpop.f32.mrf.mxu0  ;;  %v8754_v62 = vld [vmem:[#allocation2 + $0x148] sm:$0xf0]  ;;  %v8760_v4 = vld [vmem:[#allocation2 + $0x178] sm:$0xf0] }
 0x7ae   : > { %5545 = vmatmul.bf16.gmra.mxu2 %v8024_v19  ;;  %5723 = vmatmul.bf16.gmra.mxu3 %v12782_v16  ;;  %v12827_v22 = vadd.f32 %v12753_v13, %v12778_v28  ;;  %v8863_v13 = vld [vmem:[#allocation8 + $0x198] sm:$0xff] }
 0x7af   : > { %5977 = vmatmul.bf16.gmra.mxu0 %v8024_v19  ;;  %v8777_v19 = vld [vmem:[#allocation8 + $0x80] sm:$0xff] }
 0x7b0   : > { %6094 = vmatpush.bf16.msrb.mxu1 %v8777_v19  ;;  %v8756_v19 = vld [vmem:[#allocation2 + $0x158] sm:$0xf0] }
 0x7b1   : > { %v12784_v21 = vpop.f32.mrf.mxu1  ;;  %v5506_v30 = vpop.f32.mrf.mxu2 }
 0x7b2   : > { %v5596_v60 = vadd.f32 %v5595_v32, %v5506_v30  ;;  %v5684_v10 = vpop.f32.mrf.mxu3  ;;  %v8035_v32 = vld [vmem:[#allocation2 + $0x138] sm:$0xf]  ;;  %v12806_v30 = vor.u32 %v8754_v62, %v8043_v36 }
 0x7b3   : > { %v8036_v47 = vor.u32 %v8753_v33, %v8035_v32 }
 0x7b4   : > { %v12790_v38 = vadd.f32 %v5684_v10, %v5596_v60  ;;  %v12792_v54 = vpop.f32.mrf.mxu0  ;;  %14139 = vst [vmem:[#allocation54_spill] sm:$0xff] %v12806_v30 }
 0x7b9   : > { %v12794_v2 = vpop.f32.mrf.mxu1  ;;  %v5508_v39 = vpop.f32.mrf.mxu2 }
 0x7ba   : > { %v5598_v56 = vadd.f32 %v5597_v45, %v5508_v39  ;;  %v5686_v34 = vpop.f32.mrf.mxu3  ;;  %v8871_v45 = vld [vmem:[#allocation8 + $0x1d8] sm:$0xff]  ;;  %v8061_v39 = vld [vmem:[#allocation2 + $0x174] sm:$0xf0] }
 0x7bb   : > { %6782 = vmatpush.bf16.msra.mxu0 %v8871_v45  ;;  %v12822_v62 = vor.u32 %v8758_v53, %v8061_v39  ;;  %v8055_v45 = vld [vmem:[#allocation2 + $0x158] sm:$0xf]  ;;  %v8864_v39 = vld [vmem:[#allocation8 + $0x1a0] sm:$0xff] }
 0x7bc   : > { %5644 = vmatmul.bf16.gmra.mxu1 %v12796_v6  ;;  %v12802_v18 = vadd.f32 %v5686_v34, %v5598_v56  ;;  %v12804_v1 = vpop.f32.mrf.mxu0  ;;  %v8866_v56 = vld [vmem:[#allocation8 + $0x1b0] sm:$0xff]  ;;  %v8067_v6 = vld [vmem:[#allocation2 + $0x170] sm:$0xf] }
 0x7bd   : > { %v8870_v34 = vld [vmem:[#allocation8 + $0x1d0] sm:$0xff]  ;;  %14140 = vst [vmem:[#allocation51_spill] sm:$0xff] %v12822_v62  ;;  %6690 = vmatpush.bf16.msra.mxu3 %v8866_v56  ;;  %v8868_v56 = vld [vmem:[#allocation8 + $0x1c0] sm:$0xff] }
 0x7be   : > { %5550 = vmatmul.bf16.gmra.mxu2 %v8036_v47  ;;  %5728 = vmatmul.bf16.gmra.mxu3 %v12806_v30 }
 0x7bf   : > { %5982 = vmatmul.bf16.gmra.mxu0 %v8036_v47  ;;  %v8865_v47 = vld [vmem:[#allocation8 + $0x1a8] sm:$0xff] }
 0x7c0   : > { %6783 = vmatpush.bf16.msra.mxu0 %v8870_v34 }
 0x7c1   : > { %v12808_v60 = vpop.f32.mrf.mxu1  ;;  %v5511_v10 = vpop.f32.mrf.mxu2  ;;  %6691 = vmatpush.bf16.msra.mxu3 %v8865_v47 }
 0x7c2   : > { %v5601_v3 = vadd.f32 %v12770_v48, %v5511_v10  ;;  %v5689_v31 = vpop.f32.mrf.mxu3  ;;  %v8047_v48 = vld [vmem:[#allocation2 + $0x150] sm:$0xf]  ;;  %v8757_v10 = vld [vmem:[#allocation2 + $0x160] sm:$0xf0] }
 0x7c3   : > { %v8048_v53 = vor.u32 %v8756_v19, %v8047_v48  ;;  %v12834_v34 = vor.u32 %v8757_v10, %v8055_v45  ;;  %v8073_v48 = vld [vmem:[#allocation2 + $0x18c] sm:$0xf0] }
 0x7c4   : > { %v12816_v32 = vadd.f32 %v5689_v31, %v5601_v3  ;;  %v12818_v33 = vpop.f32.mrf.mxu0  ;;  %6784 = vmatpush.bf16.msra.mxu0 %v8869_v44  ;;  %v12840_v44 = vadd.f32 %v12758_v58, %v12790_v38  ;;  %v12849_v58 = vadd.f32 %v12768_v15, %v12802_v18  ;;  %v8883_v15 = vld [vmem:[#allocation8 + $0x238] sm:$0xff] }
 0x7c5   : > { %14141 = vst [vmem:[#allocation62_spill] sm:$0xff] %v12834_v34  ;;  %6692 = vmatpush.bf16.msra.mxu3 %v8864_v39  ;;  %8889 = vmatpush.bf16.msra.mxu2 %v8883_v15 }
 0x7c6   : > { %14142 = vst [vmem:[#allocation63_spill] sm:$0xff] %v12849_v58  ;;  %v8812_v58 = vld [vmem:[#allocation2 + $0x34] sm:$0xf] }
 0x7c8   : > { %6785 = vmatpush.bf16.msra.mxu0 %v8868_v56  ;;  %v8759_v56 = vld [vmem:[#allocation2 + $0x170] sm:$0xf0] }
 0x7c9   : > { %v12820_v36 = vpop.f32.mrf.mxu1  ;;  %v5513_v14 = vpop.f32.mrf.mxu2  ;;  %6693 = vmatpush.bf16.msra.mxu3 %v8863_v13 }
 0x7ca   : > { %v5603_v17 = vadd.f32 %v12784_v21, %v5513_v14  ;;  %v5691_v63 = vpop.f32.mrf.mxu3  ;;  %v8785_v14 = vld [vmem:[#allocation2 + $0x184] sm:$0xf] }
 0x7cb   : > { %v8076_v10 = vor.u32 %v8785_v14, %v8073_v48  ;;  %v8887_v14 = vld [vmem:[%s13467_s13 + $0x18] sm:$0xff]  ;;  %v12858_v48 = vor.u32 %v8760_v4, %v8067_v6 }
 0x7cc   : > { %5649 = vmatmul.bf16.gmra.mxu1 %v12822_v62  ;;  %v12830_v3 = vadd.f32 %v5691_v63, %v5603_v17  ;;  %v12832_v31 = vpop.f32.mrf.mxu0  ;;  %v8862_v63 = vld [vmem:[#allocation8 + $0x190] sm:$0xff]  ;;  %6867 = vmatpush.bf16.msrb.mxu0 %v8883_v15  ;;  %v8787_v15 = vld [vmem:[#allocation2 + $0x190] sm:$0xf0] }
 0x7cd   : > { %6694 = vmatpush.bf16.msra.mxu3 %v8862_v63  ;;  %14143 = vst [vmem:[#allocation53_spill] sm:$0xff] %v12858_v48  ;;  %v8860_v63 = vld [vmem:[#allocation8 + $0x180] sm:$0xff]  ;;  %7128 = vmatpush.bf16.msra.mxu1 %v8887_v14  ;;  %v8071_v14 = vld [vmem:[#allocation2 + $0x180] sm:$0xf] }
 0x7ce   : > { %5555 = vmatmul.bf16.gmra.mxu2 %v8048_v53  ;;  %5733 = vmatmul.bf16.gmra.mxu3 %v12834_v34 }
 0x7cf   : > { %5987 = vmatmul.bf16.gmra.mxu0 %v8048_v53  ;;  %v8861_v53 = vld [vmem:[#allocation8 + $0x188] sm:$0xff] }
 0x7d1   : > { %v5612_v62 = vpop.f32.mrf.mxu1  ;;  %v5516_v28 = vpop.f32.mrf.mxu2  ;;  %6695 = vmatpush.bf16.msra.mxu3 %v8861_v53  ;;  %v8715_v53 = vld [vmem:[#allocation2 + $0x10] sm:$0xf0] }
 0x7d2   : > { %v5606_v21 = vadd.f32 %v12794_v2, %v5516_v28  ;;  %v5694_v47 = vpop.f32.mrf.mxu3  ;;  %v8059_v2 = vld [vmem:[#allocation2 + $0x168] sm:$0xf] }
 0x7d4   : > { %v12842_v19 = vadd.f32 %v5694_v47, %v5606_v21  ;;  %v12844_v17 = vpop.f32.mrf.mxu0  ;;  %v8060_v47 = vor.u32 %v8759_v56, %v8059_v2 }
 0x7d5   : > { %6696 = vmatpush.bf16.msra.mxu3 %v8860_v63  ;;  %v8786_v63 = vld [vmem:[#allocation2 + $0x188] sm:$0xf0] }
 0x7d9   : > { %v5615_v45 = vpop.f32.mrf.mxu1  ;;  %v5518_v39 = vpop.f32.mrf.mxu2 }
 0x7da   : > { %v5608_v13 = vadd.f32 %v12808_v60, %v5518_v39  ;;  %v5696_v28 = vpop.f32.mrf.mxu3 }
 0x7dc   : > { %5654 = vmatmul.bf16.gmra.mxu1 %v8076_v10  ;;  %v12851_v38 = vadd.f32 %v5696_v28, %v5608_v13  ;;  %v12853_v21 = vpop.f32.mrf.mxu0  ;;  %v8187_v10 = vld [vmem:[#allocation2 + $0x8] sm:$0xf]  ;;  %v12866_v13 = vadd.f32 %v12780_v0, %v12816_v32 }
 0x7dd   : > { %v8188_v6 = vor.u32 %v8715_v53, %v8187_v10  ;;  %v12872_v10 = vadd.f32 %v12792_v54, %v12830_v3  ;;  %v8181_v54 = vld [vmem:[#allocation2 + $0xc] sm:$0xf0] }
 0x7de   : > { %5560 = vmatmul.bf16.gmra.mxu2 %v8060_v47  ;;  %5738 = vmatmul.bf16.gmra.mxu3 %v12858_v48  ;;  %14144 = vst [vmem:[#allocation56_spill] sm:$0xff] %v12866_v13  ;;  %v8079_v48 = vld [vmem:[#allocation2 + $0x188] sm:$0xf] }
 0x7df   : > { %5992 = vmatmul.bf16.gmra.mxu0 %v8060_v47  ;;  %v8080_v0 = vor.u32 %v8787_v15, %v8079_v48 }
 0x7e1   : > { %v5617_v60 = vpop.f32.mrf.mxu1  ;;  %v5521_v18 = vpop.f32.mrf.mxu2 }
 0x7e2   : > { %v5611_v39 = vadd.f32 %v12820_v36, %v5521_v18  ;;  %v5699_v2 = vpop.f32.mrf.mxu3  ;;  %v8289_v36 = vld [vmem:[#allocation2 + $0x3c] sm:$0xf0] }
 0x7e3   : > { %v8292_v32 = vor.u32 %v8812_v58, %v8289_v36  ;;  %v8287_v58 = vld [vmem:[#allocation2 + $0x30] sm:$0xf]  ;;  %v8813_v36 = vld [vmem:[#allocation2 + $0x38] sm:$0xf0] }
 0x7e4   : > { %v5700_v56 = vadd.f32 %v5699_v2, %v5611_v39  ;;  %v12862_v4 = vpop.f32.mrf.mxu0  ;;  %v8072_v2 = vor.u32 %v8786_v63, %v8071_v14  ;;  %v8713_v14 = vld [vmem:[#allocation2 + $0x4] sm:$0xf] }
 0x7e5   : > { %v8184_v15 = vor.u32 %v8713_v14, %v8181_v54 }
 0x7e9   : > { %v5620_v28 = vpop.f32.mrf.mxu1  ;;  %v5523_v47 = vpop.f32.mrf.mxu2 }
 0x7ea   : > { %v5613_v34 = vadd.f32 %v5612_v62, %v5523_v47  ;;  %v5701_v49 = vpop.f32.mrf.mxu3 }
 0x7ec   : > { %6095 = vmatmul.bf16.vlgmr.msrb.gmra.mxu1 %v8188_v6  ;;  %v5702_v18 = vadd.f32 %v5701_v49, %v5613_v34  ;;  %v12868_v39 = vpop.f32.mrf.mxu0  ;;  %v12878_v34 = vadd.f32 %v12804_v1, %v12842_v19  ;;  %v12885_v1 = vadd.f32 %v12818_v33, %v12851_v38  ;;  %v8299_v38 = vld [vmem:[#allocation2 + $0x48] sm:$0xf] }
 0x7ee   : > { %5565 = vmatmul.bf16.gmra.mxu2 %v8072_v2  ;;  %5743 = vmatmul.bf16.gmra.mxu3 %v8080_v0  ;;  %v8301_v2 = vld [vmem:[#allocation2 + $0x54] sm:$0xf0] }
 0x7ef   : > { %6786 = vmatmul.bf16.vlgmr.msra.gmra.mxu0 %v8292_v32 }
 0x7f1   : > { %v5622_v53 = vpop.f32.mrf.mxu1  ;;  %v5526_v6 = vpop.f32.mrf.mxu2 }
 0x7f2   : > { %v5616_v62 = vadd.f32 %v5615_v45, %v5526_v6  ;;  %v5704_v47 = vpop.f32.mrf.mxu3  ;;  %v8815_v45 = vld [vmem:[#allocation2 + $0x4c] sm:$0xf]  ;;  %v8288_v6 = vor.u32 %v8813_v36, %v8287_v58  ;;  %v12890_v58 = vadd.f32 %v12832_v31, %v5700_v56  ;;  %v8816_v36 = vld [vmem:[#allocation2 + $0x50] sm:$0xf0] }
 0x7f4   : > { %v5705_v13 = vadd.f32 %v5704_v47, %v5616_v62  ;;  %v12874_v30 = vpop.f32.mrf.mxu0  ;;  %v8304_v62 = vor.u32 %v8815_v45, %v8301_v2  ;;  %v8818_v45 = vld [vmem:[#allocation2 + $0x64] sm:$0xf]  ;;  %v8313_v2 = vld [vmem:[#allocation2 + $0x6c] sm:$0xf0] }
 0x7f9   : > { %v5625_v49 = vpop.f32.mrf.mxu1  ;;  %v5528_v3 = vpop.f32.mrf.mxu2 }
 0x7fa   : > { %v5618_v48 = vadd.f32 %v5617_v60, %v5528_v3  ;;  %v5706_v63 = vpop.f32.mrf.mxu3 }
 0x7fc   : > { %6100 = vmatmul.bf16.gmra.mxu1 %v12686_v24  ;;  %v5707_v0 = vadd.f32 %v5706_v63, %v5618_v48  ;;  %v12881_v32 = vpop.f32.mrf.mxu0  ;;  %v8882_v24 = vld [vmem:[#allocation8 + $0x230] sm:$0xff] }
 0x7fd   : > { %8890 = vmatpush.bf16.msra.mxu2 %v8882_v24  ;;  %6868 = vmatpush.bf16.msrb.mxu0 %v8882_v24  ;;  %v8316_v24 = vor.u32 %v8818_v45, %v8313_v2  ;;  %v8325_v45 = vld [vmem:[#allocation2 + $0x84] sm:$0xf0] }
 0x7fe   : > { %6006 = vmatmul.bf16.vlgmr.msrb.gmra.mxu2 %v8184_v15  ;;  %6697 = vmatmul.bf16.vlgmr.msra.gmra.mxu3 %v8288_v6 }
 0x7ff   : > { %6791 = vmatmul.bf16.gmra.mxu0 %v8304_v62 }
 0x801   : > { %v5627_v47 = vpop.f32.mrf.mxu1  ;;  %v5531_v19 = vpop.f32.mrf.mxu2 }
 0x802   : > { %v5621_v60 = vadd.f32 %v5620_v28, %v5531_v19  ;;  %v5709_v14 = vpop.f32.mrf.mxu3  ;;  %v8300_v28 = vor.u32 %v8816_v36, %v8299_v38  ;;  %v8819_v36 = vld [vmem:[#allocation2 + $0x68] sm:$0xf0] }
 0x804   : > { %v5710_v54 = vadd.f32 %v5709_v14, %v5621_v60  ;;  %v12887_v3 = vpop.f32.mrf.mxu0  ;;  %v12896_v60 = vadd.f32 %v12844_v17, %v5702_v18 }
 0x809   : > { %v5630_v48 = vpop.f32.mrf.mxu1  ;;  %v5533_v33 = vpop.f32.mrf.mxu2 }
 0x80a   : > { %v5623_v63 = vadd.f32 %v5622_v53, %v5533_v33  ;;  %v5711_v15 = vpop.f32.mrf.mxu3 }
 0x80c   : > { %6105 = vmatmul.bf16.gmra.mxu1 %v12692_v23  ;;  %v5712_v6 = vadd.f32 %v5711_v15, %v5623_v63  ;;  %v12893_v62 = vpop.f32.mrf.mxu0  ;;  %v12902_v63 = vadd.f32 %v12853_v21, %v5705_v13  ;;  %v8311_v15 = vld [vmem:[#allocation2 + $0x60] sm:$0xf]  ;;  %v12911_v13 = vadd.f32 %v12862_v4, %v5707_v0 }
 0x80e   : > { %6011 = vmatmul.bf16.gmra.mxu2 %v12562_v52  ;;  %6702 = vmatmul.bf16.gmra.mxu3 %v8300_v28  ;;  %v8821_v52 = vld [vmem:[#allocation2 + $0x7c] sm:$0xf] }
 0x80f   : > { %6796 = vmatmul.bf16.gmra.mxu0 %v8316_v24  ;;  %v8312_v24 = vor.u32 %v8819_v36, %v8311_v15 }
 0x811   : > { %v5632_v19 = vpop.f32.mrf.mxu1  ;;  %v5536_v23 = vpop.f32.mrf.mxu2 }
 0x812   : > { %v5626_v31 = vadd.f32 %v5625_v49, %v5536_v23  ;;  %v5714_v56 = vpop.f32.mrf.mxu3  ;;  %v8886_v49 = vld [vmem:[%s13467_s13 + $0x10] sm:$0xff]  ;;  %v8328_v23 = vor.u32 %v8821_v52, %v8325_v45  ;;  %v8822_v52 = vld [vmem:[#allocation2 + $0x80] sm:$0xf0] }
 0x813   : > { %7129 = vmatpush.bf16.msra.mxu1 %v8886_v49  ;;  %v8824_v45 = vld [vmem:[#allocation2 + $0x94] sm:$0xf]  ;;  %v8337_v49 = vld [vmem:[#allocation2 + $0x9c] sm:$0xf0] }
 0x814   : > { %v5715_v53 = vadd.f32 %v5714_v56, %v5626_v31  ;;  %v12899_v14 = vpop.f32.mrf.mxu0 }
 0x819   : > { %v5635_v33 = vpop.f32.mrf.mxu1  ;;  %v5538_v38 = vpop.f32.mrf.mxu2 }
 0x81a   : > { %v5628_v17 = vadd.f32 %v5627_v47, %v5538_v38  ;;  %v5716_v18 = vpop.f32.mrf.mxu3 }
 0x81c   : > { %6110 = vmatmul.bf16.gmra.mxu1 %v12698_v7  ;;  %v5717_v2 = vadd.f32 %v5716_v18, %v5628_v17  ;;  %v12905_v28 = vpop.f32.mrf.mxu0  ;;  %v8881_v7 = vld [vmem:[#allocation8 + $0x228] sm:$0xff]  ;;  %v12917_v18 = vadd.f32 %v12868_v39, %v5710_v54 }
 0x81d   : > { %8891 = vmatpush.bf16.msra.mxu2 %v8881_v7  ;;  %6869 = vmatpush.bf16.msrb.mxu0 %v8881_v7  ;;  %v8340_v7 = vor.u32 %v8824_v45, %v8337_v49  ;;  %v8349_v45 = vld [vmem:[#allocation2 + $0xb4] sm:$0xf0] }
 0x81e   : > { %6016 = vmatmul.bf16.gmra.mxu2 %v12683_v43  ;;  %6707 = vmatmul.bf16.gmra.mxu3 %v8312_v24  ;;  %v8323_v43 = vld [vmem:[#allocation2 + $0x78] sm:$0xf] }
 0x81f   : > { %6801 = vmatmul.bf16.gmra.mxu0 %v8328_v23 }
 0x821   : > { %v5637_v21 = vpop.f32.mrf.mxu1  ;;  %v5541_v47 = vpop.f32.mrf.mxu2 }
 0x822   : > { %v5631_v31 = vadd.f32 %v5630_v48, %v5541_v47  ;;  %v5719_v56 = vpop.f32.mrf.mxu3  ;;  %v8324_v48 = vor.u32 %v8822_v52, %v8323_v43  ;;  %v8825_v52 = vld [vmem:[#allocation2 + $0x98] sm:$0xf0] }
 0x824   : > { %v5720_v38 = vadd.f32 %v5719_v56, %v5631_v31  ;;  %v12914_v17 = vpop.f32.mrf.mxu0  ;;  %v12923_v31 = vadd.f32 %v12874_v30, %v5712_v6 }
 0x829   : > { %v5640_v15 = vpop.f32.mrf.mxu1  ;;  %v5543_v4 = vpop.f32.mrf.mxu2 }
 0x82a   : > { %v5633_v0 = vadd.f32 %v5632_v19, %v5543_v4  ;;  %v5721_v36 = vpop.f32.mrf.mxu3 }
 0x82c   : > { %6115 = vmatmul.bf16.gmra.mxu1 %v12704_v20  ;;  %v5722_v24 = vadd.f32 %v5721_v36, %v5633_v0  ;;  %v12920_v23 = vpop.f32.mrf.mxu0  ;;  %v12929_v0 = vadd.f32 %v12881_v32, %v5715_v53  ;;  %v8335_v36 = vld [vmem:[#allocation2 + $0x90] sm:$0xf] }
 0x82e   : > { %6021 = vmatmul.bf16.gmra.mxu2 %v12689_v29  ;;  %6712 = vmatmul.bf16.gmra.mxu3 %v8324_v48  ;;  %v8827_v29 = vld [vmem:[#allocation2 + $0xac] sm:$0xf] }
 0x82f   : > { %6806 = vmatmul.bf16.gmra.mxu0 %v8340_v7  ;;  %v8352_v7 = vor.u32 %v8827_v29, %v8349_v45  ;;  %v8830_v29 = vld [vmem:[#allocation2 + $0xc4] sm:$0xf]  ;;  %v8361_v45 = vld [vmem:[#allocation2 + $0xcc] sm:$0xf0] }
 0x831   : > { %v5642_v47 = vpop.f32.mrf.mxu1  ;;  %v5546_v20 = vpop.f32.mrf.mxu2 }
 0x832   : > { %v5636_v39 = vadd.f32 %v5635_v33, %v5546_v20  ;;  %v5724_v54 = vpop.f32.mrf.mxu3  ;;  %v8336_v33 = vor.u32 %v8825_v52, %v8335_v36  ;;  %v12941_v36 = vadd.f32 %v12893_v62, %v5720_v38  ;;  %v8828_v52 = vld [vmem:[#allocation2 + $0xb0] sm:$0xf0] }
 0x834   : > { %v5725_v19 = vadd.f32 %v5724_v54, %v5636_v39  ;;  %v12926_v56 = vpop.f32.mrf.mxu0  ;;  %v12935_v39 = vadd.f32 %v12887_v3, %v5717_v2  ;;  %v8347_v2 = vld [vmem:[#allocation2 + $0xa8] sm:$0xf] }
 0x839   : > { %v5645_v4 = vpop.f32.mrf.mxu1  ;;  %v5548_v43 = vpop.f32.mrf.mxu2 }
 0x83a   : > { %v5638_v30 = vadd.f32 %v5637_v21, %v5548_v43  ;;  %v5726_v6 = vpop.f32.mrf.mxu3 }
 0x83c   : > { %6120 = vmatmul.bf16.gmra.mxu1 %v12710_v50  ;;  %v5727_v49 = vadd.f32 %v5726_v6, %v5638_v30  ;;  %v12932_v48 = vpop.f32.mrf.mxu0  ;;  %v8880_v50 = vld [vmem:[#allocation8 + $0x220] sm:$0xff] }
 0x83d   : > { %8892 = vmatpush.bf16.msra.mxu2 %v8880_v50  ;;  %6870 = vmatpush.bf16.msrb.mxu0 %v8880_v50  ;;  %v8364_v50 = vor.u32 %v8830_v29, %v8361_v45  ;;  %v8373_v29 = vld [vmem:[#allocation2 + $0xe4] sm:$0xf0] }
 0x83e   : > { %6026 = vmatmul.bf16.gmra.mxu2 %v12695_v61  ;;  %6717 = vmatmul.bf16.gmra.mxu3 %v8336_v33 }
 0x83f   : > { %6811 = vmatmul.bf16.gmra.mxu0 %v8352_v7 }
 0x841   : > { %v5647_v20 = vpop.f32.mrf.mxu1  ;;  %v5551_v32 = vpop.f32.mrf.mxu2 }
 0x842   : > { %v5641_v53 = vadd.f32 %v5640_v15, %v5551_v32  ;;  %v5729_v21 = vpop.f32.mrf.mxu3  ;;  %v8348_v15 = vor.u32 %v8828_v52, %v8347_v2  ;;  %v8831_v52 = vld [vmem:[#allocation2 + $0xc8] sm:$0xf0] }
 0x844   : > { %v5730_v54 = vadd.f32 %v5729_v21, %v5641_v53  ;;  %v12938_v43 = vpop.f32.mrf.mxu0  ;;  %v12947_v53 = vadd.f32 %v12899_v14, %v5722_v24 }
 0x849   : > { %v5650_v30 = vpop.f32.mrf.mxu1  ;;  %v5553_v3 = vpop.f32.mrf.mxu2 }
 0x84a   : > { %v5643_v61 = vadd.f32 %v5642_v47, %v5553_v3  ;;  %v5731_v6 = vpop.f32.mrf.mxu3 }
 0x84c   : > { %6125 = vmatmul.bf16.gmra.mxu1 %v12716_v27  ;;  %v5732_v33 = vadd.f32 %v5731_v6, %v5643_v61  ;;  %v12944_v7 = vpop.f32.mrf.mxu0  ;;  %v12953_v61 = vadd.f32 %v12905_v28, %v5725_v19  ;;  %v8359_v6 = vld [vmem:[#allocation2 + $0xc0] sm:$0xf]  ;;  %v8879_v19 = vld [vmem:[#allocation8 + $0x218] sm:$0xff] }
 0x84d   : > { %8893 = vmatpush.bf16.msra.mxu2 %v8879_v19  ;;  %6871 = vmatpush.bf16.msrb.mxu0 %v8879_v19 }
 0x84e   : > { %6031 = vmatmul.bf16.gmra.mxu2 %v12701_v9  ;;  %6722 = vmatmul.bf16.gmra.mxu3 %v8348_v15  ;;  %v8833_v9 = vld [vmem:[#allocation2 + $0xdc] sm:$0xf] }
 0x84f   : > { %6816 = vmatmul.bf16.gmra.mxu0 %v8364_v50  ;;  %v8360_v50 = vor.u32 %v8831_v52, %v8359_v6 }
 0x851   : > { %v5652_v32 = vpop.f32.mrf.mxu1  ;;  %v5556_v27 = vpop.f32.mrf.mxu2 }
 0x852   : > { %v5646_v62 = vadd.f32 %v5645_v4, %v5556_v27  ;;  %v5734_v38 = vpop.f32.mrf.mxu3  ;;  %v8885_v4 = vld [vmem:[%s13467_s13 + $0x8] sm:$0xff]  ;;  %v8376_v27 = vor.u32 %v8833_v9, %v8373_v29  ;;  %v8834_v9 = vld [vmem:[#allocation2 + $0xe0] sm:$0xf0]  ;;  %v8836_v29 = vld [vmem:[#allocation2 + $0xf4] sm:$0xf] }
 0x853   : > { %7130 = vmatpush.bf16.msra.mxu1 %v8885_v4  ;;  %v8385_v4 = vld [vmem:[#allocation2 + $0xfc] sm:$0xf0] }
 0x854   : > { %v5735_v47 = vadd.f32 %v5734_v38, %v5646_v62  ;;  %v12950_v21 = vpop.f32.mrf.mxu0  ;;  %v8388_v19 = vor.u32 %v8836_v29, %v8385_v4  ;;  %v8839_v29 = vld [vmem:[#allocation2 + $0x10c] sm:$0xf]  ;;  %v8397_v4 = vld [vmem:[#allocation2 + $0x114] sm:$0xf0] }
 0x859   : > { %v5655_v3 = vpop.f32.mrf.mxu1  ;;  %v5558_v2 = vpop.f32.mrf.mxu2 }
 0x85a   : > { %v5648_v14 = vadd.f32 %v5647_v20, %v5558_v2  ;;  %v5736_v24 = vpop.f32.mrf.mxu3 }
 0x85c   : > { %6130 = vmatmul.bf16.gmra.mxu1 %v12722_v35  ;;  %v5737_v45 = vadd.f32 %v5736_v24, %v5648_v14  ;;  %v12956_v15 = vpop.f32.mrf.mxu0  ;;  %v12963_v35 = vadd.f32 %v12914_v17, %v5727_v49  ;;  %v12968_v24 = vadd.f32 %v12920_v23, %v5730_v54  ;;  %v8371_v17 = vld [vmem:[#allocation2 + $0xd8] sm:$0xf]  ;;  %v12973_v23 = vadd.f32 %v12926_v56, %v5732_v33 }
 0x85e   : > { %6036 = vmatmul.bf16.gmra.mxu2 %v12707_v8  ;;  %6727 = vmatmul.bf16.gmra.mxu3 %v8360_v50  ;;  %14145 = vst [vmem:[#allocation59_spill] sm:$0xff] %v12968_v24  ;;  %v12976_v24 = vadd.f32 %v12932_v48, %v5735_v47  ;;  %v8878_v48 = vld [vmem:[#allocation8 + $0x210] sm:$0xff] }
 0x85f   : > { %6821 = vmatmul.bf16.gmra.mxu0 %v8376_v27  ;;  %8894 = vmatpush.bf16.msra.mxu2 %v8878_v48 }
 0x860   : > { %6872 = vmatpush.bf16.msrb.mxu0 %v8878_v48 }
 0x861   : > { %v5657_v28 = vpop.f32.mrf.mxu1  ;;  %v5561_v20 = vpop.f32.mrf.mxu2 }
 0x862   : > { %v5651_v62 = vadd.f32 %v5650_v30, %v5561_v20  ;;  %v5739_v38 = vpop.f32.mrf.mxu3  ;;  %v8372_v30 = vor.u32 %v8834_v9, %v8371_v17  ;;  %v8837_v9 = vld [vmem:[#allocation2 + $0xf8] sm:$0xf0] }
 0x864   : > { %v5740_v2 = vadd.f32 %v5739_v38, %v5651_v62  ;;  %v12965_v14 = vpop.f32.mrf.mxu0 }
 0x869   : > { %v6096_v6 = vpop.f32.mrf.mxu1  ;;  %v5563_v8 = vpop.f32.mrf.mxu2 }
 0x86a   : > { %v5653_v49 = vadd.f32 %v5652_v32, %v5563_v8  ;;  %v5741_v52 = vpop.f32.mrf.mxu3 }
 0x86c   : > { %6135 = vmatmul.bf16.gmra.mxu1 %v12730_v46  ;;  %v5742_v50 = vadd.f32 %v5741_v52, %v5653_v49  ;;  %v6787_v27 = vpop.f32.mrf.mxu0  ;;  %v8383_v49 = vld [vmem:[#allocation2 + $0xf0] sm:$0xf] }
 0x86e   : > { %6041 = vmatmul.bf16.gmra.mxu2 %v12713_v26  ;;  %6732 = vmatmul.bf16.gmra.mxu3 %v8372_v30  ;;  %v8400_v30 = vor.u32 %v8839_v29, %v8397_v4  ;;  %v8842_v29 = vld [vmem:[#allocation2 + $0x124] sm:$0xf] }
 0x86f   : > { %6826 = vmatmul.bf16.gmra.mxu0 %v8388_v19 }
 0x871   : > { %v6098_v20 = vpop.f32.mrf.mxu1  ;;  %v5566_v46 = vpop.f32.mrf.mxu2 }
 0x872   : > { %v5656_v54 = vadd.f32 %v5655_v3, %v5566_v46  ;;  %v5744_v62 = vpop.f32.mrf.mxu3  ;;  %v8384_v3 = vor.u32 %v8837_v9, %v8383_v49  ;;  %v8840_v9 = vld [vmem:[#allocation2 + $0x110] sm:$0xf0] }
 0x874   : > { %v5745_v32 = vadd.f32 %v5744_v62, %v5656_v54  ;;  %v6789_v38 = vpop.f32.mrf.mxu0 }
 0x879   : > { %v6101_v8 = vpop.f32.mrf.mxu1  ;;  %v5568_v17 = vpop.f32.mrf.mxu2 }
 0x87a   : > { %v5658_v52 = vadd.f32 %v5657_v28, %v5568_v17  ;;  %v5746_v26 = vpop.f32.mrf.mxu3 }
 0x87c   : > { %6140 = vmatmul.bf16.gmra.mxu1 %v12740_v5  ;;  %v12979_v56 = vadd.f32 %v5746_v26, %v5658_v52  ;;  %v6792_v33 = vpop.f32.mrf.mxu0  ;;  %v12983_v5 = vadd.f32 %v12938_v43, %v5737_v45  ;;  %v8395_v43 = vld [vmem:[#allocation2 + $0x108] sm:$0xf] }
 0x87e   : > { %6046 = vmatmul.bf16.gmra.mxu2 %v12719_v41  ;;  %6737 = vmatmul.bf16.gmra.mxu3 %v8384_v3  ;;  %v12992_v41 = vadd.f32 %v12944_v7, %v5740_v2  ;;  %v8396_v3 = vor.u32 %v8840_v9, %v8395_v43  ;;  %v8843_v43 = vld [vmem:[#allocation2 + $0x128] sm:$0xf0] }
 0x87f   : > { %6831 = vmatmul.bf16.gmra.mxu0 %v8400_v30 }
 0x881   : > { %v6103_v19 = vpop.f32.mrf.mxu1  ;;  %v6007_v47 = vpop.f32.mrf.mxu2 }
 0x882   : > { %v6008_v28 = vadd.f32 %v6007_v47, %v12764_v11  ;;  %v6698_v46 = vpop.f32.mrf.mxu3  ;;  %v8409_v11 = vld [vmem:[#allocation2 + $0x12c] sm:$0xf0] }
 0x883   : > { %v12986_v54 = vadd.f32 %v6787_v27, %v6698_v46  ;;  %v8412_v30 = vor.u32 %v8842_v29, %v8409_v11 }
 0x884   : > { %v12988_v62 = vadd.f32 %v6096_v6, %v6008_v28  ;;  %v6794_v17 = vpop.f32.mrf.mxu0 }
 0x889   : > { %v6106_v49 = vpop.f32.mrf.mxu1  ;;  %v6009_v52 = vpop.f32.mrf.mxu2 }
 0x88a   : > { %v6010_v45 = vadd.f32 %v6009_v52, %v12775_v42  ;;  %v6700_v26 = vpop.f32.mrf.mxu3  ;;  %v8407_v52 = vld [vmem:[#allocation2 + $0x120] sm:$0xf] }
 0x88b   : > { %v12995_v4 = vadd.f32 %v6789_v38, %v6700_v26  ;;  %v8408_v9 = vor.u32 %v8843_v43, %v8407_v52 }
 0x88c   : > { %6145 = vmatmul.bf16.gmra.mxu1 %v12750_v40  ;;  %v12997_v27 = vadd.f32 %v6098_v20, %v6010_v45  ;;  %v6797_v6 = vpop.f32.mrf.mxu0  ;;  %v13001_v40 = vadd.f32 %v12950_v21, %v5742_v50  ;;  %v8845_v45 = vld [vmem:[#allocation2 + $0x13c] sm:$0xf] }
 0x88e   : > { %6051 = vmatmul.bf16.gmra.mxu2 %v12725_v51  ;;  %6742 = vmatmul.bf16.gmra.mxu3 %v8396_v3  ;;  %v13010_v51 = vadd.f32 %v12956_v15, %v5745_v32 }
 0x88f   : > { %6836 = vmatmul.bf16.gmra.mxu0 %v8412_v30 }
 0x891   : > { %v6108_v48 = vpop.f32.mrf.mxu1  ;;  %v6012_v42 = vpop.f32.mrf.mxu2 }
 0x892   : > { %v6013_v7 = vadd.f32 %v6012_v42, %v12788_v59  ;;  %v6703_v2 = vpop.f32.mrf.mxu3  ;;  %v8421_v59 = vld [vmem:[#allocation2 + $0x144] sm:$0xf0] }
 0x893   : > { %v13004_v47 = vadd.f32 %v6792_v33, %v6703_v2  ;;  %v8424_v29 = vor.u32 %v8845_v45, %v8421_v59  ;;  %v8419_v2 = vld [vmem:[#allocation2 + $0x138] sm:$0xf] }
 0x894   : > { %v13006_v38 = vadd.f32 %v6101_v8, %v6013_v7  ;;  %v6799_v20 = vpop.f32.mrf.mxu0 }
 0x899   : > { %v6111_v28 = vpop.f32.mrf.mxu1  ;;  %v6014_v46 = vpop.f32.mrf.mxu2 }
 0x89a   : > { %v6015_v21 = vadd.f32 %v6014_v46, %v12800_v37  ;;  %v6705_v50 = vpop.f32.mrf.mxu3  ;;  %v8877_v37 = vld [vmem:[#allocation8 + $0x208] sm:$0xff] }
 0x89b   : > { %v13013_v26 = vadd.f32 %v6794_v17, %v6705_v50  ;;  %8895 = vmatpush.bf16.msra.mxu2 %v8877_v37  ;;  %6873 = vmatpush.bf16.msrb.mxu0 %v8877_v37  ;;  %v14147_v37 = vld [vmem:[#allocation63_spill] sm:$0xff] }
 0x89c   : > { %6150 = vmatmul.bf16.gmra.mxu1 %v12760_v55  ;;  %v13015_v33 = vadd.f32 %v6103_v19, %v6015_v21  ;;  %v13017_v8 = vpop.f32.mrf.mxu0  ;;  %v8884_v55 = vld [vmem:[%s13467_s13] sm:$0xff]  ;;  %v13025_v19 = vadd.f32 %v12965_v14, %v12979_v56  ;;  %v8848_v14 = vld [vmem:[#allocation2 + $0x154] sm:$0xf] }
 0x89d   : > { %7131 = vmatpush.bf16.msra.mxu1 %v8884_v55  ;;  %v8846_v21 = vld [vmem:[#allocation2 + $0x140] sm:$0xf0]  ;;  %v8433_v56 = vld [vmem:[#allocation2 + $0x15c] sm:$0xf0] }
 0x89e   : > { %6056 = vmatmul.bf16.gmra.mxu2 %v12735_v12  ;;  %6747 = vmatmul.bf16.gmra.mxu3 %v8408_v9  ;;  %v8436_v43 = vor.u32 %v8848_v14, %v8433_v56  ;;  %v14146_v9 = vld [vmem:[#allocation54_spill] sm:$0xff]  ;;  %v14149_v56 = vld [vmem:[#allocation56_spill] sm:$0xff] }
 0x89f   : > { %6841 = vmatmul.bf16.gmra.mxu0 %v8424_v29  ;;  %v8431_v29 = vld [vmem:[#allocation2 + $0x150] sm:$0xf] }
 0x8a1   : > { %v6113_v15 = vpop.f32.mrf.mxu1  ;;  %v6017_v32 = vpop.f32.mrf.mxu2 }
 0x8a2   : > { %v6018_v17 = vadd.f32 %v6017_v32, %v12813_v57  ;;  %v6708_v11 = vpop.f32.mrf.mxu3 }
 0x8a3   : > { %v13028_v3 = vadd.f32 %v6797_v6, %v6708_v11  ;;  %v8851_v11 = vld [vmem:[#allocation2 + $0x16c] sm:$0xf] }
 0x8a4   : > { %v13030_v30 = vadd.f32 %v6106_v49, %v6018_v17  ;;  %v13032_v42 = vpop.f32.mrf.mxu0  ;;  %v8420_v49 = vor.u32 %v8846_v21, %v8419_v2  ;;  %v8849_v17 = vld [vmem:[#allocation2 + $0x158] sm:$0xf0]  ;;  %v8876_v21 = vld [vmem:[#allocation8 + $0x200] sm:$0xff] }
 0x8a5   : > { %8896 = vmatpush.bf16.msra.mxu2 %v8876_v21  ;;  %6874 = vmatpush.bf16.msrb.mxu0 %v8876_v21 }
 0x8a9   : > { %v6116_v12 = vpop.f32.mrf.mxu1  ;;  %v6019_v7 = vpop.f32.mrf.mxu2 }
 0x8aa   : > { %v6020_v46 = vadd.f32 %v6019_v7, %v12827_v22  ;;  %v6710_v52 = vpop.f32.mrf.mxu3  ;;  %v8445_v7 = vld [vmem:[#allocation2 + $0x174] sm:$0xf0] }
 0x8ab   : > { %v13036_v50 = vadd.f32 %v6799_v20, %v6710_v52  ;;  %v14148_v52 = vld [vmem:[#allocation57_spill] sm:$0xff] }
 0x8ac   : > { %6155 = vmatmul.bf16.gmra.mxu1 %v12782_v16  ;;  %v13038_v57 = vadd.f32 %v6108_v48, %v6020_v46  ;;  %v13040_v6 = vpop.f32.mrf.mxu0  ;;  %v8432_v46 = vor.u32 %v8849_v17, %v8431_v29  ;;  %v8457_v17 = vld [vmem:[#allocation2 + $0x18c] sm:$0xf0] }
 0x8ae   : > { %6061 = vmatmul.bf16.gmra.mxu2 %v12745_v25  ;;  %6752 = vmatmul.bf16.gmra.mxu3 %v8420_v49 }
 0x8af   : > { %6846 = vmatmul.bf16.gmra.mxu0 %v8436_v43 }
 0x8b1   : > { %v6118_v45 = vpop.f32.mrf.mxu1  ;;  %v6022_v16 = vpop.f32.mrf.mxu2 }
 0x8b2   : > { %v6023_v22 = vadd.f32 %v6022_v16, %v12840_v44  ;;  %v8448_v44 = vor.u32 %v8851_v11, %v8445_v7 }
 0x8b4   : > { %v13044_v59 = vadd.f32 %v6111_v28, %v6023_v22  ;;  %v13046_v55 = vpop.f32.mrf.mxu0  ;;  %v14150_v22 = vld [vmem:[#allocation62_spill] sm:$0xff] }
 0x8b9   : > { %v6121_v20 = vpop.f32.mrf.mxu1  ;;  %v6024_v48 = vpop.f32.mrf.mxu2 }
 0x8ba   : > { %v6025_v32 = vadd.f32 %v6024_v48, %v14147_v37  ;;  %v8443_v48 = vld [vmem:[#allocation2 + $0x168] sm:$0xf]  ;;  %v8852_v37 = vld [vmem:[#allocation2 + $0x170] sm:$0xf0] }
 0x8bc   : > { %6160 = vmatmul.bf16.gmra.mxu1 %v14146_v9  ;;  %v13050_v25 = vadd.f32 %v6113_v15, %v6025_v32  ;;  %v13052_v2 = vpop.f32.mrf.mxu0  ;;  %v8854_v32 = vld [vmem:[#allocation2 + $0x184] sm:$0xf] }
 0x8be   : > { %6066 = vmatmul.bf16.gmra.mxu2 %v14148_v52  ;;  %6757 = vmatmul.bf16.gmra.mxu3 %v8432_v46  ;;  %v8444_v46 = vor.u32 %v8852_v37, %v8443_v48  ;;  %v14151_v52 = vld [vmem:[#allocation58_spill] sm:$0xff]  ;;  %v8455_v37 = vld [vmem:[#allocation2 + $0x180] sm:$0xf] }
 0x8bf   : > { %6851 = vmatmul.bf16.gmra.mxu0 %v8448_v44  ;;  %v8460_v44 = vor.u32 %v8854_v32, %v8457_v17  ;;  %v8855_v32 = vld [vmem:[#allocation2 + $0x188] sm:$0xf0] }
 0x8c1   : > { %v6123_v28 = vpop.f32.mrf.mxu1  ;;  %v6027_v14 = vpop.f32.mrf.mxu2 }
 0x8c2   : > { %v6028_v49 = vadd.f32 %v6027_v14, %v14149_v56 }
 0x8c4   : > { %v13056_v43 = vadd.f32 %v6116_v12, %v6028_v49  ;;  %v13058_v16 = vpop.f32.mrf.mxu0 }
 0x8c9   : > { %v6126_v15 = vpop.f32.mrf.mxu1  ;;  %v6029_v9 = vpop.f32.mrf.mxu2 }
 0x8ca   : > { %v6030_v29 = vadd.f32 %v6029_v9, %v12872_v10  ;;  %v14153_v9 = vld [vmem:[#allocation53_spill] sm:$0xff] }
 0x8cc   : > { %6165 = vmatmul.bf16.gmra.mxu1 %v14150_v22  ;;  %v13062_v11 = vadd.f32 %v6118_v45, %v6030_v29  ;;  %v13064_v7 = vpop.f32.mrf.mxu0  ;;  %v8857_v22 = vld [vmem:[#allocation2 + $0x19c] sm:$0xf]  ;;  %v8469_v45 = vld [vmem:[#allocation2 + $0x1a4] sm:$0xf0] }
 0x8cd   : > { %v8472_v17 = vor.u32 %v8857_v22, %v8469_v45 }
 0x8ce   : > { %6071 = vmatmul.bf16.gmra.mxu2 %v14151_v52  ;;  %6762 = vmatmul.bf16.gmra.mxu3 %v8444_v46  ;;  %v14154_v52 = vld [vmem:[#allocation52_spill] sm:$0xff] }
 0x8cf   : > { %6856 = vmatmul.bf16.gmra.mxu0 %v8460_v44 }
 0x8d1   : > { %v6128_v12 = vpop.f32.mrf.mxu1  ;;  %v6032_v21 = vpop.f32.mrf.mxu2 }
 0x8d2   : > { %v6033_v14 = vadd.f32 %v6032_v21, %v12878_v34 }
 0x8d4   : > { %v13068_v56 = vadd.f32 %v6121_v20, %v6033_v14  ;;  %v13070_v10 = vpop.f32.mrf.mxu0  ;;  %v8456_v20 = vor.u32 %v8855_v32, %v8455_v37  ;;  %v8295_v37 = vld [vmem:[#allocation2 + $0x38] sm:$0xf]  ;;  %v8814_v32 = vld [vmem:[#allocation2 + $0x40] sm:$0xf0] }
 0x8d5   : > { %14152 = vst [vmem:[#allocation67_spill] sm:$0xff] %v13070_v10  ;;  %v9126_v10 = vld [vmem:[%s9511_s23 + $0x8] sm:$0xff] }
 0x8d9   : > { %v6131_v49 = vpop.f32.mrf.mxu1  ;;  %v6034_v29 = vpop.f32.mrf.mxu2 }
 0x8da   : > { %v6035_v48 = vadd.f32 %v6034_v29, %v12885_v1  ;;  %v9125_v29 = vld [vmem:[%s9511_s23] sm:$0xff] }
 0x8db   : > { %v7024_v22 = vpack.c.bf16 %v9126_v10, %v9125_v29 }
 0x8dc   : > { %6170 = vmatmul.bf16.gmra.mxu1 %v14153_v9  ;;  %v13074_v46 = vadd.f32 %v6123_v28, %v6035_v48  ;;  %v13076_v34 = vpop.f32.mrf.mxu0 }
 0x8de   : > { %6076 = vmatmul.bf16.gmra.mxu2 %v14154_v52  ;;  %6767 = vmatmul.bf16.gmra.mxu3 %v8456_v20  ;;  %v14158_v52 = vld [vmem:[#allocation51_spill] sm:$0xff] }
 0x8df   : > { %6861 = vmatmul.bf16.gmra.mxu0 %v8472_v17 }
 0x8e1   : > { %v6133_v44 = vpop.f32.mrf.mxu1  ;;  %v6037_v21 = vpop.f32.mrf.mxu2 }
 0x8e2   : > { %v6038_v14 = vadd.f32 %v6037_v21, %v12890_v58 }
 0x8e4   : > { %v13080_v9 = vadd.f32 %v6126_v15, %v6038_v14  ;;  %v13082_v1 = vpop.f32.mrf.mxu0  ;;  %v8296_v15 = vor.u32 %v8814_v32, %v8295_v37  ;;  %v8307_v37 = vld [vmem:[#allocation2 + $0x50] sm:$0xf]  ;;  %v8817_v32 = vld [vmem:[#allocation2 + $0x58] sm:$0xf0] }
 0x8e5   : > { %14155 = vst [vmem:[#allocation68_spill] sm:$0xff] %v13082_v1 }
 0x8e9   : > { %v6136_v28 = vpop.f32.mrf.mxu1  ;;  %v6039_v45 = vpop.f32.mrf.mxu2 }
 0x8ea   : > { %v6040_v48 = vadd.f32 %v6039_v45, %v12896_v60  ;;  %v9128_v60 = vld [vmem:[%s9511_s23 + $0x18] sm:$0xff] }
 0x8ec   : > { %8589 = vmatmul.msk.bf16.vlgmr.msra.gmra.mxu1 %vm14156_vm10, %v7024_v22  ;;  %v13088_v17 = vadd.f32 %v6128_v12, %v6040_v48  ;;  %v13090_v58 = vpop.f32.mrf.mxu0  ;;  %v9127_v22 = vld [vmem:[%s9511_s23 + $0x10] sm:$0xff] }
 0x8ed   : > { %14157 = vst [vmem:[#allocation61_spill] sm:$0xff] %v13090_v58  ;;  %v7025_v45 = vpack.c.bf16 %v9128_v60, %v9127_v22  ;;  %v9130_v58 = vld [vmem:[%s9511_s23 + $0x28] sm:$0xff] }
 0x8ee   : > { %6081 = vmatmul.bf16.gmra.mxu2 %v14158_v52 }
 0x8ef   : > { %6875 = vmatmul.bf16.vlgmr.msrb.gmra.mxu0 %v8296_v15 }
 0x8f1   : > { %v6138_v20 = vpop.f32.mrf.mxu1  ;;  %v6042_v10 = vpop.f32.mrf.mxu2 }
 0x8f2   : > { %v6043_v21 = vadd.f32 %v6042_v10, %v12902_v63 }
 0x8f4   : > { %v13094_v14 = vadd.f32 %v6131_v49, %v6043_v21  ;;  %v13096_v29 = vpop.f32.mrf.mxu0  ;;  %v8308_v49 = vor.u32 %v8817_v32, %v8307_v37 }
 0x8f5   : > { %14160 = vst [vmem:[#allocation72_spill] sm:$0xff] %v13096_v29 }
 0x8f6   : > { %14159 = vst [vmem:[#allocation64_spill] sm:$0xff] %v13094_v14 }
 0x8f9   : > { %v6141_v12 = vpop.f32.mrf.mxu1  ;;  %v6044_v48 = vpop.f32.mrf.mxu2 }
 0x8fa   : > { %v6045_v15 = vadd.f32 %v6044_v48, %v12911_v13  ;;  %v8820_v48 = vld [vmem:[#allocation2 + $0x70] sm:$0xf0] }
 0x8fc   : > { %8590 = vmatmul.msk.bf16.gmra.mxu1 %vm14161_vm7, %v7025_v45  ;;  %v13102_v52 = vadd.f32 %v6133_v44, %v6045_v15  ;;  %v13104_v63 = vpop.f32.mrf.mxu0  ;;  %v9129_v45 = vld [vmem:[%s9511_s23 + $0x20] sm:$0xff]  ;;  %v8319_v44 = vld [vmem:[#allocation2 + $0x68] sm:$0xf] }
 0x8fd   : > { %14162 = vst [vmem:[#allocation73_spill] sm:$0xff] %v13104_v63  ;;  %v7026_v1 = vpack.c.bf16 %v9130_v58, %v9129_v45  ;;  %v9132_v45 = vld [vmem:[%s9511_s23 + $0x38] sm:$0xff] }
 0x8fe   : > { %6880 = vmatmul.bf16.vlgmr.msra.gmra.mxu2 %v8308_v49 }
 0x901   : > { %v6143_v10 = vpop.f32.mrf.mxu1  ;;  %v6047_v21 = vpop.f32.mrf.mxu2 }
 0x902   : > { %v6048_v22 = vadd.f32 %v6047_v21, %v12917_v18 }
 0x904   : > { %v13107_v60 = vadd.f32 %v6136_v28, %v6048_v22  ;;  %v13109_v29 = vpop.f32.mrf.mxu0  ;;  %v8320_v28 = vor.u32 %v8820_v48, %v8319_v44 }
 0x905   : > { %14163 = vst [vmem:[#allocation55_spill] sm:$0xff] %v13109_v29 }
 0x909   : > { %v6146_v14 = vpop.f32.mrf.mxu1  ;;  %v6049_v13 = vpop.f32.mrf.mxu2 }
 0x90a   : > { %v6050_v37 = vadd.f32 %v6049_v13, %v12923_v31  ;;  %v8823_v13 = vld [vmem:[#allocation2 + $0x88] sm:$0xf0] }
 0x90c   : > { %8591 = vmatmul.msk.bf16.gmra.mxu1 %vm14164_vm6, %v7026_v1  ;;  %v13115_v32 = vadd.f32 %v6138_v20, %v6050_v37  ;;  %v13117_v18 = vpop.f32.mrf.mxu0  ;;  %v9131_v1 = vld [vmem:[%s9511_s23 + $0x30] sm:$0xff] }
 0x90d   : > { %14165 = vst [vmem:[#allocation71_spill] sm:$0xff] %v13117_v18  ;;  %v7027_v29 = vpack.c.bf16 %v9132_v45, %v9131_v1  ;;  %v8331_v20 = vld [vmem:[#allocation2 + $0x80] sm:$0xf]  ;;  %v9134_v45 = vld [vmem:[%s9511_s23 + $0x48] sm:$0xff] }
 0x90e   : > { %6885 = vmatmul.bf16.gmra.mxu2 %v8320_v28 }
 0x911   : > { %v6148_v15 = vpop.f32.mrf.mxu1  ;;  %v6052_v49 = vpop.f32.mrf.mxu2 }
 0x912   : > { %v6053_v58 = vadd.f32 %v6052_v49, %v12929_v0 }
 0x914   : > { %v13120_v21 = vadd.f32 %v6141_v12, %v6053_v58  ;;  %v13122_v22 = vpop.f32.mrf.mxu0  ;;  %v8332_v12 = vor.u32 %v8823_v13, %v8331_v20 }
 0x915   : > { %14166 = vst [vmem:[#allocation66_spill] sm:$0xff] %v13122_v22 }
 0x919   : > { %v6151_v63 = vpop.f32.mrf.mxu1  ;;  %v6054_v31 = vpop.f32.mrf.mxu2 }
 0x91a   : > { %v6055_v44 = vadd.f32 %v6054_v31, %v12935_v39  ;;  %v8826_v31 = vld [vmem:[#allocation2 + $0xa0] sm:$0xf0] }
 0x91c   : > { %8592 = vmatmul.msk.bf16.gmra.mxu1 %vm14167_vm9, %v7027_v29  ;;  %v13128_v48 = vadd.f32 %v6143_v10, %v6055_v44  ;;  %v13130_v0 = vpop.f32.mrf.mxu0  ;;  %v9133_v29 = vld [vmem:[%s9511_s23 + $0x40] sm:$0xff]  ;;  %v8343_v10 = vld [vmem:[#allocation2 + $0x98] sm:$0xf] }
 0x91d   : > { %14168 = vst [vmem:[#allocation60_spill] sm:$0xff] %v13130_v0  ;;  %v7028_v22 = vpack.c.bf16 %v9134_v45, %v9133_v29  ;;  %v9136_v45 = vld [vmem:[%s9511_s23 + $0x58] sm:$0xff] }
 0x91e   : > { %6890 = vmatmul.bf16.gmra.mxu2 %v8332_v12 }
 0x921   : > { %v6153_v37 = vpop.f32.mrf.mxu1  ;;  %v6057_v28 = vpop.f32.mrf.mxu2 }
 0x922   : > { %v6058_v49 = vadd.f32 %v6057_v28, %v12941_v36 }
 0x924   : > { %v13133_v58 = vadd.f32 %v6146_v14, %v6058_v49  ;;  %v13135_v1 = vpop.f32.mrf.mxu0  ;;  %v8344_v14 = vor.u32 %v8826_v31, %v8343_v10 }
 0x925   : > { %14169 = vst [vmem:[#allocation70_spill] sm:$0xff] %v13135_v1 }
 0x929   : > { %v6156_v18 = vpop.f32.mrf.mxu1  ;;  %v6059_v39 = vpop.f32.mrf.mxu2 }
 0x92a   : > { %v6060_v20 = vadd.f32 %v6059_v39, %v12947_v53  ;;  %v8829_v39 = vld [vmem:[#allocation2 + $0xb8] sm:$0xf0] }
 0x92c   : > { %8593 = vmatmul.msk.bf16.gmra.mxu1 %vm14170_vm4, %v7028_v22  ;;  %v13141_v13 = vadd.f32 %v6148_v15, %v6060_v20  ;;  %v13143_v36 = vpop.f32.mrf.mxu0  ;;  %v9135_v22 = vld [vmem:[%s9511_s23 + $0x50] sm:$0xff]  ;;  %v8355_v15 = vld [vmem:[#allocation2 + $0xb0] sm:$0xf] }
 0x92d   : > { %14171 = vst [vmem:[#allocation65_spill] sm:$0xff] %v13143_v36  ;;  %v7029_v1 = vpack.c.bf16 %v9136_v45, %v9135_v22 }
 0x92e   : > { %6895 = vmatmul.bf16.gmra.mxu2 %v8344_v14 }
 0x931   : > { %v6158_v44 = vpop.f32.mrf.mxu1  ;;  %v6062_v12 = vpop.f32.mrf.mxu2 }
 0x932   : > { %v6063_v28 = vadd.f32 %v6062_v12, %v12953_v61  ;;  %v14176_v12 = vld [vmem:[#allocation59_spill] sm:$0xff] }
 0x934   : > { %v13146_v49 = vadd.f32 %v6151_v63, %v6063_v28  ;;  %v13148_v29 = vpop.f32.mrf.mxu0  ;;  %v8356_v63 = vor.u32 %v8829_v39, %v8355_v15 }
 0x935   : > { %14173 = vst [vmem:[#allocation19_spill] sm:$0xff] %v13148_v29  ;;  %v9138_v29 = vld [vmem:[%s9511_s23 + $0x68] sm:$0xff] }
 0x936   : > { %14172 = vst [vmem:[#allocation69_spill] sm:$0xff] %v13146_v49 }
 0x939   : > { %v6161_v0 = vpop.f32.mrf.mxu1  ;;  %v6064_v53 = vpop.f32.mrf.mxu2 }
 0x93a   : > { %v6065_v10 = vadd.f32 %v6064_v53, %v12963_v35  ;;  %v8832_v53 = vld [vmem:[#allocation2 + $0xd0] sm:$0xf0] }
 0x93c   : > { %8594 = vmatmul.msk.bf16.gmra.mxu1 %vm14174_vm0, %v7029_v1  ;;  %v13154_v31 = vadd.f32 %v6153_v37, %v6065_v10  ;;  %v13156_v61 = vpop.f32.mrf.mxu0  ;;  %v9137_v1 = vld [vmem:[%s9511_s23 + $0x60] sm:$0xff]  ;;  %v8367_v37 = vld [vmem:[#allocation2 + $0xc8] sm:$0xf] }
 0x93d   : > { %14175 = vst [vmem:[#allocation30_spill] sm:$0xff] %v13156_v61  ;;  %v7030_v36 = vpack.c.bf16 %v9138_v29, %v9137_v1  ;;  %v9140_v1 = vld [vmem:[%s9511_s23 + $0x78] sm:$0xff] }
 0x93e   : > { %6900 = vmatmul.bf16.gmra.mxu2 %v8356_v63 }
 0x941   : > { %v6163_v20 = vpop.f32.mrf.mxu1  ;;  %v6067_v14 = vpop.f32.mrf.mxu2 }
 0x942   : > { %v6068_v28 = vadd.f32 %v6067_v14, %v14176_v12 }
 0x944   : > { %v13159_v22 = vadd.f32 %v6156_v18, %v6068_v28  ;;  %v13161_v45 = vpop.f32.mrf.mxu0  ;;  %v8368_v18 = vor.u32 %v8832_v53, %v8367_v37 }
 0x945   : > { %14177 = vst [vmem:[#allocation36_spill] sm:$0xff] %v13161_v45 }
 0x949   : > { %v6166_v49 = vpop.f32.mrf.mxu1  ;;  %v6069_v35 = vpop.f32.mrf.mxu2 }
 0x94a   : > { %v6070_v15 = vadd.f32 %v6069_v35, %v12973_v23  ;;  %v8835_v35 = vld [vmem:[#allocation2 + $0xe8] sm:$0xf0] }
 0x94c   : > { %8595 = vmatmul.msk.bf16.gmra.mxu1 %vm14178_vm14, %v7030_v36  ;;  %v13167_v39 = vadd.f32 %v6158_v44, %v6070_v15  ;;  %v13169_v10 = vpop.f32.mrf.mxu0  ;;  %v9139_v36 = vld [vmem:[%s9511_s23 + $0x70] sm:$0xff] }
 0x94d   : > { %14179 = vst [vmem:[#allocation28_spill] sm:$0xff] %v13169_v10  ;;  %v7031_v45 = vpack.c.bf16 %v9140_v1, %v9139_v36  ;;  %v8379_v44 = vld [vmem:[#allocation2 + $0xe0] sm:$0xf]  ;;  %v9142_v1 = vld [vmem:[%s9511_s23 + $0x88] sm:$0xff] }
 0x94e   : > { %6905 = vmatmul.bf16.gmra.mxu2 %v8368_v18 }
 0x951   : > { %v6168_v63 = vpop.f32.mrf.mxu1  ;;  %v6072_v14 = vpop.f32.mrf.mxu2 }
 0x952   : > { %v6073_v29 = vadd.f32 %v6072_v14, %v12976_v24 }
 0x954   : > { %v13172_v12 = vadd.f32 %v6161_v0, %v6073_v29  ;;  %v13174_v28 = vpop.f32.mrf.mxu0  ;;  %v8380_v0 = vor.u32 %v8835_v35, %v8379_v44  ;;  %v13196_v35 = vld [vmem:[%s13468_s14] ss:$0 sm:$0xff] }
 0x955   : > { %14180 = vst [vmem:[#allocation34_spill] sm:$0xff] %v13174_v28 }
 0x959   : > { %v6171_v61 = vpop.f32.mrf.mxu1  ;;  %v6074_v23 = vpop.f32.mrf.mxu2 }
 0x95a   : > { %v6075_v37 = vadd.f32 %v6074_v23, %v12983_v5  ;;  %v8838_v23 = vld [vmem:[#allocation2 + $0x100] sm:$0xf0] }
 0x95c   : > { %8596 = vmatmul.msk.bf16.gmra.mxu1 %vm14181_vm11, %v7031_v45  ;;  %v13180_v53 = vadd.f32 %v6163_v20, %v6075_v37  ;;  %v13182_v24 = vpop.f32.mrf.mxu0  ;;  %v9141_v45 = vld [vmem:[%s9511_s23 + $0x80] sm:$0xff]  ;;  %v8391_v20 = vld [vmem:[#allocation2 + $0xf8] sm:$0xf] }
 0x95d   : > { %14182 = vst [vmem:[#allocation20_spill] sm:$0xff] %v13182_v24  ;;  %v7032_v28 = vpack.c.bf16 %v9142_v1, %v9141_v45  ;;  %v8392_v37 = vor.u32 %v8838_v23, %v8391_v20 }
 0x95e   : > { %6910 = vmatmul.bf16.gmra.mxu2 %v8380_v0  ;;  %v13200_v0 = vpop.f32.mrf.mxu3 }
 0x961   : > { %v6173_v15 = vpop.f32.mrf.mxu1  ;;  %v6077_v18 = vpop.f32.mrf.mxu2 }
 0x962   : > { %v6078_v14 = vadd.f32 %v6077_v18, %v12992_v41 }
 0x964   : > { %v13185_v29 = vadd.f32 %v6166_v49, %v6078_v14  ;;  %v13187_v36 = vpop.f32.mrf.mxu0 }
 0x965   : > { %14183 = vst [vmem:[#allocation22_spill] sm:$0xff] %v13187_v36 }
 0x969   : > { %v7133_v10 = vpop.f32.mrf.mxu1  ;;  %v6079_v5 = vpop.f32.mrf.mxu2 }
 0x96a   : > { %v6080_v44 = vadd.f32 %v6079_v5, %v13001_v40  ;;  %v13206_v40 = vld [vmem:[%s14185_s12] ss:$0 sm:$0xff] }
 0x96c   : > { %8597 = vmatmul.msk.bf16.gmra.mxu1 %vm14184_vm1, %v7032_v28  ;;  %v13198_v41 = vadd.f32 %v6168_v63, %v6080_v44  ;;  %v6876_v49 = vpop.f32.mrf.mxu0  ;;  %v7134_v63 = vadd.f32 %v13196_v35, %v7133_v10  ;;  %v9143_v44 = vld [vmem:[%s9511_s23 + $0x90] sm:$0xff]  ;;  %v13222_v10 = vpop.f32.mrf.mxu3 }
 0x96d   : > { %v6877_v28 = vadd.f32 %v6876_v49, %v12986_v54  ;;  %v9144_v49 = vld [vmem:[%s9511_s23 + $0x98] sm:$0xff] }
 0x96e   : > { %6915 = vmatmul.bf16.gmra.mxu2 %v8392_v37  ;;  %v7033_v36 = vpack.c.bf16 %v9144_v49, %v9143_v44  ;;  %v9145_v44 = vld [vmem:[%s9511_s23 + $0xa0] sm:$0xff]  ;;  %v9146_v49 = vld [vmem:[%s9511_s23 + $0xa8] sm:$0xff] }
 0x96f   : > { %v6956_v14 = vadd.f32 %v6877_v28, %v12988_v62 }
 0x971   : > { %v7135_v18 = vpop.f32.mrf.mxu1  ;;  %v6082_v45 = vpop.f32.mrf.mxu2  ;;  %v6992_v1 = vadd.f32 %v13206_v40, %v6956_v14  ;;  %v8841_v14 = vld [vmem:[#allocation2 + $0x118] sm:$0xf0] }
 0x972   : > { %v6083_v5 = vadd.f32 %v6082_v45, %v13010_v51 }
 0x973   : > { %v7213_v20 = vadd.f32 %v7134_v63, %v6992_v1 }
 0x974   : > { %v13212_v23 = vadd.f32 %v6171_v61, %v6083_v5  ;;  %v6878_v54 = vpop.f32.mrf.mxu0  ;;  %v7136_v61 = vadd.f32 %v13196_v35, %v7135_v18 }
 0x975   : > { %v6879_v24 = vadd.f32 %v6878_v54, %v12995_v4  ;;  %7245 = vst [vmem:[%s13219_s24] sm:$0xff] %v7213_v20  ;;  %v8403_v4 = vld [vmem:[#allocation2 + $0x110] sm:$0xf] }
 0x976   : > { %v8404_v5 = vor.u32 %v8841_v14, %v8403_v4  ;;  %v8844_v4 = vld [vmem:[#allocation2 + $0x130] sm:$0xf0] }
 0x977   : > { %v6957_v51 = vadd.f32 %v6879_v24, %v12997_v27  ;;  %v13232_v27 = vpop.f32.mrf.mxu3 }
 0x979   : > { %v7138_v62 = vpop.f32.mrf.mxu1  ;;  %v6993_v37 = vadd.f32 %v13206_v40, %v6957_v51  ;;  %v6084_v28 = vpop.f32.mrf.mxu2 }
 0x97a   : > { %v6085_v63 = vadd.f32 %v6084_v28, %v13025_v19  ;;  %v7139_v54 = vadd.f32 %v13196_v35, %v7138_v62  ;;  %v7034_v19 = vpack.c.bf16 %v9146_v49, %v9145_v44  ;;  %v8415_v28 = vld [vmem:[#allocation2 + $0x128] sm:$0xf]  ;;  %v9147_v44 = vld [vmem:[%s9511_s23 + $0xb0] sm:$0xff] }
 0x97b   : > { %v7214_v45 = vadd.f32 %v7136_v61, %v6993_v37  ;;  %v8416_v14 = vor.u32 %v8844_v4, %v8415_v28  ;;  %v9148_v49 = vld [vmem:[%s9511_s23 + $0xb8] sm:$0xff]  ;;  %v8427_v28 = vld [vmem:[#allocation2 + $0x140] sm:$0xf] }
 0x97c   : > { %8598 = vmatmul.msk.bf16.gmra.mxu1 %vm14186_vm2, %v7033_v36  ;;  %v13229_v1 = vadd.f32 %v6173_v15, %v6085_v63  ;;  %v8847_v4 = vld [vmem:[#allocation2 + $0x148] sm:$0xf0] }
 0x97d   : > { %7246 = vst [vmem:[%s13219_s24 + $0x8] sm:$0xff] %v7214_v45 }
 0x97e   : > { %6920 = vmatmul.bf16.gmra.mxu2 %v8404_v5 }
 0x981   : > { %v7140_v20 = vpop.f32.mrf.mxu1  ;;  %v6881_v24 = vpop.f32.mrf.mxu2 }
 0x982   : > { %v6882_v36 = vadd.f32 %v6881_v24, %v13004_v47  ;;  %v7141_v63 = vadd.f32 %v13196_v35, %v7140_v20 }
 0x984   : > { %v6958_v18 = vadd.f32 %v6882_v36, %v13006_v38  ;;  %v13243_v38 = vpop.f32.mrf.mxu3 }
 0x986   : > { %v6994_v15 = vadd.f32 %v13206_v40, %v6958_v18 }
 0x988   : > { %v7215_v61 = vadd.f32 %v7139_v54, %v6994_v15 }
 0x989   : > { %v7143_v51 = vpop.f32.mrf.mxu1  ;;  %v6883_v37 = vpop.f32.mrf.mxu2 }
 0x98a   : > { %7247 = vst [vmem:[%s13219_s24 + $0x10] sm:$0xff] %v7215_v61  ;;  %v6884_v47 = vadd.f32 %v6883_v37, %v13013_v26  ;;  %v7144_v26 = vadd.f32 %v13196_v35, %v7143_v51  ;;  %v8428_v51 = vor.u32 %v8847_v4, %v8427_v28  ;;  %v8858_v28 = vld [vmem:[#allocation2 + $0x1a0] sm:$0xf0] }
 0x98c   : > { %8599 = vmatmul.msk.bf16.gmra.mxu1 %vm14187_vm12, %v7034_v19  ;;  %v6959_v62 = vadd.f32 %v6884_v47, %v13015_v33  ;;  %v7035_v33 = vpack.c.bf16 %v9148_v49, %v9147_v44  ;;  %v13254_v19 = vpop.f32.mrf.mxu3 }
 0x98e   : > { %6925 = vmatmul.bf16.gmra.mxu2 %v8416_v14  ;;  %v6995_v5 = vadd.f32 %v13206_v40, %v6959_v62 }
 0x990   : > { %v7216_v24 = vadd.f32 %v7141_v63, %v6995_v5  ;;  %v6803_v5 = vadd.f32 %v13017_v8, %v13200_v0 }
 0x991   : > { %v7145_v45 = vpop.f32.mrf.mxu1  ;;  %v6886_v36 = vpop.f32.mrf.mxu2 }
 0x992   : > { %7248 = vst [vmem:[%s13219_s24 + $0x18] sm:$0xff] %v7216_v24  ;;  %v6887_v18 = vadd.f32 %v6886_v36, %v13028_v3  ;;  %v7146_v47 = vadd.f32 %v13196_v35, %v7145_v45  ;;  %v9150_v45 = vld [vmem:[%s9511_s23 + $0xc8] sm:$0xff] }
 0x994   : > { %v6960_v54 = vadd.f32 %v6887_v18, %v13030_v30  ;;  %v13263_v63 = vpop.f32.mrf.mxu3 }
 0x996   : > { %v6996_v15 = vadd.f32 %v13206_v40, %v6960_v54  ;;  %v9149_v54 = vld [vmem:[%s9511_s23 + $0xc0] sm:$0xff] }
 0x998   : > { %v7217_v61 = vadd.f32 %v7144_v26, %v6996_v15  ;;  %v7036_v26 = vpack.c.bf16 %v9150_v45, %v9149_v54 }
 0x999   : > { %v7148_v20 = vpop.f32.mrf.mxu1  ;;  %v6888_v37 = vpop.f32.mrf.mxu2 }
 0x99a   : > { %7249 = vst [vmem:[%s13219_s24 + $0x20] sm:$0xff] %v7217_v61  ;;  %v6889_v3 = vadd.f32 %v6888_v37, %v13036_v50  ;;  %v8439_v61 = vld [vmem:[#allocation2 + $0x158] sm:$0xf]  ;;  %v8850_v37 = vld [vmem:[#allocation2 + $0x160] sm:$0xf0] }
 0x99c   : > { %8600 = vmatmul.msk.bf16.gmra.mxu1 %vm14188_vm15, %v7035_v33  ;;  %v6961_v30 = vadd.f32 %v6889_v3, %v13038_v57  ;;  %v7149_v57 = vadd.f32 %v13196_v35, %v7148_v20  ;;  %v6805_v33 = vadd.f32 %v13032_v42, %v13222_v10  ;;  %v13276_v8 = vpop.f32.mrf.mxu3  ;;  %v8467_v20 = vld [vmem:[#allocation2 + $0x198] sm:$0xf] }
 0x99d   : > { %v8468_v4 = vor.u32 %v8858_v28, %v8467_v20 }
 0x99e   : > { %6930 = vmatmul.bf16.gmra.mxu2 %v8428_v51  ;;  %v6997_v14 = vadd.f32 %v13206_v40, %v6961_v30  ;;  %v8440_v30 = vor.u32 %v8850_v37, %v8439_v61 }
 0x99f   : > { %6772 = vmatmul.bf16.gmra.mxu3 %v8468_v4 }
 0x9a0   : > { %v7218_v24 = vadd.f32 %v7146_v47, %v6997_v14  ;;  %v6808_v47 = vadd.f32 %v13040_v6, %v13232_v27  ;;  %v6810_v6 = vadd.f32 %v13046_v55, %v13243_v38  ;;  %v6813_v38 = vadd.f32 %v13052_v2, %v13254_v19 }
 0x9a1   : > { %v7150_v62 = vpop.f32.mrf.mxu1  ;;  %v6891_v36 = vpop.f32.mrf.mxu2 }
 0x9a2   : > { %7250 = vst [vmem:[%s13219_s24 + $0x28] sm:$0xff] %v7218_v24  ;;  %v6892_v50 = vadd.f32 %v6891_v36, %v6803_v5  ;;  %v7151_v42 = vadd.f32 %v13196_v35, %v7150_v62  ;;  %v9151_v62 = vld [vmem:[%s9511_s23 + $0xd0] sm:$0xff] }
 0x9a4   : > { %v6962_v18 = vadd.f32 %v6892_v50, %v13044_v59  ;;  %v13285_v36 = vpop.f32.mrf.mxu3 }
 0x9a6   : > { %v6998_v49 = vadd.f32 %v13206_v40, %v6962_v18  ;;  %v9152_v18 = vld [vmem:[%s9511_s23 + $0xd8] sm:$0xff] }
 0x9a8   : > { %v7219_v15 = vadd.f32 %v7149_v57, %v6998_v49  ;;  %v7037_v57 = vpack.c.bf16 %v9152_v18, %v9151_v62  ;;  %v8451_v49 = vld [vmem:[#allocation2 + $0x170] sm:$0xf] }
 0x9a9   : > { %v7153_v44 = vpop.f32.mrf.mxu1  ;;  %v6893_v0 = vpop.f32.mrf.mxu2 }
 0x9aa   : > { %7251 = vst [vmem:[%s13219_s24 + $0x30] sm:$0xff] %v7219_v15  ;;  %v6894_v59 = vadd.f32 %v6893_v0, %v6805_v33  ;;  %v7154_v50 = vadd.f32 %v13196_v35, %v7153_v44  ;;  %v8853_v33 = vld [vmem:[#allocation2 + $0x178] sm:$0xf0] }
 0x9ab   : > { %v8452_v15 = vor.u32 %v8853_v33, %v8451_v49  ;;  %v9156_v49 = vld [vmem:[%s9511_s23 + $0xf8] sm:$0xff] }
 0x9ac   : > { %8601 = vmatmul.msk.bf16.gmra.mxu1 %vm14189_vm13, %v7036_v26  ;;  %v6963_v3 = vadd.f32 %v6894_v59, %v13050_v25  ;;  %v6733_v61 = vpop.f32.mrf.mxu3 }
 0x9ae   : > { %6935 = vmatmul.bf16.gmra.mxu2 %v8440_v30  ;;  %v6999_v51 = vadd.f32 %v13206_v40, %v6963_v3  ;;  %v9153_v3 = vld [vmem:[%s9511_s23 + $0xe0] sm:$0xff]  ;;  %v9154_v30 = vld [vmem:[%s9511_s23 + $0xe8] sm:$0xff] }
 0x9b0   : > { %v7220_v14 = vadd.f32 %v7151_v42, %v6999_v51  ;;  %v7038_v42 = vpack.c.bf16 %v9154_v30, %v9153_v3 }
 0x9b1   : > { %v7155_v10 = vpop.f32.mrf.mxu1  ;;  %v6896_v5 = vpop.f32.mrf.mxu2 }
 0x9b2   : > { %7252 = vst [vmem:[%s13219_s24 + $0x38] sm:$0xff] %v7220_v14  ;;  %v6897_v24 = vadd.f32 %v6896_v5, %v6808_v47  ;;  %v7156_v0 = vadd.f32 %v13196_v35, %v7155_v10  ;;  %v6815_v14 = vadd.f32 %v13058_v16, %v13263_v63  ;;  %v8463_v5 = vld [vmem:[#allocation2 + $0x188] sm:$0xf]  ;;  %v6818_v63 = vadd.f32 %v13064_v7, %v13276_v8  ;;  %v14192_v7 = vld [vmem:[#allocation67_spill] sm:$0xff] }
 0x9b3   : > { %v6820_v8 = vadd.f32 %v14192_v7, %v13285_v36  ;;  %v6823_v36 = vadd.f32 %v13076_v34, %v6733_v61 }
 0x9b4   : > { %v6964_v25 = vadd.f32 %v6897_v24, %v13056_v43  ;;  %v6735_v47 = vpop.f32.mrf.mxu3  ;;  %v8856_v24 = vld [vmem:[#allocation2 + $0x190] sm:$0xf0] }
 0x9b6   : > { %v7000_v45 = vadd.f32 %v13206_v40, %v6964_v25 }
 0x9b8   : > { %v7221_v27 = vadd.f32 %v7154_v50, %v7000_v45  ;;  %v8464_v50 = vor.u32 %v8856_v24, %v8463_v5  ;;  %v14195_v5 = vld [vmem:[#allocation68_spill] sm:$0xff] }
 0x9b9   : > { %v7158_v54 = vpop.f32.mrf.mxu1  ;;  %v6898_v26 = vpop.f32.mrf.mxu2  ;;  %v6825_v24 = vadd.f32 %v14195_v5, %v6735_v47 }
 0x9ba   : > { %7253 = vst [vmem:[%s13219_s24 + $0x40] sm:$0xff] %v7221_v27  ;;  %v6899_v43 = vadd.f32 %v6898_v26, %v6810_v6  ;;  %v9155_v26 = vld [vmem:[%s9511_s23 + $0xf0] sm:$0xff] }
 0x9bb   : > { %v7039_v33 = vpack.c.bf16 %v9156_v49, %v9155_v26  ;;  %v14197_v49 = vld [vmem:[#allocation72_spill] sm:$0xff] }
 0x9bc   : > { %8602 = vmatmul.msk.bf16.gmra.mxu1 %vm14190_vm3, %v7037_v57  ;;  %v6965_v44 = vadd.f32 %v6899_v43, %v13062_v11  ;;  %v7159_v11 = vadd.f32 %v13196_v35, %v7158_v54  ;;  %v6738_v54 = vpop.f32.mrf.mxu3 }
 0x9be   : > { %6940 = vmatmul.bf16.gmra.mxu2 %v8452_v15  ;;  %v7001_v55 = vadd.f32 %v13206_v40, %v6965_v44  ;;  %v8475_v15 = vld [vmem:[#allocation2 + $0x1a0] sm:$0xf] }
 0x9c0   : > { %v7222_v59 = vadd.f32 %v7156_v0, %v7001_v55  ;;  %v8859_v0 = vld [vmem:[#allocation2 + $0x1a8] sm:$0xf0] }
 0x9c1   : > { %v7160_v37 = vpop.f32.mrf.mxu1  ;;  %v6901_v20 = vpop.f32.mrf.mxu2 }
 0x9c2   : > { %7254 = vst [vmem:[%s13219_s24 + $0x48] sm:$0xff] %v7222_v59  ;;  %v6902_v28 = vadd.f32 %v6901_v20, %v6813_v38  ;;  %v7161_v62 = vadd.f32 %v13196_v35, %v7160_v37  ;;  %v8476_v38 = vor.u32 %v8859_v0, %v8475_v15 }
 0x9c4   : > { %v6966_v4 = vadd.f32 %v6902_v28, %v13068_v56  ;;  %v6740_v59 = vpop.f32.mrf.mxu3 }
 0x9c6   : > { %v7002_v51 = vadd.f32 %v13206_v40, %v6966_v4 }
 0x9c8   : > { %v7223_v2 = vadd.f32 %v7159_v11, %v7002_v51 }
 0x9c9   : > { %v7163_v10 = vpop.f32.mrf.mxu1  ;;  %v6903_v19 = vpop.f32.mrf.mxu2 }
 0x9ca   : > { %7255 = vst [vmem:[%s13219_s24 + $0x50] sm:$0xff] %v7223_v2  ;;  %v6904_v56 = vadd.f32 %v6903_v19, %v6815_v14 }
 0x9cc   : > { %8603 = vmatmul.msk.bf16.gmra.mxu1 %vm14191_vm8, %v7038_v42  ;;  %v6967_v25 = vadd.f32 %v6904_v56, %v13074_v46  ;;  %v7164_v46 = vadd.f32 %v13196_v35, %v7163_v10  ;;  %v14194_v10 = vld [vmem:[#allocation64_spill] sm:$0xff]  ;;  %v6743_v2 = vpop.f32.mrf.mxu3 }
 0x9ce   : > { %6945 = vmatmul.bf16.gmra.mxu2 %v8464_v50  ;;  %v7003_v16 = vadd.f32 %v13206_v40, %v6967_v25 }
 0x9d0   : > { %v7224_v57 = vadd.f32 %v7161_v62, %v7003_v16 }
 0x9d1   : > { %v7165_v18 = vpop.f32.mrf.mxu1  ;;  %v6906_v45 = vpop.f32.mrf.mxu2 }
 0x9d2   : > { %7256 = vst [vmem:[%s13219_s24 + $0x58] sm:$0xff] %v7224_v57  ;;  %v6907_v6 = vadd.f32 %v6906_v45, %v6818_v63  ;;  %v7166_v28 = vadd.f32 %v13196_v35, %v7165_v18  ;;  %v14196_v63 = vld [vmem:[#allocation61_spill] sm:$0xff] }
 0x9d3   : > { %v6828_v57 = vadd.f32 %v14196_v63, %v6738_v54 }
 0x9d4   : > { %v6968_v27 = vadd.f32 %v6907_v6, %v13080_v9  ;;  %v6745_v16 = vpop.f32.mrf.mxu3 }
 0x9d6   : > { %v7004_v44 = vadd.f32 %v13206_v40, %v6968_v27 }
 0x9d8   : > { %v7225_v37 = vadd.f32 %v7164_v46, %v7004_v44 }
 0x9d9   : > { %v7168_v43 = vpop.f32.mrf.mxu1  ;;  %v6908_v55 = vpop.f32.mrf.mxu2 }
 0x9da   : > { %7257 = vst [vmem:[%s13219_s24 + $0x60] sm:$0xff] %v7225_v37  ;;  %v6909_v9 = vadd.f32 %v6908_v55, %v6820_v8  ;;  %v7169_v14 = vadd.f32 %v13196_v35, %v7168_v43  ;;  %v14198_v37 = vld [vmem:[#allocation73_spill] sm:$0xff] }
 0x9db   : > { %v6833_v55 = vadd.f32 %v14198_v37, %v6743_v2 }
 0x9dc   : > { %8604 = vmatmul.msk.bf16.gmra.mxu1 %vm14193_vm5, %v7039_v33  ;;  %v6969_v20 = vadd.f32 %v6909_v9, %v13088_v17  ;;  %v6830_v33 = vadd.f32 %v14197_v49, %v6740_v59  ;;  %v6748_v44 = vpop.f32.mrf.mxu3 }
 0x9de   : > { %6950 = vmatmul.bf16.gmra.mxu2 %v8476_v38  ;;  %v7005_v11 = vadd.f32 %v13206_v40, %v6969_v20 }
 0x9e0   : > { %v7226_v3 = vadd.f32 %v7166_v28, %v7005_v11 }
 0x9e1   : > { %v7170_v4 = vpop.f32.mrf.mxu1  ;;  %v6911_v30 = vpop.f32.mrf.mxu2 }
 0x9e2   : > { %7258 = vst [vmem:[%s13219_s24 + $0x68] sm:$0xff] %v7226_v3  ;;  %v6912_v42 = vadd.f32 %v6911_v30, %v6823_v36  ;;  %v7171_v61 = vadd.f32 %v13196_v35, %v7170_v4  ;;  %v14199_v36 = vld [vmem:[#allocation55_spill] sm:$0xff] }
 0x9e3   : > { %v6835_v3 = vadd.f32 %v14199_v36, %v6745_v16 }
 0x9e4   : > { %v6970_v51 = vadd.f32 %v6912_v42, %v14194_v10  ;;  %v6750_v59 = vpop.f32.mrf.mxu3 }
 0x9e6   : > { %v7006_v19 = vadd.f32 %v13206_v40, %v6970_v51 }
 0x9e8   : > { %v7227_v56 = vadd.f32 %v7169_v14, %v7006_v19  ;;  %v14200_v19 = vld [vmem:[#allocation71_spill] sm:$0xff] }
 0x9e9   : > { %v7173_v17 = vpop.f32.mrf.mxu1  ;;  %v6913_v25 = vpop.f32.mrf.mxu2  ;;  %v6838_v5 = vadd.f32 %v14200_v19, %v6748_v44  ;;  %v14203_v44 = vld [vmem:[#allocation69_spill] sm:$0xff] }
 0x9ea   : > { %7259 = vst [vmem:[%s13219_s24 + $0x70] sm:$0xff] %v7227_v56  ;;  %v6914_v50 = vadd.f32 %v6913_v25, %v6825_v24  ;;  %v7174_v46 = vadd.f32 %v13196_v35, %v7173_v17 }
 0x9ec   : > { %v6971_v34 = vadd.f32 %v6914_v50, %v13102_v52  ;;  %v6753_v2 = vpop.f32.mrf.mxu3 }
 0x9ee   : > { %v7007_v18 = vadd.f32 %v13206_v40, %v6971_v34 }
 0x9f0   : > { %v7228_v45 = vadd.f32 %v7171_v61, %v7007_v18  ;;  %v14201_v18 = vld [vmem:[#allocation66_spill] sm:$0xff] }
 0x9f1   : > { %v7175_v62 = vpop.f32.mrf.mxu1  ;;  %v6916_v6 = vpop.f32.mrf.mxu2  ;;  %v6840_v16 = vadd.f32 %v14201_v18, %v6750_v59 }
 0x9f2   : > { %7260 = vst [vmem:[%s13219_s24 + $0x78] sm:$0xff] %v7228_v45  ;;  %v6917_v27 = vadd.f32 %v6916_v6, %v6828_v57  ;;  %v7176_v7 = vadd.f32 %v13196_v35, %v7175_v62 }
 0x9f4   : > { %v6972_v47 = vadd.f32 %v6917_v27, %v13107_v60  ;;  %v6755_v62 = vpop.f32.mrf.mxu3 }
 0x9f6   : > { %v7008_v52 = vadd.f32 %v13206_v40, %v6972_v47 }
 0x9f8   : > { %v7229_v43 = vadd.f32 %v7174_v46, %v7008_v52  ;;  %v14202_v46 = vld [vmem:[#allocation60_spill] sm:$0xff] }
 0x9f9   : > { %v7178_v26 = vpop.f32.mrf.mxu1  ;;  %v6918_v15 = vpop.f32.mrf.mxu2 }
 0x9fa   : > { %7261 = vst [vmem:[%s13219_s24 + $0x80] sm:$0xff] %v7229_v43  ;;  %v6919_v0 = vadd.f32 %v6918_v15, %v6830_v33  ;;  %v7179_v4 = vadd.f32 %v13196_v35, %v7178_v26  ;;  %v6843_v26 = vadd.f32 %v14202_v46, %v6753_v2 }
 0x9fc   : > { %v6973_v54 = vadd.f32 %v6919_v0, %v13115_v32  ;;  %v6758_v49 = vpop.f32.mrf.mxu3 }
 0x9fe   : > { %v7009_v60 = vadd.f32 %v13206_v40, %v6973_v54 }
 0xa00   : > { %v7230_v9 = vadd.f32 %v7176_v7, %v7009_v60  ;;  %v14204_v7 = vld [vmem:[#allocation70_spill] sm:$0xff] }
 0xa01   : > { %v7180_v8 = vpop.f32.mrf.mxu1  ;;  %v6921_v38 = vpop.f32.mrf.mxu2 }
 0xa02   : > { %7262 = vst [vmem:[%s13219_s24 + $0x88] sm:$0xff] %v7230_v9  ;;  %v6922_v20 = vadd.f32 %v6921_v38, %v6833_v55  ;;  %v7181_v14 = vadd.f32 %v13196_v35, %v7180_v8  ;;  %v6845_v8 = vadd.f32 %v14204_v7, %v6755_v62  ;;  %v14210_v7 = vld [vmem:[#allocation34_spill] sm:$0xff] }
 0xa04   : > { %v6974_v28 = vadd.f32 %v6922_v20, %v13120_v21  ;;  %v6760_v9 = vpop.f32.mrf.mxu3 }
 0xa06   : > { %v7010_v32 = vadd.f32 %v13206_v40, %v6974_v28 }
 0xa08   : > { %v7231_v30 = vadd.f32 %v7179_v4, %v7010_v32  ;;  %v14205_v4 = vld [vmem:[#allocation65_spill] sm:$0xff] }
 0xa09   : > { %v7183_v11 = vpop.f32.mrf.mxu1  ;;  %v6923_v42 = vpop.f32.mrf.mxu2 }
 0xa0a   : > { %7263 = vst [vmem:[%s13219_s24 + $0x90] sm:$0xff] %v7231_v30  ;;  %v6924_v10 = vadd.f32 %v6923_v42, %v6835_v3  ;;  %v7184_v34 = vadd.f32 %v13196_v35, %v7183_v11  ;;  %v6848_v11 = vadd.f32 %v14205_v4, %v6758_v49 }
 0xa0c   : > { %v6975_v51 = vadd.f32 %v6924_v10, %v13128_v48  ;;  %v6763_v10 = vpop.f32.mrf.mxu3 }
 0xa0e   : > { %v7011_v21 = vadd.f32 %v13206_v40, %v6975_v51 }
 0xa10   : > { %v7232_v24 = vadd.f32 %v7181_v14, %v7011_v21  ;;  %v14206_v14 = vld [vmem:[#allocation19_spill] sm:$0xff] }
 0xa11   : > { %v7185_v17 = vpop.f32.mrf.mxu1  ;;  %v6926_v56 = vpop.f32.mrf.mxu2  ;;  %v6850_v2 = vadd.f32 %v14206_v14, %v6760_v9 }
 0xa12   : > { %7264 = vst [vmem:[%s13219_s24 + $0x98] sm:$0xff] %v7232_v24  ;;  %v6927_v25 = vadd.f32 %v6926_v56, %v6838_v5  ;;  %v7186_v27 = vadd.f32 %v13196_v35, %v7185_v17 }
 0xa14   : > { %v6976_v50 = vadd.f32 %v6927_v25, %v13133_v58  ;;  %v6765_v56 = vpop.f32.mrf.mxu3  ;;  %v14207_v25 = vld [vmem:[#allocation30_spill] sm:$0xff] }
 0xa16   : > { %v7012_v48 = vadd.f32 %v13206_v40, %v6976_v50  ;;  %v6853_v50 = vadd.f32 %v14207_v25, %v6763_v10  ;;  %v14212_v10 = vld [vmem:[#allocation22_spill] sm:$0xff] }
 0xa18   : > { %v7233_v63 = vadd.f32 %v7184_v34, %v7012_v48 }
 0xa19   : > { %v7188_v61 = vpop.f32.mrf.mxu1  ;;  %v6928_v57 = vpop.f32.mrf.mxu2 }
 0xa1a   : > { %7265 = vst [vmem:[%s13219_s24 + $0xa0] sm:$0xff] %v7233_v63  ;;  %v6929_v45 = vadd.f32 %v6928_v57, %v6840_v16  ;;  %v7189_v0 = vadd.f32 %v13196_v35, %v7188_v61  ;;  %v14208_v63 = vld [vmem:[#allocation36_spill] sm:$0xff] }
 0xa1b   : > { %v6855_v57 = vadd.f32 %v14208_v63, %v6765_v56 }
 0xa1c   : > { %v6977_v6 = vadd.f32 %v6929_v45, %v13141_v13 }
 0xa1e   : > { %v7013_v58 = vadd.f32 %v13206_v40, %v6977_v6  ;;  %v6768_v6 = vpop.f32.mrf.mxu3 }
 0xa20   : > { %v7234_v52 = vadd.f32 %v7186_v27, %v7013_v58 }
 0xa21   : > { %v7190_v47 = vpop.f32.mrf.mxu1  ;;  %v6931_v33 = vpop.f32.mrf.mxu2 }
 0xa22   : > { %7266 = vst [vmem:[%s13219_s24 + $0xa8] sm:$0xff] %v7234_v52  ;;  %v6932_v43 = vadd.f32 %v6931_v33, %v6843_v26  ;;  %v7191_v20 = vadd.f32 %v13196_v35, %v7190_v47  ;;  %v14209_v52 = vld [vmem:[#allocation28_spill] sm:$0xff] }
 0xa23   : > { %v6858_v49 = vadd.f32 %v14209_v52, %v6768_v6 }
 0xa24   : > { %v6978_v15 = vadd.f32 %v6932_v43, %v14203_v44 }
 0xa26   : > { %v7014_v13 = vadd.f32 %v13206_v40, %v6978_v15  ;;  %v6770_v15 = vpop.f32.mrf.mxu3 }
 0xa28   : > { %v7235_v60 = vadd.f32 %v7189_v0, %v7014_v13 }
 0xa29   : > { %v7193_v54 = vpop.f32.mrf.mxu1  ;;  %v6933_v37 = vpop.f32.mrf.mxu2 }
 0xa2a   : > { %7267 = vst [vmem:[%s13219_s24 + $0xb0] sm:$0xff] %v7235_v60  ;;  %v6934_v55 = vadd.f32 %v6933_v37, %v6845_v8  ;;  %v7194_v42 = vadd.f32 %v13196_v35, %v7193_v54  ;;  %v6860_v8 = vadd.f32 %v14210_v7, %v6770_v15 }
 0xa2c   : > { %v6979_v38 = vadd.f32 %v6934_v55, %v13154_v31 }
 0xa2e   : > { %v7015_v28 = vadd.f32 %v13206_v40, %v6979_v38  ;;  %v6773_v9 = vpop.f32.mrf.mxu3 }
 0xa30   : > { %v7236_v32 = vadd.f32 %v7191_v20, %v7015_v28  ;;  %v14211_v28 = vld [vmem:[#allocation20_spill] sm:$0xff] }
 0xa31   : > { %v7195_v59 = vpop.f32.mrf.mxu1  ;;  %v6936_v36 = vpop.f32.mrf.mxu2  ;;  %v6863_v4 = vadd.f32 %v14211_v28, %v6773_v9 }
 0xa32   : > { %7268 = vst [vmem:[%s13219_s24 + $0xb8] sm:$0xff] %v7236_v32  ;;  %v6937_v3 = vadd.f32 %v6936_v36, %v6848_v11  ;;  %v7196_v24 = vadd.f32 %v13196_v35, %v7195_v59 }
 0xa34   : > { %v6980_v30 = vadd.f32 %v6937_v3, %v13159_v22 }
 0xa36   : > { %v7016_v31 = vadd.f32 %v13206_v40, %v6980_v30 }
 0xa38   : > { %v7237_v17 = vadd.f32 %v7194_v42, %v7016_v31  ;;  %v6775_v42 = vpop.f32.mrf.mxu3 }
 0xa39   : > { %v7198_v51 = vpop.f32.mrf.mxu1  ;;  %v6938_v21 = vpop.f32.mrf.mxu2  ;;  %v6865_v31 = vadd.f32 %v14212_v10, %v6775_v42 }
 0xa3a   : > { %7269 = vst [vmem:[%s13219_s24 + $0xc0] sm:$0xff] %v7237_v17  ;;  %v6939_v19 = vadd.f32 %v6938_v21, %v6850_v2  ;;  %v7199_v16 = vadd.f32 %v13196_v35, %v7198_v51 }
 0xa3c   : > { %v6981_v5 = vadd.f32 %v6939_v19, %v13167_v39 }
 0xa3e   : > { %v7017_v22 = vadd.f32 %v13206_v40, %v6981_v5 }
 0xa40   : > { %v7238_v34 = vadd.f32 %v7196_v24, %v7017_v22 }
 0xa41   : > { %v6941_v61 = vpop.f32.mrf.mxu2  ;;  %v7200_v48 = vpop.f32.mrf.mxu1 }
 0xa42   : > { %7270 = vst [vmem:[%s13219_s24 + $0xc8] sm:$0xff] %v7238_v34  ;;  %v6942_v62 = vadd.f32 %v6941_v61, %v6853_v50  ;;  %v7201_v26 = vadd.f32 %v13196_v35, %v7200_v48 }
 0xa44   : > { %v6982_v18 = vadd.f32 %v6942_v62, %v13172_v12 }
 0xa46   : > { %v7018_v39 = vadd.f32 %v13206_v40, %v6982_v18 }
 0xa48   : > { %v7239_v45 = vadd.f32 %v7199_v16, %v7018_v39 }
 0xa49   : > { %v6943_v27 = vpop.f32.mrf.mxu2  ;;  %v7203_v58 = vpop.f32.mrf.mxu1 }
 0xa4a   : > { %7271 = vst [vmem:[%s13219_s24 + $0xd0] sm:$0xff] %v7239_v45  ;;  %v6944_v47 = vadd.f32 %v6943_v27, %v6855_v57  ;;  %v7204_v54 = vadd.f32 %v13196_v35, %v7203_v58 }
 0xa4c   : > { %v6983_v46 = vadd.f32 %v6944_v47, %v13180_v53 }
 0xa4e   : > { %v7019_v12 = vadd.f32 %v13206_v40, %v6983_v46 }
 0xa50   : > { %v7240_v33 = vadd.f32 %v7201_v26, %v7019_v12 }
 0xa51   : > { %v6946_v43 = vpop.f32.mrf.mxu2  ;;  %v7205_v13 = vpop.f32.mrf.mxu1 }
 0xa52   : > { %7272 = vst [vmem:[%s13219_s24 + $0xd8] sm:$0xff] %v7240_v33  ;;  %v6947_v44 = vadd.f32 %v6946_v43, %v6858_v49  ;;  %v7206_v20 = vadd.f32 %v13196_v35, %v7205_v13 }
 0xa54   : > { %v6984_v0 = vadd.f32 %v6947_v44, %v13185_v29 }
 0xa56   : > { %v7020_v53 = vadd.f32 %v13206_v40, %v6984_v0 }
 0xa58   : > { %v7241_v60 = vadd.f32 %v7204_v54, %v7020_v53 }
 0xa59   : > { %v6948_v37 = vpop.f32.mrf.mxu2  ;;  %v7208_v59 = vpop.f32.mrf.mxu1 }
 0xa5a   : > { %7273 = vst [vmem:[%s13219_s24 + $0xe0] sm:$0xff] %v7241_v60  ;;  %v6949_v55 = vadd.f32 %v6948_v37, %v6860_v8  ;;  %v7209_v30 = vadd.f32 %v13196_v35, %v7208_v59 }
 0xa5c   : > { %v6985_v38 = vadd.f32 %v6949_v55, %v13198_v41 }
 0xa5e   : > { %v7021_v29 = vadd.f32 %v13206_v40, %v6985_v38 }
 0xa60   : > { %v7242_v11 = vadd.f32 %v7206_v20, %v7021_v29 }
 0xa61   : > { %v6951_v32 = vpop.f32.mrf.mxu2  ;;  %v7210_v2 = vpop.f32.mrf.mxu1 }
 0xa62   : > { %7274 = vst [vmem:[%s13219_s24 + $0xe8] sm:$0xff] %v7242_v11  ;;  %v6952_v36 = vadd.f32 %v6951_v32, %v6863_v4  ;;  %v7211_v21 = vadd.f32 %v13196_v35, %v7210_v2 }
 0xa64   : > { %v6986_v3 = vadd.f32 %v6952_v36, %v13212_v23 }
 0xa66   : > { %v7022_v41 = vadd.f32 %v13206_v40, %v6986_v3 }
 0xa68   : > { %v7243_v51 = vadd.f32 %v7209_v30, %v7022_v41 }
 0xa69   : > { %v6953_v14 = vpop.f32.mrf.mxu2 }
 0xa6a   : > { %7275 = vst [vmem:[%s13219_s24 + $0xf0] sm:$0xff] %v7243_v51  ;;  %v6954_v23 = vadd.f32 %v6953_v14, %v6865_v31 }
 0xa6c   : > { %v6987_v17 = vadd.f32 %v6954_v23, %v13229_v1 }
 0xa6e   : > { %v7023_v19 = vadd.f32 %v13206_v40, %v6987_v17 }
 0xa70   : > { %v7244_v5 = vadd.f32 %v7211_v21, %v7023_v19 }
 0xa72   : > { %7276 = vst [vmem:[%s13219_s24 + $0xf8] sm:$0xff] %v7244_v5 }
 0xa73   : > { %9274 = shalt.err (!%p9271_p10)
}
 0xa74   : > { %s9327_s5 = smov 128   ;;  %s9328_s24 = smov 8  }
 0xa75   : > { %8907 = dma.vmem_to_hbm [thread:$0]  (%p9475_p3), %s7291_s27, 4096, %s7293_s22, %s7278_s16, %s9327_s5, %s9327_s5, %s9328_s24  }
 0xa76 PF: > { %s14214_s23 = sld [smem:[#allocation13_spill]]  ;;  %p14216_p12 = scmp.ge.s32.totalorder %s9317_s21, 2 }
 0xa78   : > { %p8921_p13 = pnand %p14216_p12, %p9444_p6 }
 0xa7a   : > { %p8922_p0 = pneg %p8921_p13 }
 0xa7c   : > { %s7307_s26 = sand.u32 1, %s14214_s23  }
 0xa7d   : > { %s7308_s11 = scalar_lea.sflag [#allocation5], %s7307_s26 }
 0xa7e   : > { %9300 = dma.done.wait (%p8922_p0), %s7308_s11, 4096  }
 0xa7f   : > { %9302 = vsyncadd (%p8922_p0), %s7308_s11, 4294963200  ;;  %s14217_s21 = sld [smem:[#allocation16_spill]]  ;;  %s14220_s18 = smov %s9309_s19 }
 0xa80   : > { %s14218_s30 = sld [smem:[#allocation14_spill]] }
 0xa81   : > { %s14219_s20 = sld [smem:[#allocation17_spill]] }
 0xa85   : > { %p29_p5 = scmp.ge.s32.totalorder %s14217_s21, 4  }
 0xa86   : > { %s14221_s19 = smov %s14218_s30 }
 0xa87   :  { %31 = sbr.rel (!%p29_p5) target bundleno = 11 (0xb), region = 137 }
 0xa8c   :  { %7314 = vsyncpa [#allocation4], 1 }
 0xa8d   :  { %7316 = vsyncpa [#allocation4 + $0x1], 1 }
 0xa8e   :  { %7317 = vsyncpa [#allocation7], 1 }
 0xa8f   :  { %7318 = vsyncpa [#allocation5], 1 }
 0xa90   :  { %7320 = vsyncpa [#allocation5 + $0x1], 1 }

</bundles_post_ra>
